<compile_context>
chip_gen: v7x
topology: tpu7x:2x2x1
jax: 0.10.0
libtpu: 0.0.40
codegen_flags: <defaults>
</compile_context>

<pallas_src>
import jax
import jax.numpy as jnp
from jax import lax
from jax.experimental import pallas as pl
from jax.experimental.pallas import tpu as pltpu

NUM_CLASSES = 6
NAMES = {0: 'stop', 1: 'go', 2: 'warning', 3: 'adjust speed and warning',
         4: 'adjust speed and go', 5: 'lights off'}
TOP_K = 2          # static number of detections kept (NMS / conf-threshold replaced)
CLS_SIZE = 144     # classifier input size (matches the module's Resize((144, 144)))
OFF = 128          # lane margin of the conv1->conv2 staging buffer (>= Wo+1)


# ----------------------------------------------------------------------------
# Shared in-kernel conv backbone:
#   conv1 (K = 9*Cin, im2col provided) -> bf16 staging -> VMEM im2col slab
#   -> conv2 (K = 9*C1) -> ReLU.  Everything channels-on-sublanes / P-on-lanes.
# ----------------------------------------------------------------------------

def _conv_backbone(col, w1_ref, b1_ref, w2_ref, b2_ref, cmask_ref,
                   a1pad_ref, slab_ref, C1, Wo):
    P = col.shape[-1]
    # --- conv1: one K=9*Cin matmul (bf16 in / f32 acc), bias + ReLU, cast once ---
    a1 = jnp.dot(w1_ref[...], col, preferred_element_type=jnp.float32) + b1_ref[...]
    a1 = jnp.maximum(a1, 0.0).astype(jnp.bfloat16)                    # (C1, P)

    # --- stage into a lane-padded bf16 buffer; zero ONLY the halo margins ---
    a1pad_ref[:, 0:OFF] = jnp.zeros((C1, OFF), jnp.bfloat16)
    a1pad_ref[:, OFF + P:OFF + P + OFF] = jnp.zeros((C1, OFF), jnp.bfloat16)
    a1pad_ref[:, OFF:OFF + P] = a1                                    # lane-aligned store

    # --- build the (9*C1, P) im2col slab for conv2 with static lane-shifted loads.
    # For tap (dy, dx), slab row block t = 3*dy+dx holds a1[c, p + s] with
    # s = (dy-1)*Wo + (dx-1); out-of-image rows come from the zero margins and
    # wrong-row column wraps are killed by the per-dx column-validity mask.
    for dy in range(3):
        for dx in range(3):
            t = 3 * dy + dx
            s = (dy - 1) * Wo + (dx - 1)
            win = a1pad_ref[:, OFF + s:OFF + s + P]                   # (C1, P) bf16
            if dx != 1:
                win = win * cmask_ref[dx:dx + 1, :]
            slab_ref[t * C1:(t + 1) * C1, :] = win

    # --- conv2: one K=9*C1 matmul, bias + ReLU ---
    a2 = (jnp.dot(w2_ref[...], slab_ref[...], preferred_element_type=jnp.float32)
          + b2_ref[...])
    return jnp.maximum(a2, 0.0)                                       # (C2, P) f32


# ----------------------------------------------------------------------------
# Fused detection kernel: conv1 + conv2 + 1x1 head, output (5, P) lane-dense
# ----------------------------------------------------------------------------

def make_det_kernel(C1, Wo):
    def kernel(col_ref, w1_ref, b1_ref, w2_ref, b2_ref, wh_ref, bh_ref, cmask_ref,
               o_ref, a1pad_ref, slab_ref):
        a2 = _conv_backbone(col_ref[...], w1_ref, b1_ref, w2_ref, b2_ref, cmask_ref,
                            a1pad_ref, slab_ref, C1, Wo)
        # fused 1x1 detection head, bf16 operands, f32 accumulate
        o_ref[...] = (jnp.dot(wh_ref[...], a2.astype(jnp.bfloat16),
                              preferred_element_type=jnp.float32) + bh_ref[...])
    return kernel


def run_detection(col, w1, b1, w2, b2, wh, bh, cmask, Gh, Gw):
    K1, P = col.shape                      # K1 = 9*Cin = 27, P = Gh*Gw
    C1, C2, CH = w1.shape[0], w2.shape[0], wh.shape[0]
    kernel = make_det_kernel(C1, Gw)
    return pl.pallas_call(
        kernel,
        out_shape=jax.ShapeDtypeStruct((CH, P), jnp.float32),
        grid=(1,),
        in_specs=[pl.BlockSpec((K1, P), lambda i: (0, 0)),
                  pl.BlockSpec((C1, K1), lambda i: (0, 0)),
                  pl.BlockSpec((C1, 1), lambda i: (0, 0)),
                  pl.BlockSpec((C2, 9 * C1), lambda i: (0, 0)),
                  pl.BlockSpec((C2, 1), lambda i: (0, 0)),
                  pl.BlockSpec((CH, C2), lambda i: (0, 0)),
                  pl.BlockSpec((CH, 1), lambda i: (0, 0)),
                  pl.BlockSpec((3, P), lambda i: (0, 0))],
        out_specs=pl.BlockSpec((CH, P), lambda i: (0, 0)),
        scratch_shapes=[pltpu.VMEM((C1, OFF + P + OFF), jnp.bfloat16),   # staging
                        pltpu.VMEM((9 * C1, P), jnp.bfloat16)],          # im2col slab
        compiler_params=pltpu.CompilerParams(
            dimension_semantics=("arbitrary",),
            vmem_limit_bytes=32 * 1024 * 1024),    # ~0.4 MB actual; fits v7x's 64 MiB
    )(col, w1, b1, w2, b2, wh, bh, cmask)


# ----------------------------------------------------------------------------
# Fused classification kernel (grid over crops, "parallel"):
# conv1 + conv2 + GAP (lane reduce) + FC (VPU) + softmax + top1
# ----------------------------------------------------------------------------

def make_cls_kernel(C1, NC, Ho, Wo):
    P = Ho * Wo
    inv_p = 1.0 / float(P)

    def kernel(col_ref, w1_ref, b1_ref, w2_ref, b2_ref, wf_ref, bf_ref, cmask_ref,
               probs_ref, top1_ref, a1pad_ref, slab_ref):
        a2 = _conv_backbone(col_ref[0], w1_ref, b1_ref, w2_ref, b2_ref, cmask_ref,
                            a1pad_ref, slab_ref, C1, Wo)               # (C2, P)
        # global average pool as a lane-axis reduce (XLU) -- no ones/P constant
        pooled = jnp.sum(a2, axis=1, keepdims=True) * inv_p            # (C2, 1) f32
        # tiny FC on the VPU: wf is (C2, NC)
        logits = jnp.sum(wf_ref[...] * pooled, axis=0, keepdims=True) + bf_ref[...]
        m = jnp.max(logits, axis=1, keepdims=True)
        e = jnp.exp(logits - m)
        probs = e / jnp.sum(e, axis=1, keepdims=True)                  # (1, NC)
        probs_ref[0] = probs
        ids = lax.broadcasted_iota(jnp.int32, (1, NC), 1)
        is_max = probs >= jnp.max(probs, axis=1, keepdims=True)
        top1_ref[0] = jnp.min(jnp.where(is_max, ids, NC), axis=1, keepdims=True)

    return kernel


def run_classification(cols, w1, b1, w2, b2, wf, bfc, cmask):
    K, K1, P = cols.shape                  # K crops, K1 = 27, P = 72*72
    C1, C2, NC = w1.shape[0], w2.shape[0], wf.shape[1]
    Ho = Wo = CLS_SIZE // 2
    kernel = make_cls_kernel(C1, NC, Ho, Wo)
    return pl.pallas_call(
        kernel,
        out_shape=(jax.ShapeDtypeStruct((K, 1, NC), jnp.float32),
                   jax.ShapeDtypeStruct((K, 1, 1), jnp.int32)),
        grid=(K,),
        in_specs=[pl.BlockSpec((1, K1, P), lambda k: (k, 0, 0)),
                  pl.BlockSpec((C1, K1), lambda k: (0, 0)),
                  pl.BlockSpec((C1, 1), lambda k: (0, 0)),
                  pl.BlockSpec((C2, 9 * C1), lambda k: (0, 0)),
                  pl.BlockSpec((C2, 1), lambda k: (0, 0)),
                  pl.BlockSpec((C2, NC), lambda k: (0, 0)),
                  pl.BlockSpec((1, NC), lambda k: (0, 0)),
                  pl.BlockSpec((3, P), lambda k: (0, 0))],
        out_specs=(pl.BlockSpec((1, 1, NC), lambda k: (k, 0, 0)),
                   pl.BlockSpec((1, 1, 1), lambda k: (k, 0, 0))),
        scratch_shapes=[pltpu.VMEM((C1, OFF + P + OFF), jnp.bfloat16),
                        pltpu.VMEM((9 * C1, P), jnp.bfloat16)],
        compiler_params=pltpu.CompilerParams(
            dimension_semantics=("parallel",),     # crops -> both TCs on v7x megacore
            vmem_limit_bytes=32 * 1024 * 1024),    # ~2 MB actual; fits v7x's 64 MiB
    )(cols, w1, b1, w2, b2, wf, bfc, cmask)


# ----------------------------------------------------------------------------
# XLA glue: im2col prep (fused with crop/resize), box decode, masks
# ----------------------------------------------------------------------------

def _im2col_s2(xpad, Ho, Wo):
    """xpad: (2*Ho+2, 2*Wo+2, C) zero-padded image -> (9*C, Ho*Wo) im2col for a
    3x3 / stride-2 / pad-1 conv; rows ordered tap-major (t = 3*dy+dx), then channel."""
    C = xpad.shape[-1]
    taps = []
    for dy in range(3):
        for dx in range(3):
            win = lax.slice(xpad, (dy, dx, 0),
                            (dy + 2 * Ho - 1, dx + 2 * Wo - 1, C), (2, 2, 1))
            taps.append(jnp.transpose(win, (2, 0, 1)))                 # (C, Ho, Wo)
    return jnp.stack(taps, 0).reshape(9 * C, Ho * Wo)


def image_conv1_cols(image):
    """Whole-image im2col for the detection conv1 (static strided slices only)."""
    H, W, _ = image.shape
    xpad = jnp.pad(image, ((1, 1), (1, 1), (0, 0)))
    return _im2col_s2(xpad, H // 2, W // 2)


def crop_conv1_cols(image, box, out_size):
    """Crop + nearest resize to out_size fused with the classifier conv1 im2col.
    TODO(synk): ultralytics/torchvision use bilinear (letterbox/antialias) resize."""
    H, W, _ = image.shape
    x1, y1, x2, y2 = box[0], box[1], box[2], box[3]
    r = (jnp.arange(out_size, dtype=jnp.float32) + 0.5) / out_size
    yi = jnp.clip((y1 + (y2 - y1) * r).astype(jnp.int32), 0, H - 1)
    xi = jnp.clip((x1 + (x2 - x1) * r).astype(jnp.int32), 0, W - 1)
    # two single-axis takes (no 2-D advanced-index gather)
    crop = jnp.take(jnp.take(image, yi, axis=0), xi, axis=1)           # (144,144,3)
    cpad = jnp.pad(crop, ((1, 1), (1, 1), (0, 0)))
    return _im2col_s2(cpad, out_size // 2, out_size // 2)


def make_col_masks(Ho, Wo):
    """(3, Ho*Wo) bf16 column-validity masks for dx = 0/1/2 of the stride-1 conv."""
    j = jnp.arange(Ho * Wo) % Wo
    m0 = (j >= 1).astype(jnp.bfloat16)
    m1 = jnp.ones((Ho * Wo,), jnp.bfloat16)
    m2 = (j <= Wo - 2).astype(jnp.bfloat16)
    return jnp.stack([m0, m1, m2], 0)


def decode_boxes(head, Gh, Gw, img_h, img_w):
    """head: (5, Gh*Gw) rows [tx, ty, tw, th, obj] -> (Gh*Gw, 4) xyxy, (Gh*Gw,) conf.
    Separate x / y cell strides (non-square fix)."""
    sy, sx = img_h / Gh, img_w / Gw
    rows = jnp.arange(Gh, dtype=jnp.float32)[:, None]
    cols = jnp.arange(Gw, dtype=jnp.float32)[None, :]
    tx = head[0].reshape(Gh, Gw)
    ty = head[1].reshape(Gh, Gw)
    tw = head[2].reshape(Gh, Gw)
    th = head[3].reshape(Gh, Gw)
    cx = (cols + jax.nn.sigmoid(tx)) * sx
    cy = (rows + jax.nn.sigmoid(ty)) * sy
    bw = jnp.exp(jnp.clip(tw, -4.0, 4.0)) * sx
    bh = jnp.exp(jnp.clip(th, -4.0, 4.0)) * sy
    conf = jax.nn.sigmoid(head[4])
    x1 = jnp.clip(cx - bw * 0.5, 0.0, img_w)
    y1 = jnp.clip(cy - bh * 0.5, 0.0, img_h)
    x2 = jnp.clip(cx + bw * 0.5, 0.0, img_w)
    y2 = jnp.clip(cy + bh * 0.5, 0.0, img_h)
    boxes = jnp.stack([x1, y1, x2, y2], axis=-1).reshape(-1, 4)
    return boxes, conf


# ----------------------------------------------------------------------------
# Parameters + full forward
# ----------------------------------------------------------------------------

def init_params(key):
    ks = jax.random.split(key, 12)
    p = {}
    # detection: conv3x3/s2 3->16, conv3x3/s1 16->32, 1x1 head -> 5 (tx,ty,tw,th,obj)
    p['det_w1'] = jax.random.normal(ks[0], (16, 27), jnp.float32) * 0.1
    p['det_b1'] = jax.random.normal(ks[1], (16, 1), jnp.float32) * 0.01
    p['det_w2'] = jax.random.normal(ks[2], (32, 9 * 16), jnp.float32) * 0.1
    p['det_b2'] = jax.random.normal(ks[3], (32, 1), jnp.float32) * 0.01
    p['det_wh'] = jax.random.normal(ks[4], (5, 32), jnp.float32) * 0.1
    p['det_bh'] = jax.random.normal(ks[5], (5, 1), jnp.float32) * 0.01
    # classification: conv3x3/s2 3->8, conv3x3/s1 8->16, GAP, FC 16->6
    p['cls_w1'] = jax.random.normal(ks[6], (8, 27), jnp.float32) * 0.1
    p['cls_b1'] = jax.random.normal(ks[7], (8, 1), jnp.float32) * 0.01
    p['cls_w2'] = jax.random.normal(ks[8], (16, 9 * 8), jnp.float32) * 0.1
    p['cls_b2'] = jax.random.normal(ks[9], (16, 1), jnp.float32) * 0.01
    p['cls_wf'] = jax.random.normal(ks[10], (16, NUM_CLASSES), jnp.float32) * 0.1
    p['cls_bf'] = jax.random.normal(ks[11], (1, NUM_CLASSES), jnp.float32) * 0.01
    return p


def yolo_yolo_forward(params, image):
    """image: (H, W, 3) float32 in [0, 255] (OpenCV-style HWC)."""
    H, W, _ = image.shape
    imgf = image.astype(jnp.float32)
    Gh, Gw = H // 2, W // 2
    Hc = Wc = CLS_SIZE // 2

    # Fold the YOLO /255 preprocessing into the first-layer weights of both nets
    # (the module's ImageNet Normalize transform is unused in YoloYolo.forward);
    # all MXU operands are bf16 with f32 accumulation.
    det_w1 = (params['det_w1'] * (1.0 / 255.0)).astype(jnp.bfloat16)
    cls_w1 = (params['cls_w1'] * (1.0 / 255.0)).astype(jnp.bfloat16)
    det_w2 = params['det_w2'].astype(jnp.bfloat16)
    cls_w2 = params['cls_w2'].astype(jnp.bfloat16)
    det_wh = params['det_wh'].astype(jnp.bfloat16)

    # ---- detection: one fused Pallas kernel ----
    det_col = image_conv1_cols(imgf).astype(jnp.bfloat16)              # (27, Gh*Gw)
    det_mask = make_col_masks(Gh, Gw)
    head = run_detection(det_col, det_w1, params['det_b1'], det_w2, params['det_b2'],
                         det_wh, params['det_bh'], det_mask, Gh, Gw)    # (5, Gh*Gw)
    boxes_all, conf_all = decode_boxes(head, Gh, Gw, float(H), float(W))

    # TODO(synk): conf>threshold + IoU NMS are data-dependent control flow;
    # approximated by a static top-K on objectness.
    conf_k, idx = lax.top_k(conf_all, TOP_K)
    boxes_k = boxes_all[idx]                                            # (K, 4)

    # ---- per-box crop + nearest resize fused with the classifier conv1 im2col ----
    cls_cols = jax.vmap(lambda b: crop_conv1_cols(imgf, b, CLS_SIZE))(boxes_k)
    cls_cols = cls_cols.astype(jnp.bfloat16)                            # (K, 27, 72*72)
    cls_mask = make_col_masks(Hc, Wc)

    # ---- classification: one fused Pallas kernel over crops ----
    probs, top1 = run_classification(cls_cols, cls_w1, params['cls_b1'], cls_w2,
                                     params['cls_b2'], params['cls_wf'],
                                     params['cls_bf'], cls_mask)

    return {
        'boxes': boxes_k.astype(jnp.int32),      # xyxy, truncated like int(), clamped
        'confidences': conf_k,
        'class_ids': top1.reshape(TOP_K),
        'class_probs': probs.reshape(TOP_K, NUM_CLASSES),
    }


if __name__ == "__main__":
    key = jax.random.PRNGKey(0)
    pkey, ikey = jax.random.split(key)
    params = init_params(pkey)

    # small deterministic "OpenCV image": HWC, values in [0, 255]
    image = jax.random.uniform(ikey, (64, 64, 3), jnp.float32, 0.0, 255.0)

    fwd = jax.jit(yolo_yolo_forward)
    out = jax.block_until_ready(fwd(params, image))

    probs = jax.device_get(out['class_probs'])
    cids = jax.device_get(out['class_ids'])
    results = {
        'boxes': [list(map(int, b)) for b in jax.device_get(out['boxes'])],
        'class_ids': [int(c) for c in cids],
        'class_names': [NAMES[int(c)] for c in cids],
        'confidences': [float(c) for c in jax.device_get(out['confidences'])],
    }
    assert len(results['boxes']) == TOP_K
    assert all(0 <= c < NUM_CLASSES for c in results['class_ids'])
    assert abs(float(probs.sum()) - TOP_K) < 1e-2   # each softmax row sums to 1
    print("KERNEL_OK")
</pallas_src>

<mosaic_0001>
module attributes {stable_mosaic.version = 11 : i64} {
  func.func @kernel(%arg0: i32, %arg1: memref<27x1024xbf16, #tpu.memory_space<vmem>>, %arg2: memref<16x27xbf16, #tpu.memory_space<vmem>>, %arg3: memref<16x1xf32, #tpu.memory_space<vmem>>, %arg4: memref<32x144xbf16, #tpu.memory_space<vmem>>, %arg5: memref<32x1xf32, #tpu.memory_space<vmem>>, %arg6: memref<5x32xbf16, #tpu.memory_space<vmem>>, %arg7: memref<5x1xf32, #tpu.memory_space<vmem>>, %arg8: memref<3x1024xbf16, #tpu.memory_space<vmem>>, %arg9: memref<5x1024xf32, #tpu.memory_space<vmem>>, %arg10: memref<16x1280xbf16, #tpu.memory_space<vmem>>, %arg11: memref<144x1024xbf16, #tpu.memory_space<vmem>>) attributes {dimension_semantics = [#tpu.dimension_semantics<arbitrary>], iteration_bounds = array<i64: 1>, scalar_prefetch = 0 : i64, scratch_operands = 2 : i64, tpu.core_type = #tpu.core_type<tc>, window_params = [{pipeline_mode = #tpu.pipeline_mode<synchronous>, transform_indices = @transform_0, window_bounds = array<i64: 27, 1024>}, {pipeline_mode = #tpu.pipeline_mode<synchronous>, transform_indices = @transform_1, window_bounds = array<i64: 16, 27>}, {pipeline_mode = #tpu.pipeline_mode<synchronous>, transform_indices = @transform_2, window_bounds = array<i64: 16, 1>}, {pipeline_mode = #tpu.pipeline_mode<synchronous>, transform_indices = @transform_3, window_bounds = array<i64: 32, 144>}, {pipeline_mode = #tpu.pipeline_mode<synchronous>, transform_indices = @transform_4, window_bounds = array<i64: 32, 1>}, {pipeline_mode = #tpu.pipeline_mode<synchronous>, transform_indices = @transform_5, window_bounds = array<i64: 5, 32>}, {pipeline_mode = #tpu.pipeline_mode<synchronous>, transform_indices = @transform_6, window_bounds = array<i64: 5, 1>}, {pipeline_mode = #tpu.pipeline_mode<synchronous>, transform_indices = @transform_7, window_bounds = array<i64: 3, 1024>}, {pipeline_mode = #tpu.pipeline_mode<synchronous>, transform_indices = @transform_8, window_bounds = array<i64: 5, 1024>}]} {
    %c0 = arith.constant 0 : index
    %c0_0 = arith.constant 0 : index
    %0 = vector.load %arg1[%c0, %c0_0] : memref<27x1024xbf16, #tpu.memory_space<vmem>>, vector<27x1024xbf16>
    %c0_1 = arith.constant 0 : index
    %c0_2 = arith.constant 0 : index
    %1 = vector.load %arg2[%c0_1, %c0_2] : memref<16x27xbf16, #tpu.memory_space<vmem>>, vector<16x27xbf16>
    %cst = arith.constant dense<0.000000e+00> : vector<16x1024xf32>
    %2 = tpu.matmul %1, %0, %cst {dimension_numbers = #tpu.dot_dimension_numbers<[1], [0], [0], [1], [0, 0, 1, 1], [], []>} : vector<16x27xbf16>, vector<27x1024xbf16>, vector<16x1024xf32> -> vector<16x1024xf32>
    %c0_3 = arith.constant 0 : index
    %c0_4 = arith.constant 0 : index
    %3 = vector.load %arg3[%c0_3, %c0_4] : memref<16x1xf32, #tpu.memory_space<vmem>>, vector<16x1xf32>
    %4 = vector.broadcast %3 : vector<16x1xf32> to vector<16x1024xf32>
    %5 = arith.addf %2, %4 : vector<16x1024xf32>
    %cst_5 = arith.constant 0.000000e+00 : f32
    %6 = vector.broadcast %cst_5 : f32 to vector<16x1024xf32>
    %7 = arith.maximumf %5, %6 : vector<16x1024xf32>
    %8 = arith.truncf %7 : vector<16x1024xf32> to vector<16x1024xbf16>
    %cst_6 = arith.constant 0.000000e+00 : bf16
    %9 = vector.broadcast %cst_6 : bf16 to vector<16x128xbf16>
    %c0_7 = arith.constant 0 : index
    %c0_8 = arith.constant 0 : index
    %10 = vector.load %arg10[%c0_7, %c0_8] : memref<16x1280xbf16, #tpu.memory_space<vmem>>, vector<16x128xbf16>
    tpu.vector_store %arg10[%c0_7, %c0_8], %9 {strides = array<i32>} : memref<16x1280xbf16, #tpu.memory_space<vmem>>, vector<16x128xbf16>,
    %cst_9 = arith.constant 0.000000e+00 : bf16
    %11 = vector.broadcast %cst_9 : bf16 to vector<16x128xbf16>
    %c0_10 = arith.constant 0 : index
    %c1152 = arith.constant 1152 : index
    %12 = vector.load %arg10[%c0_10, %c1152] : memref<16x1280xbf16, #tpu.memory_space<vmem>>, vector<16x128xbf16>
    tpu.vector_store %arg10[%c0_10, %c1152], %11 {strides = array<i32>} : memref<16x1280xbf16, #tpu.memory_space<vmem>>, vector<16x128xbf16>,
    %c0_11 = arith.constant 0 : index
    %c128 = arith.constant 128 : index
    %13 = vector.load %arg10[%c0_11, %c128] : memref<16x1280xbf16, #tpu.memory_space<vmem>>, vector<16x1024xbf16>
    tpu.vector_store %arg10[%c0_11, %c128], %8 {strides = array<i32>} : memref<16x1280xbf16, #tpu.memory_space<vmem>>, vector<16x1024xbf16>,
    %c0_12 = arith.constant 0 : index
    %c95 = arith.constant 95 : index
    %14 = vector.load %arg10[%c0_12, %c95] : memref<16x1280xbf16, #tpu.memory_space<vmem>>, vector<16x1024xbf16>
    %c0_13 = arith.constant 0 : index
    %c0_14 = arith.constant 0 : index
    %15 = vector.load %arg8[%c0_13, %c0_14] : memref<3x1024xbf16, #tpu.memory_space<vmem>>, vector<1x1024xbf16>
    %16 = vector.broadcast %15 : vector<1x1024xbf16> to vector<16x1024xbf16>
    %17 = arith.mulf %14, %16 : vector<16x1024xbf16>
    %c0_15 = arith.constant 0 : index
    %c0_16 = arith.constant 0 : index
    %18 = vector.load %arg11[%c0_15, %c0_16] : memref<144x1024xbf16, #tpu.memory_space<vmem>>, vector<16x1024xbf16>
    tpu.vector_store %arg11[%c0_15, %c0_16], %17 {strides = array<i32>} : memref<144x1024xbf16, #tpu.memory_space<vmem>>, vector<16x1024xbf16>,
    %c0_17 = arith.constant 0 : index
    %c96 = arith.constant 96 : index
    %19 = vector.load %arg10[%c0_17, %c96] : memref<16x1280xbf16, #tpu.memory_space<vmem>>, vector<16x1024xbf16>
    %c16 = arith.constant 16 : index
    %c0_18 = arith.constant 0 : index
    %20 = vector.load %arg11[%c16, %c0_18] : memref<144x1024xbf16, #tpu.memory_space<vmem>>, vector<16x1024xbf16>
    tpu.vector_store %arg11[%c16, %c0_18], %19 {strides = array<i32>} : memref<144x1024xbf16, #tpu.memory_space<vmem>>, vector<16x1024xbf16>,
    %c0_19 = arith.constant 0 : index
    %c97 = arith.constant 97 : index
    %21 = vector.load %arg10[%c0_19, %c97] : memref<16x1280xbf16, #tpu.memory_space<vmem>>, vector<16x1024xbf16>
    %c2 = arith.constant 2 : index
    %c0_20 = arith.constant 0 : index
    %22 = vector.load %arg8[%c2, %c0_20] : memref<3x1024xbf16, #tpu.memory_space<vmem>>, vector<1x1024xbf16>
    %23 = vector.broadcast %22 : vector<1x1024xbf16> to vector<16x1024xbf16>
    %24 = arith.mulf %21, %23 : vector<16x1024xbf16>
    %c32 = arith.constant 32 : index
    %c0_21 = arith.constant 0 : index
    %25 = vector.load %arg11[%c32, %c0_21] : memref<144x1024xbf16, #tpu.memory_space<vmem>>, vector<16x1024xbf16>
    tpu.vector_store %arg11[%c32, %c0_21], %24 {strides = array<i32>} : memref<144x1024xbf16, #tpu.memory_space<vmem>>, vector<16x1024xbf16>,
    %c0_22 = arith.constant 0 : index
    %c127 = arith.constant 127 : index
    %26 = vector.load %arg10[%c0_22, %c127] : memref<16x1280xbf16, #tpu.memory_space<vmem>>, vector<16x1024xbf16>
    %c0_23 = arith.constant 0 : index
    %c0_24 = arith.constant 0 : index
    %27 = vector.load %arg8[%c0_23, %c0_24] : memref<3x1024xbf16, #tpu.memory_space<vmem>>, vector<1x1024xbf16>
    %28 = vector.broadcast %27 : vector<1x1024xbf16> to vector<16x1024xbf16>
    %29 = arith.mulf %26, %28 : vector<16x1024xbf16>
    %c48 = arith.constant 48 : index
    %c0_25 = arith.constant 0 : index
    %30 = vector.load %arg11[%c48, %c0_25] : memref<144x1024xbf16, #tpu.memory_space<vmem>>, vector<16x1024xbf16>
    tpu.vector_store %arg11[%c48, %c0_25], %29 {strides = array<i32>} : memref<144x1024xbf16, #tpu.memory_space<vmem>>, vector<16x1024xbf16>,
    %c0_26 = arith.constant 0 : index
    %c128_27 = arith.constant 128 : index
    %31 = vector.load %arg10[%c0_26, %c128_27] : memref<16x1280xbf16, #tpu.memory_space<vmem>>, vector<16x1024xbf16>
    %c64 = arith.constant 64 : index
    %c0_28 = arith.constant 0 : index
    %32 = vector.load %arg11[%c64, %c0_28] : memref<144x1024xbf16, #tpu.memory_space<vmem>>, vector<16x1024xbf16>
    tpu.vector_store %arg11[%c64, %c0_28], %31 {strides = array<i32>} : memref<144x1024xbf16, #tpu.memory_space<vmem>>, vector<16x1024xbf16>,
    %c0_29 = arith.constant 0 : index
    %c129 = arith.constant 129 : index
    %33 = vector.load %arg10[%c0_29, %c129] : memref<16x1280xbf16, #tpu.memory_space<vmem>>, vector<16x1024xbf16>
    %c2_30 = arith.constant 2 : index
    %c0_31 = arith.constant 0 : index
    %34 = vector.load %arg8[%c2_30, %c0_31] : memref<3x1024xbf16, #tpu.memory_space<vmem>>, vector<1x1024xbf16>
    %35 = vector.broadcast %34 : vector<1x1024xbf16> to vector<16x1024xbf16>
    %36 = arith.mulf %33, %35 : vector<16x1024xbf16>
    %c80 = arith.constant 80 : index
    %c0_32 = arith.constant 0 : index
    %37 = vector.load %arg11[%c80, %c0_32] : memref<144x1024xbf16, #tpu.memory_space<vmem>>, vector<16x1024xbf16>
    tpu.vector_store %arg11[%c80, %c0_32], %36 {strides = array<i32>} : memref<144x1024xbf16, #tpu.memory_space<vmem>>, vector<16x1024xbf16>,
    %c0_33 = arith.constant 0 : index
    %c159 = arith.constant 159 : index
    %38 = vector.load %arg10[%c0_33, %c159] : memref<16x1280xbf16, #tpu.memory_space<vmem>>, vector<16x1024xbf16>
    %c0_34 = arith.constant 0 : index
    %c0_35 = arith.constant 0 : index
    %39 = vector.load %arg8[%c0_34, %c0_35] : memref<3x1024xbf16, #tpu.memory_space<vmem>>, vector<1x1024xbf16>
    %40 = vector.broadcast %39 : vector<1x1024xbf16> to vector<16x1024xbf16>
    %41 = arith.mulf %38, %40 : vector<16x1024xbf16>
    %c96_36 = arith.constant 96 : index
    %c0_37 = arith.constant 0 : index
    %42 = vector.load %arg11[%c96_36, %c0_37] : memref<144x1024xbf16, #tpu.memory_space<vmem>>, vector<16x1024xbf16>
    tpu.vector_store %arg11[%c96_36, %c0_37], %41 {strides = array<i32>} : memref<144x1024xbf16, #tpu.memory_space<vmem>>, vector<16x1024xbf16>,
    %c0_38 = arith.constant 0 : index
    %c160 = arith.constant 160 : index
    %43 = vector.load %arg10[%c0_38, %c160] : memref<16x1280xbf16, #tpu.memory_space<vmem>>, vector<16x1024xbf16>
    %c112 = arith.constant 112 : index
    %c0_39 = arith.constant 0 : index
    %44 = vector.load %arg11[%c112, %c0_39] : memref<144x1024xbf16, #tpu.memory_space<vmem>>, vector<16x1024xbf16>
    tpu.vector_store %arg11[%c112, %c0_39], %43 {strides = array<i32>} : memref<144x1024xbf16, #tpu.memory_space<vmem>>, vector<16x1024xbf16>,
    %c0_40 = arith.constant 0 : index
    %c161 = arith.constant 161 : index
    %45 = vector.load %arg10[%c0_40, %c161] : memref<16x1280xbf16, #tpu.memory_space<vmem>>, vector<16x1024xbf16>
    %c2_41 = arith.constant 2 : index
    %c0_42 = arith.constant 0 : index
    %46 = vector.load %arg8[%c2_41, %c0_42] : memref<3x1024xbf16, #tpu.memory_space<vmem>>, vector<1x1024xbf16>
    %47 = vector.broadcast %46 : vector<1x1024xbf16> to vector<16x1024xbf16>
    %48 = arith.mulf %45, %47 : vector<16x1024xbf16>
    %c128_43 = arith.constant 128 : index
    %c0_44 = arith.constant 0 : index
    %49 = vector.load %arg11[%c128_43, %c0_44] : memref<144x1024xbf16, #tpu.memory_space<vmem>>, vector<16x1024xbf16>
    tpu.vector_store %arg11[%c128_43, %c0_44], %48 {strides = array<i32>} : memref<144x1024xbf16, #tpu.memory_space<vmem>>, vector<16x1024xbf16>,
    %c0_45 = arith.constant 0 : index
    %c0_46 = arith.constant 0 : index
    %50 = vector.load %arg4[%c0_45, %c0_46] : memref<32x144xbf16, #tpu.memory_space<vmem>>, vector<32x144xbf16>
    %c0_47 = arith.constant 0 : index
    %c0_48 = arith.constant 0 : index
    %51 = vector.load %arg11[%c0_47, %c0_48] : memref<144x1024xbf16, #tpu.memory_space<vmem>>, vector<144x1024xbf16>
    %cst_49 = arith.constant dense<0.000000e+00> : vector<32x1024xf32>
    %52 = tpu.matmul %50, %51, %cst_49 {dimension_numbers = #tpu.dot_dimension_numbers<[1], [0], [0], [1], [0, 0, 1, 1], [], []>} : vector<32x144xbf16>, vector<144x1024xbf16>, vector<32x1024xf32> -> vector<32x1024xf32>
    %c0_50 = arith.constant 0 : index
    %c0_51 = arith.constant 0 : index
    %53 = vector.load %arg5[%c0_50, %c0_51] : memref<32x1xf32, #tpu.memory_space<vmem>>, vector<32x1xf32>
    %54 = vector.broadcast %53 : vector<32x1xf32> to vector<32x1024xf32>
    %55 = arith.addf %52, %54 : vector<32x1024xf32>
    %cst_52 = arith.constant 0.000000e+00 : f32
    %56 = vector.broadcast %cst_52 : f32 to vector<32x1024xf32>
    %57 = arith.maximumf %55, %56 : vector<32x1024xf32>
    %c0_53 = arith.constant 0 : index
    %c0_54 = arith.constant 0 : index
    %58 = vector.load %arg6[%c0_53, %c0_54] : memref<5x32xbf16, #tpu.memory_space<vmem>>, vector<5x32xbf16>
    %59 = arith.truncf %57 : vector<32x1024xf32> to vector<32x1024xbf16>
    %cst_55 = arith.constant dense<0.000000e+00> : vector<5x1024xf32>
    %60 = tpu.matmul %58, %59, %cst_55 {dimension_numbers = #tpu.dot_dimension_numbers<[1], [0], [0], [1], [0, 0, 1, 1], [], []>} : vector<5x32xbf16>, vector<32x1024xbf16>, vector<5x1024xf32> -> vector<5x1024xf32>
    %c0_56 = arith.constant 0 : index
    %c0_57 = arith.constant 0 : index
    %61 = vector.load %arg7[%c0_56, %c0_57] : memref<5x1xf32, #tpu.memory_space<vmem>>, vector<5x1xf32>
    %62 = vector.broadcast %61 : vector<5x1xf32> to vector<5x1024xf32>
    %63 = arith.addf %60, %62 : vector<5x1024xf32>
    %c0_58 = arith.constant 0 : index
    %c0_59 = arith.constant 0 : index
    %64 = vector.load %arg9[%c0_58, %c0_59] : memref<5x1024xf32, #tpu.memory_space<vmem>>, vector<5x1024xf32>
    tpu.vector_store %arg9[%c0_58, %c0_59], %63 {strides = array<i32>} : memref<5x1024xf32, #tpu.memory_space<vmem>>, vector<5x1024xf32>,
    return
  }
  func.func @transform_0(%arg0: i32) -> (i32, i32) {
    %c0_i32 = arith.constant 0 : i32
    %c0_i32_0 = arith.constant 0 : i32
    %c0_i32_1 = arith.constant 0 : i32
    return %c0_i32, %c0_i32_0 : i32, i32
  }
  func.func @transform_1(%arg0: i32) -> (i32, i32) {
    %c0_i32 = arith.constant 0 : i32
    %c0_i32_0 = arith.constant 0 : i32
    %c0_i32_1 = arith.constant 0 : i32
    return %c0_i32, %c0_i32_0 : i32, i32
  }
  func.func @transform_2(%arg0: i32) -> (i32, i32) {
    %c0_i32 = arith.constant 0 : i32
    %c0_i32_0 = arith.constant 0 : i32
    %c0_i32_1 = arith.constant 0 : i32
    return %c0_i32, %c0_i32_0 : i32, i32
  }
  func.func @transform_3(%arg0: i32) -> (i32, i32) {
    %c0_i32 = arith.constant 0 : i32
    %c0_i32_0 = arith.constant 0 : i32
    %c0_i32_1 = arith.constant 0 : i32
    return %c0_i32, %c0_i32_0 : i32, i32
  }
  func.func @transform_4(%arg0: i32) -> (i32, i32) {
    %c0_i32 = arith.constant 0 : i32
    %c0_i32_0 = arith.constant 0 : i32
    %c0_i32_1 = arith.constant 0 : i32
    return %c0_i32, %c0_i32_0 : i32, i32
  }
  func.func @transform_5(%arg0: i32) -> (i32, i32) {
    %c0_i32 = arith.constant 0 : i32
    %c0_i32_0 = arith.constant 0 : i32
    %c0_i32_1 = arith.constant 0 : i32
    return %c0_i32, %c0_i32_0 : i32, i32
  }
  func.func @transform_6(%arg0: i32) -> (i32, i32) {
    %c0_i32 = arith.constant 0 : i32
    %c0_i32_0 = arith.constant 0 : i32
    %c0_i32_1 = arith.constant 0 : i32
    return %c0_i32, %c0_i32_0 : i32, i32
  }
  func.func @transform_7(%arg0: i32) -> (i32, i32) {
    %c0_i32 = arith.constant 0 : i32
    %c0_i32_0 = arith.constant 0 : i32
    %c0_i32_1 = arith.constant 0 : i32
    return %c0_i32, %c0_i32_0 : i32, i32
  }
  func.func @transform_8(%arg0: i32) -> (i32, i32) {
    %c0_i32 = arith.constant 0 : i32
    %c0_i32_0 = arith.constant 0 : i32
    %c0_i32_1 = arith.constant 0 : i32
    return %c0_i32, %c0_i32_0 : i32, i32
  }
}

module attributes {stable_mosaic.version = 11 : i64} {
  func.func @kernel(%arg0: i32, %arg1: memref<1x27x5184xbf16, #tpu.memory_space<vmem>>, %arg2: memref<8x27xbf16, #tpu.memory_space<vmem>>, %arg3: memref<8x1xf32, #tpu.memory_space<vmem>>, %arg4: memref<16x72xbf16, #tpu.memory_space<vmem>>, %arg5: memref<16x1xf32, #tpu.memory_space<vmem>>, %arg6: memref<16x6xf32, #tpu.memory_space<vmem>>, %arg7: memref<1x6xf32, #tpu.memory_space<vmem>>, %arg8: memref<3x5184xbf16, #tpu.memory_space<vmem>>, %arg9: memref<1x1x6xf32, #tpu.memory_space<vmem>>, %arg10: memref<1x1x1xi32, #tpu.memory_space<vmem>>, %arg11: memref<8x5440xbf16, #tpu.memory_space<vmem>>, %arg12: memref<72x5184xbf16, #tpu.memory_space<vmem>>) attributes {dimension_semantics = [#tpu.dimension_semantics<parallel>], iteration_bounds = array<i64: 2>, scalar_prefetch = 0 : i64, scratch_operands = 2 : i64, tpu.core_type = #tpu.core_type<tc>, window_params = [{transform_indices = @transform_0, window_bounds = array<i64: 1, 27, 5184>}, {pipeline_mode = #tpu.pipeline_mode<synchronous>, transform_indices = @transform_1, window_bounds = array<i64: 8, 27>}, {pipeline_mode = #tpu.pipeline_mode<synchronous>, transform_indices = @transform_2, window_bounds = array<i64: 8, 1>}, {pipeline_mode = #tpu.pipeline_mode<synchronous>, transform_indices = @transform_3, window_bounds = array<i64: 16, 72>}, {pipeline_mode = #tpu.pipeline_mode<synchronous>, transform_indices = @transform_4, window_bounds = array<i64: 16, 1>}, {pipeline_mode = #tpu.pipeline_mode<synchronous>, transform_indices = @transform_5, window_bounds = array<i64: 16, 6>}, {pipeline_mode = #tpu.pipeline_mode<synchronous>, transform_indices = @transform_6, window_bounds = array<i64: 1, 6>}, {pipeline_mode = #tpu.pipeline_mode<synchronous>, transform_indices = @transform_7, window_bounds = array<i64: 3, 5184>}, {transform_indices = @transform_8, window_bounds = array<i64: 1, 1, 6>}, {transform_indices = @transform_9, window_bounds = array<i64: 1, 1, 1>}]} {
    %c0 = arith.constant 0 : index
    %c0_0 = arith.constant 0 : index
    %c0_1 = arith.constant 0 : index
    %0 = vector.load %arg1[%c0, %c0_0, %c0_1] : memref<1x27x5184xbf16, #tpu.memory_space<vmem>>, vector<1x27x5184xbf16>
    %1 = vector.shape_cast %0 : vector<1x27x5184xbf16> to vector<27x5184xbf16>
    %c0_2 = arith.constant 0 : index
    %c0_3 = arith.constant 0 : index
    %2 = vector.load %arg2[%c0_2, %c0_3] : memref<8x27xbf16, #tpu.memory_space<vmem>>, vector<8x27xbf16>
    %cst = arith.constant dense<0.000000e+00> : vector<8x5184xf32>
    %3 = tpu.matmul %2, %1, %cst {dimension_numbers = #tpu.dot_dimension_numbers<[1], [0], [0], [1], [0, 0, 1, 1], [], []>} : vector<8x27xbf16>, vector<27x5184xbf16>, vector<8x5184xf32> -> vector<8x5184xf32>
    %c0_4 = arith.constant 0 : index
    %c0_5 = arith.constant 0 : index
    %4 = vector.load %arg3[%c0_4, %c0_5] : memref<8x1xf32, #tpu.memory_space<vmem>>, vector<8x1xf32>
    %5 = vector.broadcast %4 : vector<8x1xf32> to vector<8x5184xf32>
    %6 = arith.addf %3, %5 : vector<8x5184xf32>
    %cst_6 = arith.constant 0.000000e+00 : f32
    %7 = vector.broadcast %cst_6 : f32 to vector<8x5184xf32>
    %8 = arith.maximumf %6, %7 : vector<8x5184xf32>
    %9 = arith.truncf %8 : vector<8x5184xf32> to vector<8x5184xbf16>
    %cst_7 = arith.constant 0.000000e+00 : bf16
    %10 = vector.broadcast %cst_7 : bf16 to vector<8x128xbf16>
    %c0_8 = arith.constant 0 : index
    %c0_9 = arith.constant 0 : index
    %11 = vector.load %arg11[%c0_8, %c0_9] : memref<8x5440xbf16, #tpu.memory_space<vmem>>, vector<8x128xbf16>
    tpu.vector_store %arg11[%c0_8, %c0_9], %10 {strides = array<i32>} : memref<8x5440xbf16, #tpu.memory_space<vmem>>, vector<8x128xbf16>,
    %cst_10 = arith.constant 0.000000e+00 : bf16
    %12 = vector.broadcast %cst_10 : bf16 to vector<8x128xbf16>
    %c0_11 = arith.constant 0 : index
    %c5312 = arith.constant 5312 : index
    %13 = vector.load %arg11[%c0_11, %c5312] : memref<8x5440xbf16, #tpu.memory_space<vmem>>, vector<8x128xbf16>
    tpu.vector_store %arg11[%c0_11, %c5312], %12 {strides = array<i32>} : memref<8x5440xbf16, #tpu.memory_space<vmem>>, vector<8x128xbf16>,
    %c0_12 = arith.constant 0 : index
    %c128 = arith.constant 128 : index
    %14 = vector.load %arg11[%c0_12, %c128] : memref<8x5440xbf16, #tpu.memory_space<vmem>>, vector<8x5184xbf16>
    tpu.vector_store %arg11[%c0_12, %c128], %9 {strides = array<i32>} : memref<8x5440xbf16, #tpu.memory_space<vmem>>, vector<8x5184xbf16>,
    %c0_13 = arith.constant 0 : index
    %c55 = arith.constant 55 : index
    %15 = vector.load %arg11[%c0_13, %c55] : memref<8x5440xbf16, #tpu.memory_space<vmem>>, vector<8x5184xbf16>
    %c0_14 = arith.constant 0 : index
    %c0_15 = arith.constant 0 : index
    %16 = vector.load %arg8[%c0_14, %c0_15] : memref<3x5184xbf16, #tpu.memory_space<vmem>>, vector<1x5184xbf16>
    %17 = vector.broadcast %16 : vector<1x5184xbf16> to vector<8x5184xbf16>
    %18 = arith.mulf %15, %17 : vector<8x5184xbf16>
    %c0_16 = arith.constant 0 : index
    %c0_17 = arith.constant 0 : index
    %19 = vector.load %arg12[%c0_16, %c0_17] : memref<72x5184xbf16, #tpu.memory_space<vmem>>, vector<8x5184xbf16>
    tpu.vector_store %arg12[%c0_16, %c0_17], %18 {strides = array<i32>} : memref<72x5184xbf16, #tpu.memory_space<vmem>>, vector<8x5184xbf16>,
    %c0_18 = arith.constant 0 : index
    %c56 = arith.constant 56 : index
    %20 = vector.load %arg11[%c0_18, %c56] : memref<8x5440xbf16, #tpu.memory_space<vmem>>, vector<8x5184xbf16>
    %c8 = arith.constant 8 : index
    %c0_19 = arith.constant 0 : index
    %21 = vector.load %arg12[%c8, %c0_19] : memref<72x5184xbf16, #tpu.memory_space<vmem>>, vector<8x5184xbf16>
    tpu.vector_store %arg12[%c8, %c0_19], %20 {strides = array<i32>} : memref<72x5184xbf16, #tpu.memory_space<vmem>>, vector<8x5184xbf16>,
    %c0_20 = arith.constant 0 : index
    %c57 = arith.constant 57 : index
    %22 = vector.load %arg11[%c0_20, %c57] : memref<8x5440xbf16, #tpu.memory_space<vmem>>, vector<8x5184xbf16>
    %c2 = arith.constant 2 : index
    %c0_21 = arith.constant 0 : index
    %23 = vector.load %arg8[%c2, %c0_21] : memref<3x5184xbf16, #tpu.memory_space<vmem>>, vector<1x5184xbf16>
    %24 = vector.broadcast %23 : vector<1x5184xbf16> to vector<8x5184xbf16>
    %25 = arith.mulf %22, %24 : vector<8x5184xbf16>
    %c16 = arith.constant 16 : index
    %c0_22 = arith.constant 0 : index
    %26 = vector.load %arg12[%c16, %c0_22] : memref<72x5184xbf16, #tpu.memory_space<vmem>>, vector<8x5184xbf16>
    tpu.vector_store %arg12[%c16, %c0_22], %25 {strides = array<i32>} : memref<72x5184xbf16, #tpu.memory_space<vmem>>, vector<8x5184xbf16>,
    %c0_23 = arith.constant 0 : index
    %c127 = arith.constant 127 : index
    %27 = vector.load %arg11[%c0_23, %c127] : memref<8x5440xbf16, #tpu.memory_space<vmem>>, vector<8x5184xbf16>
    %c0_24 = arith.constant 0 : index
    %c0_25 = arith.constant 0 : index
    %28 = vector.load %arg8[%c0_24, %c0_25] : memref<3x5184xbf16, #tpu.memory_space<vmem>>, vector<1x5184xbf16>
    %29 = vector.broadcast %28 : vector<1x5184xbf16> to vector<8x5184xbf16>
    %30 = arith.mulf %27, %29 : vector<8x5184xbf16>
    %c24 = arith.constant 24 : index
    %c0_26 = arith.constant 0 : index
    %31 = vector.load %arg12[%c24, %c0_26] : memref<72x5184xbf16, #tpu.memory_space<vmem>>, vector<8x5184xbf16>
    tpu.vector_store %arg12[%c24, %c0_26], %30 {strides = array<i32>} : memref<72x5184xbf16, #tpu.memory_space<vmem>>, vector<8x5184xbf16>,
    %c0_27 = arith.constant 0 : index
    %c128_28 = arith.constant 128 : index
    %32 = vector.load %arg11[%c0_27, %c128_28] : memref<8x5440xbf16, #tpu.memory_space<vmem>>, vector<8x5184xbf16>
    %c32 = arith.constant 32 : index
    %c0_29 = arith.constant 0 : index
    %33 = vector.load %arg12[%c32, %c0_29] : memref<72x5184xbf16, #tpu.memory_space<vmem>>, vector<8x5184xbf16>
    tpu.vector_store %arg12[%c32, %c0_29], %32 {strides = array<i32>} : memref<72x5184xbf16, #tpu.memory_space<vmem>>, vector<8x5184xbf16>,
    %c0_30 = arith.constant 0 : index
    %c129 = arith.constant 129 : index
    %34 = vector.load %arg11[%c0_30, %c129] : memref<8x5440xbf16, #tpu.memory_space<vmem>>, vector<8x5184xbf16>
    %c2_31 = arith.constant 2 : index
    %c0_32 = arith.constant 0 : index
    %35 = vector.load %arg8[%c2_31, %c0_32] : memref<3x5184xbf16, #tpu.memory_space<vmem>>, vector<1x5184xbf16>
    %36 = vector.broadcast %35 : vector<1x5184xbf16> to vector<8x5184xbf16>
    %37 = arith.mulf %34, %36 : vector<8x5184xbf16>
    %c40 = arith.constant 40 : index
    %c0_33 = arith.constant 0 : index
    %38 = vector.load %arg12[%c40, %c0_33] : memref<72x5184xbf16, #tpu.memory_space<vmem>>, vector<8x5184xbf16>
    tpu.vector_store %arg12[%c40, %c0_33], %37 {strides = array<i32>} : memref<72x5184xbf16, #tpu.memory_space<vmem>>, vector<8x5184xbf16>,
    %c0_34 = arith.constant 0 : index
    %c199 = arith.constant 199 : index
    %39 = vector.load %arg11[%c0_34, %c199] : memref<8x5440xbf16, #tpu.memory_space<vmem>>, vector<8x5184xbf16>
    %c0_35 = arith.constant 0 : index
    %c0_36 = arith.constant 0 : index
    %40 = vector.load %arg8[%c0_35, %c0_36] : memref<3x5184xbf16, #tpu.memory_space<vmem>>, vector<1x5184xbf16>
    %41 = vector.broadcast %40 : vector<1x5184xbf16> to vector<8x5184xbf16>
    %42 = arith.mulf %39, %41 : vector<8x5184xbf16>
    %c48 = arith.constant 48 : index
    %c0_37 = arith.constant 0 : index
    %43 = vector.load %arg12[%c48, %c0_37] : memref<72x5184xbf16, #tpu.memory_space<vmem>>, vector<8x5184xbf16>
    tpu.vector_store %arg12[%c48, %c0_37], %42 {strides = array<i32>} : memref<72x5184xbf16, #tpu.memory_space<vmem>>, vector<8x5184xbf16>,
    %c0_38 = arith.constant 0 : index
    %c200 = arith.constant 200 : index
    %44 = vector.load %arg11[%c0_38, %c200] : memref<8x5440xbf16, #tpu.memory_space<vmem>>, vector<8x5184xbf16>
    %c56_39 = arith.constant 56 : index
    %c0_40 = arith.constant 0 : index
    %45 = vector.load %arg12[%c56_39, %c0_40] : memref<72x5184xbf16, #tpu.memory_space<vmem>>, vector<8x5184xbf16>
    tpu.vector_store %arg12[%c56_39, %c0_40], %44 {strides = array<i32>} : memref<72x5184xbf16, #tpu.memory_space<vmem>>, vector<8x5184xbf16>,
    %c0_41 = arith.constant 0 : index
    %c201 = arith.constant 201 : index
    %46 = vector.load %arg11[%c0_41, %c201] : memref<8x5440xbf16, #tpu.memory_space<vmem>>, vector<8x5184xbf16>
    %c2_42 = arith.constant 2 : index
    %c0_43 = arith.constant 0 : index
    %47 = vector.load %arg8[%c2_42, %c0_43] : memref<3x5184xbf16, #tpu.memory_space<vmem>>, vector<1x5184xbf16>
    %48 = vector.broadcast %47 : vector<1x5184xbf16> to vector<8x5184xbf16>
    %49 = arith.mulf %46, %48 : vector<8x5184xbf16>
    %c64 = arith.constant 64 : index
    %c0_44 = arith.constant 0 : index
    %50 = vector.load %arg12[%c64, %c0_44] : memref<72x5184xbf16, #tpu.memory_space<vmem>>, vector<8x5184xbf16>
    tpu.vector_store %arg12[%c64, %c0_44], %49 {strides = array<i32>} : memref<72x5184xbf16, #tpu.memory_space<vmem>>, vector<8x5184xbf16>,
    %c0_45 = arith.constant 0 : index
    %c0_46 = arith.constant 0 : index
    %51 = vector.load %arg4[%c0_45, %c0_46] : memref<16x72xbf16, #tpu.memory_space<vmem>>, vector<16x72xbf16>
    %c0_47 = arith.constant 0 : index
    %c0_48 = arith.constant 0 : index
    %52 = vector.load %arg12[%c0_47, %c0_48] : memref<72x5184xbf16, #tpu.memory_space<vmem>>, vector<72x5184xbf16>
    %cst_49 = arith.constant dense<0.000000e+00> : vector<16x5184xf32>
    %53 = tpu.matmul %51, %52, %cst_49 {dimension_numbers = #tpu.dot_dimension_numbers<[1], [0], [0], [1], [0, 0, 1, 1], [], []>} : vector<16x72xbf16>, vector<72x5184xbf16>, vector<16x5184xf32> -> vector<16x5184xf32>
    %c0_50 = arith.constant 0 : index
    %c0_51 = arith.constant 0 : index
    %54 = vector.load %arg5[%c0_50, %c0_51] : memref<16x1xf32, #tpu.memory_space<vmem>>, vector<16x1xf32>
    %55 = vector.broadcast %54 : vector<16x1xf32> to vector<16x5184xf32>
    %56 = arith.addf %53, %55 : vector<16x5184xf32>
    %cst_52 = arith.constant 0.000000e+00 : f32
    %57 = vector.broadcast %cst_52 : f32 to vector<16x5184xf32>
    %58 = arith.maximumf %56, %57 : vector<16x5184xf32>
    %cst_53 = arith.constant dense<0.000000e+00> : vector<16xf32>
    %59 = vector.multi_reduction <add>, %58, %cst_53 [1] : vector<16x5184xf32> to vector<16xf32>
    %60 = vector.shape_cast %59 : vector<16xf32> to vector<16x1xf32>
    %cst_54 = arith.constant 1.92901236E-4 : f32
    %61 = vector.broadcast %cst_54 : f32 to vector<16x1xf32>
    %62 = arith.mulf %60, %61 : vector<16x1xf32>
    %c0_55 = arith.constant 0 : index
    %c0_56 = arith.constant 0 : index
    %63 = vector.load %arg6[%c0_55, %c0_56] : memref<16x6xf32, #tpu.memory_space<vmem>>, vector<16x6xf32>
    %64 = vector.broadcast %62 : vector<16x1xf32> to vector<16x6xf32>
    %65 = arith.mulf %63, %64 : vector<16x6xf32>
    %cst_57 = arith.constant dense<0.000000e+00> : vector<6xf32>
    %66 = vector.multi_reduction <add>, %65, %cst_57 [0] : vector<16x6xf32> to vector<6xf32>
    %67 = vector.shape_cast %66 : vector<6xf32> to vector<1x6xf32>
    %c0_58 = arith.constant 0 : index
    %c0_59 = arith.constant 0 : index
    %68 = vector.load %arg7[%c0_58, %c0_59] : memref<1x6xf32, #tpu.memory_space<vmem>>, vector<1x6xf32>
    %69 = arith.addf %67, %68 : vector<1x6xf32>
    %cst_60 = arith.constant dense<0xFF800000> : vector<1xf32>
    %70 = vector.multi_reduction <maximumf>, %69, %cst_60 [1] : vector<1x6xf32> to vector<1xf32>
    %71 = vector.shape_cast %70 : vector<1xf32> to vector<1x1xf32>
    %72 = vector.broadcast %71 : vector<1x1xf32> to vector<1x6xf32>
    %73 = arith.subf %69, %72 : vector<1x6xf32>
    %74 = math.exp %73 : vector<1x6xf32>
    %cst_61 = arith.constant dense<0.000000e+00> : vector<1xf32>
    %75 = vector.multi_reduction <add>, %74, %cst_61 [1] : vector<1x6xf32> to vector<1xf32>
    %76 = vector.shape_cast %75 : vector<1xf32> to vector<1x1xf32>
    %77 = vector.broadcast %76 : vector<1x1xf32> to vector<1x6xf32>
    %78 = arith.divf %74, %77 : vector<1x6xf32>
    %c0_62 = arith.constant 0 : index
    %c0_63 = arith.constant 0 : index
    %c0_64 = arith.constant 0 : index
    %79 = vector.load %arg9[%c0_62, %c0_63, %c0_64] : memref<1x1x6xf32, #tpu.memory_space<vmem>>, vector<1x1x6xf32>
    %80 = vector.shape_cast %79 : vector<1x1x6xf32> to vector<1x6xf32>
    %81 = vector.shape_cast %78 : vector<1x6xf32> to vector<1x1x6xf32>
    tpu.vector_store %arg9[%c0_62, %c0_63, %c0_64], %81 {strides = array<i32>} : memref<1x1x6xf32, #tpu.memory_space<vmem>>, vector<1x1x6xf32>,
    %82 = tpu.iota {dimensions = array<i32: 1>} : vector<1x6xi32>
    %cst_65 = arith.constant dense<0xFF800000> : vector<1xf32>
    %83 = vector.multi_reduction <maximumf>, %78, %cst_65 [1] : vector<1x6xf32> to vector<1xf32>
    %84 = vector.shape_cast %83 : vector<1xf32> to vector<1x1xf32>
    %85 = vector.broadcast %84 : vector<1x1xf32> to vector<1x6xf32>
    %86 = arith.cmpf oge, %78, %85 : vector<1x6xf32>
    %c6_i32 = arith.constant 6 : i32
    %87 = vector.broadcast %c6_i32 : i32 to vector<1x6xi32>
    %88 = arith.select %86, %82, %87 : vector<1x6xi1>, vector<1x6xi32>
    %cst_66 = arith.constant dense<2147483647> : vector<1xi32>
    %89 = vector.multi_reduction <minsi>, %88, %cst_66 [1] : vector<1x6xi32> to vector<1xi32>
    %90 = vector.shape_cast %89 : vector<1xi32> to vector<1x1xi32>
    %c0_67 = arith.constant 0 : index
    %c0_68 = arith.constant 0 : index
    %c0_69 = arith.constant 0 : index
    %91 = vector.load %arg10[%c0_67, %c0_68, %c0_69] : memref<1x1x1xi32, #tpu.memory_space<vmem>>, vector<1x1x1xi32>
    %92 = vector.shape_cast %91 : vector<1x1x1xi32> to vector<1x1xi32>
    %93 = vector.shape_cast %90 : vector<1x1xi32> to vector<1x1x1xi32>
    tpu.vector_store %arg10[%c0_67, %c0_68, %c0_69], %93 {strides = array<i32>} : memref<1x1x1xi32, #tpu.memory_space<vmem>>, vector<1x1x1xi32>,
    return
  }
  func.func @transform_0(%arg0: i32) -> (i32, i32, i32) {
    %c0_i32 = arith.constant 0 : i32
    %c0_i32_0 = arith.constant 0 : i32
    %c0_i32_1 = arith.constant 0 : i32
    return %arg0, %c0_i32, %c0_i32_0 : i32, i32, i32
  }
  func.func @transform_1(%arg0: i32) -> (i32, i32) {
    %c0_i32 = arith.constant 0 : i32
    %c0_i32_0 = arith.constant 0 : i32
    %c0_i32_1 = arith.constant 0 : i32
    return %c0_i32, %c0_i32_0 : i32, i32
  }
  func.func @transform_2(%arg0: i32) -> (i32, i32) {
    %c0_i32 = arith.constant 0 : i32
    %c0_i32_0 = arith.constant 0 : i32
    %c0_i32_1 = arith.constant 0 : i32
    return %c0_i32, %c0_i32_0 : i32, i32
  }
  func.func @transform_3(%arg0: i32) -> (i32, i32) {
    %c0_i32 = arith.constant 0 : i32
    %c0_i32_0 = arith.constant 0 : i32
    %c0_i32_1 = arith.constant 0 : i32
    return %c0_i32, %c0_i32_0 : i32, i32
  }
  func.func @transform_4(%arg0: i32) -> (i32, i32) {
    %c0_i32 = arith.constant 0 : i32
    %c0_i32_0 = arith.constant 0 : i32
    %c0_i32_1 = arith.constant 0 : i32
    return %c0_i32, %c0_i32_0 : i32, i32
  }
  func.func @transform_5(%arg0: i32) -> (i32, i32) {
    %c0_i32 = arith.constant 0 : i32
    %c0_i32_0 = arith.constant 0 : i32
    %c0_i32_1 = arith.constant 0 : i32
    return %c0_i32, %c0_i32_0 : i32, i32
  }
  func.func @transform_6(%arg0: i32) -> (i32, i32) {
    %c0_i32 = arith.constant 0 : i32
    %c0_i32_0 = arith.constant 0 : i32
    %c0_i32_1 = arith.constant 0 : i32
    return %c0_i32, %c0_i32_0 : i32, i32
  }
  func.func @transform_7(%arg0: i32) -> (i32, i32) {
    %c0_i32 = arith.constant 0 : i32
    %c0_i32_0 = arith.constant 0 : i32
    %c0_i32_1 = arith.constant 0 : i32
    return %c0_i32, %c0_i32_0 : i32, i32
  }
  func.func @transform_8(%arg0: i32) -> (i32, i32, i32) {
    %c0_i32 = arith.constant 0 : i32
    %c0_i32_0 = arith.constant 0 : i32
    %c0_i32_1 = arith.constant 0 : i32
    return %arg0, %c0_i32, %c0_i32_0 : i32, i32, i32
  }
  func.func @transform_9(%arg0: i32) -> (i32, i32, i32) {
    %c0_i32 = arith.constant 0 : i32
    %c0_i32_0 = arith.constant 0 : i32
    %c0_i32_1 = arith.constant 0 : i32
    return %arg0, %c0_i32, %c0_i32_0 : i32, i32, i32
  }
}

</mosaic_0001>

<bundles_post_ra>
// kernel: yolo_yolo_forward.2
= control target key start
LH: loop header
LB: loop body
LE: loop exit
PB: predicated region body
PF: predicated region fallthrough
CT: control target
= control target key end

     0   :  { %vm141_vm0 = vcmask 1044480   ;;  %vm142_vm1 = vcmask 1045504   ;;  %v2378_v3 = vmov 0   ;;  %v2379_v4 = vmov 65535   ;;  %s2381_s24 = smov 95   ;;  %s2382_s25 = smov 97   ;;  %s3425_s0 = inlined_call_operand.vmem [shape: bf16[27,1024], index: 0, kind: input, shape index: {}]   ;;  %s3426_s2 = inlined_call_operand.vmem [shape: f32[16,1], index: 2, kind: input, shape index: {}]   ;;  %s3427_s1 = inlined_call_operand.vmem [shape: bf16[16,27], index: 1, kind: input, shape index: {}]   ;;  %s3428_s7 = inlined_call_operand.vmem [shape: bf16[3,1024], index: 7, kind: input, shape index: {}]   ;;  %s3429_s3 = inlined_call_operand.vmem [shape: bf16[32,144], index: 3, kind: input, shape index: {}]   ;;  %s3430_s4 = inlined_call_operand.vmem [shape: f32[32,1], index: 4, kind: input, shape index: {}]   ;;  %s3431_s6 = inlined_call_operand.vmem [shape: f32[5,1], index: 6, kind: input, shape index: {}]   ;;  %s3432_s5 = inlined_call_operand.vmem [shape: bf16[5,32], index: 5, kind: input, shape index: {}]   ;;  %s3433_s8 = inlined_call_operand.vmem [shape: f32[5,1024], index: 8, kind: output, shape index: {}]  }
   0x1   :  { %v30_v0 = vld [vmem:[%s3425_s0] sm:$0xff]  ;;  %v31_v2 = vld [vmem:[%s3425_s0 + $0x8] sm:$0xff]  ;;  %2357 = vset.pattern.permute.xlu0 %v2378_v3  ;;  %v143_v5 = vsel %vm141_vm0, 4294967295, %v2379_v4  ;;  %201 = vmatprep.mubr.bf16.mxu0 %v2378_v3  ;;  %v392_v6 = vlaneseq  ;;  %v2380_v18 = vmov 1983009808   ;;  %v32_v26 = vld [vmem:[%s3425_s0 + $0x10] sm:$0xff] }
   0x2   :  { %v34_v1 = vld [vmem:[%s3425_s0 + $0x20] sm:$0xff]  ;;  %v35_v8 = vld [vmem:[%s3425_s0 + $0x28] sm:$0xff]  ;;  %v2454_v12 = vsel %vm142_vm1, %v143_v5, 0  ;;  %244 = vmatprep.mubr.bf16.mxu1 %v2378_v3  ;;  %2358 = vset.pattern.permute.xlu1 %v2378_v3  ;;  %v390_v19 = vunpack.c.l.s4 %v2380_v18  ;;  %v36_v27 = vld [vmem:[%s3425_s0 + $0x30] sm:$0xff]  ;;  %vm137_vm2 = vcmask 220160   ;;  %s2383_s11 = smov 127  }
   0x3   :  { %v2311_v7 = vcombine.high %v30_v0, %v34_v1  ;;  %v2310_v9 = vcombine.low %v30_v0, %v34_v1  ;;  %v48_v10 = vld [vmem:[%s3426_s2] sm:$0xff]  ;;  %v2313_v13 = vcombine.high %v31_v2, %v35_v8  ;;  %v2312_v14 = vcombine.low %v31_v2, %v35_v8  ;;  %v39_v16 = vld [vmem:[%s3425_s0 + $0x48] sm:$0xff]  ;;  %v33_v33 = vld [vmem:[%s3425_s0 + $0x18] sm:$0xff]  ;;  %s2384_s18 = smov 1   ;;  %s2386_s23 = smov 33  }
   0x4   :  { %v38_v11 = vld [vmem:[%s3425_s0 + $0x40] sm:$0xff]  ;;  %52 = vperm.xlu0 %2357, %v48_v10   ;;  %v43_v17 = vld [vmem:[%s3425_s0 + $0x68] sm:$0x33]  ;;  %v393_v20 = vshrl.u32 %v392_v6, 7  ;;  %v391_v28 = vunpack.c.0.s8 %v390_v19  ;;  %v37_v34 = vld [vmem:[%s3425_s0 + $0x38] sm:$0xff]  ;;  %v2315_v36 = vcombine.high %v32_v26, %v36_v27  ;;  %v2314_v42 = vcombine.low %v32_v26, %v36_v27 }
   0x5   :  { %v42_v15 = vld [vmem:[%s3425_s0 + $0x60] sm:$0x33]  ;;  %169 = vmatprep.subr.bf16.mxu0 %v2311_v7  ;;  %v2321_v22 = vcombine.high %v39_v16, %v43_v17  ;;  %v2320_v24 = vcombine.low %v39_v16, %v43_v17  ;;  %v49_v25 = vld [vmem:[%s3426_s2 + $0x8] sm:$0xff]  ;;  %212 = vmatprep.subr.bf16.mxu1 %v2313_v13  ;;  %v2317_v37 = vcombine.high %v33_v33, %v37_v34  ;;  %v40_v38 = vld [vmem:[%s3425_s0 + $0x50] sm:$0xff]  ;;  %vm502_vm3 = vcmask 777216  }
   0x6   :  { %v2319_v21 = vcombine.high %v38_v11, %v42_v15  ;;  %v2318_v23 = vcombine.low %v38_v11, %v42_v15  ;;  %170 = vmatpush1.bf16.msra.mxu0 %v2310_v9  ;;  %213 = vmatpush1.bf16.msra.mxu1 %v2312_v14  ;;  %v384_v35 = vld [vmem:[%s3428_s7] sm:$0x55]  ;;  %v44_v39 = vld [vmem:[%s3425_s0 + $0x70] sm:$0x33]  ;;  %v41_v40 = vld [vmem:[%s3425_s0 + $0x58] sm:$0xff]  ;;  %v2501_v43 = vsub.s32 %v391_v28, %v393_v20  ;;  %v2510_v52 = vsub.s32 0, %v393_v20 }
   0x7   :  { %v155_v30 = vand.u32 %v2321_v22, %v2454_v12  ;;  %v152_v32 = vand.u32 %v2320_v24, %v2454_v12  ;;  %v2359_v41 = vld [vmem:[%s3427_s1] sm:$0xff]   ;;  %v388_v44 = vcombine.high %v384_v35, %v384_v35  ;;  %v45_v45 = vld [vmem:[%s3425_s0 + $0x78] sm:$0x33]  ;;  %v2316_v47 = vcombine.low %v33_v33, %v37_v34  ;;  %v2516_v55 = vld [vmem:[%s3428_s7 + $0x8] sm:$0x55]  ;;  %s2387_s1 = smov 32  }
   0x8   :  { %v149_v29 = vand.u32 %v2319_v21, %v2454_v12  ;;  %v146_v31 = vand.u32 %v2318_v23, %v2454_v12  ;;  %57 = vperm.xlu0 %2357, %v49_v25   ;;  %v650_v46 = vld [vmem:[%s3428_s7] sm:$0xaa]  ;;  %v2322_v48 = vcombine.low %v40_v38, %v44_v39  ;;  %v2323_v49 = vcombine.high %v40_v38, %v44_v39  ;;  %v855_v18 = vld [vmem:[%s3428_s7] sm:$0x55]  ;;  %v651_v19 = vld [vmem:[%s3428_s7 + $0x8] sm:$0xaa] }
   0x9   :  { %214 = vmatprep.subr.bf16.mxu1 %v155_v30  ;;  %v2325_v50 = vcombine.high %v41_v40, %v45_v45  ;;  %v395_v51 = vrot.slane %v384_v35, %v2501_v43  ;;  %v2324_v53 = vcombine.low %v41_v40, %v45_v45  ;;  %v661_v54 = vrot.slane %v650_v46, %v2501_v43  ;;  %v1076_v34 = vld [vmem:[%s3428_s7] sm:$0xaa]  ;;  %s2388_s0 = smov 96  }
   0xa   :  { %171 = vmatprep.subr.bf16.mxu0 %v149_v29  ;;  %215 = vmatpush1.bf16.msra.mxu1 %v152_v32  ;;  %v161_v56 = vand.u32 %v2323_v49, %v2454_v12  ;;  %v2520_v58 = vsub.s32 1, %v393_v20  ;;  %v402_v59 = vrot.slane %v388_v44, %v2501_v43  ;;  %v654_v63 = vcombine.high %v650_v46, %v650_v46  ;;  %v856_v29 = vld [vmem:[%s3428_s7 + $0x8] sm:$0x55] }
   0xb   :  { %172 = vmatpush1.bf16.msra.mxu0 %v146_v31  ;;  %298 = vmatprep.subr.bf16.mxu1 %v2317_v37  ;;  %v167_v57 = vand.u32 %v2325_v50, %v2454_v12  ;;  %v423_v60 = vpack.i.b16 %v395_v51, %v395_v51  ;;  %v689_v61 = vpack.i.b16 %v661_v54, %v661_v54  ;;  %vm768_vm4 = vcmask 793600  }
   0xc   :  { %255 = vmatprep.subr.bf16.mxu0 %v2315_v36  ;;  %v403_v62 = vcombine.high %v395_v51, %v395_v51  ;;  %v158_v0 = vand.u32 %v2322_v48, %v2454_v12  ;;  %v437_v1 = vpack.i.b16 %v402_v59, %v402_v59  ;;  %v2528_v2 = vrot.slane %v2516_v55, %v2501_v43  ;;  %v1077_v51 = vld [vmem:[%s3428_s7 + $0x8] sm:$0xaa] }
   0xd   :  { %2327 = vmatmul.mubr.msk.bf16.vlgmr.msra.gmra.mrb[0].mxu1 %vm137_vm2, %v2359_v41  ;;  %v428_v4 = vrot.slane %v423_v60, %v2510_v52  ;;  %v164_v5 = vand.u32 %v2324_v53, %v2454_v12  ;;  %v404_v6 = vcombine.high %v402_v59, %v402_v59  ;;  %v694_v8 = vrot.slane %v689_v61, %v2520_v58  ;;  %v1279_v61 = vld [vmem:[%s3428_s7] sm:$0x55] }
   0xe   :  { %2326 = vmatmul.mubr.msk.bf16.vlgmr.msra.gmra.mrb[0].mxu0 %vm137_vm2, %v2359_v41  ;;  %299 = vmatpush1.bf16.msra.mxu1 %v2316_v47  ;;  %v442_v7 = vrot.slane %v437_v1, %v2510_v52  ;;  %v430_v9 = vpack.i.b16 %v403_v62, %v403_v62  ;;  %v451_v10 = vpack.i.b16 %v2528_v2, %v2528_v2  ;;  %vm973_vm5 = vcmask 1039360  }
   0xf   :  { %256 = vmatpush1.bf16.msra.mxu0 %v2314_v42  ;;  %300 = vmatprep.subr.bf16.mxu1 %v167_v57  ;;  %v668_v11 = vrot.slane %v654_v63, %v2501_v43  ;;  %v669_v13 = vcombine.high %v661_v54, %v661_v54  ;;  %v444_v16 = vpack.i.b16 %v404_v6, %v404_v6  ;;  %vm1026_vm6 = vcmask 7168  }
  0x10   :  { %257 = vmatprep.subr.bf16.mxu0 %v161_v56  ;;  %287 = vmatprep.mubr.bf16.mxu0 %v2378_v3  ;;  %v456_v12 = vrot.slane %v451_v10, %v2510_v52  ;;  %v435_v15 = vrot.slane %v430_v9, %v2510_v52  ;;  %v866_v22 = vrot.slane %v855_v18, %v2501_v43  ;;  %vm821_vm7 = vcmask 252928  }
  0x11   :  { %486 = vrot.lane.b32.xlu1 %v428_v4, %s2381_s24  ;;  %330 = vmatprep.mubr.bf16.mxu1 %v2378_v3  ;;  %v670_v14 = vcombine.high %v668_v11, %v668_v11  ;;  %v696_v17 = vpack.i.b16 %v669_v13, %v669_v13  ;;  %v859_v23 = vcombine.high %v855_v18, %v855_v18  ;;  %v1280_v13 = vld [vmem:[%s3428_s7 + $0x8] sm:$0x55]  ;;  %vm555_vm8 = vcmask 269312  }
  0x12   :  { %490 = vrot.lane.b32.xlu0 %v442_v7, %s2381_s24  ;;  %301 = vmatpush1.bf16.msra.mxu1 %v164_v5  ;;  %v449_v24 = vrot.slane %v444_v16, %v2510_v52  ;;  %v703_v25 = vpack.i.b16 %v668_v11, %v668_v11  ;;  %v2558_v26 = vrot.slane %v651_v19, %v2501_v43  ;;  %vm1855_vm9 = vcmask 130048  }
  0x13   :  { %258 = vmatpush1.bf16.msra.mxu0 %v158_v0  ;;  %v710_v20 = vpack.i.b16 %v670_v14, %v670_v14  ;;  %v701_v21 = vrot.slane %v696_v17, %v2520_v58  ;;  %v894_v28 = vpack.i.b16 %v866_v22, %v866_v22  ;;  %v873_v30 = vrot.slane %v859_v23, %v2501_v43 }
  0x14   :  { %v708_v31 = vrot.slane %v703_v25, %v2520_v58  ;;  %v717_v32 = vpack.i.b16 %v2558_v26, %v2558_v26  ;;  %v874_v33 = vcombine.high %v866_v22, %v866_v22  ;;  %v2576_v37 = vrot.slane %v856_v29, %v2501_v43 }
  0x15   :  { %752 = vrot.lane.b32.xlu1 %v694_v8, %s2382_s25  ;;  %2329 = vmatmul.mubr.msk.bf16.vlgmr.msra.gmra.mrb[4].mxu1 %vm137_vm2, %v2359_v41  ;;  %v715_v27 = vrot.slane %v710_v20, %v2520_v58  ;;  %v899_v35 = vrot.slane %v894_v28, %v2510_v52  ;;  %v908_v36 = vpack.i.b16 %v873_v30, %v873_v30  ;;  %vm1509_vm10 = vcmask 785408  }
  0x16   :  { %2328 = vmatmul.mubr.msk.bf16.vlgmr.msra.gmra.mrb[4].mxu0 %vm137_vm2, %v2359_v41  ;;  %494 = vrot.lane.b32.xlu0 %v456_v12, %s2381_s24  ;;  %v1087_v38 = vrot.slane %v1076_v34, %v2501_v43  ;;  %v1080_v39 = vcombine.high %v1076_v34, %v1076_v34  ;;  %v671_v40 = vcombine.high %v651_v19, %v651_v19  ;;  %vm616_vm11 = vcmask 261120  }
  0x17   :  { %v722_v41 = vrot.slane %v717_v32, %v2520_v58  ;;  %v901_v42 = vpack.i.b16 %v874_v33, %v874_v33  ;;  %v875_v44 = vcombine.high %v873_v30, %v873_v30  ;;  %v913_v45 = vrot.slane %v908_v36, %v2510_v52 }
  0x18   :  { %v922_v46 = vpack.i.b16 %v2576_v37, %v2576_v37  ;;  %v1095_v47 = vcombine.high %v1087_v38, %v1087_v38  ;;  %v1094_v48 = vrot.slane %v1080_v39, %v2501_v43  ;;  %v2592_v53 = vrot.slane %v671_v40, %v2501_v43 }
  0x19   :  { %488 = vrot.lane.b32.xlu1 %v435_v15, %s2381_s24  ;;  %v906_v49 = vrot.slane %v901_v42, %v2510_v52  ;;  %v915_v50 = vpack.i.b16 %v875_v44, %v875_v44  ;;  %v1097_v54 = vcombine.high %v1077_v51, %v1077_v51  ;;  %v876_v62 = vcombine.high %v856_v29, %v856_v29 }
  0x1a   :  { %754 = vrot.lane.b32.xlu0 %v701_v21, %s2382_s25  ;;  %v927_v56 = vrot.slane %v922_v46, %v2510_v52  ;;  %v1122_v57 = vpack.i.b16 %v1095_v47, %v1095_v47  ;;  %v1096_v59 = vcombine.high %v1094_v48, %v1094_v48  ;;  %v687_v60 = vcombine.high %v2592_v53, %v2592_v53 }
  0x1b   :  { %v920_v63 = vrot.slane %v915_v50, %v2510_v52  ;;  %v1115_v0 = vpack.i.b16 %v1087_v38, %v1087_v38  ;;  %v890_v6 = vrot.slane %v876_v62, %v2501_v43  ;;  %v1111_v7 = vrot.slane %v1097_v54, %v2501_v43 }
  0x1c   :  { %v738_v1 = vpack.i.b16 %v687_v60, %v687_v60  ;;  %v1127_v4 = vrot.slane %v1122_v57, %v2520_v58  ;;  %v1136_v5 = vpack.i.b16 %v1096_v59, %v1096_v59  ;;  %v2608_v8 = vrot.slane %v1077_v51, %v2501_v43 }
  0x1d   :  { %492 = vrot.lane.b32.xlu1 %v449_v24, %s2381_s24  ;;  %v1290_v9 = vrot.slane %v1279_v61, %v2501_v43  ;;  %v1283_v10 = vcombine.high %v1279_v61, %v1279_v61  ;;  %v1129_v12 = vpack.i.b16 %v1094_v48, %v1094_v48  ;;  %v936_v14 = vpack.i.b16 %v890_v6, %v890_v6 }
  0x1e   :  { %758 = vrot.lane.b32.xlu0 %v715_v27, %s2382_s25  ;;  %v2612_v11 = vrot.slane %v738_v1, %v2520_v58  ;;  %v1113_v15 = vcombine.high %v1111_v7, %v1111_v7  ;;  %v1120_v16 = vrot.slane %v1115_v0, %v2520_v58  ;;  %v1300_v18 = vcombine.high %v1280_v13, %v1280_v13  ;;  %v1544_v27 = vld [vmem:[%s3428_s7 + $0x8] sm:$0xaa] }
  0x1f   :  { %v1318_v17 = vpack.i.b16 %v1290_v9, %v1290_v9  ;;  %v892_v19 = vcombine.high %v890_v6, %v890_v6  ;;  %v1141_v20 = vrot.slane %v1136_v5, %v2520_v58  ;;  %v2622_v21 = vrot.slane %v936_v14, %v2510_v52 }
  0x20   :  { %v1164_v22 = vpack.i.b16 %v1113_v15, %v1113_v15  ;;  %v1157_v23 = vpack.i.b16 %v1111_v7, %v1111_v7  ;;  %v1143_v24 = vpack.i.b16 %v2608_v8, %v2608_v8  ;;  %v1297_v25 = vrot.slane %v1283_v10, %v2501_v43 }
  0x21   :  { %756 = vrot.lane.b32.xlu1 %v708_v31, %s2382_s25  ;;  %v1314_v28 = vrot.slane %v1300_v18, %v2501_v43  ;;  %v943_v29 = vpack.i.b16 %v892_v19, %v892_v19  ;;  %v1134_v30 = vrot.slane %v1129_v12, %v2520_v58  ;;  %v1543_v31 = vld [vmem:[%s3428_s7] sm:$0xaa]  ;;  %v1564_v34 = vcombine.high %v1544_v27, %v1544_v27  ;;  %s2385_s7 = smov 31  }
  0x22   :  { %957 = vrot.lane.b32.xlu0 %v899_v35, %s2383_s11  ;;  %v2636_v32 = vrot.slane %v1164_v22, %v2520_v58  ;;  %v2639_v33 = vrot.slane %v1157_v23, %v2520_v58  ;;  %v1298_v35 = vcombine.high %v1290_v9, %v1290_v9  ;;  %v1332_v36 = vpack.i.b16 %v1297_v25, %v1297_v25 }
  0x23   :  { %v1360_v38 = vpack.i.b16 %v1314_v28, %v1314_v28  ;;  %v2643_v39 = vrot.slane %v943_v29, %v2510_v52  ;;  %v1323_v40 = vrot.slane %v1318_v17, %v2510_v52  ;;  %v1316_v42 = vcombine.high %v1314_v28, %v1314_v28 }
  0x24   :  { %v1578_v44 = vrot.slane %v1564_v34, %v2501_v43  ;;  %v1554_v46 = vrot.slane %v1543_v31, %v2501_v43  ;;  %v1547_v48 = vcombine.high %v1543_v31, %v1543_v31  ;;  %v1325_v54 = vpack.i.b16 %v1298_v35, %v1298_v35 }
  0x25   :  { %760 = vrot.lane.b32.xlu1 %v722_v41, %s2382_s25  ;;  %v2648_v41 = vrot.slane %v1280_v13, %v2501_v43  ;;  %v2654_v47 = vrot.slane %v1360_v38, %v2510_v52  ;;  %v1337_v57 = vrot.slane %v1332_v36, %v2510_v52  ;;  %v405_v10 = vcombine.high %v2516_v55, %v2516_v55 }
  0x26   :  { %961 = vrot.lane.b32.xlu0 %v913_v45, %s2383_s11  ;;  %v1148_v45 = vrot.slane %v1143_v24, %v2520_v58  ;;  %v1624_v50 = vpack.i.b16 %v1578_v44, %v1578_v44  ;;  %v1580_v51 = vcombine.high %v1578_v44, %v1578_v44  ;;  %v1562_v59 = vcombine.high %v1554_v46, %v1554_v46 }
  0x27   :  { %v1346_v60 = vpack.i.b16 %v2648_v41, %v2648_v41  ;;  %v1561_v0 = vrot.slane %v1547_v48, %v2501_v43  ;;  %v1582_v13 = vpack.i.b16 %v1554_v46, %v1554_v46  ;;  %v419_v17 = vrot.slane %v405_v10, %v2501_v43 }
  0x28   :  { %v2665_v62 = vrot.slane %v1624_v50, %v2520_v58  ;;  %v1589_v7 = vpack.i.b16 %v1562_v59, %v1562_v59  ;;  %v1571_v19 = vrot.slane %v1544_v27, %v2501_v43  ;;  %v686_v29 = vcombine.high %v2558_v26, %v2558_v26 }
  0x29   :  { %959 = vrot.lane.b32.xlu1 %v906_v49, %s2383_s11  ;;  %v1367_v49 = vpack.i.b16 %v1316_v42, %v1316_v42  ;;  %v1351_v6 = vrot.slane %v1346_v60, %v2510_v52  ;;  %v1563_v9 = vcombine.high %v1561_v0, %v1561_v0  ;;  %v1587_v18 = vrot.slane %v1582_v13, %v2520_v58 }
  0x2a   :  { %965 = vrot.lane.b32.xlu0 %v927_v56, %s2383_s11  ;;  %v1299_v56 = vcombine.high %v1297_v25, %v1297_v25  ;;  %v1594_v14 = vrot.slane %v1589_v7, %v2520_v58  ;;  %v1596_v55 = vpack.i.b16 %v1561_v0, %v1561_v0  ;;  %v421_v23 = vcombine.high %v419_v17, %v419_v17 }
  0x2b   :  { %v2662_v61 = vrot.slane %v1367_v49, %v2510_v52  ;;  %v1603_v15 = vpack.i.b16 %v1563_v9, %v1563_v9  ;;  %v1610_v24 = vpack.i.b16 %v1571_v19, %v1571_v19  ;;  %v465_v27 = vpack.i.b16 %v419_v17, %v419_v17 }
  0x2c   :  { %v1339_v5 = vpack.i.b16 %v1299_v56, %v1299_v56  ;;  %v472_v28 = vpack.i.b16 %v421_v23, %v421_v23  ;;  %v731_v31 = vpack.i.b16 %v2592_v53, %v2592_v53  ;;  %v891_v34 = vcombine.high %v2576_v37, %v2576_v37 }
  0x2d   :  { %963 = vrot.lane.b32.xlu1 %v920_v63, %s2383_s11  ;;  %v1631_v63 = vpack.i.b16 %v1580_v51, %v1580_v51  ;;  %v1615_v43 = vrot.slane %v1610_v24, %v2520_v58  ;;  %v470_v35 = vrot.slane %v465_v27, %v2510_v52  ;;  %v724_v36 = vpack.i.b16 %v686_v29, %v686_v29 }
  0x2e   :  { %1180 = vrot.lane.b32.xlu0 %v1127_v4, %s2384_s18  ;;  %v1330_v4 = vrot.slane %v1325_v54, %v2510_v52  ;;  %v1344_v12 = vrot.slane %v1339_v5, %v2510_v52  ;;  %v736_v38 = vrot.slane %v731_v31, %v2520_v58  ;;  %v929_v26 = vpack.i.b16 %v891_v34, %v891_v34 }
  0x2f   :  { %v2669_v1 = vrot.slane %v1631_v63, %v2520_v58  ;;  %v1112_v37 = vcombine.high %v2608_v8, %v2608_v8  ;;  %v1315_v42 = vcombine.high %v2648_v41, %v2648_v41  ;;  %v1579_v41 = vcombine.high %v1571_v19, %v1571_v19 }
  0x30   :  { %v934_v53 = vrot.slane %v929_v26, %v2510_v52 }
  0x31   :  { %1178 = vrot.lane.b32.xlu1 %v1120_v16, %s2384_s18  ;;  %v420_v16 = vcombine.high %v2528_v2, %v2528_v2  ;;  %v1601_v2 = vrot.slane %v1596_v55, %v2520_v58  ;;  %v1150_v44 = vpack.i.b16 %v1112_v37, %v1112_v37 }
  0x32   :  { %1184 = vrot.lane.b32.xlu0 %v1141_v20, %s2384_s18  ;;  %v1608_v20 = vrot.slane %v1603_v15, %v2520_v58 }
  0x33   :  { %v458_v22 = vpack.i.b16 %v420_v16, %v420_v16  ;;  %v1155_v46 = vrot.slane %v1150_v44, %v2520_v58 }
  0x35   :  { %1182 = vrot.lane.b32.xlu1 %v1134_v30, %s2384_s18  ;;  %v463_v25 = vrot.slane %v458_v22, %v2510_v52  ;;  %v477_v30 = vrot.slane %v472_v28, %v2510_v52 }
  0x36   :  { %1381 = vrot.lane.b32.xlu0 %v1323_v40, %s2385_s7  ;;  %v729_v40 = vrot.slane %v724_v36, %v2520_v58 }
  0x39   :  { %1186 = vrot.lane.b32.xlu1 %v1148_v45, %s2384_s18  ;;  %v1353_v45 = vpack.i.b16 %v1315_v42, %v1315_v42 }
  0x3a   :  { %1385 = vrot.lane.b32.xlu0 %v1337_v57, %s2385_s7 }
  0x3b   :  { %v1358_v8 = vrot.slane %v1353_v45, %v2510_v52 }
  0x3d   :  { %1383 = vrot.lane.b32.xlu1 %v1330_v4, %s2385_s7 }
  0x3e   :  { %1389 = vrot.lane.b32.xlu0 %v1351_v6, %s2385_s7 }
  0x41   :  { %1387 = vrot.lane.b32.xlu1 %v1344_v12, %s2385_s7 }
  0x42   :  { %1647 = vrot.lane.b32.xlu0 %v1594_v14, %s2386_s23 }
  0x45   :  { %1645 = vrot.lane.b32.xlu1 %v1587_v18, %s2386_s23 }
  0x46   :  { %1651 = vrot.lane.b32.xlu0 %v1608_v20, %s2386_s23 }
  0x49   :  { %1649 = vrot.lane.b32.xlu1 %v1601_v2, %s2386_s23 }
  0x4a   :  { %496 = vrot.lane.b32.xlu0 %v463_v25, %s2381_s24 }
  0x4d   :  { %1653 = vrot.lane.b32.xlu1 %v1615_v43, %s2386_s23 }
  0x4e   :  { %500 = vrot.lane.b32.xlu0 %v477_v30, %s2381_s24 }
  0x51   :  { %498 = vrot.lane.b32.xlu1 %v470_v35, %s2381_s24 }
  0x52   :  { %764 = vrot.lane.b32.xlu0 %v736_v38, %s2382_s25 }
  0x55   :  { %762 = vrot.lane.b32.xlu1 %v729_v40, %s2382_s25 }
  0x56   :  { %967 = vrot.lane.b32.xlu0 %v934_v53, %s2383_s11 }
  0x59   :  { %766 = vrot.lane.b32.xlu1 %v2612_v11, %s2382_s25  ;;  %v1617_v11 = vpack.i.b16 %v1579_v41, %v1579_v41 }
  0x5a   :  { %971 = vrot.lane.b32.xlu0 %v2643_v39, %s2383_s11 }
  0x5d   :  { %969 = vrot.lane.b32.xlu1 %v2622_v21, %s2383_s11  ;;  %v1622_v21 = vrot.slane %v1617_v11, %v2520_v58 }
  0x5e   :  { %1190 = vrot.lane.b32.xlu0 %v2639_v33, %s2384_s18 }
  0x61   :  { %1188 = vrot.lane.b32.xlu1 %v1155_v46, %s2384_s18 }
  0x62   :  { %1391 = vrot.lane.b32.xlu0 %v1358_v8, %s2385_s7 }
  0x65   :  { %1192 = vrot.lane.b32.xlu1 %v2636_v32, %s2384_s18 }
  0x66   :  { %1395 = vrot.lane.b32.xlu0 %v2662_v61, %s2385_s7 }
  0x69   :  { %1393 = vrot.lane.b32.xlu1 %v2654_v47, %s2385_s7 }
  0x6a   :  { %598 = vrot.lane.b32.xlu0 %v2378_v3, %s2387_s1 }
  0x6d   :  { %1655 = vrot.lane.b32.xlu1 %v1622_v21, %s2386_s23 }
  0x6e   :  { %1657 = vrot.lane.b32.xlu0 %v2665_v62, %s2386_s23 }
  0x71   :  { %1659 = vrot.lane.b32.xlu1 %v2669_v1, %s2386_s23 }
  0x83   :  { %v2743_v52 = vpop.permute.xlu1 %486  ;;  %v2745_v32 = vpop.permute.xlu0 %52 }
  0x84   :  { %v519_v33 = vmul.bf16 0, %v2743_v52 }
  0x86   :  { %537 = vrot.lane.b32.xlu1 %v519_v33, %s2386_s23 }
  0x87   :  { %v2749_v58 = vpop.permute.xlu1 %752  ;;  %v2751_v39 = vpop.permute.xlu0 %57 }
  0x88   :  { %v785_v47 = vmul.bf16 0, %v2749_v58 }
  0x8a   :  { %803 = vrot.lane.b32.xlu0 %v785_v47, %s2385_s7 }
  0x8b   :  { %v2755_v48 = vpop.permute.xlu1 %488  ;;  %v2757_v49 = vpop.permute.xlu0 %490 }
  0x8f   :  { %v2759_v50 = vpop.permute.xlu1 %492  ;;  %v2761_v51 = vpop.permute.xlu0 %494 }
  0x93   :  { %v2763_v54 = vpop.permute.xlu1 %756  ;;  %v2765_v56 = vpop.permute.xlu0 %754 }
  0x97   :  { %v2767_v57 = vpop.permute.xlu1 %760  ;;  %v2769_v59 = vpop.permute.xlu0 %758 }
  0x9b   :  { %v2771_v60 = vpop.permute.xlu1 %959  ;;  %v2773_v61 = vpop.permute.xlu0 %957 }
  0x9c   :  { %v990_v62 = vmul.bf16 0, %v2773_v61 }
  0x9e   :  { %1008 = vrot.lane.b32.xlu1 %v990_v62, %s2384_s18 }
  0x9f   :  { %v2777_v63 = vpop.permute.xlu1 %963  ;;  %v2808_v55 = vpop.permute.xlu0 %961 }
  0xa3   :  { %v2779_v0 = vpop.permute.xlu1 %1178  ;;  %v2811_v19 = vpop.permute.xlu0 %965 }
  0xa7   :  { %v2781_v1 = vpop.permute.xlu1 %1182  ;;  %v2823_v41 = vpop.permute.xlu0 %1180 }
  0xab   :  { %v2783_v4 = vpop.permute.xlu1 %1186 }
  0xaf   :  { %v2785_v5 = vpop.permute.xlu1 %1383 }
  0xb3   :  { %v2787_v6 = vpop.permute.xlu1 %1387 }
  0xb7   :  { %v2789_v7 = vpop.permute.xlu1 %1645 }
  0xbb   :  { %v2791_v9 = vpop.permute.xlu1 %1649 }
  0xbf   :  { %v2793_v10 = vpop.permute.xlu1 %1653 }
  0xc3   :  { %v2795_v12 = vpop.permute.xlu1 %498 }
  0xc7   :  { %v2797_v13 = vpop.permute.xlu1 %762 }
  0xcb   :  { %v2799_v14 = vpop.permute.xlu1 %766 }
  0xcf   :  { %v2801_v15 = vpop.permute.xlu1 %969 }
  0xd3   :  { %v2803_v16 = vpop.permute.xlu1 %1188 }
  0xd7   :  { %v2805_v17 = vpop.permute.xlu1 %1192 }
  0xd8   :  { %v1218_v18 = vmul.bf16 0, %v2805_v17 }
  0xda   :  { %1244 = vrot.lane.b32.xlu1 %v1218_v18, %s2383_s11 }
  0xe0   :  { %v246_v23 = vpop.f32.mrb[0].mxu1 }
  0xe1   :  { %v203_v20 = vpop.f32.mrb[0].mxu0  ;;  %v247_v24 = vadd.f32 %v246_v23, %v2745_v32  ;;  %v248_v28 = vpop.f32.mrb[1].mxu1 }
  0xe2   :  { %v204_v22 = vadd.f32 %v203_v20, %v2745_v32  ;;  %v205_v2 = vpop.f32.mrb[1].mxu0  ;;  %v249_v27 = vadd.f32 %v248_v28, %v2745_v32  ;;  %v250_v30 = vpop.f32.mrb[2].mxu1 }
  0xe3   :  { %v206_v25 = vadd.f32 %v205_v2, %v2745_v32  ;;  %v207_v43 = vpop.f32.mrb[2].mxu0  ;;  %v251_v34 = vadd.f32 %v250_v30, %v2751_v39  ;;  %v252_v36 = vpop.f32.mrb[3].mxu1  ;;  %v343_v53 = vmax.f32 %v247_v24, 0.0 }
  0xe4   :  { %v208_v29 = vadd.f32 %v207_v43, %v2751_v39  ;;  %v209_v31 = vpop.f32.mrb[3].mxu0  ;;  %v341_v38 = vmax.f32 %v204_v22, 0.0  ;;  %v253_v40 = vadd.f32 %v252_v36, %v2751_v39  ;;  %v344_v45 = vmax.f32 %v249_v27, 0.0 }
  0xe5   :  { %v210_v35 = vadd.f32 %v209_v31, %v2751_v39  ;;  %v342_v37 = vmax.f32 %v206_v25, 0.0  ;;  %v351_v42 = vmax.f32 %v251_v34, 0.0 }
  0xe6   :  { %v349_v26 = vmax.f32 %v208_v29, 0.0  ;;  %v352_v8 = vmax.f32 %v253_v40, 0.0 }
  0xe7   :  { %v350_v44 = vmax.f32 %v210_v35, 0.0  ;;  %v2825_v11 = vpack.c.bf16 %v351_v42, %v343_v53 }
  0xe8   :  { %v2821_v46 = vpack.c.bf16 %v349_v26, %v341_v38  ;;  %v2829_v47 = vpack.c.bf16 %v352_v8, %v344_v45  ;;  %v332_v18 = vpop.f32.mrb[4].mxu1 }
  0xe9   :  { %v2827_v21 = vpack.c.bf16 %v350_v44, %v342_v37  ;;  %v289_v33 = vpop.f32.mrb[4].mxu0  ;;  %v333_v22 = vadd.f32 %v332_v18, %v2745_v32  ;;  %v334_v23 = vpop.f32.mrb[5].mxu1  ;;  %1495 = vrot.lane.b32.xlu1 %v2825_v11, %s2388_s0 }
  0xea   :  { %v290_v62 = vadd.f32 %v289_v33, %v2745_v32  ;;  %v291_v20 = vpop.f32.mrb[5].mxu0  ;;  %600 = vrot.lane.b32.xlu0 %v2821_v46, %s2387_s1  ;;  %v335_v25 = vadd.f32 %v334_v23, %v2745_v32  ;;  %v336_v43 = vpop.f32.mrb[6].mxu1  ;;  %v503_v33 = vsel %vm502_vm3, %v2743_v52, %v2755_v48  ;;  %v769_v52 = vsel %vm768_vm4, %v2749_v58, %v2765_v56 }
  0xeb   :  { %v292_v2 = vadd.f32 %v291_v20, %v2745_v32  ;;  %v293_v24 = vpop.f32.mrb[6].mxu0  ;;  %v337_v29 = vadd.f32 %v336_v43, %v2751_v39  ;;  %v338_v31 = vpop.f32.mrb[7].mxu1  ;;  %v347_v38 = vmax.f32 %v333_v22, 0.0  ;;  %v505_v20 = vsel %vm502_vm3, %v2757_v49, %v2759_v50 }
  0xec   :  { %v294_v28 = vadd.f32 %v293_v24, %v2751_v39  ;;  %v295_v27 = vpop.f32.mrb[7].mxu0  ;;  %v345_v34 = vmax.f32 %v290_v62, 0.0  ;;  %v339_v36 = vadd.f32 %v338_v31, %v2751_v39  ;;  %v348_v53 = vmax.f32 %v335_v25, 0.0  ;;  %v2849_v44 = vpop.permute.xlu0 %1184 }
  0xed   :  { %v296_v30 = vadd.f32 %v295_v27, %v2751_v39  ;;  %v346_v26 = vmax.f32 %v292_v2, 0.0  ;;  %v355_v40 = vmax.f32 %v337_v29, 0.0  ;;  %602 = vrot.lane.b32.xlu1 %v2827_v21, %s2387_s1  ;;  %v520_v62 = vmul.bf16 %v503_v33, %v2821_v46 }
  0xee   :  { %v353_v35 = vmax.f32 %v294_v28, 0.0  ;;  %604 = vrot.lane.b32.xlu0 %v2825_v11, %s2387_s1  ;;  %v356_v42 = vmax.f32 %v339_v36, 0.0  ;;  %v522_v22 = vmul.bf16 %v505_v20, %v2825_v11  ;;  %v974_v23 = vsel %vm973_vm5, %v2773_v61, %v2771_v60 }
  0xef   :  { %v354_v32 = vmax.f32 %v296_v30, 0.0  ;;  %v2851_v45 = vpack.c.bf16 %v355_v40, %v347_v38  ;;  %v786_v2 = vmul.bf16 %v769_v52, %v2821_v46  ;;  %v991_v25 = vmul.bf16 %v974_v23, %v2821_v46 }
  0xf0   :  { %v2847_v37 = vpack.c.bf16 %v353_v35, %v345_v34  ;;  %v2855_v8 = vpack.c.bf16 %v356_v42, %v348_v53  ;;  %v1382_v18 = vpop.permute.xlu0 %1381  ;;  %v771_v28 = vsel %vm768_vm4, %v2763_v54, %v2769_v59  ;;  %v976_v58 = vsel %vm973_vm5, %v2808_v55, %v2777_v63 }
  0xf1   :  { %v2853_v39 = vpack.c.bf16 %v354_v32, %v346_v26  ;;  %606 = vrot.lane.b32.xlu1 %v2829_v47, %s2387_s1  ;;  %v788_v43 = vmul.bf16 %v771_v28, %v2825_v11  ;;  %v993_v61 = vmul.bf16 %v976_v58, %v2825_v11  ;;  %v1195_v29 = vsel %vm1026_vm6, %v2823_v41, %v2781_v1 }
  0xf2   :  { %1491 = vrot.lane.b32.xlu0 %v2821_v46, %s2388_s0  ;;  %v1210_v30 = vmul.bf16 %v2779_v0, %v2821_v46  ;;  %v1212_v31 = vmul.bf16 %v1195_v29, %v2825_v11  ;;  %v1413_v38 = vmul.bf16 %v1382_v18, %v2821_v46  ;;  %v1677_v32 = vmul.bf16 %v2789_v7, %v2821_v46 }
  0xf3   :  { %v504_v53 = vsel %vm502_vm3, %v2755_v48, %v2757_v49  ;;  %v770_v33 = vsel %vm768_vm4, %v2765_v56, %v2763_v54  ;;  %v772_v48 = vsel %vm768_vm4, %v2769_v59, %v2767_v57  ;;  %v975_v56 = vsel %vm973_vm5, %v2771_v60, %v2808_v55 }
  0xf4   :  { %v1386_v24 = vpop.permute.xlu0 %1385  ;;  %v787_v20 = vmul.bf16 %v770_v33, %v2827_v21  ;;  %v789_v54 = vmul.bf16 %v772_v48, %v2829_v47  ;;  %v992_v23 = vmul.bf16 %v975_v56, %v2827_v21 }
  0xf5   :  { %539 = vrot.lane.b32.xlu1 %v520_v62, %s2386_s23  ;;  %v1398_v34 = vsel %vm821_vm7, %v2785_v5, %v1386_v24  ;;  %v521_v62 = vmul.bf16 %v504_v53, %v2827_v21  ;;  %v1399_v60 = vsel %vm821_vm7, %v1386_v24, %v2787_v6 }
  0xf6   :  { %1493 = vrot.lane.b32.xlu0 %v2827_v21, %s2388_s0  ;;  %v1415_v35 = vmul.bf16 %v1398_v34, %v2825_v11 }
  0xf8   :  { %v2894_v27 = vpop.permute.xlu0 %1389 }
  0xf9   :  { %543 = vrot.lane.b32.xlu1 %v522_v22, %s2386_s23  ;;  %v506_v22 = vsel %vm502_vm3, %v2759_v50, %v2761_v51  ;;  %v1397_v50 = vsel %vm821_vm7, %v1382_v18, %v2785_v5  ;;  %v1416_v5 = vmul.bf16 %v1399_v60, %v2829_v47  ;;  %v1194_v18 = vsel %vm1026_vm6, %v2779_v0, %v2823_v41 }
  0xfa   :  { %1497 = vrot.lane.b32.xlu0 %v2829_v47, %s2388_s0  ;;  %v523_v49 = vmul.bf16 %v506_v22, %v2829_v47  ;;  %v1414_v59 = vmul.bf16 %v1397_v50, %v2827_v21  ;;  %v1211_v28 = vmul.bf16 %v1194_v18, %v2827_v21  ;;  %v1400_v29 = vsel %vm821_vm7, %v2787_v6, %v2894_v27 }
  0xfc   :  { %v1648_v36 = vpop.permute.xlu0 %1647 }
  0xfd   :  { %1010 = vrot.lane.b32.xlu1 %v991_v25, %s2384_s18  ;;  %v1662_v26 = vsel %vm555_vm8, %v1648_v36, %v2791_v9 }
  0xfe   :  { %805 = vrot.lane.b32.xlu0 %v786_v2, %s2385_s7  ;;  %v1679_v40 = vmul.bf16 %v1662_v26, %v2825_v11  ;;  %v977_v2 = vsel %vm973_vm5, %v2777_v63, %v2811_v19  ;;  %v1661_v63 = vsel %vm555_vm8, %v2789_v7, %v1648_v36 }
  0xff   :  { %v994_v55 = vmul.bf16 %v977_v2, %v2829_v47  ;;  %v1678_v24 = vmul.bf16 %v1661_v63, %v2827_v21 }
 0x100   :  { %v1652_v42 = vpop.permute.xlu0 %1651 }
 0x101   :  { %1014 = vrot.lane.b32.xlu1 %v993_v61, %s2384_s18  ;;  %v1663_v0 = vsel %vm555_vm8, %v2791_v9, %v1652_v42 }
 0x102   :  { %809 = vrot.lane.b32.xlu0 %v788_v43, %s2385_s7  ;;  %v1196_v43 = vsel %vm1026_vm6, %v2781_v1, %v2849_v44  ;;  %v1680_v7 = vmul.bf16 %v1663_v0, %v2829_v47  ;;  %v2985_v1 = vld [vmem:[%s3429_s3 + $0x4] ss:$8 sps:$4 sm:$0xff]  }
 0x103   :  { %v1213_v41 = vmul.bf16 %v1196_v43, %v2829_v47  ;;  %2334 = vmatprep.mubr.msk.bf16.mxu0 %vm1855_vm9, %v2985_v1  ;;  %2336 = vmatprep.mubr.msk.bf16.mxu1 %vm1855_vm9, %v2985_v1 }
 0x104   :  { %v2935_v52 = vpop.permute.xlu0 %496 }
 0x105   :  { %1232 = vrot.lane.b32.xlu1 %v1212_v31, %s2383_s11  ;;  %v1664_v31 = vsel %vm555_vm8, %v1652_v42, %v2793_v10  ;;  %v508_v22 = vsel %vm502_vm3, %v2935_v52, %v2795_v12 }
 0x106   :  { %1228 = vrot.lane.b32.xlu0 %v1210_v30, %s2383_s11  ;;  %v1417_v30 = vmul.bf16 %v1400_v29, %v2847_v37  ;;  %v1681_v6 = vmul.bf16 %v1664_v31, %v2847_v37 }
 0x108   :  { %v2951_v25 = vpop.permute.xlu0 %500 }
 0x109   :  { %1431 = vrot.lane.b32.xlu1 %v1413_v38, %s2382_s25  ;;  %v507_v38 = vsel %vm502_vm3, %v2761_v51, %v2935_v52  ;;  %v509_v51 = vsel %vm502_vm3, %v2795_v12, %v2951_v25  ;;  %v527_v12 = vmul.bf16 %v2951_v25, %v2855_v8 }
 0x10a   :  { %1435 = vrot.lane.b32.xlu0 %v1415_v35, %s2382_s25  ;;  %v1197_v35 = vsel %vm1026_vm6, %v2849_v44, %v2783_v4  ;;  %v526_v33 = vmul.bf16 %v509_v51, %v2851_v45 }
 0x10b   :  { %v1214_v36 = vmul.bf16 %v1197_v35, %v2847_v37 }
 0x10c   :  { %v765_v58 = vpop.permute.xlu0 %764 }
 0x10d   :  { %1695 = vrot.lane.b32.xlu1 %v1677_v32, %s2381_s24  ;;  %v3024_v32 = vpop.permute.xlu1 %1393  ;;  %v774_v52 = vsel %vm768_vm4, %v2797_v13, %v765_v58 }
 0x10e   :  { %1699 = vrot.lane.b32.xlu0 %v1679_v40, %s2381_s24  ;;  %v524_v40 = vmul.bf16 %v507_v38, %v2847_v37  ;;  %v791_v60 = vmul.bf16 %v774_v52, %v2853_v39  ;;  %v1816_v52 = vld [vmem:[%s3430_s4 + $0x18] sm:$0xff] }
 0x110   :  { %v2977_v61 = vpop.permute.xlu0 %967 }
 0x111   :  { %807 = vrot.lane.b32.xlu1 %v787_v20, %s2385_s7  ;;  %v773_v20 = vsel %vm768_vm4, %v2767_v57, %v2797_v13  ;;  %v978_v57 = vsel %vm973_vm5, %v2811_v19, %v2977_v61  ;;  %v1656_v50 = vpop.permute.xlu1 %1655  ;;  %v793_v13 = vmul.bf16 %v2799_v14, %v2855_v8  ;;  %v979_v18 = vsel %vm973_vm5, %v2977_v61, %v2801_v15 }
 0x112   :  { %541 = vrot.lane.b32.xlu0 %v521_v62, %s2386_s23  ;;  %v790_v48 = vmul.bf16 %v773_v20, %v2847_v37  ;;  %v996_v63 = vmul.bf16 %v979_v18, %v2853_v39  ;;  %v1665_v38 = vsel %vm555_vm8, %v2793_v10, %v1656_v50 }
 0x114   :  { %v2993_v9 = vpop.permute.xlu0 %971 }
 0x115   :  { %811 = vrot.lane.b32.xlu1 %v789_v54, %s2385_s7  ;;  %v775_v54 = vsel %vm768_vm4, %v765_v58, %v2799_v14  ;;  %v1660_v2 = vpop.permute.xlu1 %1659  ;;  %v980_v19 = vsel %vm973_vm5, %v2801_v15, %v2993_v9  ;;  %v998_v58 = vmul.bf16 %v2993_v9, %v2855_v8  ;;  %v1198_v15 = vsel %vm1026_vm6, %v2783_v4, %v2803_v16 }
 0x116   :  { %545 = vrot.lane.b32.xlu0 %v523_v49, %s2386_s23  ;;  %v525_v49 = vmul.bf16 %v508_v22, %v2853_v39  ;;  %v792_v56 = vmul.bf16 %v775_v54, %v2851_v45  ;;  %v997_v25 = vmul.bf16 %v980_v19, %v2851_v45  ;;  %v1215_v0 = vmul.bf16 %v1198_v15, %v2853_v39 }
 0x118   :  { %v3006_v34 = vpop.permute.xlu0 %1190 }
 0x119   :  { %1433 = vrot.lane.b32.xlu1 %v1414_v59, %s2382_s25  ;;  %v1199_v26 = vsel %vm1026_vm6, %v2803_v16, %v3006_v34  ;;  %v995_v59 = vmul.bf16 %v978_v57, %v2847_v37 }
 0x11a   :  { %1012 = vrot.lane.b32.xlu0 %v992_v23, %s2384_s18  ;;  %v1216_v53 = vmul.bf16 %v1199_v26, %v2851_v45 }
 0x11c   :  { %v1392_v44 = vpop.permute.xlu0 %1391 }
 0x11d   :  { %1437 = vrot.lane.b32.xlu1 %v1416_v5, %s2382_s25  ;;  %v1402_v42 = vsel %vm821_vm7, %v1392_v44, %v3024_v32  ;;  %v1401_v16 = vsel %vm821_vm7, %v2894_v27, %v1392_v44  ;;  %v1685_v44 = vmul.bf16 0, %v1660_v2 }
 0x11e   :  { %1016 = vrot.lane.b32.xlu0 %v994_v55, %s2384_s18  ;;  %v1419_v62 = vmul.bf16 %v1402_v42, %v2851_v45  ;;  %v3068_v55 = vpop.permute.xlu1 %537 }
 0x120   :  { %v1396_v23 = vpop.permute.xlu0 %1395 }
 0x121   :  { %1697 = vrot.lane.b32.xlu1 %v1678_v24, %s2381_s24 }
 0x122   :  { %1230 = vrot.lane.b32.xlu0 %v1211_v28, %s2383_s11  ;;  %v3080_v28 = vpop.permute.xlu1 %1008 }
 0x124   :  { %v3072_v5 = vpop.permute.xlu0 %598 }
 0x125   :  { %1701 = vrot.lane.b32.xlu1 %v1680_v7, %s2381_s24  ;;  %v1200_v7 = vsel %vm1026_vm6, %v3006_v34, %v2805_v17  ;;  %v1418_v17 = vmul.bf16 %v1401_v16, %v2853_v39 }
 0x126   :  { %1234 = vrot.lane.b32.xlu0 %v1213_v41, %s2383_s11  ;;  %v1421_v41 = vmul.bf16 0, %v1396_v23  ;;  %v1217_v4 = vmul.bf16 %v1200_v7, %v2855_v8 }
 0x128   :  { %v1658_v14 = vpop.permute.xlu0 %1657 }
 0x129   :  { %1499 = vrot.lane.b32.xlu1 %v2847_v37, %s2388_s0  ;;  %v1666_v34 = vsel %vm555_vm8, %v1656_v50, %v1658_v14 }
 0x12a   :  { %608 = vrot.lane.b32.xlu0 %v2847_v37, %s2387_s1 }
 0x12c   :  { %v3095_v43 = vpop.permute.xlu0 %803 }
 0x12d   :  { %610 = vrot.lane.b32.xlu1 %v2853_v39, %s2387_s1 }
 0x12e   :  { %612 = vrot.lane.b32.xlu0 %v2851_v45, %s2387_s1 }
 0x131   :  { %614 = vrot.lane.b32.xlu1 %v2855_v8, %s2387_s1 }
 0x132   :  { %1439 = vrot.lane.b32.xlu0 %v1417_v30, %s2382_s25  ;;  %v1403_v30 = vsel %vm821_vm7, %v3024_v32, %v1396_v23  ;;  %v1667_v32 = vsel %vm555_vm8, %v1658_v14, %v1660_v2 }
 0x133   :  { %v1420_v35 = vmul.bf16 %v1403_v30, %v2855_v8  ;;  %v1684_v42 = vmul.bf16 %v1667_v32, %v2855_v8 }
 0x135   :  { %1236 = vrot.lane.b32.xlu1 %v1214_v36, %s2383_s11 }
 0x136   :  { %1703 = vrot.lane.b32.xlu0 %v1681_v6, %s2381_s24  ;;  %v1683_v6 = vmul.bf16 %v1666_v34, %v2851_v45 }
 0x139   :  { %1240 = vrot.lane.b32.xlu1 %v1216_v53, %s2383_s11 }
 0x13a   :  { %547 = vrot.lane.b32.xlu0 %v524_v40, %s2386_s23  ;;  %v1682_v40 = vmul.bf16 %v1665_v38, %v2853_v39 }
 0x13d   :  { %1443 = vrot.lane.b32.xlu1 %v1419_v62, %s2382_s25  ;;  %v1813_v62 = vld [vmem:[%s3430_s4] sm:$0xff] }
 0x13e   :  { %551 = vrot.lane.b32.xlu0 %v526_v33, %s2386_s23 }
 0x141   :  { %549 = vrot.lane.b32.xlu1 %v525_v49, %s2386_s23 }
 0x142   :  { %813 = vrot.lane.b32.xlu0 %v790_v48, %s2385_s7  ;;  %v1815_v48 = vld [vmem:[%s3430_s4 + $0x10] sm:$0xff] }
 0x145   :  { %553 = vrot.lane.b32.xlu1 %v527_v12, %s2386_s23  ;;  %v1814_v12 = vld [vmem:[%s3430_s4 + $0x8] sm:$0xff] }
 0x146   :  { %817 = vrot.lane.b32.xlu0 %v792_v56, %s2385_s7  ;;  %v2123_v56 = vld [vmem:[%s3431_s6] sm:$0x1f] }
 0x149   :  { %815 = vrot.lane.b32.xlu1 %v791_v60, %s2385_s7 }
 0x14a   :  { %1018 = vrot.lane.b32.xlu0 %v995_v59, %s2384_s18 }
 0x14c   :  { %v3093_v24 = vpop.permute.xlu1 %1244 }
 0x14d   :  { %819 = vrot.lane.b32.xlu1 %v793_v13, %s2385_s7 }
 0x14e   :  { %1022 = vrot.lane.b32.xlu0 %v997_v25, %s2384_s18 }
 0x151   :  { %1020 = vrot.lane.b32.xlu1 %v996_v63, %s2384_s18 }
 0x152   :  { %1501 = vrot.lane.b32.xlu0 %v2853_v39, %s2388_s0 }
 0x155   :  { %1024 = vrot.lane.b32.xlu1 %v998_v58, %s2384_s18 }
 0x156   :  { %1505 = vrot.lane.b32.xlu0 %v2855_v8, %s2388_s0 }
 0x159   :  { %1447 = vrot.lane.b32.xlu1 %v1421_v41, %s2382_s25 }
 0x15a   :  { %1238 = vrot.lane.b32.xlu0 %v1215_v0, %s2383_s11 }
 0x15b   :  { %v3108_v9 = vpop.permute.xlu1 %1495 }
 0x15c   :  { %v3103_v61 = vpop.permute.xlu0 %600 }
 0x15d   :  { %1503 = vrot.lane.b32.xlu1 %v2851_v45, %s2388_s0  ;;  %v617_v0 = vsel %vm616_vm11, %v3072_v5, %v3103_v61 }
 0x15e   :  { %1242 = vrot.lane.b32.xlu0 %v1217_v4, %s2383_s11 }
 0x15f   :  { %v3118_v31 = vpop.permute.xlu1 %602 }
 0x160   :  { %v3113_v29 = vpop.permute.xlu0 %604  ;;  %v618_v63 = vsel %vm616_vm11, %v3103_v61, %v3118_v31 }
 0x161   :  { %1507 = vrot.lane.b32.xlu1 %v2378_v3, %s2388_s0 }
 0x162   :  { %1441 = vrot.lane.b32.xlu0 %v1418_v17, %s2382_s25  ;;  %v619_v17 = vsel %vm616_vm11, %v3118_v31, %v3113_v29 }
 0x163   :  { %v3128_v36 = vpop.permute.xlu1 %606 }
 0x164   :  { %v3124_v27 = vpop.permute.xlu0 %1491  ;;  %v620_v7 = vsel %vm616_vm11, %v3113_v29, %v3128_v36 }
 0x165   :  { %1707 = vrot.lane.b32.xlu1 %v1683_v6, %s2381_s24 }
 0x166   :  { %1445 = vrot.lane.b32.xlu0 %v1420_v35, %s2382_s25 }
 0x167   :  { %v540_v53 = vpop.permute.xlu1 %539 }
 0x168   :  { %v3134_v26 = vpop.permute.xlu0 %1493  ;;  %v556_v18 = vsel %vm555_vm8, %v3068_v55, %v540_v53 }
 0x169   :  { %1711 = vrot.lane.b32.xlu1 %v1685_v44, %s2381_s24 }
 0x16a   :  { %1705 = vrot.lane.b32.xlu0 %v1682_v40, %s2381_s24 }
 0x16b   :  { %v544_v33 = vpop.permute.xlu1 %543 }
 0x16c   :  { %v3141_v51 = vpop.permute.xlu0 %1497 }
 0x16d   :  { %v3146_v10 = vsel %vm1509_vm10, %v3108_v9, %v3141_v51  ;;  %1824 = vperm.xlu1 %2358, %v1814_v12  }
 0x16e   :  { %1709 = vrot.lane.b32.xlu0 %v1684_v42, %s2381_s24 }
 0x16f   :  { %v1011_v22 = vpop.permute.xlu1 %1010 }
 0x170   :  { %v806_v20 = vpop.permute.xlu0 %805  ;;  %v1027_v6 = vsel %vm1026_vm6, %v3080_v28, %v1011_v22 }
 0x171   :  { %1834 = vperm.xlu1 %2358, %v1816_v52   ;;  %v822_v5 = vsel %vm821_vm7, %v3095_v43, %v806_v20 }
 0x172   :  { %1819 = vperm.xlu0 %2357, %v1813_v62  }
 0x173   :  { %v1015_v54 = vpop.permute.xlu1 %1014 }
 0x174   :  { %v810_v49 = vpop.permute.xlu0 %809 }
 0x176   :  { %1829 = vperm.xlu0 %2357, %v1815_v48  }
 0x177   :  { %v3158_v50 = vpop.permute.xlu1 %1232 }
 0x178   :  { %v1229_v57 = vpop.permute.xlu0 %1228 }
 0x17a   :  { %2126 = vperm.xlu0 %2357, %v2123_v56  }
 0x17b   :  { %v1432_v59 = vpop.permute.xlu1 %1431 }
 0x17c   :  { %v3166_v23 = vpop.permute.xlu0 %1435 }
 0x17f   :  { %v3170_v60 = vpop.permute.xlu1 %1695 }
 0x180   :  { %v3168_v2 = vpop.permute.xlu0 %1699 }
 0x183   :  { %v808_v25 = vpop.permute.xlu1 %807 }
 0x184   :  { %v542_v19 = vpop.permute.xlu0 %541  ;;  %v823_v41 = vsel %vm821_vm7, %v806_v20, %v808_v25  ;;  %v824_v29 = vsel %vm821_vm7, %v808_v25, %v810_v49 }
 0x185   :  { %v557_v13 = vsel %vm555_vm8, %v540_v53, %v542_v19  ;;  %v558_v55 = vsel %vm555_vm8, %v542_v19, %v544_v33  ;;  %v3262_v19 = vld [vmem:[%s3429_s3 + $0x10] ss:$8 sps:$4 sm:$0xff]  }
 0x186   :  { %1862 = vmatprep.subr.bf16.mxu0 %v557_v13 }
 0x187   :  { %1863 = vmatpush1.bf16.msra.mxu0 %v556_v18  ;;  %v3180_v58 = vpop.permute.xlu1 %811 }
 0x188   :  { %v3178_v14 = vpop.permute.xlu0 %545  ;;  %1864 = vmatprep.subr.bf16.mxu0 %v618_v63  ;;  %v825_v30 = vsel %vm821_vm7, %v810_v49, %v3180_v58 }
 0x189   :  { %v559_v15 = vsel %vm555_vm8, %v544_v33, %v3178_v14 }
 0x18a   :  { %1915 = vmatprep.subr.bf16.mxu1 %v559_v15 }
 0x18b   :  { %1865 = vmatpush1.bf16.msra.mxu0 %v617_v0  ;;  %1916 = vmatpush1.bf16.msra.mxu1 %v558_v55  ;;  %v1434_v16 = vpop.permute.xlu1 %1433 }
 0x18c   :  { %v1013_v4 = vpop.permute.xlu0 %1012  ;;  %1866 = vmatprep.subr.bf16.mxu0 %v823_v41  ;;  %1917 = vmatprep.subr.bf16.mxu1 %v620_v7  ;;  %v1449_v33 = vsel %vm768_vm4, %v1432_v59, %v1434_v16 }
 0x18d   :  { %v1028_v61 = vsel %vm1026_vm6, %v1011_v22, %v1013_v4  ;;  %v1029_v40 = vsel %vm1026_vm6, %v1013_v4, %v1015_v54 }
 0x18f   :  { %1867 = vmatpush1.bf16.msra.mxu0 %v822_v5  ;;  %1918 = vmatpush1.bf16.msra.mxu1 %v619_v17  ;;  %v1438_v35 = vpop.permute.xlu1 %1437 }
 0x190   :  { %v3200_v34 = vpop.permute.xlu0 %1016  ;;  %1868 = vmatprep.subr.bf16.mxu0 %v1028_v61  ;;  %1919 = vmatprep.subr.bf16.mxu1 %v825_v30 }
 0x191   :  { %v1030_v43 = vsel %vm1026_vm6, %v1015_v54, %v3200_v34 }
 0x193   :  { %1869 = vmatpush1.bf16.msra.mxu0 %v1027_v6  ;;  %1920 = vmatpush1.bf16.msra.mxu1 %v824_v29  ;;  %v1698_v38 = vpop.permute.xlu1 %1697 }
 0x194   :  { %v1231_v31 = vpop.permute.xlu0 %1230  ;;  %1870 = vmatprep.subr.bf16.mxu0 %v2827_v21  ;;  %1921 = vmatprep.subr.bf16.mxu1 %v1030_v43  ;;  %v1450_v21 = vsel %vm768_vm4, %v1434_v16, %v3166_v23  ;;  %v1714_v22 = vsel %vm502_vm3, %v1698_v38, %v3168_v2  ;;  %v1713_v54 = vsel %vm502_vm3, %v3170_v60, %v1698_v38 }
 0x195   :  { %v1247_v28 = vsel %vm973_vm5, %v1231_v31, %v3158_v50  ;;  %v1246_v53 = vsel %vm973_vm5, %v1229_v57, %v1231_v31 }
 0x197   :  { %1871 = vmatpush1.bf16.msra.mxu0 %v2821_v46  ;;  %1922 = vmatpush1.bf16.msra.mxu1 %v1029_v40  ;;  %v1702_v44 = vpop.permute.xlu1 %1701 }
 0x198   :  { %v1235_v32 = vpop.permute.xlu0 %1234  ;;  %1872 = vmatprep.subr.bf16.mxu0 %v1247_v28  ;;  %1923 = vmatprep.subr.bf16.mxu1 %v2829_v47  ;;  %v1511_v47 = vsel %vm1509_vm10, %v3134_v26, %v3108_v9  ;;  %v3237_v9 = vld [vmem:[%s3429_s3] ss:$8 sps:$4 sm:$0xff]  }
 0x199   :  { %v1248_v12 = vsel %vm973_vm5, %v3158_v50, %v1235_v32  ;;  %v1451_v50 = vsel %vm768_vm4, %v3166_v23, %v1438_v35 }
 0x19b   :  { %1873 = vmatpush1.bf16.msra.mxu0 %v1246_v53  ;;  %1924 = vmatpush1.bf16.msra.mxu1 %v2825_v11  ;;  %v3217_v46 = vpop.permute.xlu1 %1499  ;;  %v1510_v11 = vsel %vm1509_vm10, %v3124_v27, %v3134_v26  ;;  %v3242_v27 = vld [vmem:[%s3429_s3 + $0x14] ss:$8 sps:$4 sm:$0xff]  }
 0x19c   :  { %v609_v42 = vpop.permute.xlu0 %608  ;;  %1874 = vmatprep.subr.bf16.mxu0 %v1450_v21  ;;  %v1513_v13 = vsel %vm1509_vm10, %v3141_v51, %v3217_v46  ;;  %v1715_v51 = vsel %vm502_vm3, %v3168_v2, %v1702_v44 }
 0x19d   :  { %v621_v16 = vsel %vm616_vm11, %v3128_v36, %v609_v42 }
 0x19f   :  { %1875 = vmatpush1.bf16.msra.mxu0 %v1449_v33  ;;  %v611_v20 = vpop.permute.xlu1 %610 }
 0x1a0   :  { %v3223_v62 = vpop.permute.xlu0 %612  ;;  %1876 = vmatprep.subr.bf16.mxu0 %v1511_v47 }
 0x1a1   :  { %v623_v36 = vsel %vm616_vm11, %v611_v20, %v3223_v62 }
 0x1a3   :  { %1877 = vmatpush1.bf16.msra.mxu0 %v1510_v11  ;;  %v615_v49 = vpop.permute.xlu1 %614 }
 0x1a4   :  { %v3230_v48 = vpop.permute.xlu0 %1439  ;;  %1878 = vmatprep.subr.bf16.mxu0 %v1714_v22 }
 0x1a5   :  { %v1452_v59 = vsel %vm768_vm4, %v1438_v35, %v3230_v48 }
 0x1a7   :  { %1879 = vmatpush1.bf16.msra.mxu0 %v1713_v54  ;;  %v3246_v56 = vpop.permute.xlu1 %1236 }
 0x1a8   :  { %v3244_v26 = vpop.permute.xlu0 %1703  ;;  %v1249_v57 = vsel %vm973_vm5, %v1235_v32, %v3246_v56 }
 0x1a9   :  { %1925 = vmatprep.subr.bf16.mxu1 %v1249_v57  ;;  %v1716_v23 = vsel %vm502_vm3, %v1702_v44, %v3244_v26 }
 0x1aa   :  { %1895 = vmatmul.mubr.bf16.vlgmr.msra.gmra.mrb[8].mxu0 %v3237_v9  ;;  %1926 = vmatpush1.bf16.msra.mxu1 %v1248_v12 }
 0x1ab   :  { %2335 = vmatprep.mubr.msk.bf16.mxu0 %vm1855_vm9, %v3242_v27  ;;  %1927 = vmatprep.subr.bf16.mxu1 %v1452_v59  ;;  %v3257_v60 = vpop.permute.xlu1 %1240 }
 0x1ac   :  { %v548_v52 = vpop.permute.xlu0 %547 }
 0x1ad   :  { %v560_v55 = vsel %vm555_vm8, %v3178_v14, %v548_v52  ;;  %v624_v14 = vsel %vm616_vm11, %v3223_v62, %v615_v49 }
 0x1ae   :  { %1928 = vmatpush1.bf16.msra.mxu1 %v1451_v50 }
 0x1af   :  { %1929 = vmatprep.subr.bf16.mxu1 %v1513_v13  ;;  %v3269_v18 = vpop.permute.xlu1 %1443 }
 0x1b0   :  { %v552_v25 = vpop.permute.xlu0 %551 }
 0x1b2   :  { %1905 = vmatmul.mubr.bf16.gmra.mrb[12].mxu0 %v3262_v19  ;;  %1930 = vmatpush1.bf16.msra.mxu1 %v3146_v10  ;;  %v622_v10 = vsel %vm616_vm11, %v609_v42, %v611_v20 }
 0x1b3   :  { %2338 = vmatprep.mubr.msk.bf16.mxu0 %vm1855_vm9, %v2985_v1  ;;  %1931 = vmatprep.subr.bf16.mxu1 %v1716_v23  ;;  %v550_v15 = vpop.permute.xlu1 %549 }
 0x1b4   :  { %v814_v63 = vpop.permute.xlu0 %813  ;;  %v561_v0 = vsel %vm555_vm8, %v548_v52, %v550_v15  ;;  %v562_v17 = vsel %vm555_vm8, %v550_v15, %v552_v25 }
 0x1b5   :  { %1968 = vmatprep.subr.bf16.mxu0 %v561_v0  ;;  %v826_v30 = vsel %vm821_vm7, %v3180_v58, %v814_v63 }
 0x1b6   :  { %1932 = vmatpush1.bf16.msra.mxu1 %v1715_v51  ;;  %1969 = vmatpush1.bf16.msra.mxu0 %v560_v55 }
 0x1b7   :  { %1970 = vmatprep.subr.bf16.mxu0 %v622_v10  ;;  %v554_v7 = vpop.permute.xlu1 %553 }
 0x1b8   :  { %v818_v41 = vpop.permute.xlu0 %817  ;;  %v563_v4 = vsel %vm555_vm8, %v552_v25, %v554_v7 }
 0x1b9   :  { %1948 = vmatmul.mubr.bf16.vlgmr.msra.gmra.mrb[8].mxu1 %v3237_v9  ;;  %2021 = vmatprep.subr.bf16.mxu1 %v563_v4 }
 0x1ba   :  { %1971 = vmatpush1.bf16.msra.mxu0 %v621_v16  ;;  %2022 = vmatpush1.bf16.msra.mxu1 %v562_v17 }
 0x1bb   :  { %2023 = vmatprep.subr.bf16.mxu1 %v624_v14  ;;  %v816_v5 = vpop.permute.xlu1 %815  ;;  %2337 = vmatprep.mubr.msk.bf16.mxu1 %vm1855_vm9, %v3242_v27 }
 0x1bc   :  { %v1019_v2 = vpop.permute.xlu0 %1018  ;;  %v827_v61 = vsel %vm821_vm7, %v814_v63, %v816_v5  ;;  %v828_v43 = vsel %vm821_vm7, %v816_v5, %v818_v41 }
 0x1bd   :  { %1972 = vmatprep.subr.bf16.mxu0 %v827_v61  ;;  %v1031_v40 = vsel %vm1026_vm6, %v3200_v34, %v1019_v2 }
 0x1be   :  { %1973 = vmatpush1.bf16.msra.mxu0 %v826_v30  ;;  %2024 = vmatpush1.bf16.msra.mxu1 %v623_v36 }
 0x1bf   :  { %v820_v6 = vpop.permute.xlu1 %819 }
 0x1c0   :  { %v1023_v35 = vpop.permute.xlu0 %1022  ;;  %v829_v29 = vsel %vm821_vm7, %v818_v41, %v820_v6 }
 0x1c1   :  { %1958 = vmatmul.mubr.bf16.gmra.mrb[12].mxu1 %v3262_v19  ;;  %2025 = vmatprep.subr.bf16.mxu1 %v829_v29 }
 0x1c2   :  { %2026 = vmatpush1.bf16.msra.mxu1 %v828_v43  ;;  %2340 = vmatprep.mubr.msk.bf16.mxu1 %vm1855_vm9, %v2985_v1 }
 0x1c3   :  { %v1021_v38 = vpop.permute.xlu1 %1020 }
 0x1c4   :  { %v1502_v31 = vpop.permute.xlu0 %1501  ;;  %v1032_v58 = vsel %vm1026_vm6, %v1019_v2, %v1021_v38  ;;  %v1033_v53 = vsel %vm1026_vm6, %v1021_v38, %v1023_v35 }
 0x1c5   :  { %1974 = vmatprep.subr.bf16.mxu0 %v1032_v58  ;;  %v1514_v54 = vsel %vm1509_vm10, %v3217_v46, %v1502_v31 }
 0x1c6   :  { %1975 = vmatpush1.bf16.msra.mxu0 %v1031_v40 }
 0x1c7   :  { %1976 = vmatprep.subr.bf16.mxu0 %v2853_v39  ;;  %v1025_v32 = vpop.permute.xlu1 %1024 }
 0x1c8   :  { %v1506_v28 = vpop.permute.xlu0 %1505  ;;  %v1034_v44 = vsel %vm1026_vm6, %v1023_v35, %v1025_v32 }
 0x1c9   :  { %2027 = vmatprep.subr.bf16.mxu1 %v1034_v44 }
 0x1ca   :  { %1977 = vmatpush1.bf16.msra.mxu0 %v2847_v37  ;;  %2028 = vmatpush1.bf16.msra.mxu1 %v1033_v53 }
 0x1cb   :  { %2029 = vmatprep.subr.bf16.mxu1 %v2855_v8  ;;  %v1448_v34 = vpop.permute.xlu1 %1447 }
 0x1cc   :  { %v1239_v1 = vpop.permute.xlu0 %1238 }
 0x1cd   :  { %v1250_v21 = vsel %vm973_vm5, %v3246_v56, %v1239_v1  ;;  %v1251_v42 = vsel %vm973_vm5, %v1239_v1, %v3257_v60 }
 0x1ce   :  { %1978 = vmatprep.subr.bf16.mxu0 %v1251_v42  ;;  %2030 = vmatpush1.bf16.msra.mxu1 %v2851_v45 }
 0x1cf   :  { %1979 = vmatpush1.bf16.msra.mxu0 %v1250_v21  ;;  %v1504_v37 = vpop.permute.xlu1 %1503  ;;  %v3367_v21 = vld [vmem:[%s3432_s5] sm:$0x7] }
 0x1d0   :  { %v1243_v39 = vpop.permute.xlu0 %1242  ;;  %v1515_v45 = vsel %vm1509_vm10, %v1502_v31, %v1504_v37  ;;  %v1516_v59 = vsel %vm1509_vm10, %v1504_v37, %v1506_v28 }
 0x1d1   :  { %v1252_v33 = vsel %vm973_vm5, %v3257_v60, %v1243_v39  ;;  %v1253_v47 = vsel %vm973_vm5, %v1243_v39, %v3093_v24 }
 0x1d2   :  { %2031 = vmatprep.subr.bf16.mxu1 %v1253_v47 }
 0x1d3   :  { %2032 = vmatpush1.bf16.msra.mxu1 %v1252_v33  ;;  %v1508_v20 = vpop.permute.xlu1 %1507 }
 0x1d4   :  { %v1442_v62 = vpop.permute.xlu0 %1441 }
 0x1d5   :  { %v1453_v8 = vsel %vm768_vm4, %v3230_v48, %v1442_v62  ;;  %v1454_v11 = vsel %vm768_vm4, %v1442_v62, %v3269_v18  ;;  %v1517_v48 = vsel %vm1509_vm10, %v1506_v28, %v1508_v20 }
 0x1d6   :  { %1980 = vmatprep.subr.bf16.mxu0 %v1454_v11 }
 0x1d7   :  { %1981 = vmatpush1.bf16.msra.mxu0 %v1453_v8  ;;  %v1708_v56 = vpop.permute.xlu1 %1707 }
 0x1d8   :  { %v1446_v22 = vpop.permute.xlu0 %1445  ;;  %1982 = vmatprep.subr.bf16.mxu0 %v1515_v45 }
 0x1d9   :  { %v1455_v49 = vsel %vm768_vm4, %v3269_v18, %v1446_v22  ;;  %v1456_v24 = vsel %vm768_vm4, %v1446_v22, %v1448_v34 }
 0x1da   :  { %2033 = vmatprep.subr.bf16.mxu1 %v1456_v24 }
 0x1db   :  { %1983 = vmatpush1.bf16.msra.mxu0 %v1514_v54  ;;  %2034 = vmatpush1.bf16.msra.mxu1 %v1455_v49  ;;  %v1712_v60 = vpop.permute.xlu1 %1711 }
 0x1dc   :  { %v1706_v57 = vpop.permute.xlu0 %1705  ;;  %2035 = vmatprep.subr.bf16.mxu1 %v1517_v48 }
 0x1dd   :  { %v1717_v12 = vsel %vm502_vm3, %v3244_v26, %v1706_v57  ;;  %v1718_v52 = vsel %vm502_vm3, %v1706_v57, %v1708_v56 }
 0x1de   :  { %1984 = vmatprep.subr.bf16.mxu0 %v1718_v52 }
 0x1df   :  { %1985 = vmatpush1.bf16.msra.mxu0 %v1717_v12  ;;  %2036 = vmatpush1.bf16.msra.mxu1 %v1516_v59 }
 0x1e0   :  { %v1710_v46 = vpop.permute.xlu0 %1709 }
 0x1e1   :  { %v1719_v50 = vsel %vm502_vm3, %v1708_v56, %v1710_v46  ;;  %v1720_v25 = vsel %vm502_vm3, %v1710_v46, %v1712_v60 }
 0x1e2   :  { %2001 = vmatmul.mubr.bf16.vlgmr.msra.gmra.mrb[16].mxu0 %v3237_v9  ;;  %2037 = vmatprep.subr.bf16.mxu1 %v1720_v25 }
 0x1e3   :  { %2038 = vmatpush1.bf16.msra.mxu1 %v1719_v50  ;;  %2339 = vmatprep.mubr.msk.bf16.mxu0 %vm1855_vm9, %v3242_v27 }
 0x1e6   :  { %2054 = vmatmul.mubr.bf16.vlgmr.msra.gmra.mrb[16].mxu1 %v3237_v9 }
 0x1e7   :  { %2341 = vmatprep.mubr.msk.bf16.mxu1 %vm1855_vm9, %v3242_v27 }
 0x1ea   :  { %2011 = vmatmul.mubr.bf16.gmra.mrb[20].mxu0 %v3262_v19 }
 0x1eb   :  { %2165 = vmatprep.mubr.bf16.mxu0 %v2378_v3 }
 0x1ec   :  { %v3348_v18 = vpop.permute.xlu1 %1824 }
 0x1ee   :  { %2064 = vmatmul.mubr.bf16.gmra.mrb[20].mxu1 %v3262_v19 }
 0x1ef   :  { %2206 = vmatprep.mubr.bf16.mxu1 %v2378_v3 }
 0x1f0   :  { %v3356_v2 = vpop.permute.xlu1 %1834 }
 0x1f1   :  { %v3346_v26 = vpop.permute.xlu0 %1819 }
 0x1f5   :  { %v3354_v7 = vpop.permute.xlu0 %1829 }
 0x27d   :  { %v1896_v13 = vpop.f32.mrb[8].mxu0 }
 0x27e   :  { %v1897_v63 = vadd.f32 %v1896_v13, %v3346_v26  ;;  %v1898_v23 = vpop.f32.mrb[9].mxu0 }
 0x27f   :  { %v1899_v9 = vadd.f32 %v1898_v23, %v3346_v26  ;;  %v1900_v15 = vpop.f32.mrb[10].mxu0 }
 0x280   :  { %v1902_v27 = vpop.f32.mrb[11].mxu0  ;;  %v1901_v0 = vadd.f32 %v1900_v15, %v3348_v18  ;;  %v2074_v55 = vmax.f32 %v1897_v63, 0.0 }
 0x281   :  { %v1903_v51 = vadd.f32 %v1902_v27, %v3348_v18  ;;  %v2075_v41 = vmax.f32 %v1899_v9, 0.0 }
 0x282   :  { %v2082_v19 = vmax.f32 %v1901_v0, 0.0 }
 0x283   :  { %v2083_v10 = vmax.f32 %v1903_v51, 0.0 }
 0x284   :  { %v2107_v4 = vpack.c.bf16 %v2082_v19, %v2074_v55 }
 0x285   :  { %v2108_v16 = vpack.c.bf16 %v2083_v10, %v2075_v41  ;;  %v1906_v17 = vpop.f32.mrb[12].mxu0 }
 0x286   :  { %v1907_v14 = vadd.f32 %v1906_v17, %v3354_v7  ;;  %v1908_v5 = vpop.f32.mrb[13].mxu0 }
 0x287   :  { %v1909_v61 = vadd.f32 %v1908_v5, %v3354_v7  ;;  %v1910_v36 = vpop.f32.mrb[14].mxu0  ;;  %2133 = vmatprep.subr.bf16.mxu0 %v2108_v16 }
 0x288   :  { %v1912_v30 = vpop.f32.mrb[15].mxu0  ;;  %2134 = vmatpush1.bf16.msra.mxu0 %v2107_v4  ;;  %v1911_v35 = vadd.f32 %v1910_v36, %v3356_v2  ;;  %v2090_v29 = vmax.f32 %v1907_v14, 0.0 }
 0x289   :  { %v1913_v6 = vadd.f32 %v1912_v30, %v3356_v2  ;;  %v2091_v31 = vmax.f32 %v1909_v61, 0.0 }
 0x28a   :  { %v2098_v43 = vmax.f32 %v1911_v35, 0.0 }
 0x28b   :  { %v2099_v38 = vmax.f32 %v1913_v6, 0.0 }
 0x28c   :  { %v2115_v58 = vpack.c.bf16 %v2098_v43, %v2090_v29  ;;  %v1949_v28 = vpop.f32.mrb[8].mxu1 }
 0x28d   :  { %v2116_v40 = vpack.c.bf16 %v2099_v38, %v2091_v31  ;;  %v1950_v32 = vadd.f32 %v1949_v28, %v3346_v26  ;;  %v1951_v44 = vpop.f32.mrb[9].mxu1 }
 0x28e   :  { %v1952_v53 = vadd.f32 %v1951_v44, %v3346_v26  ;;  %v1953_v1 = vpop.f32.mrb[10].mxu1 }
 0x28f   :  { %2135 = vmatprep.subr.bf16.mxu0 %v2116_v40  ;;  %v1954_v34 = vadd.f32 %v1953_v1, %v3348_v18  ;;  %v1955_v42 = vpop.f32.mrb[11].mxu1  ;;  %v2076_v33 = vmax.f32 %v1950_v32, 0.0 }
 0x290   :  { %2136 = vmatpush1.bf16.msra.mxu0 %v2115_v58  ;;  %v1956_v39 = vadd.f32 %v1955_v42, %v3348_v18  ;;  %v2077_v47 = vmax.f32 %v1952_v53, 0.0 }
 0x291   :  { %v2084_v37 = vmax.f32 %v1954_v34, 0.0 }
 0x292   :  { %v2085_v62 = vmax.f32 %v1956_v39, 0.0 }
 0x293   :  { %2342 = vmatmul.mubr.msk.bf16.vlgmr.msra.gmra.mrb[24].mxu0 %vm616_vm11, %v3367_v21  ;;  %v2109_v8 = vpack.c.bf16 %v2084_v37, %v2076_v33 }
 0x294   :  { %2247 = vmatprep.mubr.bf16.mxu0 %v2378_v3  ;;  %v2110_v20 = vpack.c.bf16 %v2085_v62, %v2077_v47  ;;  %v1959_v11 = vpop.f32.mrb[12].mxu1 }
 0x295   :  { %v1960_v45 = vadd.f32 %v1959_v11, %v3354_v7  ;;  %v1961_v22 = vpop.f32.mrb[13].mxu1 }
 0x296   :  { %v1962_v49 = vadd.f32 %v1961_v22, %v3354_v7  ;;  %v1963_v24 = vpop.f32.mrb[14].mxu1  ;;  %2174 = vmatprep.subr.bf16.mxu1 %v2110_v20 }
 0x297   :  { %v1964_v54 = vadd.f32 %v1963_v24, %v3356_v2  ;;  %v1965_v56 = vpop.f32.mrb[15].mxu1  ;;  %2175 = vmatpush1.bf16.msra.mxu1 %v2109_v8  ;;  %v2092_v57 = vmax.f32 %v1960_v45, 0.0 }
 0x298   :  { %v1966_v48 = vadd.f32 %v1965_v56, %v3356_v2  ;;  %v2093_v52 = vmax.f32 %v1962_v49, 0.0 }
 0x299   :  { %v2100_v12 = vmax.f32 %v1964_v54, 0.0 }
 0x29a   :  { %v2101_v59 = vmax.f32 %v1966_v48, 0.0 }
 0x29b   :  { %v2117_v60 = vpack.c.bf16 %v2100_v12, %v2092_v57 }
 0x29c   :  { %v2118_v46 = vpack.c.bf16 %v2101_v59, %v2093_v52 }
 0x29e   :  { %2176 = vmatprep.subr.bf16.mxu1 %v2118_v46 }
 0x29f   :  { %2177 = vmatpush1.bf16.msra.mxu1 %v2117_v60 }
 0x2a2   :  { %2343 = vmatmul.mubr.msk.bf16.vlgmr.msra.gmra.mrb[24].mxu1 %vm616_vm11, %v3367_v21 }
 0x2a3   :  { %2288 = vmatprep.mubr.bf16.mxu1 %v2378_v3 }
 0x2b5   :  { %v2002_v50 = vpop.f32.mrb[16].mxu0 }
 0x2b6   :  { %v2003_v25 = vadd.f32 %v2002_v50, %v3346_v26  ;;  %v2004_v13 = vpop.f32.mrb[17].mxu0 }
 0x2b7   :  { %v2005_v63 = vadd.f32 %v2004_v13, %v3346_v26  ;;  %v2006_v23 = vpop.f32.mrb[18].mxu0 }
 0x2b8   :  { %v2007_v9 = vadd.f32 %v2006_v23, %v3348_v18  ;;  %v2008_v15 = vpop.f32.mrb[19].mxu0  ;;  %v2078_v51 = vmax.f32 %v2003_v25, 0.0 }
 0x2b9   :  { %v2009_v27 = vadd.f32 %v2008_v15, %v3348_v18  ;;  %v2055_v0 = vpop.f32.mrb[16].mxu1  ;;  %v2079_v10 = vmax.f32 %v2005_v63, 0.0 }
 0x2ba   :  { %v2086_v55 = vmax.f32 %v2007_v9, 0.0  ;;  %v2056_v19 = vadd.f32 %v2055_v0, %v3346_v26  ;;  %v2057_v41 = vpop.f32.mrb[17].mxu1 }
 0x2bb   :  { %v2087_v3 = vmax.f32 %v2009_v27, 0.0  ;;  %v2058_v4 = vadd.f32 %v2057_v41, %v3346_v26  ;;  %v2059_v16 = vpop.f32.mrb[18].mxu1 }
 0x2bc   :  { %v2111_v17 = vpack.c.bf16 %v2086_v55, %v2078_v51  ;;  %v2060_v14 = vadd.f32 %v2059_v16, %v3348_v18  ;;  %v2061_v5 = vpop.f32.mrb[19].mxu1  ;;  %v2080_v35 = vmax.f32 %v2056_v19, 0.0 }
 0x2bd   :  { %v2112_v61 = vpack.c.bf16 %v2087_v3, %v2079_v10  ;;  %v2062_v36 = vadd.f32 %v2061_v5, %v3348_v18  ;;  %v2012_v30 = vpop.f32.mrb[20].mxu0  ;;  %v2081_v31 = vmax.f32 %v2058_v4, 0.0 }
 0x2be   :  { %v2088_v6 = vmax.f32 %v2060_v14, 0.0  ;;  %v2013_v29 = vadd.f32 %v2012_v30, %v3354_v7  ;;  %v2014_v43 = vpop.f32.mrb[21].mxu0 }
 0x2bf   :  { %v2089_v38 = vmax.f32 %v2062_v36, 0.0  ;;  %v2015_v58 = vadd.f32 %v2014_v43, %v3354_v7  ;;  %v2016_v40 = vpop.f32.mrb[22].mxu0  ;;  %2215 = vmatprep.subr.bf16.mxu0 %v2112_v61 }
 0x2c0   :  { %v2113_v26 = vpack.c.bf16 %v2088_v6, %v2080_v35  ;;  %v2017_v28 = vadd.f32 %v2016_v40, %v3356_v2  ;;  %v2018_v32 = vpop.f32.mrb[23].mxu0  ;;  %2216 = vmatpush1.bf16.msra.mxu0 %v2111_v17  ;;  %v2094_v1 = vmax.f32 %v2013_v29, 0.0 }
 0x2c1   :  { %v2114_v44 = vpack.c.bf16 %v2089_v38, %v2081_v31  ;;  %v2019_v18 = vadd.f32 %v2018_v32, %v3356_v2  ;;  %v2065_v53 = vpop.f32.mrb[20].mxu1  ;;  %v2095_v33 = vmax.f32 %v2015_v58, 0.0 }
 0x2c2   :  { %v2102_v34 = vmax.f32 %v2017_v28, 0.0  ;;  %v2066_v42 = vadd.f32 %v2065_v53, %v3354_v7  ;;  %v2067_v39 = vpop.f32.mrb[21].mxu1 }
 0x2c3   :  { %v2103_v37 = vmax.f32 %v2019_v18, 0.0  ;;  %v2068_v47 = vadd.f32 %v2067_v39, %v3354_v7  ;;  %v2069_v62 = vpop.f32.mrb[22].mxu1  ;;  %2256 = vmatprep.subr.bf16.mxu1 %v2114_v44  ;;  %v2127_v7 = vpop.permute.xlu0 %2126 }
 0x2c4   :  { %v2119_v8 = vpack.c.bf16 %v2102_v34, %v2094_v1  ;;  %v2070_v20 = vadd.f32 %v2069_v62, %v3356_v2  ;;  %v2071_v11 = vpop.f32.mrb[23].mxu1  ;;  %2257 = vmatpush1.bf16.msra.mxu1 %v2113_v26  ;;  %v2096_v49 = vmax.f32 %v2066_v42, 0.0 }
 0x2c5   :  { %v2120_v45 = vpack.c.bf16 %v2103_v37, %v2095_v33  ;;  %v2072_v22 = vadd.f32 %v2071_v11, %v3356_v2  ;;  %v2097_v54 = vmax.f32 %v2068_v47, 0.0 }
 0x2c6   :  { %v2104_v24 = vmax.f32 %v2070_v20, 0.0 }
 0x2c7   :  { %v2105_v56 = vmax.f32 %v2072_v22, 0.0  ;;  %2217 = vmatprep.subr.bf16.mxu0 %v2120_v45 }
 0x2c8   :  { %v2121_v48 = vpack.c.bf16 %v2104_v24, %v2096_v49  ;;  %2218 = vmatpush1.bf16.msra.mxu0 %v2119_v8 }
 0x2c9   :  { %v2122_v57 = vpack.c.bf16 %v2105_v56, %v2097_v54 }
 0x2cb   :  { %2344 = vmatmul.mubr.msk.bf16.vlgmr.msra.gmra.mrb[28].mxu0 %vm616_vm11, %v3367_v21  ;;  %2258 = vmatprep.subr.bf16.mxu1 %v2122_v57 }
 0x2cc   :  { %2259 = vmatpush1.bf16.msra.mxu1 %v2121_v48 }
 0x2cf   :  { %2345 = vmatmul.mubr.msk.bf16.vlgmr.msra.gmra.mrb[28].mxu1 %vm616_vm11, %v3367_v21 }
 0x366   :  { %v2167_v12 = vpop.f32.mrb[24].mxu0 }
 0x367   :  { %v2168_v52 = vadd.f32 %v2167_v12, %v2127_v7  ;;  %v2169_v2 = vpop.f32.mrb[25].mxu0 }
 0x368   :  { %v2170_v59 = vadd.f32 %v2169_v2, %v2127_v7  ;;  %v2171_v60 = vpop.f32.mrb[26].mxu0 }
 0x369   :  { %2297 = vst [vmem:[%s3433_s8] sm:$0x1f] %v2168_v52  ;;  %v2172_v46 = vpop.f32.mrb[27].mxu0 }
 0x36a   :  { %2298 = vst [vmem:[%s3433_s8 + $0x8] sm:$0x1f] %v2170_v59 }
 0x375   :  { %v2208_v50 = vpop.f32.mrb[24].mxu1 }
 0x376   :  { %v2209_v25 = vadd.f32 %v2208_v50, %v2127_v7  ;;  %v2210_v13 = vpop.f32.mrb[25].mxu1 }
 0x377   :  { %v2211_v63 = vadd.f32 %v2210_v13, %v2127_v7  ;;  %v2212_v21 = vpop.f32.mrb[26].mxu1 }
 0x378   :  { %2299 = vst [vmem:[%s3433_s8 + $0x10] sm:$0x1f] %v2209_v25  ;;  %v2213_v23 = vpop.f32.mrb[27].mxu1 }
 0x379   :  { %2300 = vst [vmem:[%s3433_s8 + $0x18] sm:$0x1f] %v2211_v63 }
 0x39e   :  { %v2249_v9 = vpop.f32.mrb[28].mxu0 }
 0x39f   :  { %v2250_v15 = vadd.f32 %v2249_v9, %v2127_v7  ;;  %v2251_v27 = vpop.f32.mrb[29].mxu0 }
 0x3a0   :  { %v2252_v0 = vadd.f32 %v2251_v27, %v2127_v7  ;;  %v2253_v51 = vpop.f32.mrb[30].mxu0 }
 0x3a1   :  { %2301 = vst [vmem:[%s3433_s8 + $0x20] sm:$0x1f] %v2250_v15  ;;  %v2254_v55 = vpop.f32.mrb[31].mxu0 }
 0x3a2   :  { %2302 = vst [vmem:[%s3433_s8 + $0x28] sm:$0x1f] %v2252_v0  ;;  %v2290_v19 = vpop.f32.mrb[28].mxu1 }
 0x3a3   :  { %v2291_v41 = vadd.f32 %v2290_v19, %v2127_v7  ;;  %v2292_v10 = vpop.f32.mrb[29].mxu1 }
 0x3a4   :  { %v2293_v3 = vadd.f32 %v2292_v10, %v2127_v7  ;;  %v2294_v4 = vpop.f32.mrb[30].mxu1 }
 0x3a5   :  { %2303 = vst [vmem:[%s3433_s8 + $0x30] sm:$0x1f] %v2291_v41  ;;  %v2295_v16 = vpop.f32.mrb[31].mxu1 }
 0x3a6   :  { %2304 = vst [vmem:[%s3433_s8 + $0x38] sm:$0x1f] %v2293_v3 }

// kernel: yolo_yolo_forward.3
= control target key start
LH: loop header
LB: loop body
LE: loop exit
PB: predicated region body
PF: predicated region fallthrough
CT: control target
= control target key end

     0   :  { %s15993_s0 = inlined_call_operand.vmem [shape: bf16[2,27,5184], index: 0, kind: input, shape index: {}]   ;;  %s15994_s1 = inlined_call_operand.vmem [shape: bf16[8,27], index: 1, kind: input, shape index: {}]   ;;  %s15995_s2 = inlined_call_operand.vmem [shape: f32[8,1], index: 2, kind: input, shape index: {}]   ;;  %s15996_s3 = inlined_call_operand.vmem [shape: bf16[16,72], index: 3, kind: input, shape index: {}]   ;;  %s15997_s4 = inlined_call_operand.vmem [shape: f32[16,1], index: 4, kind: input, shape index: {}]   ;;  %s15998_s5 = inlined_call_operand.vmem [shape: f32[16,6], index: 5, kind: input, shape index: {}]   ;;  %s15999_s6 = inlined_call_operand.vmem [shape: f32[1,6], index: 6, kind: input, shape index: {}]   ;;  %s16000_s7 = inlined_call_operand.vmem [shape: bf16[3,5184], index: 7, kind: input, shape index: {}]   ;;  %s16001_s8 = inlined_call_operand.hbm [shape: f32[2,1,6], index: 8, kind: output, shape index: {0}]   ;;  %s16002_s9 = inlined_call_operand.vmem [shape: s32[2,1,1], index: 9, kind: output, shape index: {1}]  }
   0x1   :  { %16123 = sst [smem:[#allocation42_spill]] %s15993_s0 }
   0x2   :  { %15 = vsyncpa [#allocation5], 0 }
   0x3   :  { %17 = vsyncpa [#allocation5 + $0x1], 0  ;;  %s11408_s30 = smov 0   ;;  %s11410_s10 = smov 0  }
   0x4   :  { %s11412_s11 = smov 0   ;;  %s11414_s12 = smov 0  }
   0x5 LB: > { %s11429_s13 = sadd.s32 4294967295, %s11342_s12   ;;  %s10462_s14 = sadd.s32 4294967294, %s11342_s12   ;;  %s11342_s12 = sphi %s11414_s12, %s16369_s12   ;;  %s11338_s11 = sphi %s11412_s11, %s16368_s11   ;;  %s11334_s10 = sphi %s11410_s10, %s16367_s10   ;;  %s11330_s30 = sphi %s11408_s30, %s16366_s30  }
   0x6   : > { %s11433_s15 = sadd.s32 1, %s11342_s12   ;;  %s203_s16 = sadd.s32 1, %s11338_s11 }
   0x7   : > { %s200_s17 = ssub.s32 %s11342_s12, %s11433_s15  ;;  %p213_p0 = scmp.ne.s32.totalorder %s11338_s11, %s11334_s10 }
   0x8   : > { %p201_p1 = scmp.eq.s32.totalorder %s200_s17, 0  ;;  %p214_p2 = scmp.eq.s32.totalorder %s11429_s13, 1 }
   0x9   : > { %p219_p3 = scmp.ne.s32.totalorder %s11334_s10, %s11330_s30  ;;  %p220_p4 = scmp.eq.s32.totalorder %s10462_s14, 1 }
   0xa   : > { %s11444_s18 = scalar_select %p201_p1, %s11338_s11, %s203_s16  }
   0xb   : > { %p11446_p5 = por %p214_p2, %p213_p0  ;;  %p11450_p6 = por %p220_p4, %p219_p3 }
   0xc   : > { %p10465_p7 = scmp.ge.s32.totalorder %s11342_s12, 1  ;;  %p293_p8 = scmp.lt.s32.totalorder %s11342_s12, 3 }
   0xe   : > { %p294_p9 = pnand %p10465_p7, %p293_p8 }
  0x10   : > { %297 = sbr.rel (%p294_p9) target bundleno = 1995 (0x7cb), region = 52 }
  0x17   : > { %v425_v0 = vld [vmem:[%s15995_s2] sm:$0xff]  ;;  %p331_p10 = scmp.lt.s32.totalorder %s11429_s13, 1  ;;  %vm806_vm0 = vcmask 1044480   ;;  %v16006_v1 = vmov 0   ;;  %v16003_v3 = vlaneseq  ;;  %vm807_vm1 = vcmask 1045504   ;;  %s16126_s0 = sld [smem:[#allocation42_spill]] }
  0x18   : > { %11078 = vset.pattern.permute.xlu0 %v16006_v1  ;;  %1875 = vst [vmem:[#allocation2] sm:$0xf] %v16006_v1  ;;  %965 = vmatprep.mubr.bf16.mxu0 %v16006_v1  ;;  %v2047_v2 = vld [vmem:[%s16000_s7] sm:$0x55]  ;;  %v3158_v4 = vld [vmem:[%s16000_s7] sm:$0xaa] }
  0x19   : > { %428 = vperm.xlu0 %11078, %v425_v0   ;;  %s11467_s25 = scalar_select %p331_p10, %s11429_s13, 1  ;;  %1088 = vmatprep.mubr.bf16.mxu1 %v16006_v1  ;;  %v11345_v5 = vmov 65535   ;;  %v11346_v7 = vmov 1983009808   ;;  %v2074_v9 = vshrl.u32 %v16003_v3, 7  ;;  %v2069_v12 = vcombine.high %v2047_v2, %v2047_v2 }
  0x1a   : > { %v808_v6 = vsel %vm806_vm0, 4294967295, %v11345_v5  ;;  %v2071_v8 = vunpack.c.l.s4 %v11346_v7  ;;  %v4080_v10 = vld [vmem:[%s16000_s7] sm:$0x55]  ;;  %11079 = vset.pattern.permute.xlu1 %v16006_v1  ;;  %v5047_v11 = vld [vmem:[%s16000_s7] sm:$0xaa]  ;;  %v3180_v14 = vcombine.high %v3158_v4, %v3158_v4  ;;  %vm802_vm2 = vcmask 220160  }
  0x1b   : > { %s11025_s14 = smul.u32 656, %s11467_s25  ;;  %v11485_v15 = vld [vmem:[%s16000_s7] sm:$0x55]  ;;  %v11490_v16 = vld [vmem:[%s16000_s7] sm:$0xaa]  ;;  %v11498_v17 = vsel %vm807_vm1, %v808_v6, 0  ;;  %v4102_v18 = vcombine.high %v4080_v10, %v4080_v10  ;;  %v5069_v19 = vcombine.high %v5047_v11, %v5047_v11 }
  0x1c   : > { %v2072_v13 = vunpack.c.0.s8 %v2071_v8  ;;  %v11503_v20 = vld [vmem:[%s16000_s7 + $0x8] sm:$0x55]  ;;  %v11508_v21 = vld [vmem:[%s16000_s7 + $0x8] sm:$0xaa]  ;;  %v11513_v24 = vsub.s32 0, %v2074_v9  ;;  %v11515_v25 = vsub.s32 1, %v2074_v9  ;;  %v5989_v27 = vcombine.high %v11485_v15, %v11485_v15 }
  0x1d   : > { %s11495_s28 = scalar_lea.vmem %s16126_s0, %s11025_s14  ;;  %v7101_v28 = vcombine.high %v11490_v16, %v11490_v16  ;;  %v2086_v29 = vcombine.high %v11503_v20, %v11503_v20  ;;  %v3197_v30 = vcombine.high %v11508_v21, %v11508_v21  ;;  %v11555_v59 = vld [vmem:[%s15994_s1] sm:$0xf]  ;;  %s16111_s23 = smov 55   ;;  %vm11354_vm3 = vmmov 0  }
  0x1e   : > { %v11080_v22 = vld [vmem:[%s11495_s28 + $0x4] ss:$164 sps:$4 sm:$0xff]   ;;  %v11511_v23 = vsub.s32 %v2072_v13, %v2074_v9  ;;  %16128 = vst [vmem:[#allocation8_spill] sm:$0xff] %v11513_v24  ;;  %16129 = vst [vmem:[#allocation9_spill] sm:$0xff] %v11515_v25  ;;  %v11082_v26 = vld [vmem:[%s11495_s28 + $0x1c] ss:$164 sps:$4 sm:$0xff]  }
  0x1f   : > { %933 = vmatprep.subr.bf16.mxu0 %v11080_v22  ;;  %v11084_v31 = vld [vmem:[%s11495_s28] ss:$164 sps:$4 sm:$0xff]   ;;  %v11085_v32 = vld [vmem:[%s11495_s28 + $0x18] ss:$164 sps:$4 sm:$0xff]   ;;  %1056 = vmatprep.subr.bf16.mxu1 %v11082_v26  ;;  %v11094_v53 = vld [vmem:[%s11495_s28 + $0xc] ss:$164 sps:$4 sm:$0xff]  }
  0x20   : > { %16127 = vst [vmem:[#allocation7_spill] sm:$0xff] %v11511_v23  ;;  %v2083_v33 = vrot.slane %v2069_v12, %v11511_v23  ;;  %v2076_v34 = vrot.slane %v2047_v2, %v11511_v23  ;;  %v3187_v35 = vrot.slane %v3158_v4, %v11511_v23  ;;  %v3194_v36 = vrot.slane %v3180_v14, %v11511_v23  ;;  %v11086_v37 = vld [vmem:[%s11495_s28 + $0x14c] ss:$164 sps:$4 sm:$0x3f]   ;;  %s11348_s24 = smov 57   ;;  %s11349_s26 = smov 127  }
  0x21   : > { %v4109_v38 = vrot.slane %v4080_v10, %v11511_v23  ;;  %v11535_v39 = vrot.slane %v4102_v18, %v11511_v23  ;;  %v11538_v40 = vrot.slane %v5047_v11, %v11511_v23  ;;  %v11541_v41 = vrot.slane %v5069_v19, %v11511_v23  ;;  %934 = vmatpush1.bf16.msra.mxu0 %v11084_v31  ;;  %v11088_v42 = vld [vmem:[%s11495_s28 + $0x164] ss:$164 sps:$4 sm:$0x3f]   ;;  %v11097_v0 = vld [vmem:[%s11495_s28 + $0x2c] ss:$164 sps:$4 sm:$0xff]   ;;  %s11350_s27 = smov 1  }
  0x22   : > { %1057 = vmatpush1.bf16.msra.mxu1 %v11085_v32  ;;  %v2085_v43 = vcombine.high %v2083_v33, %v2083_v33  ;;  %v2261_v44 = vpack.i.b16 %v2083_v33, %v2083_v33  ;;  %v2084_v45 = vcombine.high %v2076_v34, %v2076_v34  ;;  %v814_v46 = vand.u32 %v11086_v37, %v11498_v17  ;;  %v11090_v47 = vld [vmem:[%s11495_s28 + $0x148] ss:$164 sps:$4 sm:$0x3f]   ;;  %v11091_v48 = vld [vmem:[%s11495_s28 + $0x160] ss:$164 sps:$4 sm:$0x3f]  }
  0x23   : > { %v2247_v49 = vpack.i.b16 %v2076_v34, %v2076_v34  ;;  %v3195_v50 = vcombine.high %v3187_v35, %v3187_v35  ;;  %v3358_v51 = vpack.i.b16 %v3187_v35, %v3187_v35  ;;  %v832_v52 = vand.u32 %v11088_v42, %v11498_v17  ;;  %v11092_v62 = vld [vmem:[%s11495_s28 + $0x8] ss:$164 sps:$4 sm:$0xff]   ;;  %v11099_v7 = vld [vmem:[%s11495_s28 + $0x150] ss:$164 sps:$4 sm:$0x3f]   ;;  %s16068_s29 = smov 71  }
  0x24   : > { %v2266_v54 = vrot.slane %v2261_v44, %v11513_v24  ;;  %v2268_v55 = vpack.i.b16 %v2085_v43, %v2085_v43  ;;  %v2254_v56 = vpack.i.b16 %v2084_v45, %v2084_v45  ;;  %935 = vmatprep.subr.bf16.mxu0 %v814_v46  ;;  %v811_v57 = vand.u32 %v11090_v47, %v11498_v17  ;;  %v11095_v63 = vld [vmem:[%s11495_s28 + $0x28] ss:$164 sps:$4 sm:$0xff]   ;;  %v11101_v8 = vld [vmem:[%s11495_s28 + $0x154] ss:$164 sps:$4 sm:$0x3f]   ;;  %s11352_s21 = smov 73  }
  0x25   : > { %v829_v58 = vand.u32 %v11091_v48, %v11498_v17  ;;  %v2252_v60 = vrot.slane %v2247_v49, %v11513_v24  ;;  %v3363_v61 = vrot.slane %v3358_v51, %v11515_v25  ;;  %1058 = vmatprep.subr.bf16.mxu1 %v832_v52  ;;  %v3365_v5 = vpack.i.b16 %v3195_v50, %v3195_v50  ;;  %v11102_v14 = vld [vmem:[%s11495_s28 + $0x170] ss:$164 sps:$4 sm:$0x3f]   ;;  %v11111_v43 = vld [vmem:[%s11495_s28 + $0x3c] ss:$164 sps:$4 sm:$0xff]   ;;  %s11355_s16 = smov 56  }
  0x26   : > { %v2273_v2 = vrot.slane %v2268_v55, %v11513_v24  ;;  %v2259_v4 = vrot.slane %v2254_v56, %v11513_v24  ;;  %v3196_v6 = vcombine.high %v3194_v36, %v3194_v36  ;;  %936 = vmatpush1.bf16.msra.mxu0 %v811_v57  ;;  %v3372_v9 = vpack.i.b16 %v3194_v36, %v3194_v36  ;;  %v11104_v22 = vld [vmem:[%s11495_s28 + $0x174] ss:$164 sps:$4 sm:$0x3f]   ;;  %v11115_v50 = vld [vmem:[%s11495_s28 + $0x15c] ss:$164 sps:$4 sm:$0x3f]  }
  0x27   : > { %1059 = vmatpush1.bf16.msra.mxu1 %v829_v58  ;;  %v4117_v10 = vcombine.high %v4109_v38, %v4109_v38  ;;  %v4280_v11 = vpack.i.b16 %v4109_v38, %v4109_v38  ;;  %974 = vmatprep.subr.bf16.mxu0 %v11094_v53  ;;  %v3370_v18 = vrot.slane %v3365_v5, %v11515_v25  ;;  %v11108_v38 = vld [vmem:[%s11495_s28 + $0x14] ss:$164 sps:$4 sm:$0xff]   ;;  %v11601_v53 = vld [vmem:[%s11495_s28 + $0x180] ss:$164 sps:$4 sm:$0x3f]   ;;  %vm1876_vm4 = vcmask 1043968  }
  0x28   : > { %1138 = vmatprep.subr.bf16.mxu1 %v11097_v0  ;;  %v10593_v12 = vcombine.low %v2266_v54, %v2273_v2  ;;  %v10592_v13 = vcombine.low %v2252_v60, %v2259_v4  ;;  %v820_v19 = vand.u32 %v11101_v8, %v11498_v17  ;;  %v3377_v26 = vrot.slane %v3372_v9, %v11515_v25  ;;  %v11592_v49 = vld [vmem:[%s11495_s28 + $0x158] ss:$164 sps:$4 sm:$0x3f]   ;;  %v11118_v56 = vld [vmem:[%s11495_s28 + $0x184] ss:$164 sps:$4 sm:$0x3f]  }
  0x29   : > { %v3379_v31 = vpack.i.b16 %v3196_v6, %v3196_v6  ;;  %v817_v32 = vand.u32 %v11099_v7, %v11498_v17  ;;  %10549 = vmatmul.mubr.msk.bf16.vlgmr.msra.gmra.mrb[0].mxu0 %vm802_vm2, %v11555_v59  ;;  %v10614_v33 = vcombine.low %v3363_v61, %v3370_v18  ;;  %v841_v34 = vand.u32 %v11102_v14, %v11498_v17  ;;  %v11106_v58 = vld [vmem:[%s11495_s28 + $0x10] ss:$164 sps:$4 sm:$0xff]   ;;  %s11356_s17 = smov 72   ;;  %s16266_s14 = smov 71  }
  0x2a   : > { %10552 = vmatmul.mubr.msk.bf16.vlgmr.msra.gmra.mrb[0].mxu1 %vm802_vm2, %v11555_v59  ;;  %v4285_v35 = vrot.slane %v4280_v11, %v11513_v24  ;;  %2638 = vrot.lane.b32.xlu1 %v10593_v12, %s16111_s23  ;;  %v844_v36 = vand.u32 %v11104_v22, %v11498_v17  ;;  %v4287_v42 = vpack.i.b16 %v4117_v10, %v4117_v10  ;;  %v11633_v11 = vld [vmem:[%s11495_s28 + $0x16c] ss:$164 sps:$4 sm:$0x3f]   ;;  %v11132_v22 = vld [vmem:[%s11495_s28 + $0x194] ss:$164 sps:$4 sm:$0x3f]  }
  0x2b   : > { %2636 = vrot.lane.b32.xlu0 %v10592_v13, %s16111_s23  ;;  %v3384_v37 = vrot.slane %v3379_v31, %v11515_v25  ;;  %975 = vmatpush1.bf16.msra.mxu0 %v11092_v62  ;;  %v4118_v44 = vcombine.high %v11535_v39, %v11535_v39  ;;  %v4294_v45 = vpack.i.b16 %v11535_v39, %v11535_v39  ;;  %v11125_v31 = vld [vmem:[%s11495_s28 + $0x4c] ss:$164 sps:$4 sm:$0xff]   ;;  %vm1877_vm5 = vcmask 523268  }
  0x2c   : > { %1139 = vmatpush1.bf16.msra.mxu1 %v11095_v63  ;;  %v5084_v46 = vcombine.high %v11538_v40, %v11538_v40  ;;  %976 = vmatprep.subr.bf16.mxu0 %v820_v19  ;;  %v4292_v48 = vrot.slane %v4287_v42, %v11513_v24  ;;  %v5247_v51 = vpack.i.b16 %v11538_v40, %v11538_v40  ;;  %v11109_v63 = vld [vmem:[%s11495_s28 + $0x38] ss:$164 sps:$4 sm:$0xff]   ;;  %vm1878_vm6 = vmor %vm1877_vm5, %vm1876_vm4  ;;  %vm3809_vm7 = vcmask 465920  }
  0x2d   : > { %1140 = vmatprep.subr.bf16.mxu1 %v844_v36  ;;  %v10615_v47 = vcombine.low %v3377_v26, %v3384_v37  ;;  %1006 = vmatprep.mubr.bf16.mxu0 %v16006_v1  ;;  %v4299_v39 = vrot.slane %v4294_v45, %v11513_v24  ;;  %v4301_v52 = vpack.i.b16 %v4118_v44, %v4118_v44  ;;  %v11120_v36 = vld [vmem:[%s11495_s28 + $0x20] ss:$164 sps:$4 sm:$0xff]   ;;  %v11123_v37 = vld [vmem:[%s11495_s28 + $0x48] ss:$164 sps:$4 sm:$0xff]   ;;  %vm2698_vm8 = vcmask 449536  }
  0x2e   : > { %1170 = vmatprep.mubr.bf16.mxu1 %v16006_v1  ;;  %v5254_v54 = vpack.i.b16 %v5084_v46, %v5084_v46  ;;  %3747 = vrot.lane.b32.xlu1 %v10614_v33, %s11348_s24  ;;  %v10636_v55 = vcombine.low %v4285_v35, %v4292_v48  ;;  %v826_v40 = vand.u32 %v11115_v50, %v11498_v17  ;;  %v11653_v35 = vld [vmem:[%s11495_s28 + $0x168] ss:$164 sps:$4 sm:$0x3f]   ;;  %v11130_v46 = vld [vmem:[%s11495_s28 + $0x190] ss:$164 sps:$4 sm:$0x3f]  }
  0x2f   : > { %3749 = vrot.lane.b32.xlu0 %v10615_v47, %s11348_s24  ;;  %v5252_v57 = vrot.slane %v5247_v51, %v11515_v25  ;;  %977 = vmatpush1.bf16.msra.mxu0 %v817_v32  ;;  %v4306_v60 = vrot.slane %v4301_v52, %v11513_v24  ;;  %v5085_v62 = vcombine.high %v11541_v41, %v11541_v41  ;;  %v11665_v51 = vld [vmem:[%s11495_s28 + $0x17c] ss:$164 sps:$4 sm:$0x3f]   ;;  %vm4732_vm9 = vcmask 1039360  }
  0x30   : > { %1141 = vmatpush1.bf16.msra.mxu1 %v841_v34  ;;  %v5259_v61 = vrot.slane %v5254_v54, %v11515_v25  ;;  %1015 = vmatprep.subr.bf16.mxu0 %v11108_v38  ;;  %v856_v0 = vand.u32 %v11118_v56, %v11498_v17  ;;  %v5261_v2 = vpack.i.b16 %v11541_v41, %v11541_v41  ;;  %vm2700_vm10 = vcmask 1043456  }
  0x31   : > { %1220 = vmatprep.subr.bf16.mxu1 %v11111_v43  ;;  %v823_v4 = vand.u32 %v11592_v49, %v11498_v17  ;;  %v10637_v5 = vcombine.low %v4299_v39, %v4306_v60  ;;  %v5268_v7 = vpack.i.b16 %v5085_v62, %v5085_v62  ;;  %v853_v8 = vand.u32 %v11601_v53, %v11498_v17  ;;  %v11136_v60 = vld [vmem:[%s11495_s28 + $0x34] ss:$164 sps:$4 sm:$0xff]  }
  0x32   : > { %v10658_v6 = vcombine.low %v5252_v57, %v5259_v61  ;;  %10550 = vmatmul.mubr.msk.bf16.vlgmr.msra.gmra.mrb[4].mxu0 %vm802_vm2, %v11555_v59  ;;  %v5266_v9 = vrot.slane %v5261_v2, %v11515_v25  ;;  %v5996_v41 = vrot.slane %v11485_v15, %v11511_v23  ;;  %v6003_v10 = vrot.slane %v5989_v27, %v11511_v23  ;;  %v11122_v15 = vld [vmem:[%s11495_s28 + $0x24] ss:$164 sps:$4 sm:$0xff]   ;;  %v11691_v2 = vld [vmem:[%s11495_s28 + $0x178] ss:$164 sps:$4 sm:$0x3f]  }
  0x33   : > { %10554 = vmatmul.mubr.msk.bf16.vlgmr.msra.gmra.mrb[4].mxu1 %vm802_vm2, %v11555_v59  ;;  %4669 = vrot.lane.b32.xlu1 %v10636_v55, %s11349_s26  ;;  %v5273_v12 = vrot.slane %v5268_v7, %v11515_v25  ;;  %v7108_v13 = vrot.slane %v11490_v16, %v11511_v23  ;;  %v7115_v14 = vrot.slane %v7101_v28, %v11511_v23  ;;  %v11677_v57 = vld [vmem:[%s11495_s28 + $0x1a4] ss:$164 sps:$4 sm:$0x3f]   ;;  %vm4901_vm11 = vcmask 7168  }
  0x34   : > { %4671 = vrot.lane.b32.xlu0 %v10637_v5, %s11349_s26  ;;  %1016 = vmatpush1.bf16.msra.mxu0 %v11106_v58  ;;  %v6004_v27 = vcombine.high %v5996_v41, %v5996_v41  ;;  %v6167_v18 = vpack.i.b16 %v5996_v41, %v5996_v41  ;;  %v6005_v19 = vcombine.high %v6003_v10, %v6003_v10  ;;  %v11704_v41 = vld [vmem:[%s11495_s28 + $0x1a0] ss:$164 sps:$4 sm:$0x3f]   ;;  %vm2867_vm12 = vcmask 596992  }
  0x35   : > { %1221 = vmatpush1.bf16.msra.mxu1 %v11109_v63  ;;  %1017 = vmatprep.subr.bf16.mxu0 %v826_v40  ;;  %v10659_v26 = vcombine.low %v5266_v9, %v5273_v12  ;;  %v6181_v32 = vpack.i.b16 %v6003_v10, %v6003_v10  ;;  %v838_v33 = vand.u32 %v11633_v11, %v11498_v17  ;;  %vm3977_vm13 = vcmask 580608  }
  0x36   : > { %1222 = vmatprep.subr.bf16.mxu1 %v856_v0  ;;  %1047 = vmatprep.mubr.bf16.mxu0 %v16006_v1  ;;  %v6172_v16 = vrot.slane %v6167_v18, %v11513_v24  ;;  %v6174_v28 = vpack.i.b16 %v6004_v27, %v6004_v27  ;;  %v6188_v34 = vpack.i.b16 %v6005_v19, %v6005_v19  ;;  %vm2024_vm14 = vcmask 519168  }
  0x37   : > { %1252 = vmatprep.mubr.bf16.mxu1 %v16006_v1  ;;  %5636 = vrot.lane.b32.xlu1 %v10658_v6, %s11350_s27  ;;  %v6186_v38 = vrot.slane %v6181_v32, %v11513_v24  ;;  %v868_v42 = vand.u32 %v11132_v22, %v11498_v17  ;;  %v7116_v43 = vcombine.high %v7108_v13, %v7108_v13  ;;  %v11137_v22 = vld [vmem:[%s11495_s28 + $0x58] ss:$164 sps:$4 sm:$0xff]   ;;  %vm6975_vm15 = vcmask 457728  }
  0x38   : > { %5638 = vrot.lane.b32.xlu0 %v10659_v26, %s11350_s27  ;;  %1018 = vmatpush1.bf16.msra.mxu0 %v823_v4  ;;  %v6179_v44 = vrot.slane %v6174_v28, %v11513_v24  ;;  %v6193_v45 = vrot.slane %v6188_v34, %v11513_v24  ;;  %v7279_v47 = vpack.i.b16 %v7108_v13, %v7108_v13  ;;  %vm3055_vm0 = vcmask 588800  }
  0x39   : > { %1223 = vmatpush1.bf16.msra.mxu1 %v853_v8  ;;  %1097 = vmatprep.subr.bf16.mxu0 %v11122_v15  ;;  %v7286_v48 = vpack.i.b16 %v7116_v43, %v7116_v43  ;;  %v7117_v49 = vcombine.high %v7115_v14, %v7115_v14  ;;  %v7293_v50 = vpack.i.b16 %v7115_v14, %v7115_v14  ;;  %v11139_v8 = vld [vmem:[%s11495_s28 + $0x5c] ss:$164 sps:$4 sm:$0xff]   ;;  %v11134_v15 = vld [vmem:[%s11495_s28 + $0x30] ss:$164 sps:$4 sm:$0xff]   ;;  %vm10266_vm1 = vcmask 523264  }
  0x3a   : > { %1302 = vmatprep.subr.bf16.mxu1 %v11125_v31  ;;  %v10680_v39 = vcombine.low %v6172_v16, %v6179_v44  ;;  %v10681_v52 = vcombine.low %v6186_v38, %v6193_v45  ;;  %v7284_v53 = vrot.slane %v7279_v47, %v11515_v25  ;;  %v835_v54 = vand.u32 %v11653_v35, %v11498_v17  ;;  %v11725_v35 = vld [vmem:[%s11495_s28 + $0x18c] ss:$164 sps:$4 sm:$0x3f]  }
  0x3b   : > { %10551 = vmatmul.mubr.msk.bf16.vlgmr.msra.gmra.mrb[8].mxu0 %vm802_vm2, %v11555_v59  ;;  %v7291_v55 = vrot.slane %v7286_v48, %v11515_v25  ;;  %v7298_v40 = vrot.slane %v7293_v50, %v11515_v25  ;;  %v7300_v56 = vpack.i.b16 %v7117_v49, %v7117_v49  ;;  %v865_v58 = vand.u32 %v11130_v46, %v11498_v17  ;;  %v11738_v46 = vld [vmem:[%s11495_s28 + $0x1b4] ss:$164 sps:$4 sm:$0x3f]  }
  0x3c   : > { %10556 = vmatmul.mubr.msk.bf16.vlgmr.msra.gmra.mrb[8].mxu1 %vm802_vm2, %v11555_v59  ;;  %6556 = vrot.lane.b32.xlu1 %v10680_v39, %s16068_s29  ;;  %v2093_v61 = vrot.slane %v11503_v20, %v11511_v23  ;;  %v2100_v62 = vrot.slane %v2086_v29, %v11511_v23  ;;  %v850_v4 = vand.u32 %v11665_v51, %v11498_v17  ;;  %v11698_v20 = vld [vmem:[%s16000_s7 + $0x8] sm:$0x55] }
  0x3d   : > { %6558 = vrot.lane.b32.xlu0 %v10681_v52, %s16068_s29  ;;  %1098 = vmatpush1.bf16.msra.mxu0 %v11120_v36  ;;  %v10702_v63 = vcombine.low %v7284_v53, %v7291_v55  ;;  %v7305_v0 = vrot.slane %v7300_v56, %v11515_v25  ;;  %v880_v10 = vand.u32 %v11677_v57, %v11498_v17  ;;  %v11155_v51 = vld [vmem:[%s11495_s28 + $0x188] ss:$164 sps:$4 sm:$0x3f]   ;;  %v11147_v57 = vld [vmem:[%s11495_s28 + $0x40] ss:$164 sps:$4 sm:$0xff]  }
  0x3e   : > { %1303 = vmatpush1.bf16.msra.mxu1 %v11123_v37  ;;  %1099 = vmatprep.subr.bf16.mxu0 %v838_v33  ;;  %v2101_v5 = vcombine.high %v2093_v61, %v2093_v61  ;;  %v2275_v6 = vpack.i.b16 %v2093_v61, %v2093_v61  ;;  %v2102_v7 = vcombine.high %v2100_v62, %v2100_v62  ;;  %v5048_v52 = vld [vmem:[%s16000_s7 + $0x8] sm:$0xaa] }
  0x3f   : > { %1304 = vmatprep.subr.bf16.mxu1 %v868_v42  ;;  %v10703_v29 = vcombine.low %v7298_v40, %v7305_v0  ;;  %1129 = vmatprep.mubr.bf16.mxu0 %v16006_v1  ;;  %v2289_v9 = vpack.i.b16 %v2100_v62, %v2100_v62  ;;  %v3204_v14 = vrot.slane %v11508_v21, %v11511_v23  ;;  %v11150_v62 = vld [vmem:[%s11495_s28 + $0x68] ss:$164 sps:$4 sm:$0xff]  }
  0x40   : > { %1334 = vmatprep.mubr.bf16.mxu1 %v16006_v1  ;;  %7668 = vrot.lane.b32.xlu1 %v10702_v63, %s11352_s21  ;;  %v2280_v11 = vrot.slane %v2275_v6, %v11513_v24  ;;  %v2282_v12 = vpack.i.b16 %v2101_v5, %v2101_v5  ;;  %v2296_v13 = vpack.i.b16 %v2102_v7, %v2102_v7  ;;  %v5968_v7 = vld [vmem:[%s16000_s7 + $0x8] sm:$0x55] }
  0x41   : > { %7670 = vrot.lane.b32.xlu0 %v10703_v29, %s11352_s21  ;;  %1100 = vmatpush1.bf16.msra.mxu0 %v835_v54  ;;  %v2294_v27 = vrot.slane %v2289_v9, %v11513_v24  ;;  %v4126_v18 = vrot.slane %v11698_v20, %v11511_v23  ;;  %v847_v19 = vand.u32 %v11691_v2, %v11498_v17  ;;  %v11152_v54 = vld [vmem:[%s11495_s28 + $0x6c] ss:$164 sps:$4 sm:$0xff]  }
  0x42   : > { %1305 = vmatpush1.bf16.msra.mxu1 %v865_v58  ;;  %1179 = vmatprep.subr.bf16.mxu0 %v11136_v60  ;;  %v2287_v26 = vrot.slane %v2282_v12, %v11513_v24  ;;  %v2301_v31 = vrot.slane %v2296_v13, %v11513_v24  ;;  %v3212_v32 = vcombine.high %v3204_v14, %v3204_v14  ;;  %v11158_v60 = vld [vmem:[%s11495_s28 + $0x1b0] ss:$164 sps:$4 sm:$0x3f]  }
  0x43   : > { %1384 = vmatprep.subr.bf16.mxu1 %v11139_v8  ;;  %v3386_v33 = vpack.i.b16 %v3204_v14, %v3204_v14  ;;  %v4134_v16 = vcombine.high %v4126_v18, %v4126_v18  ;;  %v4308_v28 = vpack.i.b16 %v4126_v18, %v4126_v18  ;;  %v877_v34 = vand.u32 %v11704_v41, %v11498_v17  ;;  %v11164_v14 = vld [vmem:[%s11495_s28 + $0x54] ss:$164 sps:$4 sm:$0xff]  }
  0x44   : > { %10553 = vmatmul.mubr.msk.bf16.vlgmr.msra.gmra.mrb[12].mxu0 %vm802_vm2, %v11555_v59  ;;  %v10594_v36 = vcombine.low %v2280_v11, %v2287_v26  ;;  %v10595_v37 = vcombine.low %v2294_v27, %v2301_v31  ;;  %v3393_v38 = vpack.i.b16 %v3212_v32, %v3212_v32  ;;  %v3211_v42 = vrot.slane %v3197_v30, %v11511_v23  ;;  %v11149_v30 = vld [vmem:[%s11495_s28 + $0x44] ss:$164 sps:$4 sm:$0xff]   ;;  %v11171_v27 = vld [vmem:[%s11495_s28 + $0x19c] ss:$164 sps:$4 sm:$0x3f]  }
  0x45   : > { %10558 = vmatmul.mubr.msk.bf16.vlgmr.msra.gmra.mrb[12].mxu1 %vm802_vm2, %v11555_v59  ;;  %1180 = vmatpush1.bf16.msra.mxu0 %v11134_v15  ;;  %v3391_v43 = vrot.slane %v3386_v33, %v11515_v25  ;;  %v4313_v44 = vrot.slane %v4308_v28, %v11513_v24  ;;  %v4315_v45 = vpack.i.b16 %v4134_v16, %v4134_v16  ;;  %v11162_v26 = vld [vmem:[%s11495_s28 + $0x50] ss:$164 sps:$4 sm:$0xff]   ;;  %v11174_v31 = vld [vmem:[%s11495_s28 + $0x1c4] ss:$164 sps:$4 sm:$0x3f]  }
  0x46   : > { %2640 = vrot.lane.b32.xlu1 %v10594_v36, %s16111_s23  ;;  %2642 = vrot.lane.b32.xlu0 %v10595_v37, %s16111_s23  ;;  %v3398_v21 = vrot.slane %v3393_v38, %v11515_v25  ;;  %v3213_v47 = vcombine.high %v3211_v42, %v3211_v42  ;;  %v3400_v48 = vpack.i.b16 %v3211_v42, %v3211_v42  ;;  %v11167_v33 = vld [vmem:[%s11495_s28 + $0x7c] ss:$164 sps:$4 sm:$0xff]   ;;  %v7080_v38 = vld [vmem:[%s16000_s7 + $0x8] sm:$0xaa] }
  0x47   : > { %1385 = vmatpush1.bf16.msra.mxu1 %v11137_v22  ;;  %1181 = vmatprep.subr.bf16.mxu0 %v850_v4  ;;  %v4320_v49 = vrot.slane %v4315_v45, %v11513_v24  ;;  %v4119_v50 = vcombine.high %v11698_v20, %v11698_v20  ;;  %v862_v39 = vand.u32 %v11725_v35, %v11498_v17  ;;  %v11169_v37 = vld [vmem:[%s11495_s28 + $0x198] ss:$164 sps:$4 sm:$0x3f]  }
  0x48   : > { %1386 = vmatprep.subr.bf16.mxu1 %v880_v10  ;;  %v10616_v53 = vcombine.low %v3391_v43, %v3398_v21  ;;  %1211 = vmatprep.mubr.bf16.mxu0 %v16006_v1  ;;  %v3405_v55 = vrot.slane %v3400_v48, %v11515_v25  ;;  %v3407_v40 = vpack.i.b16 %v3213_v47, %v3213_v47  ;;  %v11165_v21 = vld [vmem:[%s11495_s28 + $0x78] ss:$164 sps:$4 sm:$0xff]  }
  0x49   : > { %v10638_v56 = vcombine.low %v4313_v44, %v4320_v49  ;;  %1182 = vmatpush1.bf16.msra.mxu0 %v847_v19  ;;  %1416 = vmatprep.mubr.bf16.mxu1 %v16006_v1  ;;  %v4133_v58 = vrot.slane %v4119_v50, %v11511_v23  ;;  %v892_v61 = vand.u32 %v11738_v46, %v11498_v17  ;;  %v11172_v50 = vld [vmem:[%s11495_s28 + $0x1c0] ss:$164 sps:$4 sm:$0x3f]  }
  0x4a   : > { %3751 = vrot.lane.b32.xlu1 %v10616_v53, %s11348_s24  ;;  %1261 = vmatprep.subr.bf16.mxu0 %v11149_v30  ;;  %v3412_v63 = vrot.slane %v3407_v40, %v11515_v25  ;;  %v5093_v0 = vrot.slane %v5048_v52, %v11511_v23  ;;  %v5086_v2 = vcombine.high %v5048_v52, %v5048_v52 }
  0x4b   : > { %4673 = vrot.lane.b32.xlu0 %v10638_v56, %s11349_s26  ;;  %1387 = vmatpush1.bf16.msra.mxu1 %v877_v34  ;;  %v4135_v4 = vcombine.high %v4133_v58, %v4133_v58  ;;  %v4322_v5 = vpack.i.b16 %v4133_v58, %v4133_v58  ;;  %v859_v6 = vand.u32 %v11155_v51, %v11498_v17  ;;  %v11178_v56 = vld [vmem:[%s11495_s28 + $0x64] ss:$164 sps:$4 sm:$0xff]  }
  0x4c   : > { %10555 = vmatmul.mubr.msk.bf16.vlgmr.msra.gmra.mrb[16].mxu0 %vm802_vm2, %v11555_v59  ;;  %1466 = vmatprep.subr.bf16.mxu1 %v11152_v54  ;;  %v10617_v20 = vcombine.low %v3405_v55, %v3412_v63  ;;  %v5101_v29 = vcombine.high %v5093_v0, %v5093_v0  ;;  %v5275_v8 = vpack.i.b16 %v5093_v0, %v5093_v0 }
  0x4d   : > { %v4327_v9 = vrot.slane %v4322_v5, %v11513_v24  ;;  %v4329_v41 = vpack.i.b16 %v4135_v4, %v4135_v4  ;;  %1262 = vmatpush1.bf16.msra.mxu0 %v11147_v57  ;;  %v5100_v10 = vrot.slane %v5086_v2, %v11511_v23  ;;  %v889_v11 = vand.u32 %v11158_v60, %v11498_v17  ;;  %v11176_v2 = vld [vmem:[%s11495_s28 + $0x60] ss:$164 sps:$4 sm:$0xff]   ;;  %v11181_v4 = vld [vmem:[%s11495_s28 + $0x8c] ss:$164 sps:$4 sm:$0xff]  }
  0x4e   : > { %10560 = vmatmul.mubr.msk.bf16.vlgmr.msra.gmra.mrb[16].mxu1 %vm802_vm2, %v11555_v59  ;;  %3753 = vrot.lane.b32.xlu1 %v10617_v20, %s11348_s24  ;;  %v5280_v12 = vrot.slane %v5275_v8, %v11515_v25  ;;  %v5282_v13 = vpack.i.b16 %v5101_v29, %v5101_v29  ;;  %v6013_v15 = vrot.slane %v5968_v7, %v11511_v23  ;;  %v11179_v29 = vld [vmem:[%s11495_s28 + $0x88] ss:$164 sps:$4 sm:$0xff]  }
  0x4f   : > { %v4334_v18 = vrot.slane %v4329_v41, %v11513_v24  ;;  %1467 = vmatpush1.bf16.msra.mxu1 %v11150_v62  ;;  %1263 = vmatprep.subr.bf16.mxu0 %v862_v39  ;;  %v5102_v19 = vcombine.high %v5100_v10, %v5100_v10  ;;  %v5289_v22 = vpack.i.b16 %v5100_v10, %v5100_v10  ;;  %v11185_v8 = vld [vmem:[%s11495_s28 + $0x1ac] ss:$164 sps:$4 sm:$0x3f]  }
  0x50   : > { %1468 = vmatprep.subr.bf16.mxu1 %v892_v61  ;;  %v5287_v32 = vrot.slane %v5282_v13, %v11515_v25  ;;  %1293 = vmatprep.mubr.bf16.mxu0 %v16006_v1  ;;  %v6021_v16 = vcombine.high %v6013_v15, %v6013_v15  ;;  %v6195_v28 = vpack.i.b16 %v6013_v15, %v6013_v15  ;;  %v2049_v61 = vld [vmem:[%s16000_s7 + $0x10] sm:$0x55]  ;;  %v11183_v15 = vld [vmem:[%s11495_s28 + $0x1a8] ss:$164 sps:$4 sm:$0x3f]  }
  0x51   : > { %v10639_v34 = vcombine.low %v4327_v9, %v4334_v18  ;;  %v5294_v35 = vrot.slane %v5289_v22, %v11515_v25  ;;  %v5296_v36 = vpack.i.b16 %v5102_v19, %v5102_v19  ;;  %1264 = vmatpush1.bf16.msra.mxu0 %v859_v6  ;;  %1498 = vmatprep.mubr.bf16.mxu1 %v16006_v1 }
  0x52   : > { %v10660_v42 = vcombine.low %v5280_v12, %v5287_v32  ;;  %1343 = vmatprep.subr.bf16.mxu0 %v11164_v14  ;;  %v6200_v43 = vrot.slane %v6195_v28, %v11513_v24  ;;  %v6202_v44 = vpack.i.b16 %v6021_v16, %v6021_v16  ;;  %v6006_v45 = vcombine.high %v5968_v7, %v5968_v7  ;;  %v3160_v16 = vld [vmem:[%s16000_s7 + $0x10] sm:$0xaa]  ;;  %v4082_v28 = vld [vmem:[%s16000_s7 + $0x10] sm:$0x55] }
  0x53   : > { %4675 = vrot.lane.b32.xlu0 %v10639_v34, %s11349_s26  ;;  %v5301_v46 = vrot.slane %v5296_v36, %v11515_v25  ;;  %1469 = vmatpush1.bf16.msra.mxu1 %v889_v11  ;;  %v874_v30 = vand.u32 %v11171_v27, %v11498_v17  ;;  %v904_v47 = vand.u32 %v11174_v31, %v11498_v17  ;;  %v11188_v11 = vld [vmem:[%s11495_s28 + $0x1d4] ss:$164 sps:$4 sm:$0x3f]  }
  0x54   : > { %5640 = vrot.lane.b32.xlu1 %v10660_v42, %s11350_s27  ;;  %10557 = vmatmul.mubr.msk.bf16.vlgmr.msra.gmra.mrb[20].mxu0 %vm802_vm2, %v11555_v59  ;;  %v6207_v48 = vrot.slane %v6202_v44, %v11513_v24  ;;  %v6020_v49 = vrot.slane %v6006_v45, %v11511_v23  ;;  %v7125_v51 = vrot.slane %v7080_v38, %v11511_v23  ;;  %v11186_v27 = vld [vmem:[%s11495_s28 + $0x1d0] ss:$164 sps:$4 sm:$0x3f]  }
  0x55   : > { %v10661_v39 = vcombine.low %v5294_v35, %v5301_v46  ;;  %1548 = vmatprep.subr.bf16.mxu1 %v11167_v33  ;;  %1344 = vmatpush1.bf16.msra.mxu0 %v11162_v26  ;;  %v7118_v52 = vcombine.high %v7080_v38, %v7080_v38  ;;  %v871_v53 = vand.u32 %v11169_v37, %v11498_v17 }
  0x56   : > { %10562 = vmatmul.mubr.msk.bf16.vlgmr.msra.gmra.mrb[20].mxu1 %vm802_vm2, %v11555_v59  ;;  %v10682_v54 = vcombine.low %v6200_v43, %v6207_v48  ;;  %v6022_v55 = vcombine.high %v6020_v49, %v6020_v49  ;;  %v6209_v40 = vpack.i.b16 %v6020_v49, %v6020_v49  ;;  %1345 = vmatprep.subr.bf16.mxu0 %v874_v30  ;;  %v11191_v48 = vld [vmem:[%s11495_s28 + $0x74] ss:$164 sps:$4 sm:$0xff]   ;;  %v11194_v49 = vld [vmem:[%s11495_s28 + $0x9c] ss:$164 sps:$4 sm:$0xff]  }
  0x57   : > { %5642 = vrot.lane.b32.xlu0 %v10661_v39, %s11350_s27  ;;  %1549 = vmatpush1.bf16.msra.mxu1 %v11165_v21  ;;  %v7133_v57 = vcombine.high %v7125_v51, %v7125_v51  ;;  %v7307_v58 = vpack.i.b16 %v7125_v51, %v7125_v51  ;;  %v7132_v60 = vrot.slane %v7118_v52, %v11511_v23 }
  0x58   : > { %6560 = vrot.lane.b32.xlu1 %v10682_v54, %s16068_s29  ;;  %v6214_v62 = vrot.slane %v6209_v40, %v11513_v24  ;;  %v6216_v63 = vpack.i.b16 %v6022_v55, %v6022_v55  ;;  %1550 = vmatprep.subr.bf16.mxu1 %v904_v47  ;;  %v901_v0 = vand.u32 %v11172_v50, %v11498_v17  ;;  %v11189_v55 = vld [vmem:[%s11495_s28 + $0x70] ss:$164 sps:$4 sm:$0xff]  }
  0x59   : > { %v7312_v5 = vrot.slane %v7307_v58, %v11515_v25  ;;  %v7314_v6 = vpack.i.b16 %v7133_v57, %v7133_v57  ;;  %v7134_v7 = vcombine.high %v7132_v60, %v7132_v60  ;;  %v7321_v20 = vpack.i.b16 %v7132_v60, %v7132_v60  ;;  %1346 = vmatpush1.bf16.msra.mxu0 %v871_v53 }
  0x5a   : > { %v6221_v9 = vrot.slane %v6216_v63, %v11513_v24  ;;  %1375 = vmatprep.mubr.bf16.mxu0 %v16006_v1  ;;  %1580 = vmatprep.mubr.bf16.mxu1 %v16006_v1  ;;  %v2110_v41 = vrot.slane %v2049_v61, %v11511_v23  ;;  %v2103_v10 = vcombine.high %v2049_v61, %v2049_v61  ;;  %v11192_v61 = vld [vmem:[%s11495_s28 + $0x98] ss:$164 sps:$4 sm:$0xff]  }
  0x5b   : > { %v7319_v12 = vrot.slane %v7314_v6, %v11515_v25  ;;  %v7326_v13 = vrot.slane %v7321_v20, %v11515_v25  ;;  %v7328_v14 = vpack.i.b16 %v7134_v7, %v7134_v7  ;;  %1551 = vmatpush1.bf16.msra.mxu1 %v901_v0  ;;  %1425 = vmatprep.subr.bf16.mxu0 %v11178_v56  ;;  %v11199_v56 = vld [vmem:[%s11495_s28 + $0x1bc] ss:$164 sps:$4 sm:$0x3f]   ;;  %v5049_v20 = vld [vmem:[%s16000_s7 + $0x10] sm:$0xaa] }
  0x5c   : > { %v10683_v18 = vcombine.low %v6214_v62, %v6221_v9  ;;  %10559 = vmatmul.mubr.msk.bf16.vlgmr.msra.gmra.mrb[24].mxu0 %vm802_vm2, %v11555_v59  ;;  %1630 = vmatprep.subr.bf16.mxu1 %v11181_v4  ;;  %v2118_v19 = vcombine.high %v2110_v41, %v2110_v41  ;;  %v2303_v22 = vpack.i.b16 %v2110_v41, %v2110_v41  ;;  %v11202_v62 = vld [vmem:[%s11495_s28 + $0x1e4] ss:$164 sps:$4 sm:$0x3f]   ;;  %v11197_v7 = vld [vmem:[%s11495_s28 + $0x1b8] ss:$164 sps:$4 sm:$0x3f]  }
  0x5d   : > { %v10704_v26 = vcombine.low %v7312_v5, %v7319_v12  ;;  %v7333_v31 = vrot.slane %v7328_v14, %v11515_v25  ;;  %v2117_v32 = vrot.slane %v2103_v10, %v11511_v23  ;;  %1426 = vmatpush1.bf16.msra.mxu0 %v11176_v2  ;;  %v886_v33 = vand.u32 %v11185_v8, %v11498_v17 }
  0x5e   : > { %6562 = vrot.lane.b32.xlu0 %v10683_v18, %s16068_s29  ;;  %10564 = vmatmul.mubr.msk.bf16.vlgmr.msra.gmra.mrb[24].mxu1 %vm802_vm2, %v11555_v59  ;;  %v2308_v34 = vrot.slane %v2303_v22, %v11513_v24  ;;  %v2310_v35 = vpack.i.b16 %v2118_v19, %v2118_v19  ;;  %v916_v36 = vand.u32 %v11188_v11, %v11498_v17 }
  0x5f   : > { %7672 = vrot.lane.b32.xlu1 %v10704_v26, %s11352_s21  ;;  %v10705_v37 = vcombine.low %v7326_v13, %v7333_v31  ;;  %v2119_v38 = vcombine.high %v2117_v32, %v2117_v32  ;;  %v2317_v42 = vpack.i.b16 %v2117_v32, %v2117_v32  ;;  %1631 = vmatpush1.bf16.msra.mxu1 %v11179_v29  ;;  %v11206_v26 = vld [vmem:[%s11495_s28 + $0x84] ss:$164 sps:$4 sm:$0xff]  }
  0x60   : > { %v2315_v43 = vrot.slane %v2310_v35, %v11513_v24  ;;  %1427 = vmatprep.subr.bf16.mxu0 %v886_v33  ;;  %1632 = vmatprep.subr.bf16.mxu1 %v916_v36  ;;  %v3221_v44 = vrot.slane %v3160_v16, %v11511_v23  ;;  %v4143_v45 = vrot.slane %v4082_v28, %v11511_v23 }
  0x61   : > { %v2322_v46 = vrot.slane %v2317_v42, %v11513_v24  ;;  %v2324_v21 = vpack.i.b16 %v2119_v38, %v2119_v38  ;;  %v883_v30 = vand.u32 %v11183_v15, %v11498_v17  ;;  %v913_v47 = vand.u32 %v11186_v27, %v11498_v17  ;;  %1457 = vmatprep.mubr.bf16.mxu0 %v16006_v1 }
  0x62   : > { %7674 = vrot.lane.b32.xlu0 %v10705_v37, %s11352_s21  ;;  %v10596_v50 = vcombine.low %v2308_v34, %v2315_v43  ;;  %v3229_v51 = vcombine.high %v3221_v44, %v3221_v44  ;;  %v3414_v39 = vpack.i.b16 %v3221_v44, %v3221_v44  ;;  %v4151_v52 = vcombine.high %v4143_v45, %v4143_v45  ;;  %v11204_v37 = vld [vmem:[%s11495_s28 + $0x80] ss:$164 sps:$4 sm:$0xff]  }
  0x63   : > { %v2329_v53 = vrot.slane %v2324_v21, %v11513_v24  ;;  %v4336_v54 = vpack.i.b16 %v4143_v45, %v4143_v45  ;;  %1428 = vmatpush1.bf16.msra.mxu0 %v883_v30  ;;  %1633 = vmatpush1.bf16.msra.mxu1 %v913_v47  ;;  %v3214_v40 = vcombine.high %v3160_v16, %v3160_v16  ;;  %v11210_v45 = vld [vmem:[%s11495_s28 + $0x1cc] ss:$164 sps:$4 sm:$0x3f]  }
  0x64   : > { %2644 = vrot.lane.b32.xlu1 %v10596_v50, %s16111_s23  ;;  %v3419_v57 = vrot.slane %v3414_v39, %v11515_v25  ;;  %v3421_v58 = vpack.i.b16 %v3229_v51, %v3229_v51  ;;  %v4343_v60 = vpack.i.b16 %v4151_v52, %v4151_v52  ;;  %1662 = vmatprep.mubr.bf16.mxu1 %v16006_v1  ;;  %v7081_v51 = vld [vmem:[%s16000_s7 + $0x10] sm:$0xaa] }
  0x65   : > { %v10597_v63 = vcombine.low %v2322_v46, %v2329_v53  ;;  %v4341_v0 = vrot.slane %v4336_v54, %v11513_v24  ;;  %1507 = vmatprep.subr.bf16.mxu0 %v11191_v48  ;;  %1712 = vmatprep.subr.bf16.mxu1 %v11194_v49  ;;  %v3228_v2 = vrot.slane %v3214_v40, %v11511_v23  ;;  %v11911_v49 = vld [vmem:[%s15994_s1] sm:$0xf] }
  0x66   : > { %v3426_v4 = vrot.slane %v3421_v58, %v11515_v25  ;;  %v4348_v5 = vrot.slane %v4343_v60, %v11513_v24  ;;  %10561 = vmatmul.mubr.msk.bf16.vlgmr.msra.gmra.mrb[28].mxu0 %vm802_vm2, %v11555_v59  ;;  %10566 = vmatmul.mubr.msk.bf16.vlgmr.msra.gmra.mrb[28].mxu1 %vm802_vm2, %v11555_v59  ;;  %v4136_v6 = vcombine.high %v4082_v28, %v4082_v28  ;;  %v11200_v59 = vld [vmem:[%s11495_s28 + $0x1e0] ss:$164 sps:$4 sm:$0x3f]   ;;  %v5969_v28 = vld [vmem:[%s16000_s7 + $0x10] sm:$0x55] }
  0x67   : > { %2646 = vrot.lane.b32.xlu0 %v10597_v63, %s16111_s23  ;;  %v3230_v29 = vcombine.high %v3228_v2, %v3228_v2  ;;  %v3428_v8 = vpack.i.b16 %v3228_v2, %v3228_v2  ;;  %1508 = vmatpush1.bf16.msra.mxu0 %v11189_v55  ;;  %v898_v9 = vand.u32 %v11199_v56, %v11498_v17 }
  0x68   : > { %v10618_v41 = vcombine.low %v3419_v57, %v3426_v4  ;;  %v10640_v10 = vcombine.low %v4341_v0, %v4348_v5  ;;  %v4150_v11 = vrot.slane %v4136_v6, %v11511_v23  ;;  %1713 = vmatpush1.bf16.msra.mxu1 %v11192_v61  ;;  %v928_v12 = vand.u32 %v11202_v62, %v11498_v17  ;;  %v11208_v57 = vld [vmem:[%s11495_s28 + $0x1c8] ss:$164 sps:$4 sm:$0x3f]   ;;  %v2050_v0 = vld [vmem:[%s16000_s7 + $0x18] sm:$0x55] }
  0x69   : > { %v3433_v13 = vrot.slane %v3428_v8, %v11515_v25  ;;  %v3435_v14 = vpack.i.b16 %v3230_v29, %v3230_v29  ;;  %1509 = vmatprep.subr.bf16.mxu0 %v898_v9  ;;  %v5110_v15 = vrot.slane %v5049_v20, %v11511_v23  ;;  %v5103_v27 = vcombine.high %v5049_v20, %v5049_v20  ;;  %v11214_v8 = vld [vmem:[%s11495_s28 + $0x94] ss:$164 sps:$4 sm:$0xff]  }
  0x6a   : > { %3755 = vrot.lane.b32.xlu1 %v10618_v41, %s11348_s24  ;;  %v4152_v18 = vcombine.high %v4150_v11, %v4150_v11  ;;  %v4350_v19 = vpack.i.b16 %v4150_v11, %v4150_v11  ;;  %1714 = vmatprep.subr.bf16.mxu1 %v928_v12  ;;  %v895_v22 = vand.u32 %v11197_v7, %v11498_v17 }
  0x6b   : > { %4677 = vrot.lane.b32.xlu0 %v10640_v10, %s11349_s26  ;;  %v3440_v31 = vrot.slane %v3435_v14, %v11515_v25  ;;  %v5118_v32 = vcombine.high %v5110_v15, %v5110_v15  ;;  %v5303_v33 = vpack.i.b16 %v5110_v15, %v5110_v15  ;;  %v5117_v16 = vrot.slane %v5103_v27, %v11511_v23  ;;  %v11218_v15 = vld [vmem:[%s11495_s28 + $0x1dc] ss:$164 sps:$4 sm:$0x3f]  }
  0x6c   : > { %v4355_v34 = vrot.slane %v4350_v19, %v11513_v24  ;;  %v4357_v35 = vpack.i.b16 %v4152_v18, %v4152_v18  ;;  %1510 = vmatpush1.bf16.msra.mxu0 %v895_v22  ;;  %v925_v36 = vand.u32 %v11200_v59, %v11498_v17  ;;  %1539 = vmatprep.mubr.bf16.mxu0 %v16006_v1  ;;  %v11212_v19 = vld [vmem:[%s11495_s28 + $0x90] ss:$164 sps:$4 sm:$0xff]  }
  0x6d   : > { %v10619_v38 = vcombine.low %v3433_v13, %v3440_v31  ;;  %v5308_v42 = vrot.slane %v5303_v33, %v11515_v25  ;;  %v5310_v43 = vpack.i.b16 %v5118_v32, %v5118_v32  ;;  %v5119_v44 = vcombine.high %v5117_v16, %v5117_v16  ;;  %1744 = vmatprep.mubr.bf16.mxu1 %v16006_v1 }
  0x6e   : > { %v4362_v46 = vrot.slane %v4357_v35, %v11513_v24  ;;  %v5317_v21 = vpack.i.b16 %v5117_v16, %v5117_v16  ;;  %1715 = vmatpush1.bf16.msra.mxu1 %v925_v36  ;;  %1589 = vmatprep.subr.bf16.mxu0 %v11206_v26  ;;  %v6030_v30 = vrot.slane %v5969_v28, %v11511_v23  ;;  %v3161_v16 = vld [vmem:[%s16000_s7 + $0x18] sm:$0xaa] }
  0x6f   : > { %3757 = vrot.lane.b32.xlu1 %v10619_v38, %s11348_s24  ;;  %v5315_v47 = vrot.slane %v5310_v43, %v11515_v25  ;;  %v5324_v48 = vpack.i.b16 %v5119_v44, %v5119_v44  ;;  %10563 = vmatmul.mubr.msk.bf16.vlgmr.msra.gmra.mrb[32].mxu0 %vm802_vm2, %v11911_v49  ;;  %v6023_v50 = vcombine.high %v5969_v28, %v5969_v28  ;;  %v4083_v28 = vld [vmem:[%s16000_s7 + $0x18] sm:$0x55] }
  0x70   : > { %v10641_v39 = vcombine.low %v4355_v34, %v4362_v46  ;;  %v5322_v52 = vrot.slane %v5317_v21, %v11515_v25  ;;  %v6038_v53 = vcombine.high %v6030_v30, %v6030_v30  ;;  %v6223_v54 = vpack.i.b16 %v6030_v30, %v6030_v30  ;;  %1590 = vmatpush1.bf16.msra.mxu0 %v11204_v37  ;;  %v11216_v44 = vld [vmem:[%s11495_s28 + $0x1d8] ss:$164 sps:$4 sm:$0x3f]  }
  0x71   : > { %v10662_v55 = vcombine.low %v5308_v42, %v5315_v47  ;;  %v5329_v40 = vrot.slane %v5324_v48, %v11515_v25  ;;  %10568 = vmatmul.mubr.msk.bf16.vlgmr.msra.gmra.mrb[32].mxu1 %vm802_vm2, %v11911_v49  ;;  %v6037_v56 = vrot.slane %v6023_v50, %v11511_v23  ;;  %v910_v58 = vand.u32 %v11210_v45, %v11498_v17 }
  0x72   : > { %4679 = vrot.lane.b32.xlu0 %v10641_v39, %s11349_s26  ;;  %v6228_v60 = vrot.slane %v6223_v54, %v11513_v24  ;;  %v6230_v61 = vpack.i.b16 %v6038_v53, %v6038_v53  ;;  %v7142_v62 = vrot.slane %v7081_v51, %v11511_v23  ;;  %v7135_v63 = vcombine.high %v7081_v51, %v7081_v51 }
  0x73   : > { %5644 = vrot.lane.b32.xlu1 %v10662_v55, %s11350_s27  ;;  %v10663_v2 = vcombine.low %v5322_v52, %v5329_v40  ;;  %v6039_v4 = vcombine.high %v6037_v56, %v6037_v56  ;;  %v6237_v5 = vpack.i.b16 %v6037_v56, %v6037_v56  ;;  %1591 = vmatprep.subr.bf16.mxu0 %v910_v58  ;;  %v11223_v58 = vld [vmem:[%s11495_s28 + $0x1e8] ss:$164 sps:$4 sm:$0x3f]  }
  0x74   : > { %v6235_v6 = vrot.slane %v6230_v61, %v11513_v24  ;;  %v7150_v7 = vcombine.high %v7142_v62, %v7142_v62  ;;  %v7335_v20 = vpack.i.b16 %v7142_v62, %v7142_v62  ;;  %v7149_v29 = vrot.slane %v7135_v63, %v11511_v23  ;;  %1621 = vmatprep.mubr.bf16.mxu0 %v16006_v1 }
  0x75   : > { %v6242_v9 = vrot.slane %v6237_v5, %v11513_v24  ;;  %v6244_v41 = vpack.i.b16 %v6039_v4, %v6039_v4  ;;  %v907_v10 = vand.u32 %v11208_v57, %v11498_v17  ;;  %v2127_v11 = vrot.slane %v2050_v0, %v11511_v23  ;;  %9276 = vmatprep.mubr.bf16.mxu1 %v16006_v1  ;;  %v5050_v57 = vld [vmem:[%s16000_s7 + $0x18] sm:$0xaa]  ;;  %v11221_v5 = vld [vmem:[%s11495_s28 + $0xa0] ss:$164 sps:$4 sm:$0xff]  }
  0x76   : > { %5646 = vrot.lane.b32.xlu0 %v10663_v2, %s11350_s27  ;;  %v10684_v59 = vcombine.low %v6228_v60, %v6235_v6  ;;  %v7340_v12 = vrot.slane %v7335_v20, %v11515_v25  ;;  %v7342_v13 = vpack.i.b16 %v7150_v7, %v7150_v7  ;;  %v7151_v14 = vcombine.high %v7149_v29, %v7149_v29 }
  0x77   : > { %v6249_v27 = vrot.slane %v6244_v41, %v11513_v24  ;;  %v7349_v18 = vpack.i.b16 %v7149_v29, %v7149_v29  ;;  %1592 = vmatpush1.bf16.msra.mxu0 %v907_v10  ;;  %v2135_v22 = vcombine.high %v2127_v11, %v2127_v11  ;;  %v2331_v26 = vpack.i.b16 %v2127_v11, %v2127_v11 }
  0x78   : > { %6564 = vrot.lane.b32.xlu1 %v10684_v59, %s16068_s29  ;;  %v7347_v31 = vrot.slane %v7342_v13, %v11515_v25  ;;  %v7356_v32 = vpack.i.b16 %v7151_v14, %v7151_v14  ;;  %1671 = vmatprep.subr.bf16.mxu0 %v11214_v8  ;;  %v2120_v33 = vcombine.high %v2050_v0, %v2050_v0  ;;  %v16004_v20 = vmov 0.0  }
  0x79   : > { %v10685_v34 = vcombine.low %v6242_v9, %v6249_v27  ;;  %v7354_v35 = vrot.slane %v7349_v18, %v11515_v25  ;;  %v2336_v36 = vrot.slane %v2331_v26, %v11513_v24  ;;  %v2338_v37 = vpack.i.b16 %v2135_v22, %v2135_v22  ;;  %1879 = vst.msk [vmem:[#allocation2 + $0xa4] sm:$0xff] %vm1878_vm6, %v16006_v1 }
  0x7a   : > { %v10706_v38 = vcombine.low %v7340_v12, %v7347_v31  ;;  %v7361_v42 = vrot.slane %v7356_v32, %v11515_v25  ;;  %10565 = vmatmul.mubr.msk.bf16.vlgmr.msra.gmra.mrb[36].mxu0 %vm802_vm2, %v11911_v49  ;;  %v2134_v43 = vrot.slane %v2120_v33, %v11511_v23  ;;  %v922_v45 = vand.u32 %v11218_v15, %v11498_v17 }
  0x7b   : > { %6566 = vrot.lane.b32.xlu0 %v10685_v34, %s16068_s29  ;;  %v2343_v46 = vrot.slane %v2338_v37, %v11513_v24  ;;  %1672 = vmatpush1.bf16.msra.mxu0 %v11212_v19  ;;  %v3238_v21 = vrot.slane %v3161_v16, %v11511_v23  ;;  %v4160_v30 = vrot.slane %v4083_v28, %v11511_v23  ;;  %v5970_v19 = vld [vmem:[%s16000_s7 + $0x18] sm:$0x55] }
  0x7c   : > { %7676 = vrot.lane.b32.xlu1 %v10706_v38, %s11352_s21  ;;  %v10707_v47 = vcombine.low %v7354_v35, %v7361_v42  ;;  %v2136_v48 = vcombine.high %v2134_v43, %v2134_v43  ;;  %v2345_v50 = vpack.i.b16 %v2134_v43, %v2134_v43  ;;  %1673 = vmatprep.subr.bf16.mxu0 %v922_v45 }
  0x7d   : > { %v10598_v51 = vcombine.low %v2336_v36, %v2343_v46  ;;  %v3246_v39 = vcombine.high %v3238_v21, %v3238_v21  ;;  %v3442_v52 = vpack.i.b16 %v3238_v21, %v3238_v21  ;;  %v4168_v53 = vcombine.high %v4160_v30, %v4160_v30  ;;  %1703 = vmatprep.mubr.bf16.mxu0 %v16006_v1 }
  0x7e   : > { %v2350_v54 = vrot.slane %v2345_v50, %v11513_v24  ;;  %v2352_v55 = vpack.i.b16 %v2136_v48, %v2136_v48  ;;  %v4364_v40 = vpack.i.b16 %v4160_v30, %v4160_v30  ;;  %v919_v56 = vand.u32 %v11216_v44, %v11498_v17  ;;  %v7082_v30 = vld [vmem:[%s16000_s7 + $0x18] sm:$0xaa] }
  0x7f   : > { %7678 = vrot.lane.b32.xlu0 %v10707_v47, %s11352_s21  ;;  %v3447_v60 = vrot.slane %v3442_v52, %v11515_v25  ;;  %v3449_v61 = vpack.i.b16 %v3246_v39, %v3246_v39  ;;  %v4371_v62 = vpack.i.b16 %v4168_v53, %v4168_v53  ;;  %v3231_v63 = vcombine.high %v3161_v16, %v3161_v16  ;;  %v2051_v39 = vld [vmem:[%s16000_s7 + $0x20] sm:$0x55] }
  0x80   : > { %2648 = vrot.lane.b32.xlu1 %v10598_v51, %s16111_s23  ;;  %v2357_v0 = vrot.slane %v2352_v55, %v11513_v24  ;;  %v4369_v2 = vrot.slane %v4364_v40, %v11513_v24  ;;  %1674 = vmatpush1.bf16.msra.mxu0 %v919_v56  ;;  %v4153_v4 = vcombine.high %v4083_v28, %v4083_v28 }
  0x81   : > { %v3454_v6 = vrot.slane %v3449_v61, %v11515_v25  ;;  %v4376_v7 = vrot.slane %v4371_v62, %v11513_v24  ;;  %11003 = vmatprep.subr.bf16.mxu0 %v16004_v20  ;;  %v3245_v29 = vrot.slane %v3231_v63, %v11511_v23  ;;  %v5127_v8 = vrot.slane %v5050_v57, %v11511_v23 }
  0x82   : > { %v10599_v9 = vcombine.low %v2350_v54, %v2357_v0  ;;  %v4167_v41 = vrot.slane %v4153_v4, %v11511_v23  ;;  %v5120_v10 = vcombine.high %v5050_v57, %v5050_v57  ;;  %v931_v11 = vand.u32 %v11223_v58, %v11498_v17 }
  0x83   : > { %v10620_v59 = vcombine.low %v3447_v60, %v3454_v6  ;;  %v10642_v12 = vcombine.low %v4369_v2, %v4376_v7  ;;  %10567 = vmatmul.mubr.msk.bf16.vlgmr.msra.gmra.mrb[40].mxu0 %vm802_vm2, %v11911_v49  ;;  %v3247_v13 = vcombine.high %v3245_v29, %v3245_v29  ;;  %v3456_v14 = vpack.i.b16 %v3245_v29, %v3245_v29  ;;  %v3162_v29 = vld [vmem:[%s16000_s7 + $0x20] sm:$0xaa] }
  0x84   : > { %2650 = vrot.lane.b32.xlu0 %v10599_v9, %s16111_s23  ;;  %v4169_v15 = vcombine.high %v4167_v41, %v4167_v41  ;;  %v4378_v27 = vpack.i.b16 %v4167_v41, %v4167_v41  ;;  %11004 = vmatpush3.bf16.msra.mxu0 %v11221_v5  ;;  %v5135_v18 = vcombine.high %v5127_v8, %v5127_v8 }
  0x85   : > { %3759 = vrot.lane.b32.xlu1 %v10620_v59, %s11348_s24  ;;  %v3461_v17 = vrot.slane %v3456_v14, %v11515_v25  ;;  %v3463_v22 = vpack.i.b16 %v3247_v13, %v3247_v13  ;;  %11005 = vmatprep.subr.bf16.mxu0 %v16004_v20  ;;  %v5331_v26 = vpack.i.b16 %v5127_v8, %v5127_v8 }
  0x86   : > { %v4383_v31 = vrot.slane %v4378_v27, %v11513_v24  ;;  %v4385_v32 = vpack.i.b16 %v4169_v15, %v4169_v15  ;;  %v5338_v33 = vpack.i.b16 %v5135_v18, %v5135_v18  ;;  %v5134_v16 = vrot.slane %v5120_v10, %v11511_v23  ;;  %11007 = vmatprep.mubr.msk.bf16.mxu0 %vm11354_vm3, %v16004_v20 }
  0x87   : > { %v3468_v28 = vrot.slane %v3463_v22, %v11515_v25  ;;  %v5336_v34 = vrot.slane %v5331_v26, %v11515_v25  ;;  %v6047_v35 = vrot.slane %v5970_v19, %v11511_v23  ;;  %v6040_v36 = vcombine.high %v5970_v19, %v5970_v19 }
  0x88   : > { %4681 = vrot.lane.b32.xlu0 %v10642_v12, %s11349_s26  ;;  %v4390_v37 = vrot.slane %v4385_v32, %v11513_v24  ;;  %v5343_v38 = vrot.slane %v5338_v33, %v11515_v25  ;;  %v5136_v42 = vcombine.high %v5134_v16, %v5134_v16  ;;  %v5345_v43 = vpack.i.b16 %v5134_v16, %v5134_v16 }
  0x89   : > { %v10621_v44 = vcombine.low %v3461_v17, %v3468_v28  ;;  %11006 = vmatpush3.bf16.msra.mxu0 %v931_v11  ;;  %v6055_v45 = vcombine.high %v6047_v35, %v6047_v35  ;;  %v6251_v46 = vpack.i.b16 %v6047_v35, %v6047_v35  ;;  %v6054_v21 = vrot.slane %v6040_v36, %v11511_v23  ;;  %v4084_v11 = vld [vmem:[%s16000_s7 + $0x20] sm:$0x55] }
  0x8a   : > { %v10643_v47 = vcombine.low %v4383_v31, %v4390_v37  ;;  %v10664_v48 = vcombine.low %v5336_v34, %v5343_v38  ;;  %v5350_v50 = vrot.slane %v5345_v43, %v11515_v25  ;;  %v5352_v51 = vpack.i.b16 %v5136_v42, %v5136_v42  ;;  %v5051_v38 = vld [vmem:[%s16000_s7 + $0x20] sm:$0xaa] }
  0x8b   : > { %3761 = vrot.lane.b32.xlu1 %v10621_v44, %s11348_s24  ;;  %v6256_v52 = vrot.slane %v6251_v46, %v11513_v24  ;;  %v6258_v53 = vpack.i.b16 %v6055_v45, %v6055_v45  ;;  %v6056_v54 = vcombine.high %v6054_v21, %v6054_v21  ;;  %v6265_v55 = vpack.i.b16 %v6054_v21, %v6054_v21 }
  0x8c   : > { %4683 = vrot.lane.b32.xlu0 %v10643_v47, %s11349_s26  ;;  %v5357_v40 = vrot.slane %v5352_v51, %v11515_v25  ;;  %11008 = vmatmul.mubr.msk.bf16.vlgmr.msra.gmra.mrb[44].mxu0 %vm802_vm2, %v11911_v49  ;;  %v7159_v56 = vrot.slane %v7082_v30, %v11511_v23  ;;  %v7152_v57 = vcombine.high %v7082_v30, %v7082_v30  ;;  %vm10320_vm2 = vcmask 48128  }
  0x8d   : > { %v6263_v58 = vrot.slane %v6258_v53, %v11513_v24  ;;  %v6270_v60 = vrot.slane %v6265_v55, %v11513_v24  ;;  %v6272_v61 = vpack.i.b16 %v6056_v54, %v6056_v54  ;;  %v2144_v62 = vrot.slane %v2051_v39, %v11511_v23  ;;  %9319 = vmatprep.mubr.bf16.mxu0 %v16006_v1 }
  0x8e   : > { %v10665_v63 = vcombine.low %v5350_v50, %v5357_v40  ;;  %v7167_v0 = vcombine.high %v7159_v56, %v7159_v56  ;;  %v7363_v2 = vpack.i.b16 %v7159_v56, %v7159_v56  ;;  %v7166_v4 = vrot.slane %v7152_v57, %v11511_v23 }
  0x8f   : > { %5648 = vrot.lane.b32.xlu1 %v10664_v48, %s11350_s27  ;;  %v10686_v49 = vcombine.low %v6256_v52, %v6263_v58  ;;  %v6277_v5 = vrot.slane %v6272_v61, %v11513_v24  ;;  %v2152_v6 = vcombine.high %v2144_v62, %v2144_v62  ;;  %v2359_v7 = vpack.i.b16 %v2144_v62, %v2144_v62  ;;  %v5971_v61 = vld [vmem:[%s16000_s7 + $0x20] sm:$0x55] }
  0x90   : > { %5650 = vrot.lane.b32.xlu0 %v10665_v63, %s11350_s27  ;;  %v7368_v8 = vrot.slane %v7363_v2, %v11515_v25  ;;  %v7370_v9 = vpack.i.b16 %v7167_v0, %v7167_v0  ;;  %v7168_v41 = vcombine.high %v7166_v4, %v7166_v4  ;;  %v7377_v10 = vpack.i.b16 %v7166_v4, %v7166_v4 }
  0x91   : > { %v10687_v59 = vcombine.low %v6270_v60, %v6277_v5  ;;  %v2364_v12 = vrot.slane %v2359_v7, %v11513_v24  ;;  %v2366_v13 = vpack.i.b16 %v2152_v6, %v2152_v6  ;;  %v2137_v14 = vcombine.high %v2051_v39, %v2051_v39  ;;  %v12064_v60 = vld [vmem:[%s16000_s7 + $0x20] sm:$0xaa] }
  0x92   : > { %v7375_v15 = vrot.slane %v7370_v9, %v11515_v25  ;;  %v7382_v27 = vrot.slane %v7377_v10, %v11515_v25  ;;  %v7384_v18 = vpack.i.b16 %v7168_v41, %v7168_v41  ;;  %v3255_v19 = vrot.slane %v3162_v29, %v11511_v23 }
  0x93   : > { %6568 = vrot.lane.b32.xlu1 %v10686_v49, %s16068_s29  ;;  %v2371_v17 = vrot.slane %v2366_v13, %v11513_v24  ;;  %v2151_v22 = vrot.slane %v2137_v14, %v11511_v23  ;;  %v4177_v26 = vrot.slane %v4084_v11, %v11511_v23  ;;  %v3248_v31 = vcombine.high %v3162_v29, %v3162_v29 }
  0x94   : > { %6570 = vrot.lane.b32.xlu0 %v10687_v59, %s16068_s29  ;;  %v10708_v32 = vcombine.low %v7368_v8, %v7375_v15  ;;  %v7389_v33 = vrot.slane %v7384_v18, %v11515_v25  ;;  %v3263_v16 = vcombine.high %v3255_v19, %v3255_v19  ;;  %v3470_v28 = vpack.i.b16 %v3255_v19, %v3255_v19 }
  0x95   : > { %v10600_v34 = vcombine.low %v2364_v12, %v2371_v17  ;;  %v2153_v35 = vcombine.high %v2151_v22, %v2151_v22  ;;  %v2373_v36 = vpack.i.b16 %v2151_v22, %v2151_v22  ;;  %v4185_v37 = vcombine.high %v4177_v26, %v4177_v26 }
  0x96   : > { %v10709_v42 = vcombine.low %v7382_v27, %v7389_v33  ;;  %v3475_v43 = vrot.slane %v3470_v28, %v11515_v25  ;;  %v3477_v44 = vpack.i.b16 %v3263_v16, %v3263_v16  ;;  %v4392_v45 = vpack.i.b16 %v4177_v26, %v4177_v26  ;;  %v2052_v26 = vld [vmem:[%s16000_s7 + $0x28] sm:$0x55] }
  0x97   : > { %7680 = vrot.lane.b32.xlu1 %v10708_v32, %s11352_s21  ;;  %v2378_v46 = vrot.slane %v2373_v36, %v11513_v24  ;;  %v2380_v21 = vpack.i.b16 %v2153_v35, %v2153_v35  ;;  %v4399_v30 = vpack.i.b16 %v4185_v37, %v4185_v37  ;;  %v3262_v47 = vrot.slane %v3248_v31, %v11511_v23 }
  0x98   : > { %v12052_v48 = vpop.permute.xlu0 %428  ;;  %7682 = vrot.lane.b32.xlu0 %v10709_v42, %s11352_s21  ;;  %v3482_v50 = vrot.slane %v3477_v44, %v11515_v25  ;;  %v4397_v51 = vrot.slane %v4392_v45, %v11513_v24  ;;  %v4170_v39 = vcombine.high %v4084_v11, %v4084_v11  ;;  %v5144_v52 = vrot.slane %v5051_v38, %v11511_v23 }
  0x99   : > { %v2385_v53 = vrot.slane %v2380_v21, %v11513_v24  ;;  %v4404_v54 = vrot.slane %v4399_v30, %v11513_v24  ;;  %v3264_v55 = vcombine.high %v3262_v47, %v3262_v47  ;;  %v3484_v40 = vpack.i.b16 %v3262_v47, %v3262_v47 }
  0x9a   : > { %v4184_v56 = vrot.slane %v4170_v39, %v11511_v23  ;;  %v5152_v57 = vcombine.high %v5144_v52, %v5144_v52  ;;  %v5359_v58 = vpack.i.b16 %v5144_v52, %v5144_v52  ;;  %v10622_v63 = vcombine.low %v3475_v43, %v3482_v50 }
  0x9b   : > { %2652 = vrot.lane.b32.xlu1 %v10600_v34, %s16111_s23  ;;  %v10601_v62 = vcombine.low %v2378_v46, %v2385_v53  ;;  %v3489_v0 = vrot.slane %v3484_v40, %v11515_v25  ;;  %v3491_v2 = vpack.i.b16 %v3264_v55, %v3264_v55  ;;  %v10644_v4 = vcombine.low %v4397_v51, %v4404_v54 }
  0x9c   : > { %v4186_v49 = vcombine.high %v4184_v56, %v4184_v56  ;;  %v4406_v5 = vpack.i.b16 %v4184_v56, %v4184_v56  ;;  %v5366_v6 = vpack.i.b16 %v5152_v57, %v5152_v57  ;;  %v12071_v7 = vpop.permute.xlu1 %2638  ;;  %v5137_v9 = vcombine.high %v5051_v38, %v5051_v38 }
  0x9d   : > { %v12073_v29 = vpop.permute.xlu0 %2636  ;;  %2654 = vrot.lane.b32.xlu0 %v10601_v62, %s16111_s23  ;;  %v3496_v8 = vrot.slane %v3491_v2, %v11515_v25  ;;  %v7176_v41 = vrot.slane %v12064_v60, %v11511_v23  ;;  %v6064_v10 = vrot.slane %v5971_v61, %v11511_v23  ;;  %v5364_v12 = vrot.slane %v5359_v58, %v11515_v25  ;;  %v3163_v2 = vld [vmem:[%s16000_s7 + $0x28] sm:$0xaa] }
  0x9e   : > { %v4411_v11 = vrot.slane %v4406_v5, %v11513_v24  ;;  %v4413_v59 = vpack.i.b16 %v4186_v49, %v4186_v49  ;;  %v5371_v13 = vrot.slane %v5366_v6, %v11515_v25  ;;  %v5151_v15 = vrot.slane %v5137_v9, %v11511_v23 }
  0x9f   : > { %3763 = vrot.lane.b32.xlu1 %v10622_v63, %s11348_s24  ;;  %v10623_v14 = vcombine.low %v3489_v0, %v3496_v8  ;;  %v7184_v27 = vcombine.high %v7176_v41, %v7176_v41  ;;  %v7391_v18 = vpack.i.b16 %v7176_v41, %v7176_v41  ;;  %v6072_v17 = vcombine.high %v6064_v10, %v6064_v10 }
  0xa0   : > { %v4418_v19 = vrot.slane %v4413_v59, %v11513_v24  ;;  %v6279_v22 = vpack.i.b16 %v6064_v10, %v6064_v10  ;;  %v12089_v31 = vpop.permute.xlu1 %3747  ;;  %v5153_v33 = vcombine.high %v5151_v15, %v5151_v15  ;;  %v5373_v16 = vpack.i.b16 %v5151_v15, %v5151_v15  ;;  %v4085_v59 = vld [vmem:[%s16000_s7 + $0x28] sm:$0x55] }
  0xa1   : > { %v12091_v32 = vpop.permute.xlu0 %3749  ;;  %4685 = vrot.lane.b32.xlu0 %v10644_v4, %s11349_s26  ;;  %v7398_v28 = vpack.i.b16 %v7184_v27, %v7184_v27  ;;  %v10666_v35 = vcombine.low %v5364_v12, %v5371_v13  ;;  %v7396_v36 = vrot.slane %v7391_v18, %v11515_v25  ;;  %v6286_v37 = vpack.i.b16 %v6072_v17, %v6072_v17 }
  0xa2   : > { %v10645_v34 = vcombine.low %v4411_v11, %v4418_v19  ;;  %v5378_v38 = vrot.slane %v5373_v16, %v11515_v25  ;;  %v5380_v42 = vpack.i.b16 %v5153_v33, %v5153_v33  ;;  %v2161_v44 = vrot.slane %v2052_v26, %v11511_v23 }
  0xa3   : > { %3765 = vrot.lane.b32.xlu1 %v10623_v14, %s11348_s24  ;;  %v7403_v43 = vrot.slane %v7398_v28, %v11515_v25  ;;  %v6284_v45 = vrot.slane %v6279_v22, %v11513_v24  ;;  %v6057_v46 = vcombine.high %v5971_v61, %v5971_v61  ;;  %v6291_v30 = vrot.slane %v6286_v37, %v11513_v24 }
  0xa4   : > { %v5385_v21 = vrot.slane %v5380_v42, %v11515_v25  ;;  %v2169_v47 = vcombine.high %v2161_v44, %v2161_v44  ;;  %v2387_v50 = vpack.i.b16 %v2161_v44, %v2161_v44  ;;  %v2154_v56 = vcombine.high %v2052_v26, %v2052_v26 }
  0xa5   : > { %4687 = vrot.lane.b32.xlu0 %v10645_v34, %s11349_s26  ;;  %v12103_v51 = vpop.permute.xlu1 %4669  ;;  %v10710_v52 = vcombine.low %v7396_v36, %v7403_v43  ;;  %v6071_v53 = vrot.slane %v6057_v46, %v11511_v23  ;;  %v10688_v61 = vcombine.low %v6284_v45, %v6291_v30  ;;  %v7169_v0 = vcombine.high %v12064_v60, %v12064_v60  ;;  %v5052_v45 = vld [vmem:[%s16000_s7 + $0x28] sm:$0xaa] }
  0xa6   : > { %v12105_v39 = vpop.permute.xlu0 %4671  ;;  %v10667_v54 = vcombine.low %v5378_v38, %v5385_v21  ;;  %v2392_v55 = vrot.slane %v2387_v50, %v11513_v24  ;;  %v2394_v40 = vpack.i.b16 %v2169_v47, %v2169_v47  ;;  %v2168_v63 = vrot.slane %v2154_v56, %v11511_v23 }
  0xa7   : > { %5652 = vrot.lane.b32.xlu1 %v10666_v35, %s11350_s27  ;;  %v6073_v57 = vcombine.high %v6071_v53, %v6071_v53  ;;  %v6293_v58 = vpack.i.b16 %v6071_v53, %v6071_v53  ;;  %v7183_v10 = vrot.slane %v7169_v0, %v11511_v23  ;;  %v3272_v11 = vrot.slane %v3163_v2, %v11511_v23 }
  0xa8   : > { %v2399_v62 = vrot.slane %v2394_v40, %v11513_v24  ;;  %v2170_v9 = vcombine.high %v2168_v63, %v2168_v63  ;;  %v2401_v41 = vpack.i.b16 %v2168_v63, %v2168_v63  ;;  %v4194_v28 = vrot.slane %v4085_v59, %v11511_v23 }
  0xa9   : > { %5654 = vrot.lane.b32.xlu0 %v10667_v54, %s11350_s27  ;;  %v12118_v4 = vpop.permute.xlu1 %5636  ;;  %v6298_v5 = vrot.slane %v6293_v58, %v11513_v24  ;;  %v6300_v6 = vpack.i.b16 %v6073_v57, %v6073_v57  ;;  %v7185_v14 = vcombine.high %v7183_v10, %v7183_v10  ;;  %v7405_v15 = vpack.i.b16 %v7183_v10, %v7183_v10 }
  0xaa   : > { %v12120_v49 = vpop.permute.xlu0 %5638  ;;  %v10602_v8 = vcombine.low %v2392_v55, %v2399_v62  ;;  %v2406_v12 = vrot.slane %v2401_v41, %v11513_v24  ;;  %v2408_v13 = vpack.i.b16 %v2170_v9, %v2170_v9  ;;  %v3280_v18 = vcombine.high %v3272_v11, %v3272_v11 }
  0xab   : > { %7684 = vrot.lane.b32.xlu1 %v10710_v52, %s11352_s21  ;;  %v6305_v60 = vrot.slane %v6300_v6, %v11513_v24  ;;  %v3498_v19 = vpack.i.b16 %v3272_v11, %v3272_v11  ;;  %v7410_v33 = vrot.slane %v7405_v15, %v11515_v25  ;;  %v7412_v16 = vpack.i.b16 %v7185_v14, %v7185_v14 }
  0xac   : > { %v2413_v26 = vrot.slane %v2408_v13, %v11513_v24  ;;  %v3505_v35 = vpack.i.b16 %v3280_v18, %v3280_v18  ;;  %v4202_v38 = vcombine.high %v4194_v28, %v4194_v28  ;;  %v4420_v42 = vpack.i.b16 %v4194_v28, %v4194_v28 }
  0xad   : > { %6572 = vrot.lane.b32.xlu0 %v10688_v61, %s16068_s29  ;;  %v10689_v27 = vcombine.low %v6298_v5, %v6305_v60  ;;  %v3503_v34 = vrot.slane %v3498_v19, %v11515_v25  ;;  %v7417_v37 = vrot.slane %v7412_v16, %v11515_v25  ;;  %v3265_v44 = vcombine.high %v3163_v2, %v3163_v2  ;;  %v12167_v60 = vld [vmem:[%s16000_s7 + $0x28] sm:$0xaa]  ;;  %v5972_v16 = vld [vmem:[%s16000_s7 + $0x28] sm:$0x55] }
  0xae   : > { %v12132_v17 = vpop.permute.xlu1 %6556  ;;  %v10603_v36 = vcombine.low %v2406_v12, %v2413_v26  ;;  %v3510_v43 = vrot.slane %v3505_v35, %v11515_v25  ;;  %v4425_v30 = vrot.slane %v4420_v42, %v11513_v24  ;;  %v4427_v47 = vpack.i.b16 %v4202_v38, %v4202_v38 }
  0xaf   : > { %v12134_v22 = vpop.permute.xlu0 %6558  ;;  %2656 = vrot.lane.b32.xlu1 %v10602_v8, %s16111_s23  ;;  %v10711_v21 = vcombine.low %v7410_v33, %v7417_v37  ;;  %v3279_v53 = vrot.slane %v3265_v44, %v11511_v23  ;;  %v4187_v54 = vcombine.high %v4085_v59, %v4085_v59  ;;  %v5161_v40 = vrot.slane %v5052_v45, %v11511_v23 }
  0xb0   : > { %v10624_v52 = vcombine.low %v3503_v34, %v3510_v43  ;;  %v4432_v55 = vrot.slane %v4427_v47, %v11513_v24  ;;  %v5154_v56 = vcombine.high %v5052_v45, %v5052_v45  ;;  %v7193_v33 = vrot.slane %v12167_v60, %v11511_v23 }
  0xb1   : > { %6574 = vrot.lane.b32.xlu0 %v10689_v27, %s16068_s29  ;;  %v3281_v57 = vcombine.high %v3279_v53, %v3279_v53  ;;  %v3512_v58 = vpack.i.b16 %v3279_v53, %v3279_v53  ;;  %v4201_v61 = vrot.slane %v4187_v54, %v11511_v23  ;;  %v5169_v63 = vcombine.high %v5161_v40, %v5161_v40 }
  0xb2   : > { %v12147_v46 = vpop.permute.xlu1 %7668  ;;  %v10646_v62 = vcombine.low %v4425_v30, %v4432_v55  ;;  %v5387_v0 = vpack.i.b16 %v5161_v40, %v5161_v40  ;;  %v5168_v10 = vrot.slane %v5154_v56, %v11511_v23  ;;  %v7201_v42 = vcombine.high %v7193_v33, %v7193_v33 }
  0xb3   : > { %2658 = vrot.lane.b32.xlu1 %v10603_v36, %s16111_s23  ;;  %v12151_v50 = vpop.permute.xlu0 %7670  ;;  %v3517_v2 = vrot.slane %v3512_v58, %v11515_v25  ;;  %v3519_v5 = vpack.i.b16 %v3281_v57, %v3281_v57  ;;  %v4203_v6 = vcombine.high %v4201_v61, %v4201_v61  ;;  %v4434_v8 = vpack.i.b16 %v4201_v61, %v4201_v61  ;;  %v2053_v36 = vld [vmem:[%s16000_s7 + $0x30] sm:$0x55] }
  0xb4   : > { %v5394_v41 = vpack.i.b16 %v5169_v63, %v5169_v63  ;;  %v5392_v14 = vrot.slane %v5387_v0, %v11515_v25  ;;  %v5170_v27 = vcombine.high %v5168_v10, %v5168_v10  ;;  %v5401_v18 = vpack.i.b16 %v5168_v10, %v5168_v10 }
  0xb5   : > { %7686 = vrot.lane.b32.xlu0 %v10711_v21, %s11352_s21  ;;  %v3524_v59 = vrot.slane %v3519_v5, %v11515_v25  ;;  %v4439_v12 = vrot.slane %v4434_v8, %v11513_v24  ;;  %v4441_v13 = vpack.i.b16 %v4203_v6, %v4203_v6  ;;  %v7419_v43 = vpack.i.b16 %v7193_v33, %v7193_v33 }
  0xb6   : > { %v5399_v15 = vrot.slane %v5394_v41, %v11515_v25  ;;  %v5406_v34 = vrot.slane %v5401_v18, %v11515_v25  ;;  %v5408_v35 = vpack.i.b16 %v5170_v27, %v5170_v27  ;;  %v6081_v45 = vrot.slane %v5972_v16, %v11511_v23  ;;  %v3164_v18 = vld [vmem:[%s16000_s7 + $0x30] sm:$0xaa] }
  0xb7   : > { %3767 = vrot.lane.b32.xlu1 %v10624_v52, %s11348_s24  ;;  %v10625_v19 = vcombine.low %v3517_v2, %v3524_v59  ;;  %v4446_v26 = vrot.slane %v4441_v13, %v11513_v24  ;;  %v7424_v30 = vrot.slane %v7419_v43, %v11515_v25  ;;  %v7426_v47 = vpack.i.b16 %v7201_v42, %v7201_v42 }
  0xb8   : > { %v12160_v9 = vpop.permute.xlu1 %2640  ;;  %v12169_v11 = vpop.permute.xlu0 %2642  ;;  %v10668_v38 = vcombine.low %v5392_v14, %v5399_v15  ;;  %v5413_v44 = vrot.slane %v5408_v35, %v11515_v25  ;;  %v2178_v52 = vrot.slane %v2053_v36, %v11511_v23  ;;  %v6074_v53 = vcombine.high %v5972_v16, %v5972_v16 }
  0xb9   : > { %4689 = vrot.lane.b32.xlu0 %v10646_v62, %s11349_s26  ;;  %v10647_v37 = vcombine.low %v4439_v12, %v4446_v26  ;;  %v6089_v40 = vcombine.high %v6081_v45, %v6081_v45  ;;  %v6307_v56 = vpack.i.b16 %v6081_v45, %v6081_v45  ;;  %v7431_v57 = vrot.slane %v7426_v47, %v11515_v25 }
  0xba   : > { %v10669_v55 = vcombine.low %v5406_v34, %v5413_v44  ;;  %v2186_v58 = vcombine.high %v2178_v52, %v2178_v52  ;;  %v2415_v63 = vpack.i.b16 %v2178_v52, %v2178_v52  ;;  %v6088_v5 = vrot.slane %v6074_v53, %v11511_v23 }
  0xbb   : > { %3769 = vrot.lane.b32.xlu1 %v10625_v19, %s11348_s24  ;;  %v6312_v61 = vrot.slane %v6307_v56, %v11513_v24  ;;  %v6314_v62 = vpack.i.b16 %v6089_v40, %v6089_v40  ;;  %v10712_v0 = vcombine.low %v7424_v30, %v7431_v57  ;;  %v2171_v41 = vcombine.high %v2053_v36, %v2053_v36  ;;  %v4086_v19 = vld [vmem:[%s16000_s7 + $0x30] sm:$0x55] }
  0xbc   : > { %v12181_v28 = vpop.permute.xlu1 %3751  ;;  %v2422_v2 = vpack.i.b16 %v2186_v58, %v2186_v58  ;;  %v2420_v8 = vrot.slane %v2415_v63, %v11513_v24  ;;  %v6090_v12 = vcombine.high %v6088_v5, %v6088_v5  ;;  %v6321_v13 = vpack.i.b16 %v6088_v5, %v6088_v5 }
  0xbd   : > { %v12190_v21 = vpop.permute.xlu0 %4673  ;;  %4691 = vrot.lane.b32.xlu0 %v10647_v37, %s11349_s26  ;;  %v6319_v6 = vrot.slane %v6314_v62, %v11513_v24  ;;  %v2185_v27 = vrot.slane %v2171_v41, %v11511_v23  ;;  %v7186_v36 = vcombine.high %v12167_v60, %v12167_v60  ;;  %v4211_v42 = vrot.slane %v4086_v19, %v11511_v23 }
  0xbe   : > { %v2427_v59 = vrot.slane %v2422_v2, %v11513_v24  ;;  %v6326_v33 = vrot.slane %v6321_v13, %v11513_v24  ;;  %v6328_v16 = vpack.i.b16 %v6090_v12, %v6090_v12  ;;  %v3282_v12 = vcombine.high %v3164_v18, %v3164_v18 }
  0xbf   : > { %5656 = vrot.lane.b32.xlu1 %v10668_v38, %s11350_s27  ;;  %v10690_v15 = vcombine.low %v6312_v61, %v6319_v6  ;;  %v2187_v34 = vcombine.high %v2185_v27, %v2185_v27  ;;  %v2429_v35 = vpack.i.b16 %v2185_v27, %v2185_v27  ;;  %v3289_v38 = vrot.slane %v3164_v18, %v11511_v23 }
  0xc0   : > { %v12195_v54 = vpop.permute.xlu1 %3753  ;;  %v10604_v26 = vcombine.low %v2420_v8, %v2427_v59  ;;  %v6333_v37 = vrot.slane %v6328_v16, %v11513_v24  ;;  %v7200_v30 = vrot.slane %v7186_v36, %v11511_v23  ;;  %v4219_v58 = vcombine.high %v4211_v42, %v4211_v42 }
  0xc1   : > { %5658 = vrot.lane.b32.xlu0 %v10669_v55, %s11350_s27  ;;  %v2434_v44 = vrot.slane %v2429_v35, %v11513_v24  ;;  %v2436_v45 = vpack.i.b16 %v2187_v34, %v2187_v34  ;;  %v3297_v53 = vcombine.high %v3289_v38, %v3289_v38  ;;  %v3526_v56 = vpack.i.b16 %v3289_v38, %v3289_v38  ;;  %v5053_v35 = vld [vmem:[%s16000_s7 + $0x30] sm:$0xaa] }
  0xc2   : > { %v10691_v52 = vcombine.low %v6326_v33, %v6333_v37  ;;  %v7202_v55 = vcombine.high %v7200_v30, %v7200_v30  ;;  %v7433_v40 = vpack.i.b16 %v7200_v30, %v7200_v30  ;;  %v4448_v61 = vpack.i.b16 %v4211_v42, %v4211_v42 }
  0xc3   : > { %7688 = vrot.lane.b32.xlu1 %v10712_v0, %s11352_s21  ;;  %v2441_v60 = vrot.slane %v2436_v45, %v11513_v24  ;;  %v3533_v57 = vpack.i.b16 %v3297_v53, %v3297_v53  ;;  %v3531_v2 = vrot.slane %v3526_v56, %v11515_v25  ;;  %v4455_v6 = vpack.i.b16 %v4219_v58, %v4219_v58 }
  0xc4   : > { %v7438_v63 = vrot.slane %v7433_v40, %v11515_v25  ;;  %v7440_v0 = vpack.i.b16 %v7202_v55, %v7202_v55  ;;  %v4453_v59 = vrot.slane %v4448_v61, %v11513_v24  ;;  %v3296_v16 = vrot.slane %v3282_v12, %v11511_v23 }
  0xc5   : > { %v12204_v10 = vpop.permute.xlu0 %4675  ;;  %6576 = vrot.lane.b32.xlu0 %v10690_v15, %s16068_s29  ;;  %v10605_v62 = vcombine.low %v2434_v44, %v2441_v60  ;;  %v3538_v5 = vrot.slane %v3533_v57, %v11515_v25  ;;  %v4460_v27 = vrot.slane %v4455_v6, %v11513_v24  ;;  %v5171_v55 = vcombine.high %v5053_v35, %v5053_v35 }
  0xc6   : > { %v12208_v14 = vpop.permute.xlu1 %5640  ;;  %v7445_v41 = vrot.slane %v7440_v0, %v11515_v25  ;;  %v3298_v37 = vcombine.high %v3296_v16, %v3296_v16  ;;  %v3540_v38 = vpack.i.b16 %v3296_v16, %v3296_v16 }
  0xc7   : > { %2660 = vrot.lane.b32.xlu1 %v10604_v26, %s16111_s23  ;;  %v10626_v15 = vcombine.low %v3531_v2, %v3538_v5  ;;  %v4204_v26 = vcombine.high %v4086_v19, %v4086_v19  ;;  %v10648_v18 = vcombine.low %v4453_v59, %v4460_v27  ;;  %v12268_v59 = vld [vmem:[%s16000_s7 + $0x30] sm:$0x55] }
  0xc8   : > { %v10713_v33 = vcombine.low %v7438_v63, %v7445_v41  ;;  %v3545_v45 = vrot.slane %v3540_v38, %v11515_v25  ;;  %v3547_v30 = vpack.i.b16 %v3298_v37, %v3298_v37 }
  0xc9   : > { %v12225_v43 = vpop.permute.xlu0 %5642  ;;  %6578 = vrot.lane.b32.xlu0 %v10691_v52, %s16068_s29  ;;  %v4218_v34 = vrot.slane %v4204_v26, %v11511_v23  ;;  %v5178_v52 = vrot.slane %v5053_v35, %v11511_v23 }
  0xca   : > { %v12229_v47 = vpop.permute.xlu1 %6560  ;;  %v3552_v40 = vrot.slane %v3547_v30, %v11515_v25 }
  0xcb   : > { %2662 = vrot.lane.b32.xlu1 %v10605_v62, %s16111_s23  ;;  %v4220_v42 = vcombine.high %v4218_v34, %v4218_v34  ;;  %v4462_v19 = vpack.i.b16 %v4218_v34, %v4218_v34  ;;  %v5186_v56 = vcombine.high %v5178_v52, %v5178_v52  ;;  %v5415_v57 = vpack.i.b16 %v5178_v52, %v5178_v52 }
  0xcc   : > { %v5185_v62 = vrot.slane %v5171_v55, %v11511_v23  ;;  %v10627_v63 = vcombine.low %v3545_v45, %v3552_v40  ;;  %v6098_v34 = vrot.slane %v12268_v59, %v11511_v23 }
  0xcd   : > { %7690 = vrot.lane.b32.xlu0 %v10713_v33, %s11352_s21  ;;  %v4467_v53 = vrot.slane %v4462_v19, %v11513_v24  ;;  %v4469_v60 = vpack.i.b16 %v4220_v42, %v4220_v42  ;;  %v5420_v0 = vrot.slane %v5415_v57, %v11515_v25  ;;  %v5422_v2 = vpack.i.b16 %v5186_v56, %v5186_v56 }
  0xce   : > { %v5187_v6 = vcombine.high %v5185_v62, %v5185_v62  ;;  %v5429_v41 = vpack.i.b16 %v5185_v62, %v5185_v62  ;;  %v6335_v37 = vpack.i.b16 %v6098_v34, %v6098_v34 }
  0xcf   : > { %3771 = vrot.lane.b32.xlu1 %v10626_v15, %s11348_s24  ;;  %v4474_v61 = vrot.slane %v4469_v60, %v11513_v24  ;;  %v5427_v15 = vrot.slane %v5422_v2, %v11515_v25 }
  0xd0   : > { %v12236_v8 = vpop.permute.xlu0 %6562  ;;  %v5434_v27 = vrot.slane %v5429_v41, %v11515_v25  ;;  %v5436_v26 = vpack.i.b16 %v5187_v6, %v5187_v6  ;;  %v6340_v19 = vrot.slane %v6335_v37, %v11513_v24 }
  0xd1   : > { %v12241_v13 = vpop.permute.xlu1 %7672  ;;  %4693 = vrot.lane.b32.xlu0 %v10648_v18, %s11349_s26  ;;  %v10649_v5 = vcombine.low %v4467_v53, %v4474_v61  ;;  %v10670_v16 = vcombine.low %v5420_v0, %v5427_v15  ;;  %v6106_v18 = vcombine.high %v6098_v34, %v6098_v34 }
  0xd2   : > { %v5441_v35 = vrot.slane %v5436_v26, %v11515_v25 }
  0xd3   : > { %3773 = vrot.lane.b32.xlu1 %v10627_v63, %s11348_s24  ;;  %v6342_v45 = vpack.i.b16 %v6106_v18, %v6106_v18 }
  0xd4   : > { %v12249_v36 = vpop.permute.xlu0 %7674  ;;  %v10671_v42 = vcombine.low %v5434_v27, %v5441_v35 }
  0xd5   : > { %4695 = vrot.lane.b32.xlu0 %v10649_v5, %s11349_s26  ;;  %v6347_v52 = vrot.slane %v6342_v45, %v11513_v24 }
  0xd6   : > { %v12253_v44 = vpop.permute.xlu1 %2644 }
  0xd7   : > { %5660 = vrot.lane.b32.xlu1 %v10670_v16, %s11350_s27  ;;  %v10692_v60 = vcombine.low %v6340_v19, %v6347_v52 }
  0xd9   : > { %v12260_v58 = vpop.permute.xlu0 %2646  ;;  %5662 = vrot.lane.b32.xlu0 %v10671_v42, %s11350_s27 }
  0xdc   : > { %v12270_v12 = vpop.permute.xlu1 %3755 }
  0xdd   : > { %v12276_v33 = vpop.permute.xlu0 %4677  ;;  %6580 = vrot.lane.b32.xlu0 %v10692_v60, %s16068_s29 }
  0xe1   : > { %v12282_v38 = vpop.permute.xlu1 %3757 }
  0xe2   : > { %16130 = vst [vmem:[#allocation10_spill] sm:$0xff] %v12282_v38 }
  0xe4   : > { %v12286_v30 = vpop.permute.xlu0 %4679 }
  0xe5   : > { %16131 = vst [vmem:[#allocation11_spill] sm:$0xff] %v12286_v30  ;;  %v12289_v53 = vpop.permute.xlu1 %5644 }
  0xe8   : > { %v12292_v55 = vpop.permute.xlu0 %5646 }
  0xea   : > { %v12295_v40 = vpop.permute.xlu1 %6564 }
  0xed   : > { %v12297_v56 = vpop.permute.xlu0 %6566 }
  0xee   : > { %v12299_v57 = vpop.permute.xlu1 %7676 }
  0xf1   : > { %v12301_v61 = vpop.permute.xlu0 %7678 }
  0xf2   : > { %v12305_v63 = vpop.permute.xlu1 %2648 }
  0xf3   : > { %16133 = vst [vmem:[#allocation13_spill] sm:$0xff] %v12305_v63 }
  0xf6   : > { %v12303_v62 = vpop.permute.xlu0 %2650 }
  0xf7   : > { %16132 = vst [vmem:[#allocation12_spill] sm:$0xff] %v12303_v62  ;;  %v12309_v6 = vpop.permute.xlu1 %3759 }
  0xf8   : > { %16135 = vst [vmem:[#allocation15_spill] sm:$0xff] %v12309_v6 }
  0xfa   : > { %v12307_v0 = vpop.permute.xlu0 %4681 }
  0xfb   : > { %16134 = vst [vmem:[#allocation14_spill] sm:$0xff] %v12307_v0 }
  0xfc   : > { %v967_v2 = vpop.f32.mrb[0].mxu0 }
  0xfd   : > { %v1090_v5 = vpop.f32.mrb[0].mxu1  ;;  %v968_v41 = vadd.f32 %v967_v2, %v12052_v48  ;;  %v969_v27 = vpop.f32.mrb[1].mxu0 }
  0xfe   : > { %v1091_v15 = vadd.f32 %v1090_v5, %v12052_v48  ;;  %v12313_v26 = vpop.permute.xlu0 %4683  ;;  %v970_v16 = vadd.f32 %v969_v27, %v12052_v48  ;;  %v1092_v34 = vpop.f32.mrb[1].mxu1 }
  0xff   : > { %16136 = vst [vmem:[#allocation16_spill] sm:$0xff] %v12313_v26  ;;  %v1793_v35 = vmax.f32 %v968_v41, 0.0  ;;  %v1093_v37 = vadd.f32 %v1092_v34, %v12052_v48  ;;  %v971_v42 = vpop.f32.mrb[2].mxu0  ;;  %v1094_v19 = vpop.f32.mrb[2].mxu1 }
 0x100   : > { %v1799_v18 = vmax.f32 %v1091_v15, 0.0  ;;  %v1794_v45 = vmax.f32 %v970_v16, 0.0  ;;  %v972_v52 = vpop.f32.mrb[3].mxu0  ;;  %v1095_v60 = vpop.f32.mrb[3].mxu1 }
 0x101   : > { %v1800_v3 = vmax.f32 %v1093_v37, 0.0  ;;  %v12319_v2 = vpop.permute.xlu1 %3761  ;;  %v16013_v52 = vrot.slane %v12089_v31, 4 }
 0x102   : > { %v12317_v20 = vpack.c.bf16 %v1794_v45, %v1793_v35  ;;  %16137 = vst [vmem:[#allocation17_spill] sm:$0xff] %v12319_v2  ;;  %v12327_v41 = vpop.permute.xlu0 %5650 }
 0x103   : > { %v12321_v5 = vpack.c.bf16 %v1800_v3, %v1799_v18 }
 0x104   : > { %2004 = vst [vmem:[#allocation2 + $0x4] sm:$0xff] %v12317_v20  ;;  %5005 = vst [vmem:[#allocation3 + $0x290] sm:$0xff] %v12317_v20  ;;  %6911 = vrot.lane.b32.xlu0 %v12317_v20, %s11355_s16 }
 0x105   : > { %2007 = vst [vmem:[#allocation2 + $0x1c] sm:$0xff] %v12321_v5  ;;  %5008 = vst [vmem:[#allocation3 + $0x2a8] sm:$0xff] %v12321_v5  ;;  %v1008_v15 = vpop.f32.mrb[4].mxu0  ;;  %v12336_v60 = vpop.permute.xlu1 %5648 }
 0x106   : > { %v1009_v27 = vadd.f32 %v1008_v15, %v12052_v48  ;;  %v1172_v16 = vpop.f32.mrb[4].mxu1  ;;  %v1010_v34 = vpop.f32.mrb[5].mxu0 }
 0x107   : > { %v1173_v3 = vadd.f32 %v1172_v16, %v12052_v48  ;;  %v1174_v35 = vpop.f32.mrb[5].mxu1  ;;  %v1011_v37 = vadd.f32 %v1010_v34, %v12052_v48  ;;  %v1012_v19 = vpop.f32.mrb[6].mxu0 }
 0x108   : > { %v1795_v18 = vmax.f32 %v1009_v27, 0.0  ;;  %v1175_v42 = vadd.f32 %v1174_v35, %v12052_v48  ;;  %v1176_v45 = vpop.f32.mrb[6].mxu1  ;;  %v1013_v25 = vpop.f32.mrb[7].mxu0  ;;  %v3810_v27 = vsel %vm3809_vm7, %v16013_v52, %v12089_v31  ;;  %v16020_v35 = vrot.slane %v12073_v29, 4 }
 0x109   : > { %v1803_v1 = vmax.f32 %v1173_v3, 0.0  ;;  %v1796_v15 = vmax.f32 %v1011_v37, 0.0  ;;  %v1177_v26 = vpop.f32.mrb[7].mxu1  ;;  %v12342_v16 = vpop.permute.xlu0 %6570 }
 0x10a   : > { %v1804_v24 = vmax.f32 %v1175_v42, 0.0  ;;  %16138 = vst [vmem:[#allocation18_spill] sm:$0xff] %v12342_v16  ;;  %v16014_v26 = vrot.slane %v12103_v51, 4 }
 0x10b   : > { %v2949_v34 = vld [vmem:[#allocation2] sm:$0xff]  ;;  %v12345_v19 = vpack.c.bf16 %v1796_v15, %v1795_v18 }
 0x10c   : > { %v12347_v45 = vpack.c.bf16 %v1804_v24, %v1803_v1  ;;  %2991 = vrot.lane.b32.xlu1 %v2949_v34, %s11356_s17  ;;  %v3871_v25 = vmul.bf16 %v3810_v27, %v2949_v34  ;;  %v4733_v1 = vsel %vm4732_vm9, %v16014_v26, %v12103_v51  ;;  %v12360_v24 = vpop.permute.xlu1 %6568  ;;  %v2699_v27 = vsel %vm2698_vm8, %v16020_v35, %v12073_v29 }
 0x10d   : > { %2005 = vst [vmem:[#allocation2 + $0xc] sm:$0xff] %v12345_v19  ;;  %5006 = vst [vmem:[#allocation3 + $0x298] sm:$0xff] %v12345_v19  ;;  %v4795_v16 = vmul.bf16 %v4733_v1, %v2949_v34  ;;  %v16028_v35 = vrot.slane %v12225_v43, 4  ;;  %v2761_v30 = vmul.bf16 %v2949_v34, %v2699_v27  ;;  %v16026_v1 = vrot.slane %v12147_v46, 4 }
 0x10e   : > { %2009 = vst [vmem:[#allocation2 + $0x2c] sm:$0xff] %v12347_v45  ;;  %5010 = vst [vmem:[#allocation3 + $0x2b8] sm:$0xff] %v12347_v45  ;;  %v1049_v3 = vpop.f32.mrb[8].mxu0  ;;  %3913 = vrot.lane.b32.xlu0 %v3871_v25, %s16068_s29 }
 0x10f   : > { %v1254_v18 = vpop.f32.mrb[8].mxu1  ;;  %16139 = vst [vmem:[#allocation19_spill] sm:$0xff] %v12360_v24  ;;  %v1050_v37 = vadd.f32 %v1049_v3, %v12052_v48  ;;  %v1051_v15 = vpop.f32.mrb[9].mxu0  ;;  %v16025_v24 = vrot.slane %v12118_v4, 4  ;;  %v7731_v34 = vsel %vm2867_vm12, %v16026_v1, %v12147_v46 }
 0x110   : > { %v1255_v42 = vadd.f32 %v1254_v18, %v12052_v48  ;;  %v1052_v25 = vadd.f32 %v1051_v15, %v12052_v48  ;;  %v1256_v52 = vpop.f32.mrb[9].mxu1  ;;  %6917 = vrot.lane.b32.xlu1 %v12321_v5, %s11355_s16  ;;  %v1053_v26 = vpop.f32.mrb[10].mxu0 }
 0x111   : > { %v12372_v3 = vpop.permute.xlu0 %7682  ;;  %v1797_v18 = vmax.f32 %v1050_v37, 0.0  ;;  %v1257_v0 = vadd.f32 %v1256_v52, %v12052_v48  ;;  %v1258_v6 = vpop.f32.mrb[10].mxu1  ;;  %v5698_v26 = vsel %vm4901_vm11, %v16025_v24, %v12118_v4  ;;  %v16032_v52 = vrot.slane %v12236_v8, 4 }
 0x112   : > { %16140 = vst [vmem:[#allocation20_spill] sm:$0xff] %v12372_v3  ;;  %v1807_v2 = vmax.f32 %v1255_v42, 0.0  ;;  %v1798_v62 = vmax.f32 %v1052_v25, 0.0  ;;  %v1054_v15 = vpop.f32.mrb[11].mxu0  ;;  %v1259_v63 = vpop.f32.mrb[11].mxu1  ;;  %4837 = vrot.lane.b32.xlu0 %v4795_v16, %s11350_s27  ;;  %v16024_v6 = vrot.slane %v12208_v14, 4 }
 0x113   : > { %v1808_v37 = vmax.f32 %v1257_v0, 0.0  ;;  %v5759_v63 = vmul.bf16 %v12317_v20, %v5698_v26  ;;  %v16027_v16 = vrot.slane %v12132_v17, 4  ;;  %v12393_v27 = vpop.permute.xlu1 %7680  ;;  %v7713_v25 = vrot.slane %v12249_v36, 4 }
 0x114   : > { %v12384_v42 = vpack.c.bf16 %v1798_v62, %v1797_v18  ;;  %2803 = vrot.lane.b32.xlu1 %v2761_v30, %s11352_s21  ;;  %16141 = vst [vmem:[#allocation21_spill] sm:$0xff] %v12393_v27  ;;  %v5703_v30 = vsel %vm2700_vm10, %v16024_v6, %v16028_v35  ;;  %v16031_v62 = vrot.slane %v12229_v47, 4  ;;  %v7793_v18 = vmul.bf16 %v12317_v20, %v7731_v34 }
 0x115   : > { %v12395_v0 = vpack.c.bf16 %v1808_v37, %v1807_v2  ;;  %v6619_v15 = vsel %vm3977_vm13, %v16027_v16, %v12132_v17  ;;  %v12413_v26 = vpop.permute.xlu0 %2654  ;;  %v16037_v34 = vrot.slane %v12241_v13, 4  ;;  %v5704_v35 = vsel %vm4901_vm11, %v5703_v30, %v12225_v43 }
 0x116   : > { %2006 = vst [vmem:[#allocation2 + $0x14] sm:$0xff] %v12384_v42  ;;  %5007 = vst [vmem:[#allocation3 + $0x2a0] sm:$0xff] %v12384_v42  ;;  %5801 = vrot.lane.b32.xlu0 %v5759_v63, %s11349_s26  ;;  %v6624_v63 = vsel %vm2700_vm10, %v16031_v62, %v16032_v52  ;;  %v6681_v16 = vmul.bf16 %v12317_v20, %v6619_v15  ;;  %v5762_v20 = vmul.bf16 %v12321_v5, %v5704_v35 }
 0x117   : > { %16142 = vst [vmem:[#allocation22_spill] sm:$0xff] %v12413_v26  ;;  %2011 = vst [vmem:[#allocation2 + $0x3c] sm:$0xff] %v12395_v0  ;;  %v1131_v37 = vpop.f32.mrb[12].mxu0  ;;  %v6625_v30 = vsel %vm3977_vm13, %v6624_v63, %v12236_v8  ;;  %v16038_v35 = vrot.slane %v12071_v7, 4  ;;  %v16143_v63 = vrot.slane %v12299_v57, 4 }
 0x118   : > { %5012 = vst [vmem:[#allocation3 + $0x2c8] sm:$0xff] %v12395_v0  ;;  %v1132_v6 = vadd.f32 %v1131_v37, %v12052_v48  ;;  %v1336_v24 = vpop.f32.mrb[12].mxu1  ;;  %v1133_v1 = vpop.f32.mrb[13].mxu0  ;;  %7835 = vrot.lane.b32.xlu1 %v7793_v18, %s16111_s23  ;;  %v7736_v37 = vsel %vm2700_vm10, %v16037_v34, %v7713_v25 }
 0x119   : > { %v1337_v26 = vadd.f32 %v1336_v24, %v12052_v48  ;;  %v1134_v3 = vadd.f32 %v1133_v1, %v12052_v48  ;;  %v1338_v62 = vpop.f32.mrb[13].mxu1  ;;  %v1135_v18 = vpop.f32.mrb[14].mxu0  ;;  %v16039_v24 = vrot.slane %v12289_v53, 4 }
 0x11a   : > { %v1801_v52 = vmax.f32 %v1132_v6, 0.0  ;;  %v1339_v27 = vadd.f32 %v1338_v62, %v12052_v48  ;;  %v1340_v38 = vpop.f32.mrb[14].mxu1  ;;  %6723 = vrot.lane.b32.xlu0 %v6681_v16, %s11348_s24  ;;  %v12440_v1 = vpop.permute.xlu1 %2652  ;;  %v6602_v6 = vrot.slane %v12295_v40, 4  ;;  %v7737_v16 = vsel %vm2867_vm12, %v7736_v37, %v12249_v36 }
 0x11b   : > { %v1811_v15 = vmax.f32 %v1337_v26, 0.0  ;;  %v1802_v2 = vmax.f32 %v1134_v3, 0.0  ;;  %v1136_v23 = vpop.f32.mrb[15].mxu0  ;;  %v1341_v62 = vpop.f32.mrb[15].mxu1  ;;  %v6684_v38 = vmul.bf16 %v12321_v5, %v6625_v30  ;;  %v7738_v18 = vsel %vm2700_vm10, %v7713_v25, %v16143_v63 }
 0x11c   : > { %v1812_v34 = vmax.f32 %v1339_v27, 0.0  ;;  %5807 = vrot.lane.b32.xlu1 %v5762_v20, %s11349_s26  ;;  %v12451_v26 = vpop.permute.xlu0 %4685  ;;  %v16144_v27 = vrot.slane %v12091_v32, 4  ;;  %v16145_v20 = vrot.slane %v12089_v31, 4  ;;  %v16040_v62 = vrot.slane %v12105_v39, 4 }
 0x11d   : > { %v12453_v23 = vpack.c.bf16 %v1802_v2, %v1801_v52  ;;  %v16146_v36 = vrot.slane %v12225_v43, 4  ;;  %v16147_v2 = vrot.slane %v12236_v8, 4  ;;  %v16148_v8 = vrot.slane %v12073_v29, 4 }
 0x11e   : > { %v10982_v3 = vpack.c.bf16 %v1812_v34, %v1811_v15  ;;  %6729 = vrot.lane.b32.xlu0 %v6684_v38, %s11348_s24  ;;  %v3811_v30 = vsel %vm2700_vm10, %v16145_v20, %v16144_v27  ;;  %v12476_v34 = vsel %vm2867_vm12, %v7738_v18, %v12299_v57  ;;  %v7796_v15 = vmul.bf16 %v12321_v5, %v7737_v16  ;;  %v12487_v63 = vpop.permute.xlu1 %3763 }
 0x11f   : > { %v5705_v25 = vsel %vm2700_vm10, %v16146_v36, %v16039_v24  ;;  %2008 = vst [vmem:[#allocation2 + $0x24] sm:$0xff] %v12453_v23  ;;  %5009 = vst [vmem:[#allocation3 + $0x2b0] sm:$0xff] %v12453_v23  ;;  %v1213_v52 = vpop.f32.mrb[16].mxu0  ;;  %v6626_v31 = vsel %vm2700_vm10, %v16147_v2, %v6602_v6  ;;  %v2701_v38 = vsel %vm2700_vm10, %v16148_v8, %v16038_v35  ;;  %v2950_v35 = vld [vmem:[#allocation2 + $0x8] sm:$0xff] }
 0x120   : > { %2013 = vst [vmem:[#allocation2 + $0x4c] sm:$0xff] %v10982_v3  ;;  %5014 = vst [vmem:[#allocation3 + $0x2d8] sm:$0xff] %v10982_v3  ;;  %v1214_v43 = vadd.f32 %v1213_v52, %v12052_v48  ;;  %v1215_v37 = vpop.f32.mrb[17].mxu0  ;;  %6913 = vrot.lane.b32.xlu1 %v12345_v19, %s11355_s16  ;;  %v3812_v20 = vsel %vm3809_vm7, %v3811_v30, %v12091_v32  ;;  %v12496_v5 = vsel %vm4901_vm11, %v5705_v25, %v12289_v53 }
 0x121   : > { %v1418_v18 = vpop.f32.mrb[16].mxu1  ;;  %v1216_v27 = vadd.f32 %v1215_v37, %v12052_v48  ;;  %v1217_v52 = vpop.f32.mrb[18].mxu0  ;;  %v12502_v2 = vsel %vm3977_vm13, %v6626_v31, %v12295_v40 }
 0x122   : > { %v1805_v16 = vmax.f32 %v1214_v43, 0.0  ;;  %v1419_v29 = vadd.f32 %v1418_v18, %v12052_v48  ;;  %v1420_v36 = vpop.f32.mrb[17].mxu1  ;;  %7841 = vrot.lane.b32.xlu0 %v7796_v15, %s16111_s23  ;;  %v12504_v37 = vpop.permute.xlu0 %4687  ;;  %v16149_v43 = vrot.slane %v12103_v51, 4  ;;  %v16041_v18 = vrot.slane %v12151_v50, 4 }
 0x123   : > { %v1806_v8 = vmax.f32 %v1216_v27, 0.0  ;;  %v1421_v30 = vadd.f32 %v1420_v36, %v12052_v48  ;;  %v1422_v3 = vpop.f32.mrb[18].mxu1  ;;  %v1218_v52 = vpop.f32.mrb[19].mxu0  ;;  %v16043_v36 = vrot.slane %v12297_v56, 4 }
 0x124   : > { %v4734_v15 = vsel %vm2700_vm10, %v16149_v43, %v16040_v62  ;;  %v1815_v31 = vmax.f32 %v1419_v29, 0.0  ;;  %v1423_v24 = vpop.f32.mrb[19].mxu1  ;;  %6921 = vrot.lane.b32.xlu1 %v12347_v45, %s11355_s16  ;;  %v16042_v3 = vrot.slane %v12120_v49, 4  ;;  %v3872_v43 = vmul.bf16 %v3812_v20, %v2950_v35  ;;  %v12537_v20 = vpop.permute.xlu1 %3765 }
 0x125   : > { %v12521_v25 = vpack.c.bf16 %v1806_v8, %v1805_v16  ;;  %v1816_v51 = vmax.f32 %v1421_v30, 0.0  ;;  %v2702_v52 = vsel %vm2698_vm8, %v2701_v38, %v12071_v7  ;;  %v4735_v27 = vsel %vm4732_vm9, %v4734_v15, %v12105_v39 }
 0x126   : > { %2993 = vrot.lane.b32.xlu0 %v2950_v35, %s11356_s17  ;;  %v16152_v16 = vrot.slane %v12147_v46, 4  ;;  %v16153_v38 = vrot.slane %v12118_v4, 4  ;;  %v6628_v46 = vsel %vm2700_vm10, %v6602_v6, %v16043_v36  ;;  %v4796_v40 = vmul.bf16 %v4735_v27, %v2950_v35 }
 0x127   : > { %16150 = vst [vmem:[#allocation23_spill] sm:$0xff] %v12521_v25  ;;  %2010 = vst [vmem:[#allocation2 + $0x34] sm:$0xff] %v12521_v25  ;;  %v12526_v24 = vpack.c.bf16 %v1816_v51, %v1815_v31  ;;  %v1295_v29 = vpop.f32.mrb[20].mxu0  ;;  %v2762_v31 = vmul.bf16 %v2950_v35, %v2702_v52  ;;  %v6629_v35 = vsel %vm3977_vm13, %v6628_v46, %v12297_v56 }
 0x128   : > { %5011 = vst [vmem:[#allocation3 + $0x2c0] sm:$0xff] %v12521_v25  ;;  %v7732_v8 = vsel %vm2700_vm10, %v16152_v16, %v16041_v18  ;;  %v1296_v30 = vadd.f32 %v1295_v29, %v12052_v48  ;;  %v1297_v62 = vpop.f32.mrb[21].mxu0  ;;  %3915 = vrot.lane.b32.xlu1 %v3872_v43, %s16068_s29  ;;  %v5699_v15 = vsel %vm2700_vm10, %v16153_v38, %v16042_v3  ;;  %v12552_v16 = vpop.permute.xlu0 %5654  ;;  %v16050_v25 = vrot.slane %v12292_v55, 4 }
 0x129   : > { %16151 = vst [vmem:[#allocation24_spill] sm:$0xff] %v12526_v24  ;;  %16154 = vst [vmem:[#allocation25_spill] sm:$0xff] %v12552_v16  ;;  %v1500_v43 = vpop.f32.mrb[20].mxu1  ;;  %v1298_v29 = vadd.f32 %v1297_v62, %v12052_v48  ;;  %v1299_v3 = vpop.f32.mrb[22].mxu0  ;;  %v7733_v6 = vsel %vm2867_vm12, %v7732_v8, %v12151_v50 }
 0x12a   : > { %2015 = vst [vmem:[#allocation2 + $0x5c] sm:$0xff] %v12526_v24  ;;  %5016 = vst [vmem:[#allocation3 + $0x2e8] sm:$0xff] %v12526_v24  ;;  %v1809_v52 = vmax.f32 %v1296_v30, 0.0  ;;  %v1501_v38 = vadd.f32 %v1500_v43, %v12052_v48  ;;  %v1502_v18 = vpop.f32.mrb[21].mxu1  ;;  %2805 = vrot.lane.b32.xlu0 %v2762_v31, %s11352_s21  ;;  %v1300_v16 = vpop.f32.mrb[23].mxu0  ;;  %v7794_v30 = vmul.bf16 %v12345_v19, %v7733_v6  ;;  %v16158_v43 = vrot.slane %v12299_v57, 4 }
 0x12b   : > { %v1810_v36 = vmax.f32 %v1298_v29, 0.0  ;;  %v1503_v51 = vadd.f32 %v1502_v18, %v12052_v48  ;;  %v1504_v24 = vpop.f32.mrb[22].mxu1  ;;  %v5700_v3 = vsel %vm4901_vm11, %v5699_v15, %v12120_v49  ;;  %v16155_v18 = vrot.slane %v12134_v22, 4 }
 0x12c   : > { %v1819_v62 = vmax.f32 %v1501_v38, 0.0  ;;  %v1505_v4 = vpop.f32.mrb[23].mxu1  ;;  %4839 = vrot.lane.b32.xlu1 %v4796_v40, %s11350_s27  ;;  %v16156_v24 = vrot.slane %v12132_v17, 4  ;;  %v16157_v16 = vrot.slane %v12301_v61, 4  ;;  %v5760_v15 = vmul.bf16 %v12345_v19, %v5700_v3 }
 0x12d   : > { %v10981_v27 = vpack.c.bf16 %v1810_v36, %v1809_v52  ;;  %v1820_v8 = vmax.f32 %v1503_v51, 0.0  ;;  %v12582_v4 = vpop.permute.xlu1 %5652  ;;  %v16159_v17 = vrot.slane %v12289_v53, 4  ;;  %v12589_v52 = vpop.permute.xlu0 %6572  ;;  %v6686_v40 = vmul.bf16 %v12347_v45, %v6629_v35 }
 0x12e   : > { %v6620_v31 = vsel %vm2700_vm10, %v16156_v24, %v16155_v18  ;;  %v7740_v29 = vsel %vm2700_vm10, %v16158_v43, %v16157_v16  ;;  %7837 = vrot.lane.b32.xlu0 %v7794_v30, %s16111_s23 }
 0x12f   : > { %2012 = vst [vmem:[#allocation2 + $0x44] sm:$0xff] %v10981_v27  ;;  %5013 = vst [vmem:[#allocation3 + $0x2d0] sm:$0xff] %v10981_v27  ;;  %v10986_v36 = vpack.c.bf16 %v1820_v8, %v1819_v62  ;;  %v1377_v51 = vpop.f32.mrb[24].mxu0  ;;  %v5707_v46 = vsel %vm2700_vm10, %v16159_v17, %v16050_v25  ;;  %v6621_v6 = vsel %vm3977_vm13, %v6620_v31, %v12134_v22  ;;  %v2680_v27 = vrot.slane %v12160_v9, 4  ;;  %v16179_v25 = vld [vmem:[#allocation15_spill] sm:$0xff] }
 0x130   : > { %v1378_v57 = vadd.f32 %v1377_v51, %v12052_v48  ;;  %v1379_v38 = vpop.f32.mrb[25].mxu0  ;;  %5803 = vrot.lane.b32.xlu1 %v5760_v15, %s11349_s26  ;;  %v7741_v62 = vsel %vm2867_vm12, %v7740_v29, %v12301_v61  ;;  %v6682_v35 = vmul.bf16 %v12345_v19, %v6621_v6  ;;  %v5708_v31 = vsel %vm4901_vm11, %v5707_v46, %v12292_v55 }
 0x131   : > { %2017 = vst [vmem:[#allocation2 + $0x6c] sm:$0xff] %v10986_v36  ;;  %5018 = vst [vmem:[#allocation3 + $0x2f8] sm:$0xff] %v10986_v36  ;;  %v1582_v53 = vpop.f32.mrb[24].mxu1  ;;  %v1380_v30 = vadd.f32 %v1379_v38, %v12052_v48  ;;  %v1381_v3 = vpop.f32.mrb[26].mxu0  ;;  %v7798_v17 = vmul.bf16 %v12347_v45, %v7741_v62  ;;  %v16160_v6 = vrot.slane %v12071_v7, 4  ;;  %v12618_v62 = vld [vmem:[#allocation2 + $0x10] sm:$0xff] }
 0x132   : > { %v1813_v8 = vmax.f32 %v1378_v57, 0.0  ;;  %v1583_v18 = vadd.f32 %v1582_v53, %v12052_v48  ;;  %v1584_v24 = vpop.f32.mrb[25].mxu1  ;;  %6733 = vrot.lane.b32.xlu0 %v6686_v40, %s11348_s24  ;;  %v1382_v15 = vpop.f32.mrb[27].mxu0  ;;  %v2681_v57 = vrot.slane %v12169_v11, 4 }
 0x133   : > { %v1814_v16 = vmax.f32 %v1380_v30, 0.0  ;;  %v1585_v43 = vadd.f32 %v1584_v24, %v12052_v48  ;;  %v1586_v29 = vpop.f32.mrb[26].mxu1  ;;  %v12609_v38 = vpop.permute.xlu1 %7684  ;;  %v2703_v46 = vsel %vm2700_vm10, %v16160_v6, %v2680_v27  ;;  %v5764_v30 = vmul.bf16 %v12347_v45, %v5708_v31 }
 0x134   : > { %v1823_v36 = vmax.f32 %v1583_v18, 0.0  ;;  %v1587_v51 = vpop.f32.mrb[27].mxu1  ;;  %6725 = vrot.lane.b32.xlu1 %v6682_v35, %s11348_s24  ;;  %v12614_v53 = vpop.permute.xlu0 %6574  ;;  %v2705_v7 = vsel %vm2700_vm10, %v2680_v27, %v2681_v57  ;;  %v3791_v45 = vrot.slane %v12181_v28, 4 }
 0x135   : > { %v10983_v40 = vpack.c.bf16 %v1814_v16, %v1813_v8  ;;  %v1824_v19 = vmax.f32 %v1585_v43, 0.0  ;;  %v2704_v8 = vsel %vm2698_vm8, %v2703_v46, %v12160_v9  ;;  %v12636_v51 = vld [vmem:[#allocation2 + $0x18] sm:$0xff] }
 0x136   : > { %7845 = vrot.lane.b32.xlu0 %v7798_v17, %s16111_s23  ;;  %v2763_v9 = vmul.bf16 %v12618_v62, %v2704_v8  ;;  %v4713_v17 = vrot.slane %v12190_v21, 4 }
 0x137   : > { %2014 = vst [vmem:[#allocation2 + $0x54] sm:$0xff] %v10983_v40  ;;  %5015 = vst [vmem:[#allocation3 + $0x2e0] sm:$0xff] %v10983_v40  ;;  %v10988_v3 = vpack.c.bf16 %v1824_v19, %v1823_v36  ;;  %v12632_v29 = vpop.permute.xlu1 %2656 }
 0x138   : > { %5811 = vrot.lane.b32.xlu1 %v5764_v30, %s11349_s26  ;;  %v12639_v40 = vpop.permute.xlu0 %7686  ;;  %v2706_v30 = vsel %vm2698_vm8, %v2705_v7, %v12169_v11 }
 0x139   : > { %2019 = vst [vmem:[#allocation2 + $0x7c] sm:$0xff] %v10988_v3  ;;  %5020 = vst [vmem:[#allocation3 + $0x308] sm:$0xff] %v10988_v3  ;;  %v1459_v18 = vpop.f32.mrb[28].mxu0  ;;  %v1664_v24 = vpop.f32.mrb[28].mxu1 }
 0x13a   : > { %v1460_v35 = vadd.f32 %v1459_v18, %v12052_v48  ;;  %v1665_v31 = vadd.f32 %v1664_v24, %v12052_v48  ;;  %v1461_v16 = vpop.f32.mrb[29].mxu0  ;;  %v1666_v43 = vpop.f32.mrb[29].mxu1  ;;  %2995 = vrot.lane.b32.xlu0 %v12618_v62, %s11356_s17 }
 0x13b   : > { %v1462_v27 = vadd.f32 %v1461_v16, %v12052_v48  ;;  %v1667_v15 = vadd.f32 %v1666_v43, %v12052_v48  ;;  %v1463_v36 = vpop.f32.mrb[30].mxu0  ;;  %v1668_v46 = vpop.f32.mrb[30].mxu1  ;;  %v16161_v16 = vrot.slane %v12091_v32, 4 }
 0x13c   : > { %v1817_v19 = vmax.f32 %v1460_v35, 0.0  ;;  %v1827_v6 = vmax.f32 %v1665_v31, 0.0  ;;  %2807 = vrot.lane.b32.xlu1 %v2763_v9, %s11352_s21  ;;  %v1464_v18 = vpop.f32.mrb[31].mxu0  ;;  %v1669_v24 = vpop.f32.mrb[31].mxu1  ;;  %v4714_v36 = vrot.slane %v12204_v10, 4  ;;  %v2764_v35 = vmul.bf16 %v12636_v51, %v2706_v30 }
 0x13d   : > { %v1818_v3 = vmax.f32 %v1462_v27, 0.0  ;;  %v1828_v8 = vmax.f32 %v1667_v15, 0.0  ;;  %v3813_v43 = vsel %vm2700_vm10, %v16161_v16, %v3791_v45  ;;  %v16162_v46 = vrot.slane %v12105_v39, 4 }
 0x13e   : > { %2997 = vrot.lane.b32.xlu0 %v12636_v51, %s11356_s17  ;;  %v3792_v27 = vrot.slane %v12195_v54, 4  ;;  %v3814_v32 = vsel %vm3809_vm7, %v3813_v43, %v12181_v28  ;;  %v4738_v15 = vsel %vm2700_vm10, %v4713_v17, %v4714_v36  ;;  %v12668_v28 = vpop.permute.xlu1 %2658 }
 0x13f   : > { %v10985_v31 = vpack.c.bf16 %v1818_v3, %v1817_v19  ;;  %v10990_v9 = vpack.c.bf16 %v1828_v8, %v1827_v6  ;;  %v4736_v7 = vsel %vm2700_vm10, %v16162_v46, %v4713_v17  ;;  %v12661_v19 = vpop.permute.xlu0 %4689  ;;  %v3873_v6 = vmul.bf16 %v3814_v32, %v12618_v62 }
 0x140   : > { %2809 = vrot.lane.b32.xlu1 %v2764_v35, %s11352_s21  ;;  %v4737_v30 = vsel %vm4732_vm9, %v4736_v7, %v12190_v21  ;;  %v3815_v17 = vsel %vm2700_vm10, %v3791_v45, %v3792_v27  ;;  %v4739_v21 = vsel %vm4732_vm9, %v4738_v15, %v12204_v10  ;;  %v16163_v7 = vrot.slane %v12208_v14, 4 }
 0x141   : > { %2016 = vst [vmem:[#allocation2 + $0x64] sm:$0xff] %v10985_v31  ;;  %5017 = vst [vmem:[#allocation3 + $0x2f0] sm:$0xff] %v10985_v31  ;;  %v4797_v43 = vmul.bf16 %v4737_v30, %v12618_v62  ;;  %v16164_v45 = vrot.slane %v12120_v49, 4  ;;  %v4798_v62 = vmul.bf16 %v4739_v21, %v12636_v51  ;;  %v3816_v15 = vsel %vm3809_vm7, %v3815_v17, %v12195_v54 }
 0x142   : > { %2021 = vst [vmem:[#allocation2 + $0x8c] sm:$0xff] %v10990_v9  ;;  %5022 = vst [vmem:[#allocation3 + $0x318] sm:$0xff] %v10990_v9  ;;  %v1541_v39 = vpop.f32.mrb[32].mxu0  ;;  %6915 = vrot.lane.b32.xlu0 %v12384_v42, %s11355_s16  ;;  %v16165_v30 = vrot.slane %v12241_v13, 4  ;;  %v16051_v49 = vrot.slane %v12336_v60, 4  ;;  %v3874_v21 = vmul.bf16 %v3816_v15, %v12636_v51 }
 0x143   : > { %v1542_v3 = vadd.f32 %v1541_v39, %v12052_v48  ;;  %v1543_v8 = vpop.f32.mrb[33].mxu0  ;;  %v5701_v32 = vsel %vm2700_vm10, %v16164_v45, %v16163_v7  ;;  %v16169_v45 = vrot.slane %v12134_v22, 4 }
 0x144   : > { %v1746_v18 = vpop.f32.mrb[32].mxu1  ;;  %v1544_v24 = vadd.f32 %v1543_v8, %v12052_v48  ;;  %v1545_v16 = vpop.f32.mrb[34].mxu0  ;;  %3917 = vrot.lane.b32.xlu1 %v3873_v6, %s16068_s29  ;;  %v5702_v17 = vsel %vm4901_vm11, %v5701_v32, %v12208_v14 }
 0x145   : > { %v1821_v35 = vmax.f32 %v1542_v3, 0.0  ;;  %v1747_v31 = vadd.f32 %v1746_v18, %v12052_v48  ;;  %v1748_v9 = vpop.f32.mrb[33].mxu1  ;;  %v1546_v46 = vpop.f32.mrb[35].mxu0  ;;  %v16166_v3 = vrot.slane %v12151_v50, 4  ;;  %v16168_v50 = vrot.slane %v12229_v47, 4 }
 0x146   : > { %v1822_v39 = vmax.f32 %v1544_v24, 0.0  ;;  %v1749_v8 = vadd.f32 %v1748_v9, %v12052_v48  ;;  %4841 = vrot.lane.b32.xlu0 %v4797_v43, %s11350_s27  ;;  %v1750_v6 = vpop.f32.mrb[34].mxu1  ;;  %v16049_v24 = vrot.slane %v12327_v41, 4  ;;  %v12697_v9 = vpop.permute.xlu0 %4691 }
 0x147   : > { %v7734_v18 = vsel %vm2700_vm10, %v16166_v3, %v16165_v30  ;;  %v1831_v16 = vmax.f32 %v1747_v31, 0.0  ;;  %16167 = vst [vmem:[#allocation26_spill] sm:$0xff] %v12697_v9  ;;  %v1751_v7 = vpop.f32.mrb[35].mxu1  ;;  %v6622_v31 = vsel %vm2700_vm10, %v16169_v45, %v16168_v50  ;;  %v12708_v6 = vpop.permute.xlu1 %3767 }
 0x148   : > { %v10987_v43 = vpack.c.bf16 %v1822_v39, %v1821_v35  ;;  %v1832_v46 = vmax.f32 %v1749_v8, 0.0  ;;  %4843 = vrot.lane.b32.xlu1 %v4798_v62, %s11350_s27  ;;  %v5761_v39 = vmul.bf16 %v12384_v42, %v5702_v17  ;;  %v7735_v51 = vsel %vm2867_vm12, %v7734_v18, %v12241_v13  ;;  %v2953_v7 = vld [vmem:[#allocation2 + $0x20] sm:$0xff] }
 0x149   : > { %v5711_v22 = vsel %vm2700_vm10, %v16051_v49, %v16049_v24  ;;  %v7795_v14 = vmul.bf16 %v12384_v42, %v7735_v51  ;;  %v6623_v32 = vsel %vm3977_vm13, %v6622_v31, %v12229_v47  ;;  %v2682_v62 = vrot.slane %v12253_v44, 4 }
 0x14a   : > { %2018 = vst [vmem:[#allocation2 + $0x74] sm:$0xff] %v10987_v43  ;;  %5019 = vst [vmem:[#allocation3 + $0x300] sm:$0xff] %v10987_v43  ;;  %v10992_v35 = vpack.c.bf16 %v1832_v46, %v1831_v16  ;;  %3919 = vrot.lane.b32.xlu0 %v3874_v21, %s16068_s29  ;;  %v12724_v15 = vpop.permute.xlu0 %5658  ;;  %v6683_v3 = vmul.bf16 %v12384_v42, %v6623_v32  ;;  %v5712_v18 = vsel %vm4901_vm11, %v5711_v22, %v12327_v41 }
 0x14b   : > { %16170 = vst [vmem:[#allocation27_spill] sm:$0xff] %v12724_v15  ;;  %v12732_v46 = vpop.permute.xlu1 %3769  ;;  %v2707_v50 = vsel %vm2700_vm10, %v2681_v57, %v2682_v62  ;;  %v2683_v42 = vrot.slane %v12260_v58, 4  ;;  %v5766_v45 = vmul.bf16 %v12395_v0, %v5712_v18  ;;  %v6091_v31 = vcombine.high %v12268_v59, %v12268_v59  ;;  %v12749_v57 = vld [vmem:[#allocation2 + $0x28] sm:$0xff] }
 0x14c   : > { %2023 = vst [vmem:[#allocation2 + $0x9c] sm:$0xff] %v10992_v35  ;;  %5024 = vst [vmem:[#allocation3 + $0x328] sm:$0xff] %v10992_v35  ;;  %5805 = vrot.lane.b32.xlu1 %v5761_v39, %s11349_s26  ;;  %v4715_v39 = vrot.slane %v12276_v33, 4  ;;  %v2708_v11 = vsel %vm2698_vm8, %v2707_v50, %v12253_v44  ;;  %v3793_v59 = vrot.slane %v12270_v12, 4 }
 0x14d   : > { %v1623_v8 = vpop.f32.mrb[36].mxu0  ;;  %16171 = vst [vmem:[#allocation28_spill] sm:$0xff] %v12732_v46  ;;  %v2709_v22 = vsel %vm2700_vm10, %v2682_v62, %v2683_v42 }
 0x14e   : > { %v1624_v13 = vadd.f32 %v1623_v8, %v12052_v48  ;;  %v1625_v30 = vpop.f32.mrb[37].mxu0  ;;  %7839 = vrot.lane.b32.xlu0 %v7795_v14, %s16111_s23  ;;  %v12744_v51 = vpop.permute.xlu0 %6576  ;;  %v2765_v8 = vmul.bf16 %v2953_v7, %v2708_v11  ;;  %v4740_v18 = vsel %vm2700_vm10, %v4714_v36, %v4715_v39 }
 0x14f   : > { %v1626_v16 = vadd.f32 %v1625_v30, %v12052_v48  ;;  %v1627_v43 = vpop.f32.mrb[38].mxu0  ;;  %16172 = vst [vmem:[#allocation29_spill] sm:$0xff] %v12744_v51  ;;  %v12755_v14 = vpop.permute.xlu1 %5656  ;;  %v16173_v30 = vld [vmem:[#allocation7_spill] sm:$0xff]  ;;  %v16195_v51 = vrot.slane %v12292_v55, 4  ;;  %v16199_v55 = vmul.bf16 %v12453_v23, %v12496_v5  ;;  %v16058_v5 = vrot.slane %v12537_v20, 4 }
 0x150   : > { %v1825_v47 = vmax.f32 %v1624_v13, 0.0  ;;  %v1628_v21 = vpop.f32.mrb[39].mxu0  ;;  %6727 = vrot.lane.b32.xlu1 %v6683_v3, %s11348_s24  ;;  %v6105_v3 = vrot.slane %v6091_v31, %v16173_v30  ;;  %v16175_v31 = vld [vmem:[#allocation11_spill] sm:$0xff] }
 0x151   : > { %v1826_v17 = vmax.f32 %v1626_v16, 0.0  ;;  %v16174_v16 = vld [vmem:[#allocation10_spill] sm:$0xff]  ;;  %v2710_v21 = vsel %vm2698_vm8, %v2709_v22, %v12260_v58  ;;  %v4716_v10 = vrot.slane %v16175_v31, 4 }
 0x152   : > { %2999 = vrot.lane.b32.xlu0 %v2953_v7, %s11356_s17  ;;  %v3794_v62 = vrot.slane %v16174_v16, 4  ;;  %v2766_v11 = vmul.bf16 %v12749_v57, %v2710_v21  ;;  %v6107_v22 = vcombine.high %v6105_v3, %v6105_v3 }
 0x153   : > { %v10989_v35 = vpack.c.bf16 %v1826_v17, %v1825_v47  ;;  %v4742_v21 = vsel %vm2700_vm10, %v4715_v39, %v4716_v10  ;;  %v16181_v39 = vld [vmem:[#allocation17_spill] sm:$0xff] }
 0x154   : > { %5815 = vrot.lane.b32.xlu1 %v5766_v45, %s11349_s26  ;;  %v3817_v45 = vsel %vm2700_vm10, %v3792_v27, %v3793_v59  ;;  %v16056_v49 = vrot.slane %v16181_v39, 4 }
 0x155   : > { %2020 = vst [vmem:[#allocation2 + $0x84] sm:$0xff] %v10989_v35  ;;  %5021 = vst [vmem:[#allocation3 + $0x310] sm:$0xff] %v10989_v35  ;;  %v12773_v35 = vpop.permute.xlu0 %6578 }
 0x156   : > { %v1705_v32 = vpop.f32.mrb[40].mxu0  ;;  %3001 = vrot.lane.b32.xlu0 %v12749_v57, %s11356_s17  ;;  %16176 = vst [vmem:[#allocation7_spill] sm:$0xff] %v12773_v35  ;;  %v16190_v35 = vld [vmem:[#allocation20_spill] sm:$0xff] }
 0x157   : > { %v1706_v13 = vadd.f32 %v1705_v32, %v12052_v48  ;;  %v1707_v44 = vpop.f32.mrb[41].mxu0  ;;  %v4741_v32 = vsel %vm4732_vm9, %v4740_v18, %v12276_v33  ;;  %v3795_v33 = vrot.slane %v16179_v25, 4 }
 0x158   : > { %v1708_v43 = vadd.f32 %v1707_v44, %v12052_v48  ;;  %v1709_v47 = vpop.f32.mrb[42].mxu0  ;;  %2811 = vrot.lane.b32.xlu1 %v2765_v8, %s11352_s21  ;;  %v3819_v8 = vsel %vm2700_vm10, %v3793_v59, %v3794_v62  ;;  %v4799_v27 = vmul.bf16 %v4741_v32, %v2953_v7  ;;  %v3818_v44 = vsel %vm3809_vm7, %v3817_v45, %v12270_v12  ;;  %v12797_v32 = vld [vmem:[%s16000_s7 + $0x30] sm:$0xaa] }
 0x159   : > { %v1829_v17 = vmax.f32 %v1706_v13, 0.0  ;;  %v1710_v50 = vpop.f32.mrb[43].mxu0  ;;  %v12781_v13 = vpop.permute.xlu1 %7688  ;;  %v3875_v59 = vmul.bf16 %v3818_v44, %v2953_v7  ;;  %v3820_v18 = vsel %vm3809_vm7, %v3819_v8, %v16174_v16  ;;  %v6349_v12 = vpack.i.b16 %v6105_v3, %v6105_v3 }
 0x15a   : > { %v1830_v36 = vmax.f32 %v1708_v43, 0.0  ;;  %6919 = vrot.lane.b32.xlu0 %v12453_v23, %s11355_s16  ;;  %v16177_v43 = vld [vmem:[#allocation13_spill] sm:$0xff]  ;;  %v16178_v50 = vld [vmem:[#allocation12_spill] sm:$0xff]  ;;  %v6356_v45 = vpack.i.b16 %v6107_v22, %v6107_v22  ;;  %v12800_v24 = vpop.permute.xlu0 %7690  ;;  %v3876_v7 = vmul.bf16 %v3820_v18, %v12749_v57  ;;  %v4743_v3 = vsel %vm4732_vm9, %v4742_v21, %v16175_v31 }
 0x15b   : > { %v2684_v47 = vrot.slane %v16177_v43, 4  ;;  %16182 = vst [vmem:[#allocation10_spill] sm:$0xff] %v12800_v24  ;;  %v16183_v8 = vrot.slane %v16178_v50, 4  ;;  %v4800_v18 = vmul.bf16 %v4743_v3, %v12749_v57  ;;  %v7203_v58 = vcombine.high %v12797_v32, %v12797_v32  ;;  %v16185_v21 = vld [vmem:[#allocation16_spill] sm:$0xff]  ;;  %v16188_v3 = vld [vmem:[#allocation18_spill] sm:$0xff] }
 0x15c   : > { %v10991_v54 = vpack.c.bf16 %v1830_v36, %v1829_v17  ;;  %2813 = vrot.lane.b32.xlu1 %v2766_v11, %s11352_s21  ;;  %v16180_v17 = vld [vmem:[#allocation14_spill] sm:$0xff] }
 0x15d   : > { %v4717_v36 = vrot.slane %v16180_v17, 4  ;;  %v2711_v22 = vsel %vm2700_vm10, %v2683_v42, %v2684_v47 }
 0x15e   : > { %2022 = vst [vmem:[#allocation2 + $0x94] sm:$0xff] %v10991_v54  ;;  %5023 = vst [vmem:[#allocation3 + $0x320] sm:$0xff] %v10991_v54  ;;  %4845 = vrot.lane.b32.xlu0 %v4799_v27, %s11350_s27  ;;  %v2713_v27 = vsel %vm2700_vm10, %v2684_v47, %v16183_v8  ;;  %v16186_v47 = vld [vmem:[#allocation8_spill] sm:$0xff] }
 0x15f   : > { %v1787_v11 = vpop.f32.mrb[44].mxu0  ;;  %v4744_v42 = vsel %vm2700_vm10, %v4716_v10, %v4717_v36  ;;  %v12823_v8 = vrot.slane %v6349_v12, %v16186_v47  ;;  %v2712_v10 = vsel %vm2698_vm8, %v2711_v22, %v16177_v43  ;;  %v16193_v43 = vmul.bf16 %v12453_v23, %v12476_v34 }
 0x160   : > { %v1788_v54 = vadd.f32 %v1787_v11, %v12052_v48  ;;  %3921 = vrot.lane.b32.xlu1 %v3875_v59, %s16068_s29  ;;  %v11009_v16 = vpop.f32.mrb[45].mxu0  ;;  %v3821_v48 = vsel %vm2700_vm10, %v3794_v62, %v3795_v33  ;;  %v12814_v11 = vpop.permute.xlu1 %2660  ;;  %v12826_v62 = vrot.slane %v6356_v45, %v16186_v47  ;;  %v2686_v45 = vrot.slane %v12440_v1, 4 }
 0x161   : > { %v1790_v44 = vpop.f32.mrb[46].mxu0  ;;  %16184 = vst [vmem:[#allocation11_spill] sm:$0xff] %v12814_v11  ;;  %v4718_v16 = vrot.slane %v16185_v21, 4  ;;  %v12841_v11 = vsel %vm2698_vm8, %v2713_v27, %v16178_v50  ;;  %v7217_v22 = vrot.slane %v7203_v58, %v16173_v30  ;;  %v4745_v27 = vsel %vm4732_vm9, %v4744_v42, %v16180_v17 }
 0x162   : > { %v1833_v59 = vmax.f32 %v1788_v54, 0.0  ;;  %3923 = vrot.lane.b32.xlu0 %v3876_v7, %s16068_s29  ;;  %v11010_v31 = vpop.f32.mrb[47].mxu0  ;;  %v3823_v54 = vsel %vm2700_vm10, %v3795_v33, %v16056_v49  ;;  %v16187_v7 = vld [vmem:[#allocation19_spill] sm:$0xff]  ;;  %v16057_v44 = vrot.slane %v16188_v3, 4  ;;  %v12845_v33 = vsel %vm3809_vm7, %v3821_v48, %v16179_v25 }
 0x163   : > { %v6604_v57 = vrot.slane %v16187_v7, 4  ;;  %v16189_v31 = vld [vmem:[#allocation21_spill] sm:$0xff]  ;;  %v12860_v25 = vsel %vm3809_vm7, %v3823_v54, %v16181_v39  ;;  %v4746_v48 = vsel %vm2700_vm10, %v4717_v36, %v4718_v16  ;;  %v16196_v58 = vrot.slane %v12297_v56, 4 }
 0x164   : > { %v10993_v24 = vpack.c.bf16 %v1833_v59, %v1833_v59  ;;  %4847 = vrot.lane.b32.xlu1 %v4800_v18, %s11350_s27  ;;  %v7716_v12 = vrot.slane %v16189_v31, 4  ;;  %v16191_v59 = vld [vmem:[#allocation22_spill] sm:$0xff]  ;;  %v12848_v18 = vpop.permute.xlu0 %4693  ;;  %v16197_v42 = vrot.slane %v12301_v61, 4  ;;  %v12879_v54 = vpop.permute.xlu1 %2662  ;;  %v4719_v61 = vrot.slane %v12451_v26, 4 }
 0x165   : > { %16192 = vst [vmem:[#allocation13_spill] sm:$0xff] %v12848_v18  ;;  %v6632_v17 = vsel %vm2700_vm10, %v6604_v57, %v16057_v44  ;;  %16198 = vst [vmem:[#allocation12_spill] sm:$0xff] %v12879_v54  ;;  %v16202_v49 = vrot.slane %v16191_v59, 4  ;;  %v16071_v18 = vrot.slane %v12639_v40, 4 }
 0x166   : > { %2025 = vst.msk [vmem:[#allocation2 + $0xa4] sm:$0xf] %vm2024_vm14, %v10993_v24  ;;  %7843 = vrot.lane.b32.xlu0 %v16193_v43, %s16111_s23  ;;  %v16194_v24 = vrot.slane %v12336_v60, 4  ;;  %v6630_v43 = vsel %vm2700_vm10, %v16196_v58, %v6604_v57  ;;  %v7742_v36 = vsel %vm2700_vm10, %v16197_v42, %v7716_v12  ;;  %v3797_v57 = vrot.slane %v12487_v63, 4  ;;  %v12893_v42 = vld [vmem:[#allocation2 + $0x30] sm:$0xff] }
 0x167   : > { %v2717_v44 = vsel %vm2700_vm10, %v2686_v45, %v16202_v49  ;;  %v12916_v49 = vrot.slane %v12797_v32, %v16173_v30  ;;  %v7461_v32 = vpack.i.b16 %v7217_v22, %v7217_v22 }
 0x168   : > { %v5709_v34 = vsel %vm2700_vm10, %v16195_v51, %v16194_v24  ;;  %5809 = vrot.lane.b32.xlu1 %v16199_v55, %s11349_s26  ;;  %v16200_v51 = vrot.slane %v16190_v35, 4  ;;  %v16201_v24 = vrot.slane %v16178_v50, 4  ;;  %v7219_v50 = vcombine.high %v7217_v22, %v7217_v22  ;;  %v12948_v55 = vld [vmem:[#allocation2 + $0x38] sm:$0xff]  ;;  %v12956_v22 = vpop.permute.xlu1 %3771 }
 0x169   : > { %16207 = vst [vmem:[#allocation14_spill] sm:$0xff] %v12956_v22 }
 0x16a   : > { %v7744_v56 = vsel %vm2700_vm10, %v7716_v12, %v16200_v51  ;;  %v2715_v58 = vsel %vm2700_vm10, %v16201_v24, %v2686_v45  ;;  %3003 = vrot.lane.b32.xlu0 %v12893_v42, %s11356_s17  ;;  %v12904_v12 = vsel %vm4732_vm9, %v4746_v48, %v16185_v21  ;;  %v12908_v51 = vsel %vm4901_vm11, %v5709_v34, %v12336_v60  ;;  %v12930_v48 = vpop.permute.xlu0 %4695 }
 0x16b   : > { %v12912_v24 = vsel %vm3977_vm13, %v6630_v43, %v16187_v7  ;;  %v12920_v45 = vsel %vm3977_vm13, %v6632_v17, %v16188_v3  ;;  %v12924_v21 = vsel %vm2867_vm12, %v7742_v36, %v16189_v31  ;;  %v12928_v60 = vsel %vm2867_vm12, %v7744_v56, %v16190_v35  ;;  %16203 = vst [vmem:[#allocation15_spill] sm:$0xff] %v12930_v48 }
 0x16c   : > { %v16204_v7 = vmul.bf16 %v12453_v23, %v12502_v2  ;;  %v12938_v34 = vsel %vm2698_vm8, %v2715_v58, %v12440_v1  ;;  %v12942_v31 = vsel %vm2698_vm8, %v2717_v44, %v16191_v59  ;;  %v16205_v43 = vrot.slane %v16181_v39, 4  ;;  %v16208_v58 = vld [vmem:[#allocation25_spill] sm:$0xff]  ;;  %v13018_v54 = vpop.permute.xlu1 %3773 }
 0x16d   : > { %v4748_v36 = vsel %vm2700_vm10, %v4718_v16, %v4719_v61  ;;  %v5004_v56 = vld [vmem:[#allocation2 + $0xa4] sm:$0xf]  ;;  %v3827_v23 = vsel %vm2700_vm10, %v3797_v57, %v16058_v5  ;;  %v16206_v1 = vrot.slane %v12504_v37, 4  ;;  %v2767_v39 = vmul.bf16 %v12893_v42, %v2712_v10  ;;  %16216 = vst [vmem:[#allocation16_spill] sm:$0xff] %v13018_v54 }
 0x16e   : > { %6731 = vrot.lane.b32.xlu1 %v16204_v7, %s11348_s24  ;;  %v3825_v17 = vsel %vm2700_vm10, %v16205_v43, %v3797_v57  ;;  %5025 = vst.msk [vmem:[#allocation3 + $0x330] sm:$0xf] %vm2024_vm14, %v5004_v56  ;;  %3005 = vrot.lane.b32.xlu0 %v12948_v55, %s11356_s17  ;;  %v7468_v16 = vpack.i.b16 %v7219_v50, %v7219_v50  ;;  %v5686_v44 = vrot.slane %v12582_v4, 4  ;;  %v2688_v57 = vrot.slane %v12632_v29, 4  ;;  %v16209_v50 = vld [vmem:[#allocation9_spill] sm:$0xff] }
 0x16f   : > { %v4750_v2 = vsel %vm2700_vm10, %v4719_v61, %v16206_v1  ;;  %v7218_v43 = vcombine.high %v12916_v49, %v12916_v49  ;;  %v12969_v61 = vsel %vm3809_vm7, %v3825_v17, %v12487_v63  ;;  %v12973_v56 = vsel %vm4732_vm9, %v4748_v36, %v12451_v26 }
 0x170   : > { %v4801_v10 = vmul.bf16 %v4745_v27, %v12893_v42  ;;  %v12978_v1 = vrot.slane %v7461_v32, %v16209_v50  ;;  %v12982_v5 = vsel %vm3809_vm7, %v3827_v23, %v12537_v20  ;;  %v12986_v7 = vsel %vm4732_vm9, %v4750_v2, %v12504_v37  ;;  %v12993_v27 = vpop.permute.xlu0 %5662 }
 0x171   : > { %v7718_v63 = vrot.slane %v12609_v38, 4  ;;  %v6606_v26 = vrot.slane %v12589_v52, 4  ;;  %v16210_v17 = vrot.slane %v12327_v41, 4  ;;  %16211 = vst [vmem:[#allocation17_spill] sm:$0xff] %v12993_v27  ;;  %v2768_v32 = vmul.bf16 %v12948_v55, %v12841_v11 }
 0x172   : > { %2815 = vrot.lane.b32.xlu1 %v2767_v39, %s11352_s21  ;;  %4849 = vrot.lane.b32.xlu0 %v4801_v10, %s11350_s27  ;;  %v13001_v2 = vrot.slane %v7468_v16, %v16209_v50  ;;  %v16212_v39 = vrot.slane %v16208_v58, 4  ;;  %v16213_v41 = vrot.slane %v16190_v35, 4  ;;  %v16214_v27 = vrot.slane %v16188_v3, 4  ;;  %v2054_v3 = vld [vmem:[%s16000_s7 + $0x38] sm:$0x55] }
 0x173   : > { %v5713_v36 = vsel %vm2700_vm10, %v16210_v17, %v5686_v44  ;;  %v16215_v11 = vrot.slane %v16191_v59, 4  ;;  %v16067_v23 = vrot.slane %v12614_v53, 4  ;;  %v16066_v16 = vrot.slane %v12668_v28, 4 }
 0x174   : > { %v5715_v48 = vsel %vm2700_vm10, %v5686_v44, %v16212_v39  ;;  %v7746_v17 = vsel %vm2700_vm10, %v16213_v41, %v7718_v63  ;;  %v6634_v10 = vsel %vm2700_vm10, %v16214_v27, %v6606_v26  ;;  %v3878_v35 = vmul.bf16 %v12860_v25, %v12948_v55 }
 0x175   : > { %v2719_v22 = vsel %vm2700_vm10, %v16215_v11, %v2688_v57  ;;  %v13028_v59 = vsel %vm4901_vm11, %v5713_v36, %v12582_v4  ;;  %v3799_v44 = vrot.slane %v12708_v6, 4  ;;  %v7447_v27 = vpack.i.b16 %v12916_v49, %v12916_v49 }
 0x176   : > { %2817 = vrot.lane.b32.xlu1 %v2768_v32, %s11352_s21  ;;  %v7454_v39 = vpack.i.b16 %v7218_v43, %v7218_v43  ;;  %v13035_v32 = vsel %vm4901_vm11, %v5715_v48, %v16208_v58  ;;  %v13039_v25 = vsel %vm2867_vm12, %v7746_v17, %v12609_v38  ;;  %3927 = vrot.lane.b32.xlu0 %v3878_v35, %s16068_s29  ;;  %v13058_v43 = vld [vmem:[%s16000_s7 + $0x38] sm:$0x55]  ;;  %v16220_v17 = vrot.slane %v12537_v20, 4  ;;  %v13081_v35 = vpop.permute.xlu1 %5660 }
 0x177   : > { %16217 = vst [vmem:[#allocation8_spill] sm:$0xff] %v13039_v25  ;;  %v3877_v4 = vmul.bf16 %v12845_v33, %v12893_v42  ;;  %v2188_v36 = vcombine.high %v2054_v3, %v2054_v3  ;;  %v13046_v41 = vsel %vm3977_vm13, %v6634_v10, %v12589_v52  ;;  %v13050_v49 = vsel %vm2698_vm8, %v2719_v22, %v12632_v29  ;;  %v13070_v22 = vpop.permute.xlu0 %6580 }
 0x178   : > { %16218 = vst [vmem:[#allocation19_spill] sm:$0xff] %v13046_v41  ;;  %v2195_v38 = vrot.slane %v2054_v3, %v16173_v30  ;;  %v6636_v33 = vsel %vm2700_vm10, %v6606_v26, %v16067_v23  ;;  %v2721_v52 = vsel %vm2700_vm10, %v2688_v57, %v16066_v16  ;;  %v7748_v29 = vsel %vm2700_vm10, %v7718_v63, %v16071_v18 }
 0x179   : > { %v4721_v42 = vrot.slane %v12661_v19, 4  ;;  %16219 = vst [vmem:[#allocation18_spill] sm:$0xff] %v13070_v22  ;;  %v3829_v10 = vsel %vm2700_vm10, %v16220_v17, %v3799_v44  ;;  %v16064_v26 = vrot.slane %v12732_v46, 4  ;;  %v16065_v11 = vrot.slane %v12697_v9, 4  ;;  %16221 = vst [vmem:[#allocation21_spill] sm:$0xff] %v13081_v35  ;;  %v16233_v35 = vld [vmem:[#allocation29_spill] sm:$0xff] }
 0x17a   : > { %3925 = vrot.lane.b32.xlu1 %v3877_v4, %s16068_s29  ;;  %v13079_v57 = vrot.slane %v7447_v27, %v16209_v50  ;;  %v16222_v63 = vcombine.low %v12823_v8, %v12826_v62  ;;  %v4802_v3 = vmul.bf16 %v12904_v12, %v12948_v55  ;;  %v13090_v20 = vrot.slane %v7454_v39, %v16209_v50 }
 0x17b   : > { %v2202_v4 = vrot.slane %v2188_v36, %v16173_v30  ;;  %v4228_v17 = vrot.slane %v13058_v43, %v16173_v30  ;;  %v13097_v27 = vsel %vm3977_vm13, %v6636_v33, %v12614_v53  ;;  %v13101_v48 = vsel %vm2698_vm8, %v2721_v52, %v12668_v28  ;;  %v13115_v36 = vpop.permute.xlu0 %6911  ;;  %v16226_v33 = vld [vmem:[#allocation23_spill] sm:$0xff] }
 0x17c   : > { %6582 = vrot.lane.b32.xlu0 %v16222_v63, %s16068_s29  ;;  %v13105_v8 = vsel %vm2867_vm12, %v7748_v29, %v12639_v40  ;;  %v2203_v62 = vcombine.high %v2195_v38, %v2195_v38  ;;  %v13109_v55 = vsel %vm3809_vm7, %v3829_v10, %v12708_v6  ;;  %v16225_v12 = vrot.slane %v12504_v37, 4  ;;  %s11357_s29 = smov [#allocation4]  }
 0x17d   : > { %16223 = vst [vmem:[#allocation20_spill] sm:$0xff] %v13105_v8  ;;  %16224 = vst [vmem:[#allocation22_spill] sm:$0xff] %v13109_v55  ;;  %v5765_v52 = vmul.bf16 %v16226_v33, %v12908_v51  ;;  %v2443_v63 = vpack.i.b16 %v2195_v38, %v2195_v38  ;;  %v3831_v29 = vsel %vm2700_vm10, %v3799_v44, %v16064_v26  ;;  %v5688_v37 = vrot.slane %v12755_v14, 4 }
 0x17e   : > { %v4752_v39 = vsel %vm2700_vm10, %v16225_v12, %v4721_v42  ;;  %4851 = vrot.lane.b32.xlu1 %v4802_v3, %s11350_s27  ;;  %v4754_v6 = vsel %vm2700_vm10, %v4721_v42, %v16065_v11  ;;  %v16070_v10 = vrot.slane %v12724_v15, 4  ;;  %v13127_v12 = vpop.permute.xlu1 %2991  ;;  %v6687_v51 = vmul.bf16 %v16226_v33, %v12912_v24 }
 0x17f   : > { %v10714_v38 = vcombine.low %v13079_v57, %v13090_v20  ;;  %v2204_v44 = vcombine.high %v2202_v4, %v2202_v4  ;;  %v4236_v3 = vcombine.high %v4228_v17, %v4228_v17  ;;  %v13137_v42 = vsel %vm4732_vm9, %v4752_v39, %v12661_v19  ;;  %v5054_v20 = vld [vmem:[%s16000_s7 + $0x38] sm:$0xaa] }
 0x180   : > { %6923 = vrot.lane.b32.xlu0 %v16226_v33, %s11355_s16  ;;  %v7799_v26 = vmul.bf16 %v16226_v33, %v12924_v21  ;;  %v2450_v16 = vpack.i.b16 %v2203_v62, %v2203_v62  ;;  %v13145_v23 = vsel %vm3809_vm7, %v3831_v29, %v12732_v46  ;;  %v13149_v24 = vsel %vm4732_vm9, %v4754_v6, %v12697_v9  ;;  %v13152_v57 = vpop.permute.xlu0 %3913  ;;  %v16229_v29 = vld [vmem:[#allocation11_spill] sm:$0xff] }
 0x181   : > { %16227 = vst [vmem:[#allocation25_spill] sm:$0xff] %v13145_v23  ;;  %16228 = vst [vmem:[#allocation9_spill] sm:$0xff] %v13149_v24  ;;  %v13155_v19 = vrot.slane %v2443_v63, %v16186_v47  ;;  %v2457_v21 = vpack.i.b16 %v2202_v4, %v2202_v4  ;;  %v5719_v62 = vsel %vm2700_vm10, %v5688_v37, %v16070_v10  ;;  %v6608_v46 = vrot.slane %v16233_v35, 4 }
 0x182   : > { %5813 = vrot.lane.b32.xlu1 %v5765_v52, %s11349_s26  ;;  %v4476_v33 = vpack.i.b16 %v4228_v17, %v4228_v17  ;;  %v3165_v52 = vld [vmem:[%s16000_s7 + $0x38] sm:$0xaa]  ;;  %v4221_v63 = vcombine.high %v13058_v43, %v13058_v43  ;;  %v13170_v6 = vpop.permute.xlu1 %6917  ;;  %v16231_v11 = vmul.bf16 %v12395_v0, %v12920_v45  ;;  %v2464_v10 = vpack.i.b16 %v2204_v44, %v2204_v44 }
 0x183   : > { %16230 = vst [vmem:[#allocation23_spill] sm:$0xff] %v13170_v6  ;;  %v4483_v18 = vpack.i.b16 %v4236_v3, %v4236_v3  ;;  %v3299_v39 = vcombine.high %v3165_v52, %v3165_v52  ;;  %v16232_v17 = vrot.slane %v16208_v58, 4  ;;  %v13181_v43 = vrot.slane %v2450_v16, %v16186_v47  ;;  %v16237_v3 = vld [vmem:[#allocation7_spill] sm:$0xff] }
 0x184   : > { %6737 = vrot.lane.b32.xlu0 %v16231_v11, %s11348_s24  ;;  %v5188_v4 = vcombine.high %v5054_v20, %v5054_v20  ;;  %v13185_v54 = vsel %vm4901_vm11, %v5719_v62, %v12724_v15  ;;  %v16235_v45 = vrot.slane %v12781_v13, 4  ;;  %v16236_v11 = vrot.slane %v12639_v40, 4 }
 0x185   : > { %v5717_v22 = vsel %vm2700_vm10, %v16232_v17, %v5688_v37  ;;  %16234 = vst [vmem:[#allocation29_spill] sm:$0xff] %v13185_v54  ;;  %v13194_v37 = vpop.permute.xlu0 %4837  ;;  %v3306_v16 = vrot.slane %v3165_v52, %v16173_v30  ;;  %v16238_v17 = vrot.slane %v12614_v53, 4  ;;  %v13201_v62 = vrot.slane %v2457_v21, %v16186_v47  ;;  %v13218_v21 = vld [vmem:[#allocation2 + $0x40] sm:$0xff] }
 0x186   : > { %v7750_v44 = vsel %vm2700_vm10, %v16236_v11, %v16235_v45  ;;  %6735 = vrot.lane.b32.xlu1 %v6687_v51, %s11348_s24  ;;  %v13204_v15 = vrot.slane %v4476_v33, %v16186_v47  ;;  %v4235_v40 = vrot.slane %v4221_v63, %v16173_v30  ;;  %v16239_v45 = vrot.slane %v16229_v29, 4  ;;  %v13212_v58 = vpop.permute.xlu1 %2803 }
 0x187   : > { %v6638_v9 = vsel %vm2700_vm10, %v16238_v17, %v6608_v46  ;;  %v16240_v51 = vrot.slane %v12668_v28, 4  ;;  %v16241_v53 = vcombine.low %v12978_v1, %v13001_v2  ;;  %v13221_v33 = vrot.slane %v2464_v10, %v16186_v47  ;;  %v5974_v10 = vld [vmem:[%s16000_s7 + $0x38] sm:$0x55] }
 0x188   : > { %v13224_v52 = vrot.slane %v4483_v18, %v16186_v47  ;;  %v3313_v63 = vrot.slane %v3299_v39, %v16173_v30  ;;  %v13229_v28 = vsel %vm4901_vm11, %v5717_v22, %v12755_v14  ;;  %v10606_v17 = vcombine.low %v13155_v19, %v13181_v43 }
 0x189   : > { %v2723_v11 = vsel %vm2700_vm10, %v16240_v51, %v16239_v45  ;;  %7694 = vrot.lane.b32.xlu0 %v16241_v53, %s11352_s21  ;;  %16242 = vst [vmem:[#allocation30_spill] sm:$0xff] %v13229_v28  ;;  %v5202_v1 = vrot.slane %v5188_v4, %v16173_v30  ;;  %v5195_v2 = vrot.slane %v5054_v20, %v16173_v30  ;;  %v16245_v14 = vrot.slane %v16237_v3, 4  ;;  %v13248_v19 = vpop.permute.xlu0 %5801 }
 0x18a   : > { %v13242_v39 = vsel %vm2867_vm12, %v7750_v44, %v12781_v13  ;;  %7692 = vrot.lane.b32.xlu1 %v10714_v38, %s11352_s21  ;;  %v3314_v20 = vcombine.high %v3306_v16, %v3306_v16  ;;  %v13252_v4 = vsel %vm3977_vm13, %v6638_v9, %v16233_v35  ;;  %v13256_v43 = vsel %vm2698_vm8, %v2723_v11, %v16229_v29  ;;  %v13260_v53 = vpop.permute.xlu1 %7835  ;;  %v13267_v9 = vld [vmem:[#allocation2 + $0x48] sm:$0xff] }
 0x18b   : > { %16244 = vst [vmem:[#allocation31_spill] sm:$0xff] %v13242_v39  ;;  %v6640_v22 = vsel %vm2700_vm10, %v6608_v46, %v16245_v14  ;;  %16246 = vst [vmem:[#allocation32_spill] sm:$0xff] %v13252_v4  ;;  %v4237_v51 = vcombine.high %v4235_v40, %v4235_v40  ;;  %v10607_v46 = vcombine.low %v13201_v62, %v13221_v33  ;;  %v11273_v39 = vld [vmem:[#allocation2 + $0x3c] sm:$0xff] }
 0x18c   : > { %16247 = vst [vmem:[#allocation33_spill] sm:$0xff] %v13256_v43  ;;  %v3315_v35 = vcombine.high %v3313_v63, %v3313_v63  ;;  %v6115_v11 = vrot.slane %v5974_v10, %v16173_v30  ;;  %v13272_v14 = vsel %vm3977_vm13, %v6640_v22, %v16237_v3  ;;  %v3554_v45 = vpack.i.b16 %v3306_v16, %v3306_v16 }
 0x18d   : > { %7847 = vrot.lane.b32.xlu0 %v7799_v26, %s16111_s23  ;;  %16248 = vst [vmem:[#allocation34_spill] sm:$0xff] %v13272_v14  ;;  %v5204_v44 = vcombine.high %v5202_v1, %v5202_v1  ;;  %v5203_v43 = vcombine.high %v5195_v2, %v5195_v2  ;;  %v16249_v26 = vld [vmem:[#allocation10_spill] sm:$0xff]  ;;  %v13276_v62 = vpop.permute.xlu0 %6723  ;;  %v3561_v33 = vpack.i.b16 %v3314_v20, %v3314_v20 }
 0x18e   : > { %6925 = vrot.lane.b32.xlu1 %v11273_v39, %s11355_s16  ;;  %v4490_v38 = vpack.i.b16 %v4235_v40, %v4235_v40  ;;  %v6108_v54 = vcombine.high %v5974_v10, %v5974_v10  ;;  %v4497_v4 = vpack.i.b16 %v4237_v51, %v4237_v51  ;;  %v3568_v16 = vpack.i.b16 %v3313_v63, %v3313_v63  ;;  %v13282_v3 = vpop.permute.xlu1 %5807  ;;  %v13361_v10 = vld [vmem:[#allocation2 + $0x4c] sm:$0xff] }
 0x18f   : > { %16250 = vst [vmem:[#allocation35_spill] sm:$0xff] %v13282_v3  ;;  %v16251_v29 = vmul.bf16 %v12395_v0, %v12928_v60  ;;  %v3575_v39 = vpack.i.b16 %v3315_v35, %v3315_v35  ;;  %v5457_v24 = vpack.i.b16 %v5202_v1, %v5202_v1  ;;  %v5443_v20 = vpack.i.b16 %v5195_v2, %v5195_v2 }
 0x190   : > { %v6123_v40 = vcombine.high %v6115_v11, %v6115_v11  ;;  %v13291_v51 = vrot.slane %v3554_v45, %v16209_v50  ;;  %v5464_v28 = vpack.i.b16 %v5204_v44, %v5204_v44  ;;  %v5450_v22 = vpack.i.b16 %v5203_v43, %v5203_v43 }
 0x191   : > { %7849 = vrot.lane.b32.xlu0 %v16251_v29, %s16111_s23  ;;  %v16252_v63 = vrot.slane %v16249_v26, 4  ;;  %v16253_v3 = vrot.slane %v12781_v13, 4  ;;  %v13299_v0 = vpop.permute.xlu0 %6729  ;;  %v13302_v60 = vrot.slane %v3561_v33, %v16209_v50  ;;  %v13305_v29 = vrot.slane %v4490_v38, %v16186_v47  ;;  %v7086_v38 = vld [vmem:[%s16000_s7 + $0x38] sm:$0xaa] }
 0x192   : > { %2664 = vrot.lane.b32.xlu1 %v10606_v17, %s16111_s23  ;;  %16254 = vst [vmem:[#allocation36_spill] sm:$0xff] %v13299_v0  ;;  %v6122_v1 = vrot.slane %v6108_v54, %v16173_v30  ;;  %v13309_v2 = vrot.slane %v4497_v4, %v16186_v47  ;;  %v13312_v13 = vrot.slane %v3568_v16, %v16209_v50  ;;  %v13316_v45 = vpop.permute.xlu1 %6913  ;;  %v6953_v35 = vrot.slane %v13115_v36, 4 }
 0x193   : > { %v7752_v6 = vsel %vm2700_vm10, %v16253_v3, %v16252_v63  ;;  %v6363_v17 = vpack.i.b16 %v6115_v11, %v6115_v11  ;;  %v13321_v43 = vrot.slane %v3575_v39, %v16209_v50  ;;  %v13324_v54 = vrot.slane %v5457_v24, %v16209_v50 }
 0x194   : > { %v13327_v4 = vrot.slane %v5443_v20, %v16209_v50  ;;  %v6370_v44 = vpack.i.b16 %v6123_v40, %v6123_v40  ;;  %v16085_v11 = vrot.slane %v13316_v45, 4  ;;  %v13335_v33 = vrot.slane %v5464_v28, %v16209_v50 }
 0x195   : > { %3007 = vrot.lane.b32.xlu0 %v13218_v21, %s11356_s17  ;;  %v13338_v16 = vrot.slane %v5450_v22, %v16209_v50  ;;  %v13342_v24 = vsel %vm2867_vm12, %v7752_v6, %v16249_v26  ;;  %v13345_v39 = vpop.permute.xlu0 %7841  ;;  %v10628_v20 = vcombine.low %v13291_v51, %v13302_v60  ;;  %v6124_v63 = vcombine.high %v6122_v1, %v6122_v1 }
 0x196   : > { %16255 = vst [vmem:[#allocation37_spill] sm:$0xff] %v13342_v24  ;;  %2666 = vrot.lane.b32.xlu1 %v10607_v46, %s16111_s23  ;;  %16256 = vst [vmem:[#allocation38_spill] sm:$0xff] %v13345_v39  ;;  %v6974_v28 = vsel %vm2700_vm10, %v6953_v35, %v16085_v11  ;;  %v10651_v22 = vcombine.low %v13305_v29, %v13309_v2  ;;  %v13357_v6 = vrot.slane %v6363_v17, %v16186_v47  ;;  %v13359_v46 = vld [vmem:[#allocation2 + $0x44] sm:$0xff]  ;;  %v13367_v60 = vpop.permute.xlu1 %6921 }
 0x197   : > { %v7220_v3 = vcombine.high %v7086_v38, %v7086_v38  ;;  %v13365_v51 = vsel %vm6975_vm15, %v13115_v36, %v6974_v28  ;;  %16257 = vst [vmem:[#allocation39_spill] sm:$0xff] %v13367_v60  ;;  %v16258_v35 = vcombine.low %v13204_v15, %v13224_v52  ;;  %v13374_v29 = vrot.slane %v6370_v44, %v16186_v47  ;;  %v13388_v15 = vld [vmem:[%s16000_s7 + $0x40] sm:$0x55] }
 0x198   : > { %v6377_v2 = vpack.i.b16 %v6122_v1, %v6122_v1  ;;  %v7227_v17 = vrot.slane %v7086_v38, %v16173_v30  ;;  %v16259_v52 = vmul.bf16 %v13218_v21, %v12938_v34  ;;  %v6384_v44 = vpack.i.b16 %v6124_v63, %v6124_v63 }
 0x199   : > { %4697 = vrot.lane.b32.xlu0 %v16258_v35, %s11349_s26  ;;  %v13394_v1 = vpop.permute.xlu0 %2993  ;;  %v3033_v28 = vrot.slane %v13127_v12, 4  ;;  %v2212_v38 = vrot.slane %v13388_v15, %v16173_v30  ;;  %v3955_v36 = vrot.slane %v13152_v57, 4  ;;  %v7877_v39 = vrot.slane %v13260_v53, 4 }
 0x19a   : > { %2819 = vrot.lane.b32.xlu1 %v16259_v52, %s11352_s21  ;;  %v7234_v52 = vrot.slane %v7220_v3, %v16173_v30  ;;  %v13407_v11 = vpop.permute.xlu1 %3915  ;;  %v13414_v35 = vrot.slane %v6377_v2, %v16186_v47  ;;  %v7235_v40 = vcombine.high %v7227_v17, %v7227_v17  ;;  %v16260_v34 = vrot.slane %v13394_v1, 4 }
 0x19b   : > { %v16091_v26 = vrot.slane %v13407_v11, 4  ;;  %v13431_v14 = vrot.slane %v6384_v44, %v16186_v47  ;;  %v7475_v18 = vpack.i.b16 %v7227_v17, %v7227_v17  ;;  %v2220_v8 = vcombine.high %v2212_v38, %v2212_v38 }
 0x19c   : > { %v3054_v3 = vsel %vm2700_vm10, %v3033_v28, %v16260_v34  ;;  %v2845_v28 = vrot.slane %v13212_v58, 4  ;;  %v7482_v60 = vpack.i.b16 %v7235_v40, %v7235_v40  ;;  %v2471_v0 = vpack.i.b16 %v2212_v38, %v2212_v38 }
 0x19d   : > { %3009 = vrot.lane.b32.xlu0 %v13267_v9, %s11356_s17  ;;  %v3056_v63 = vsel %vm3055_vm0, %v13127_v12, %v3054_v3  ;;  %v13428_v2 = vpop.permute.xlu0 %2805  ;;  %v3976_v34 = vsel %vm2700_vm10, %v3955_v36, %v16091_v26  ;;  %v7236_v12 = vcombine.high %v7234_v52, %v7234_v52  ;;  %v7489_v3 = vpack.i.b16 %v7234_v52, %v7234_v52 }
 0x19e   : > { %3775 = vrot.lane.b32.xlu1 %v10628_v20, %s11348_s24  ;;  %v16095_v24 = vrot.slane %v13428_v2, 4  ;;  %v13443_v20 = vld [vmem:[%s16000_s7 + $0x40] sm:$0x55]  ;;  %v3978_v17 = vsel %vm3977_vm13, %v13152_v57, %v3976_v34  ;;  %v13447_v44 = vpop.permute.xlu1 %4839  ;;  %v4879_v36 = vrot.slane %v13194_v37, 4  ;;  %v2205_v52 = vcombine.high %v13388_v15, %v13388_v15 }
 0x19f   : > { %16261 = vst [vmem:[#allocation40_spill] sm:$0xff] %v13447_v44  ;;  %v4880_v25 = vrot.slane %v13447_v44, 4  ;;  %v16263_v15 = vmul.bf16 %v12973_v56, %v13218_v21  ;;  %v13483_v41 = vrot.slane %v7475_v18, %v16209_v50  ;;  %v2478_v44 = vpack.i.b16 %v2220_v8, %v2220_v8  ;;  %v13493_v56 = vld [vmem:[%s16000_s7 + $0x40] sm:$0xaa] }
 0x1a0   : > { %v2866_v26 = vsel %vm2700_vm10, %v2845_v28, %v16095_v24  ;;  %v13468_v28 = vrot.slane %v13443_v20, %v16173_v30  ;;  %v7496_v24 = vpack.i.b16 %v7236_v12, %v7236_v12  ;;  %v16264_v8 = vcombine.low %v13312_v13, %v13321_v43 }
 0x1a1   : > { %4699 = vrot.lane.b32.xlu0 %v10651_v22, %s11349_s26  ;;  %v2868_v57 = vsel %vm2867_vm12, %v13212_v58, %v2866_v26  ;;  %v16262_v22 = vmul.bf16 %v13267_v9, %v12942_v31  ;;  %v13462_v40 = vpop.permute.xlu0 %7837  ;;  %v4900_v38 = vsel %vm2700_vm10, %v4879_v36, %v4880_v25  ;;  %v5843_v36 = vrot.slane %v13248_v19, 4 }
 0x1a2   : > { %v16099_v58 = vrot.slane %v13462_v40, 4  ;;  %v10724_v26 = vcombine.low %v2868_v57, %v3056_v63  ;;  %v10725_v34 = vcombine.high %v2868_v57, %v3056_v63  ;;  %v4902_v31 = vsel %vm4901_vm11, %v13194_v37, %v4900_v38 }
 0x1a3   : > { %2821 = vrot.lane.b32.xlu1 %v16262_v22, %s11352_s21  ;;  %v13476_v22 = vpop.permute.xlu1 %5803  ;;  %v10766_v57 = vcombine.high %v3978_v17, %v4902_v31  ;;  %v2219_v38 = vrot.slane %v2205_v52, %v16173_v30  ;;  %v4253_v13 = vcombine.high %v13468_v28, %v13468_v28  ;;  %v16267_v52 = vmul.bf16 %v12982_v5, %v13267_v9 }
 0x1a4   : > { %v7898_v63 = vsel %vm2700_vm10, %v7877_v39, %v16099_v58  ;;  %v16100_v37 = vrot.slane %v13476_v22, 4  ;;  %9244 = vmatprep.subr.bf16.mxu1 %v10725_v34  ;;  %v13506_v39 = vrot.slane %v7489_v3, %v16209_v50  ;;  %v16268_v5 = vmul.bf16 %v12969_v61, %v13218_v21 }
 0x1a5   : > { %4853 = vrot.lane.b32.xlu0 %v16263_v15, %s11350_s27  ;;  %v13497_v18 = vsel %vm2698_vm8, %v13260_v53, %v7898_v63  ;;  %v13503_v12 = vpop.permute.xlu0 %6733  ;;  %9245 = vmatpush1.bf16.msra.mxu1 %v10724_v26  ;;  %v13513_v53 = vrot.slane %v7482_v60, %v16209_v50  ;;  %v13516_v15 = vrot.slane %v2471_v0, %v16186_v47  ;;  %v13531_v0 = vld [vmem:[#allocation2 + $0x50] sm:$0xff] }
 0x1a6   : > { %16265 = vst [vmem:[#allocation41_spill] sm:$0xff] %v13503_v12  ;;  %v5864_v34 = vsel %vm2700_vm10, %v5843_v36, %v16100_v37  ;;  %9246 = vmatprep.subr.bf16.mxu1 %v10766_v57  ;;  %v10765_v26 = vcombine.low %v3978_v17, %v4902_v31  ;;  %v8067_v36 = vld [vmem:[#allocation3 + $0x290] sm:$0xff]  ;;  %v13529_v60 = vrot.slane %v7496_v24, %v16209_v50  ;;  %v6765_v57 = vrot.slane %v13276_v62, 4 }
 0x1a7   : > { %3777 = vrot.lane.b32.xlu1 %v16264_v8, %s11348_s24  ;;  %v5865_v43 = vsel %vm4732_vm9, %v13248_v19, %v5864_v34  ;;  %v13522_v3 = vpop.permute.xlu1 %6725  ;;  %v3323_v63 = vrot.slane %v13493_v56, %v16173_v30  ;;  %v13538_v34 = vrot.slane %v2478_v44, %v16186_v47  ;;  %v10695_v17 = vcombine.low %v13414_v35, %v13431_v14 }
 0x1a8   : > { %v16104_v19 = vrot.slane %v13522_v3, 4  ;;  %v10807_v8 = vcombine.high %v8067_v36, %v5865_v43  ;;  %v2221_v31 = vcombine.high %v2219_v38, %v2219_v38  ;;  %v2485_v58 = vpack.i.b16 %v2219_v38, %v2219_v38 }
 0x1a9   : > { %3931 = vrot.lane.b32.xlu0 %v16267_v52, %s16266_s14  ;;  %v13544_v24 = vpop.permute.xlu0 %7845  ;;  %9247 = vmatpush1.bf16.msra.mxu1 %v10765_v26  ;;  %v4504_v52 = vpack.i.b16 %v13468_v28, %v13468_v28  ;;  %v4511_v37 = vpack.i.b16 %v4253_v13, %v4253_v13  ;;  %v16269_v14 = vcombine.low %v13324_v54, %v13335_v33  ;;  %v13563_v28 = vld [vmem:[#allocation2 + $0x58] sm:$0xff]  ;;  %v16294_v12 = vrot.slane %v13462_v40, 4 }
 0x1aa   : > { %v6786_v44 = vsel %vm2700_vm10, %v6765_v57, %v16104_v19  ;;  %9248 = vmatprep.subr.bf16.mxu1 %v10807_v8  ;;  %v10806_v35 = vcombine.low %v8067_v36, %v5865_v43  ;;  %v3331_v57 = vcombine.high %v3323_v63, %v3323_v63  ;;  %v3582_v8 = vpack.i.b16 %v3323_v63, %v3323_v63 }
 0x1ab   : > { %3929 = vrot.lane.b32.xlu1 %v16268_v5, %s16266_s14  ;;  %v6787_v21 = vsel %vm3809_vm7, %v13276_v62, %v6786_v44  ;;  %v13557_v26 = vpop.permute.xlu1 %5811  ;;  %v16270_v54 = vcombine.low %v13327_v4, %v13338_v16  ;;  %v2492_v43 = vpack.i.b16 %v2221_v31, %v2221_v31  ;;  %v13577_v36 = vrot.slane %v4504_v52, %v16186_v47 }
 0x1ac   : > { %v10848_v38 = vcombine.high %v6787_v21, %v13365_v51  ;;  %v4238_v63 = vcombine.high %v13443_v20, %v13443_v20  ;;  %v13585_v61 = vrot.slane %v4511_v37, %v16186_v47  ;;  %v16271_v31 = vcombine.low %v13357_v6, %v13374_v29  ;;  %v16276_v6 = vld [vmem:[#allocation23_spill] sm:$0xff] }
 0x1ad   : > { %5666 = vrot.lane.b32.xlu0 %v16269_v14, %s11350_s27  ;;  %v2996_v33 = vpop.permute.xlu0 %2995  ;;  %9249 = vmatpush1.bf16.msra.mxu1 %v10806_v35  ;;  %v13582_v14 = vrot.slane %v2485_v58, %v16186_v47  ;;  %v10847_v52 = vcombine.low %v6787_v21, %v13365_v51  ;;  %v10888_v20 = vcombine.low %v13497_v18, %v13497_v18  ;;  %v16272_v37 = vrot.slane %v13394_v1, 4 }
 0x1ae   : > { %v3035_v44 = vrot.slane %v2996_v33, 4  ;;  %9250 = vmatprep.subr.bf16.mxu1 %v10848_v38  ;;  %v13597_v58 = vrot.slane %v3582_v8, %v16209_v50  ;;  %v3589_v35 = vpack.i.b16 %v3331_v57, %v3331_v57  ;;  %v10889_v4 = vcombine.high %v13497_v18, %v13497_v18 }
 0x1af   : > { %5664 = vrot.lane.b32.xlu1 %v16270_v54, %s11350_s27  ;;  %v2808_v16 = vpop.permute.xlu1 %2807  ;;  %v16273_v29 = vmul.bf16 %v12986_v7, %v13267_v9  ;;  %v13615_v57 = vrot.slane %v2492_v43, %v16186_v47  ;;  %v4252_v8 = vrot.slane %v4238_v63, %v16173_v30  ;;  %v16274_v18 = vrot.slane %v13428_v2, 4 }
 0x1b0   : > { %v3057_v38 = vsel %vm2700_vm10, %v16272_v37, %v3035_v44  ;;  %v2847_v54 = vrot.slane %v2808_v16, 4  ;;  %v3316_v7 = vcombine.high %v13493_v56, %v13493_v56  ;;  %v13639_v56 = vrot.slane %v3589_v35, %v16209_v50 }
 0x1b1   : > { %6584 = vrot.lane.b32.xlu0 %v16271_v31, %s16266_s14  ;;  %v3058_v51 = vsel %vm3055_vm0, %v13394_v1, %v3057_v38  ;;  %v13612_v21 = vpop.permute.xlu0 %2997  ;;  %9251 = vmatpush1.bf16.msra.mxu1 %v10847_v52  ;;  %v5055_v1 = vld [vmem:[%s16000_s7 + $0x40] sm:$0xaa]  ;;  %v9122_v52 = vsel %vm2700_vm10, %v10888_v20, 0  ;;  %v16275_v35 = vmul.bf16 %v13028_v59, %v13359_v46  ;;  %v4518_v59 = vpack.i.b16 %v4252_v8, %v4252_v8 }
 0x1b2   : > { %v2869_v31 = vsel %vm2700_vm10, %v16274_v18, %v2847_v54  ;;  %v16103_v37 = vrot.slane %v13612_v21, 4  ;;  %10929 = vmatprep.subr.msk.bf16.mxu1 %vm2700_vm10, %v10889_v4  ;;  %v5205_v9 = vcombine.high %v5055_v1, %v5055_v1 }
 0x1b3   : > { %4855 = vrot.lane.b32.xlu1 %v16273_v29, %s11350_s27  ;;  %v2870_v43 = vsel %vm2867_vm12, %v13428_v2, %v2869_v31  ;;  %v13632_v63 = vpop.permute.xlu1 %2809 }
 0x1b4   : > { %v3059_v38 = vsel %vm2700_vm10, %v3035_v44, %v16103_v37  ;;  %v16101_v29 = vrot.slane %v13632_v63, 4  ;;  %v10726_v18 = vcombine.low %v2870_v43, %v3058_v51  ;;  %v10727_v2 = vcombine.high %v2870_v43, %v3058_v51 }
 0x1b5   : > { %6586 = vrot.lane.b32.xlu0 %v10695_v17, %s16266_s14  ;;  %v13648_v17 = vld [vmem:[%s15996_s3] sm:$0xff]   ;;  %v3060_v20 = vsel %vm3055_vm0, %v2996_v33, %v3059_v38  ;;  %v6916_v31 = vpop.permute.xlu0 %6915  ;;  %9253 = vmatpush1.bf16.msra.mxu1 %v9122_v52  ;;  %v16102_v51 = vrot.slane %v16276_v6, 4  ;;  %v4254_v33 = vcombine.high %v4252_v8, %v4252_v8  ;;  %v3330_v52 = vrot.slane %v3316_v7, %v16173_v30 }
 0x1b6   : > { %v2871_v43 = vsel %vm2700_vm10, %v2847_v54, %v16101_v29  ;;  %v6955_v4 = vrot.slane %v6916_v31, 4  ;;  %9287 = vmatprep.subr.bf16.mxu0 %v10727_v2  ;;  %v16278_v7 = vmul.bf16 %v13035_v32, %v13361_v10 }
 0x1b7   : > { %5817 = vrot.lane.b32.xlu1 %v16275_v35, %s11349_s26  ;;  %v2872_v38 = vsel %vm2867_vm12, %v2808_v16, %v2871_v43  ;;  %v3918_v5 = vpop.permute.xlu1 %3917  ;;  %9288 = vmatpush1.bf16.msra.mxu0 %v10726_v18  ;;  %v16277_v35 = vrot.slane %v13316_v45, 4  ;;  %v13730_v37 = vcombine.high %v3330_v52, %v3330_v52 }
 0x1b8   : > { %v6979_v54 = vsel %vm2700_vm10, %v6955_v4, %v16102_v51  ;;  %v3957_v2 = vrot.slane %v3918_v5, 4  ;;  %v10728_v29 = vcombine.low %v2872_v38, %v3060_v20  ;;  %10930 = vmatmul.mubr.msk.bf16.vlgmr.msra.gmra.mrb[36].mxu1 %vm3055_vm0, %v13648_v17  ;;  %v10729_v43 = vcombine.high %v2872_v38, %v3060_v20 }
 0x1b9   : > { %6927 = vrot.lane.b32.xlu0 %v13359_v46, %s11355_s16  ;;  %v6977_v44 = vsel %vm2700_vm10, %v16277_v35, %v6955_v4  ;;  %v13678_v8 = vsel %vm6975_vm15, %v6916_v31, %v6979_v54  ;;  %v4842_v18 = vpop.permute.xlu0 %4841  ;;  %v16279_v4 = vmov 0   ;;  %v13688_v35 = vld [vmem:[%s16000_s7 + $0x40] sm:$0x55]  ;;  %v13709_v51 = vrot.slane %v5055_v1, %v16173_v30  ;;  %v16283_v1 = vld [vmem:[#allocation19_spill] sm:$0xff] }
 0x1ba   : > { %v13675_v16 = vsel %vm6975_vm15, %v13316_v45, %v6977_v44  ;;  %9362 = vmatprep.mubr.bf16.mxu1 %v16279_v4  ;;  %v16280_v45 = vrot.slane %v13407_v11, 4  ;;  %v4881_v31 = vrot.slane %v4842_v18, 4  ;;  %9330 = vmatprep.subr.bf16.mxu1 %v10729_v43  ;;  %v16282_v54 = vld [vmem:[#allocation40_spill] sm:$0xff]  ;;  %v16284_v43 = vmul.bf16 %v16283_v1, %v13359_v46 }
 0x1bb   : > { %5819 = vrot.lane.b32.xlu1 %v16278_v7, %s11349_s26  ;;  %v13699_v38 = vpop.permute.xlu1 %4843  ;;  %v16281_v7 = vmul.bf16 %v13097_v27, %v13361_v10  ;;  %9331 = vmatpush1.bf16.msra.mxu1 %v10728_v29  ;;  %v13720_v27 = vrot.slane %v13688_v35, %v16173_v30  ;;  %v3596_v29 = vpack.i.b16 %v3330_v52, %v3330_v52 }
 0x1bc   : > { %v3979_v44 = vsel %vm2700_vm10, %v16280_v45, %v3957_v2  ;;  %v13706_v45 = vrot.slane %v5205_v9, %v16173_v30  ;;  %v4903_v32 = vsel %vm2700_vm10, %v4880_v25, %v4881_v31  ;;  %v4525_v25 = vpack.i.b16 %v4254_v33, %v4254_v33 }
 0x1bd   : > { %v3980_v20 = vsel %vm3977_vm13, %v13407_v11, %v3979_v44  ;;  %6741 = vrot.lane.b32.xlu0 %v16281_v7, %s11348_s24  ;;  %v16105_v11 = vrot.slane %v13699_v38, 4  ;;  %v13716_v44 = vrot.slane %v4518_v59, %v16186_v47  ;;  %v4904_v9 = vsel %vm4901_vm11, %v16282_v54, %v4903_v32  ;;  %v13728_v7 = vpop.permute.xlu0 %3919 }
 0x1be   : > { %v16106_v19 = vrot.slane %v13728_v7, 4  ;;  %v10767_v62 = vcombine.low %v3980_v20, %v4904_v9  ;;  %v10768_v13 = vcombine.high %v3980_v20, %v4904_v9  ;;  %v16285_v1 = vcombine.low %v13506_v39, %v13529_v60  ;;  %v16286_v20 = vld [vmem:[#allocation35_spill] sm:$0xff]  ;;  %v16287_v60 = vld [vmem:[#allocation38_spill] sm:$0xff] }
 0x1bf   : > { %6739 = vrot.lane.b32.xlu1 %v16284_v43, %s11348_s24  ;;  %v4905_v59 = vsel %vm2700_vm10, %v4881_v31, %v16105_v11  ;;  %v5806_v32 = vpop.permute.xlu1 %5805  ;;  %v13743_v33 = vcombine.high %v13706_v45, %v13706_v45  ;;  %v5485_v52 = vpack.i.b16 %v13706_v45, %v13706_v45  ;;  %v13749_v31 = vcombine.high %v13709_v51, %v13709_v51 }
 0x1c0   : > { %v4906_v54 = vsel %vm4901_vm11, %v4842_v18, %v4905_v59  ;;  %v3981_v18 = vsel %vm2700_vm10, %v3957_v2, %v16106_v19  ;;  %v5845_v43 = vrot.slane %v5806_v32, 4  ;;  %9289 = vmatprep.subr.bf16.mxu0 %v10768_v13  ;;  %v5471_v39 = vpack.i.b16 %v13709_v51, %v13709_v51 }
 0x1c1   : > { %7698 = vrot.lane.b32.xlu0 %v16285_v1, %s11352_s21  ;;  %v3982_v1 = vsel %vm3977_vm13, %v3918_v5, %v3981_v18  ;;  %v16288_v45 = vcombine.low %v13483_v41, %v13513_v53  ;;  %v7840_v11 = vpop.permute.xlu0 %7839  ;;  %9290 = vmatpush1.bf16.msra.mxu0 %v10767_v62  ;;  %v13764_v9 = vrot.slane %v4525_v25, %v16186_v47  ;;  %v16289_v13 = vrot.slane %v13476_v22, 4  ;;  %v16291_v41 = vld [vmem:[#allocation36_spill] sm:$0xff] }
 0x1c2   : > { %v13767_v2 = vrot.slane %v3596_v29, %v16209_v50  ;;  %v16290_v19 = vrot.slane %v16286_v20, 4  ;;  %v7879_v18 = vrot.slane %v7840_v11, 4  ;;  %v10769_v59 = vcombine.low %v3982_v1, %v4906_v54  ;;  %v16292_v29 = vld [vmem:[#allocation8_spill] sm:$0xff] }
 0x1c3   : > { %7696 = vrot.lane.b32.xlu1 %v16288_v45, %s11352_s21  ;;  %v5866_v51 = vsel %vm2700_vm10, %v16289_v13, %v5845_v43  ;;  %v6728_v45 = vpop.permute.xlu1 %6727  ;;  %v16293_v55 = vmul.bf16 %v16292_v29, %v13359_v46  ;;  %v8068_v13 = vld [vmem:[#allocation3 + $0x298] sm:$0xff]  ;;  %v10770_v23 = vcombine.high %v3982_v1, %v4906_v54  ;;  %v16297_v1 = vrot.slane %v16291_v41, 4  ;;  %v16298_v29 = vld [vmem:[#allocation20_spill] sm:$0xff] }
 0x1c4   : > { %v5868_v5 = vsel %vm2700_vm10, %v5845_v43, %v16290_v19  ;;  %v5867_v62 = vsel %vm4732_vm9, %v13476_v22, %v5866_v51  ;;  %v7900_v19 = vsel %vm2700_vm10, %v16294_v12, %v7879_v18  ;;  %v16295_v43 = vrot.slane %v16287_v60, 4 }
 0x1c5   : > { %v5869_v25 = vsel %vm4732_vm9, %v5806_v32, %v5868_v5  ;;  %7851 = vrot.lane.b32.xlu0 %v16293_v55, %s16111_s23  ;;  %v6767_v20 = vrot.slane %v6728_v45, 4  ;;  %v10808_v22 = vcombine.low %v8068_v13, %v5867_v62  ;;  %v7901_v32 = vsel %vm2698_vm8, %v13462_v40, %v7900_v19  ;;  %v3000_v55 = vpop.permute.xlu0 %2999  ;;  %9332 = vmatprep.subr.bf16.mxu1 %v10770_v23  ;;  %v8069_v40 = vld [vmem:[#allocation3 + $0x2a0] sm:$0xff] }
 0x1c6   : > { %v7902_v53 = vsel %vm2700_vm10, %v7879_v18, %v16295_v43  ;;  %v10809_v46 = vcombine.high %v8068_v13, %v5867_v62  ;;  %v16296_v12 = vrot.slane %v13522_v3, 4  ;;  %v3037_v18 = vrot.slane %v3000_v55, 4  ;;  %9333 = vmatpush1.bf16.msra.mxu1 %v10769_v59 }
 0x1c7   : > { %v13792_v51 = vsel %vm2698_vm8, %v7840_v11, %v7902_v53  ;;  %6929 = vrot.lane.b32.xlu1 %v13361_v10, %s11355_s16  ;;  %v6790_v5 = vsel %vm2700_vm10, %v6767_v20, %v16297_v1  ;;  %v3603_v11 = vpack.i.b16 %v13730_v37, %v13730_v37  ;;  %v13807_v23 = vpop.permute.xlu1 %5815  ;;  %v16299_v13 = vmul.bf16 %v16298_v29, %v13361_v10 }
 0x1c8   : > { %v6788_v54 = vsel %vm2700_vm10, %v16296_v12, %v6767_v20  ;;  %v6791_v62 = vsel %vm3809_vm7, %v6728_v45, %v6790_v5  ;;  %9291 = vmatprep.subr.bf16.mxu0 %v10809_v46  ;;  %v10811_v20 = vcombine.high %v8069_v40, %v5869_v25  ;;  %v16300_v59 = vrot.slane %v13612_v21, 4 }
 0x1c9   : > { %v6789_v53 = vsel %vm3809_vm7, %v13522_v3, %v6788_v54  ;;  %7853 = vrot.lane.b32.xlu0 %v16299_v13, %s16111_s23  ;;  %9292 = vmatpush1.bf16.msra.mxu0 %v10808_v22  ;;  %v10810_v37 = vcombine.low %v8069_v40, %v5869_v25  ;;  %v16301_v10 = vcombine.low %v13516_v15, %v13538_v34  ;;  %v13826_v46 = vpop.permute.xlu0 %3001  ;;  %v16304_v13 = vrot.slane %v13632_v63, 4 }
 0x1ca   : > { %v3061_v19 = vsel %vm2700_vm10, %v16300_v59, %v3037_v18  ;;  %v10849_v43 = vcombine.low %v6789_v53, %v13675_v16  ;;  %v10850_v3 = vcombine.high %v6789_v53, %v13675_v16  ;;  %9334 = vmatprep.subr.bf16.mxu1 %v10811_v20  ;;  %v13829_v12 = vrot.slane %v5485_v52, %v16209_v50 }
 0x1cb   : > { %v13820_v45 = vsel %vm3055_vm0, %v13612_v21, %v3061_v19  ;;  %2668 = vrot.lane.b32.xlu1 %v16301_v10, %s16111_s23  ;;  %v13833_v25 = vcombine.high %v13720_v27, %v13720_v27  ;;  %v3038_v16 = vrot.slane %v13826_v46, 4  ;;  %9335 = vmatpush1.bf16.msra.mxu1 %v10810_v37  ;;  %v10852_v21 = vcombine.high %v6791_v62, %v13678_v8  ;;  %v2812_v22 = vpop.permute.xlu1 %2811 }
 0x1cc   : > { %9293 = vmatprep.subr.bf16.mxu0 %v10850_v3  ;;  %v5492_v15 = vpack.i.b16 %v13743_v33, %v13743_v33  ;;  %v13840_v34 = vrot.slane %v5471_v39, %v16209_v50  ;;  %v10891_v52 = vcombine.high %v7901_v32, %v7901_v32  ;;  %v10890_v54 = vcombine.low %v7901_v32, %v7901_v32 }
 0x1cd   : > { %3011 = vrot.lane.b32.xlu0 %v13531_v0, %s11356_s17  ;;  %v5478_v1 = vpack.i.b16 %v13749_v31, %v13749_v31  ;;  %v6125_v5 = vcombine.high %v13688_v35, %v13688_v35  ;;  %v3063_v40 = vsel %vm2700_vm10, %v3037_v18, %v3038_v16  ;;  %v2849_v33 = vrot.slane %v2812_v22, 4  ;;  %9294 = vmatpush1.bf16.msra.mxu0 %v10849_v43  ;;  %v6920_v35 = vpop.permute.xlu0 %6919 }
 0x1ce   : > { %v10851_v39 = vcombine.low %v6791_v62, %v13678_v8  ;;  %9336 = vmatprep.subr.bf16.mxu1 %v10852_v21  ;;  %v10892_v53 = vcombine.low %v13792_v51, %v13792_v51  ;;  %v3064_v32 = vsel %vm3055_vm0, %v3000_v55, %v3063_v40  ;;  %v16302_v31 = vcombine.low %v13582_v14, %v13615_v57  ;;  %v16303_v62 = vld [vmem:[#allocation39_spill] sm:$0xff] }
 0x1cf   : > { %10931 = vmatprep.subr.msk.bf16.mxu0 %vm2700_vm10, %v10891_v52  ;;  %v10893_v18 = vcombine.high %v13792_v51, %v13792_v51  ;;  %v10653_v8 = vcombine.low %v13716_v44, %v13764_v9  ;;  %v6958_v29 = vrot.slane %v16303_v62, 4  ;;  %v2873_v55 = vsel %vm2700_vm10, %v16304_v13, %v2849_v33  ;;  %v13873_v59 = vpop.permute.xlu1 %2813 }
 0x1d0   : > { %2670 = vrot.lane.b32.xlu1 %v16302_v31, %s16111_s23  ;;  %v6957_v20 = vrot.slane %v6920_v35, 4  ;;  %9337 = vmatpush1.bf16.msra.mxu1 %v10851_v39  ;;  %v13869_v14 = vrot.slane %v3603_v11, %v16209_v50  ;;  %v2874_v57 = vsel %vm2867_vm12, %v13632_v63, %v2873_v55  ;;  %v16305_v44 = vcombine.low %v13577_v36, %v13585_v61  ;;  %v16310_v55 = vld [vmem:[#allocation9_spill] sm:$0xff] }
 0x1d1   : > { %v9128_v9 = vsel %vm2700_vm10, %v10890_v54, 0  ;;  %10933 = vmatprep.subr.msk.bf16.mxu1 %vm2700_vm10, %v10893_v18  ;;  %v6391_v51 = vpack.i.b16 %v13720_v27, %v13720_v27  ;;  %v13884_v11 = vrot.slane %v6125_v5, %v16173_v30  ;;  %v16306_v19 = vrot.slane %v16276_v6, 4  ;;  %v4846_v10 = vpop.permute.xlu0 %4845 }
 0x1d2   : > { %4701 = vrot.lane.b32.xlu0 %v16305_v44, %s11349_s26  ;;  %v6983_v37 = vsel %vm2700_vm10, %v6957_v20, %v6958_v29  ;;  %v2850_v61 = vrot.slane %v13873_v59, 4  ;;  %9296 = vmatpush1.bf16.msra.mxu0 %v9128_v9  ;;  %v9134_v36 = vsel %vm2700_vm10, %v10892_v53, 0  ;;  %v16307_v3 = vmul.bf16 %v13531_v0, %v13050_v49 }
 0x1d3   : > { %v6981_v63 = vsel %vm2700_vm10, %v16306_v19, %v6957_v20  ;;  %v13899_v27 = vsel %vm6975_vm15, %v6920_v35, %v6983_v37  ;;  %v10730_v21 = vcombine.low %v2874_v57, %v13820_v45  ;;  %v10731_v52 = vcombine.high %v2874_v57, %v13820_v45  ;;  %v3922_v39 = vpop.permute.xlu1 %3921 }
 0x1d4   : > { %v13896_v43 = vsel %vm6975_vm15, %v16276_v6, %v6981_v63  ;;  %2823 = vrot.lane.b32.xlu1 %v16307_v3, %s11352_s21  ;;  %v2875_v54 = vsel %vm2700_vm10, %v2849_v33, %v2850_v61  ;;  %v4883_v5 = vrot.slane %v4846_v10, 4  ;;  %9339 = vmatpush1.bf16.msra.mxu1 %v9134_v36  ;;  %v13911_v6 = vrot.slane %v5492_v15, %v16209_v50 }
 0x1d5   : > { %v6398_v40 = vpack.i.b16 %v13833_v25, %v13833_v25  ;;  %v2876_v49 = vsel %vm2867_vm12, %v2812_v22, %v2875_v54  ;;  %9373 = vmatprep.subr.bf16.mxu0 %v10731_v52  ;;  %v13919_v45 = vrot.slane %v5478_v1, %v16209_v50  ;;  %v6141_v33 = vcombine.high %v13884_v11, %v13884_v11  ;;  %v13934_v18 = vpop.permute.xlu0 %3923  ;;  %v16313_v52 = vld [vmem:[#allocation30_spill] sm:$0xff] }
 0x1d6   : > { %3013 = vrot.lane.b32.xlu0 %v13563_v28, %s11356_s17  ;;  %v16308_v53 = vrot.slane %v13699_v38, 4  ;;  %v3959_v31 = vrot.slane %v3922_v39, 4  ;;  %10932 = vmatmul.mubr.msk.bf16.vlgmr.msra.gmra.mrb[48].mxu0 %vm3055_vm0, %v13648_v17  ;;  %v10732_v25 = vcombine.low %v2876_v49, %v3064_v32  ;;  %v10733_v22 = vcombine.high %v2876_v49, %v3064_v32 }
 0x1d7   : > { %v16309_v1 = vcombine.low %v13597_v58, %v13639_v56  ;;  %9374 = vmatpush1.bf16.msra.mxu0 %v10730_v21  ;;  %v10631_v13 = vcombine.low %v13767_v2, %v13869_v14  ;;  %v4806_v20 = vmul.bf16 %v16310_v55, %v13563_v28  ;;  %v16311_v57 = vrot.slane %v13728_v7, 4  ;;  %10934 = vmatmul.mubr.msk.bf16.vlgmr.msra.gmra.mrb[40].mxu1 %vm3055_vm0, %v13648_v17  ;;  %v13952_v2 = vld [vmem:[#allocation2 + $0x54] sm:$0xff]  ;;  %v13956_v44 = vpop.permute.xlu1 %4847 }
 0x1d8   : > { %v4907_v15 = vsel %vm2700_vm10, %v16308_v53, %v4883_v5  ;;  %9416 = vmatprep.subr.bf16.mxu1 %v10733_v22  ;;  %v13947_v58 = vrot.slane %v6391_v51, %v16186_v47  ;;  %v13950_v56 = vrot.slane %v6398_v40, %v16186_v47  ;;  %v6405_v9 = vpack.i.b16 %v13884_v11, %v13884_v11 }
 0x1d9   : > { %v4908_v35 = vsel %vm4901_vm11, %v13699_v38, %v4907_v15  ;;  %3779 = vrot.lane.b32.xlu1 %v16309_v1, %s11348_s24  ;;  %v3983_v32 = vsel %vm2700_vm10, %v16311_v57, %v3959_v31  ;;  %v3960_v38 = vrot.slane %v13934_v18, 4  ;;  %9417 = vmatpush1.bf16.msra.mxu1 %v10732_v25  ;;  %v6412_v19 = vpack.i.b16 %v6141_v33, %v6141_v33  ;;  %v7844_v11 = vpop.permute.xlu0 %7843 }
 0x1da   : > { %v3984_v14 = vsel %vm3977_vm13, %v13728_v7, %v3983_v32  ;;  %4703 = vrot.lane.b32.xlu0 %v10653_v8, %s11349_s26  ;;  %v4884_v63 = vrot.slane %v13956_v44, 4  ;;  %9405 = vmatprep.mubr.bf16.mxu0 %v16279_v4  ;;  %v16312_v8 = vmul.bf16 %v13563_v28, %v13101_v48  ;;  %v10675_v3 = vcombine.low %v13829_v12, %v13911_v6  ;;  %v7087_v12 = vld [vmem:[%s16000_s7 + $0x40] sm:$0xaa] }
 0x1db   : > { %v3985_v51 = vsel %vm2700_vm10, %v3959_v31, %v3960_v38  ;;  %v10771_v37 = vcombine.low %v3984_v14, %v4908_v35  ;;  %v10772_v36 = vcombine.high %v3984_v14, %v4908_v35  ;;  %9448 = vmatprep.mubr.bf16.mxu1 %v16279_v4  ;;  %v10674_v21 = vcombine.low %v13840_v34, %v13919_v45  ;;  %v5810_v53 = vpop.permute.xlu1 %5809  ;;  %v2056_v34 = vld [vmem:[%s16000_s7 + $0x48] sm:$0x55] }
 0x1dc   : > { %v3986_v7 = vsel %vm3977_vm13, %v3922_v39, %v3985_v51  ;;  %v5769_v54 = vmul.bf16 %v16313_v52, %v13952_v2  ;;  %v7882_v40 = vrot.slane %v13544_v24, 4  ;;  %v4909_v49 = vsel %vm2700_vm10, %v4883_v5, %v4884_v63 }
 0x1dd   : > { %2825 = vrot.lane.b32.xlu1 %v16312_v8, %s11352_s21  ;;  %v7881_v39 = vrot.slane %v7844_v11, 4  ;;  %9375 = vmatprep.subr.bf16.mxu0 %v10772_v36  ;;  %v10696_v48 = vcombine.low %v13947_v58, %v13950_v56  ;;  %v5848_v6 = vrot.slane %v13557_v26, 4  ;;  %v4910_v33 = vsel %vm4901_vm11, %v4846_v10, %v4909_v49  ;;  %v3004_v32 = vpop.permute.xlu0 %3003  ;;  %v16318_v49 = vld [vmem:[#allocation41_spill] sm:$0xff] }
 0x1de   : > { %v16314_v15 = vmul.bf16 %v13137_v42, %v13531_v0  ;;  %9376 = vmatpush1.bf16.msra.mxu0 %v10771_v37  ;;  %v13994_v5 = vrot.slane %v6405_v9, %v16186_v47  ;;  %v13997_v31 = vrot.slane %v6412_v19, %v16186_v47  ;;  %v16315_v25 = vrot.slane %v16287_v60, 4  ;;  %v16316_v19 = vld [vmem:[#allocation35_spill] sm:$0xff] }
 0x1df   : > { %v7906_v10 = vsel %vm2700_vm10, %v7881_v39, %v7882_v40  ;;  %v5847_v35 = vrot.slane %v5810_v53, 4  ;;  %v10773_v1 = vcombine.low %v3986_v7, %v4910_v33  ;;  %v10774_v14 = vcombine.high %v3986_v7, %v4910_v33  ;;  %v16319_v33 = vld [vmem:[#allocation25_spill] sm:$0xff] }
 0x1e0   : > { %4857 = vrot.lane.b32.xlu0 %v16314_v15, %s11350_s27  ;;  %v7904_v22 = vsel %vm2700_vm10, %v16315_v25, %v7881_v39  ;;  %v14010_v57 = vsel %vm2698_vm8, %v7844_v11, %v7906_v10  ;;  %v7237_v9 = vcombine.high %v7087_v12, %v7087_v12  ;;  %v16317_v51 = vrot.slane %v16316_v19, 4  ;;  %v6732_v39 = vpop.permute.xlu1 %6731  ;;  %v8070_v25 = vld [vmem:[#allocation3 + $0x2a8] sm:$0xff] }
 0x1e1   : > { %v14007_v42 = vsel %vm2698_vm8, %v16287_v60, %v7904_v22  ;;  %3781 = vrot.lane.b32.xlu1 %v10631_v13, %s11348_s24  ;;  %v5872_v36 = vsel %vm2700_vm10, %v5847_v35, %v5848_v6  ;;  %v3039_v8 = vrot.slane %v3004_v32, 4  ;;  %v14020_v60 = vrot.slane %v7087_v12, %v16173_v30  ;;  %9418 = vmatprep.subr.bf16.mxu1 %v10774_v14 }
 0x1e2   : > { %v5870_v37 = vsel %vm2700_vm10, %v16317_v51, %v5847_v35  ;;  %v6770_v11 = vrot.slane %v16318_v49, 4  ;;  %v5873_v7 = vsel %vm4732_vm9, %v5810_v53, %v5872_v36  ;;  %v16320_v15 = vmul.bf16 %v16319_v33, %v13563_v28  ;;  %9419 = vmatpush1.bf16.msra.mxu1 %v10773_v1  ;;  %v8071_v53 = vld [vmem:[#allocation3 + $0x2b0] sm:$0xff]  ;;  %v14043_v36 = vpop.permute.xlu0 %3005 }
 0x1e3   : > { %v5871_v13 = vsel %vm4732_vm9, %v16316_v19, %v5870_v37  ;;  %v10697_v22 = vcombine.low %v13994_v5, %v13997_v31  ;;  %v3065_v12 = vsel %vm2700_vm10, %v3038_v16, %v3039_v8  ;;  %v6769_v10 = vrot.slane %v6732_v39, 4  ;;  %v16321_v37 = vld [vmem:[#allocation22_spill] sm:$0xff] }
 0x1e4   : > { %3935 = vrot.lane.b32.xlu0 %v16320_v15, %s16266_s14  ;;  %v10812_v35 = vcombine.low %v8070_v25, %v5871_v13  ;;  %v10813_v19 = vcombine.high %v8070_v25, %v5871_v13  ;;  %v14037_v51 = vsel %vm3055_vm0, %v13826_v46, %v3065_v12  ;;  %v16322_v14 = vmul.bf16 %v16321_v37, %v13531_v0 }
 0x1e5   : > { %v10814_v33 = vcombine.low %v8071_v53, %v5873_v7  ;;  %v10815_v15 = vcombine.high %v8071_v53, %v5873_v7  ;;  %v7251_v16 = vrot.slane %v7237_v9, %v16173_v30  ;;  %v16323_v1 = vrot.slane %v16291_v41, 4  ;;  %v2816_v9 = vpop.permute.xlu1 %2815 }
 0x1e6   : > { %3933 = vrot.lane.b32.xlu1 %v16322_v14, %s16266_s14  ;;  %v6794_v46 = vsel %vm2700_vm10, %v6769_v10, %v6770_v11  ;;  %v3040_v25 = vrot.slane %v14043_v36, 4  ;;  %9377 = vmatprep.subr.bf16.mxu0 %v10813_v19  ;;  %v7252_v0 = vcombine.high %v14020_v60, %v14020_v60  ;;  %v7503_v53 = vpack.i.b16 %v14020_v60, %v14020_v60 }
 0x1e7   : > { %v6792_v13 = vsel %vm2700_vm10, %v16323_v1, %v6769_v10  ;;  %v6795_v7 = vsel %vm3809_vm7, %v6732_v39, %v6794_v46  ;;  %9420 = vmatprep.subr.bf16.mxu1 %v10815_v15  ;;  %v2851_v19 = vrot.slane %v2816_v9, 4  ;;  %9378 = vmatpush1.bf16.msra.mxu0 %v10812_v35  ;;  %v7253_v35 = vcombine.high %v7251_v16, %v7251_v16 }
 0x1e8   : > { %v6793_v12 = vsel %vm3809_vm7, %v16291_v41, %v6792_v13  ;;  %5670 = vrot.lane.b32.xlu0 %v10675_v3, %s11350_s27  ;;  %v3067_v10 = vsel %vm2700_vm10, %v3039_v8, %v3040_v25  ;;  %9421 = vmatpush1.bf16.msra.mxu1 %v10814_v33  ;;  %v14073_v3 = vpop.permute.xlu0 %4849  ;;  %v10855_v60 = vcombine.low %v6795_v7, %v13899_v27 }
 0x1e9   : > { %v10853_v37 = vcombine.low %v6793_v12, %v13896_v43  ;;  %v10854_v41 = vcombine.high %v6793_v12, %v13896_v43  ;;  %v14067_v39 = vsel %vm3055_vm0, %v3004_v32, %v3067_v10  ;;  %v10856_v8 = vcombine.high %v6795_v7, %v13899_v27  ;;  %v14088_v27 = vpop.permute.xlu1 %2817 }
 0x1ea   : > { %5668 = vrot.lane.b32.xlu1 %v10674_v21, %s11350_s27  ;;  %v2877_v14 = vsel %vm2700_vm10, %v2850_v61, %v2851_v19  ;;  %v4885_v43 = vrot.slane %v14073_v3, 4  ;;  %v10895_v32 = vcombine.high %v14007_v42, %v14007_v42  ;;  %v7517_v33 = vpack.i.b16 %v7251_v16, %v7251_v16 }
 0x1eb   : > { %9379 = vmatprep.subr.bf16.mxu0 %v10854_v41  ;;  %v2878_v45 = vsel %vm2867_vm12, %v13873_v59, %v2877_v14  ;;  %9422 = vmatprep.subr.bf16.mxu1 %v10856_v8  ;;  %v10894_v61 = vcombine.low %v14007_v42, %v14007_v42  ;;  %v10896_v21 = vcombine.low %v14010_v57, %v14010_v57  ;;  %v2852_v15 = vrot.slane %v14088_v27, 4 }
 0x1ec   : > { %6588 = vrot.lane.b32.xlu0 %v10696_v48, %s16266_s14  ;;  %v4911_v59 = vsel %vm2700_vm10, %v4884_v63, %v4885_v43  ;;  %9380 = vmatpush1.bf16.msra.mxu0 %v10853_v37  ;;  %v10897_v58 = vcombine.high %v14010_v57, %v14010_v57  ;;  %v7510_v56 = vpack.i.b16 %v7252_v0, %v7252_v0  ;;  %v14114_v42 = vpop.permute.xlu0 %3927 }
 0x1ed   : > { %9423 = vmatpush1.bf16.msra.mxu1 %v10855_v60  ;;  %v14108_v48 = vsel %vm4901_vm11, %v13956_v44, %v4911_v59  ;;  %10935 = vmatprep.subr.msk.bf16.mxu0 %vm2700_vm10, %v10895_v32  ;;  %v7524_v63 = vpack.i.b16 %v7253_v35, %v7253_v35  ;;  %v2229_v16 = vrot.slane %v2056_v34, %v16173_v30  ;;  %v9140_v13 = vsel %vm2700_vm10, %v10894_v61, 0  ;;  %v16328_v59 = vld [vmem:[#allocation29_spill] sm:$0xff] }
 0x1ee   : > { %4859 = vrot.lane.b32.xlu1 %v4806_v20, %s11350_s27  ;;  %v2879_v57 = vsel %vm2700_vm10, %v2851_v19, %v2852_v15  ;;  %10937 = vmatprep.subr.msk.bf16.mxu1 %vm2700_vm10, %v10897_v58  ;;  %v14123_v44 = vrot.slane %v7517_v33, %v16209_v50  ;;  %v14126_v1 = vrot.slane %v7503_v53, %v16209_v50  ;;  %v3926_v20 = vpop.permute.xlu1 %3925  ;;  %v9146_v46 = vsel %vm2700_vm10, %v10896_v21, 0  ;;  %v16327_v21 = vld [vmem:[#allocation24_spill] sm:$0xff] }
 0x1ef   : > { %v2222_v28 = vcombine.high %v2056_v34, %v2056_v34  ;;  %v2880_v55 = vsel %vm2867_vm12, %v2816_v9, %v2879_v57  ;;  %v10735_v0 = vcombine.high %v2878_v45, %v14037_v51  ;;  %v3962_v12 = vrot.slane %v14114_v42, 4 }
 0x1f0   : > { %6590 = vrot.lane.b32.xlu0 %v10697_v22, %s16266_s14  ;;  %v3961_v7 = vrot.slane %v3926_v20, 4  ;;  %9382 = vmatpush1.bf16.msra.mxu0 %v9140_v13  ;;  %v10737_v53 = vcombine.high %v2880_v55, %v14067_v39  ;;  %v14139_v9 = vrot.slane %v7510_v56, %v16209_v50  ;;  %v14145_v5 = vpop.permute.xlu0 %6582  ;;  %v10736_v31 = vcombine.low %v2880_v55, %v14067_v39 }
 0x1f1   : > { %9425 = vmatpush1.bf16.msra.mxu1 %v9146_v46  ;;  %9459 = vmatprep.subr.bf16.mxu0 %v10735_v0  ;;  %v7529_v22 = vrot.slane %v7524_v63, %v16209_v50  ;;  %v2237_v10 = vcombine.high %v2229_v16, %v2229_v16  ;;  %v10734_v41 = vcombine.low %v2878_v45, %v14037_v51  ;;  %v14172_v51 = vld [vmem:[%s16000_s7 + $0x48] sm:$0x55] }
 0x1f2   : > { %5821 = vrot.lane.b32.xlu1 %v5769_v54, %s11349_s26  ;;  %v3987_v19 = vsel %vm2700_vm10, %v3960_v38, %v3961_v7  ;;  %v3989_v37 = vsel %vm2700_vm10, %v3961_v7, %v3962_v12  ;;  %9502 = vmatprep.subr.bf16.mxu1 %v10737_v53  ;;  %v14157_v52 = vrot.slane %v2222_v28, %v16173_v30  ;;  %v16324_v54 = vld [vmem:[#allocation12_spill] sm:$0xff]  ;;  %v14163_v35 = vpop.permute.xlu1 %4851  ;;  %v16326_v45 = vld [vmem:[#allocation13_spill] sm:$0xff] }
 0x1f3   : > { %v2691_v60 = vrot.slane %v16324_v54, 4  ;;  %v3988_v39 = vsel %vm3977_vm13, %v13934_v18, %v3987_v19  ;;  %v3990_v8 = vsel %vm3977_vm13, %v3926_v20, %v3989_v37  ;;  %10936 = vmatmul.mubr.msk.bf16.vlgmr.msra.gmra.mrb[52].mxu0 %vm3055_vm0, %v13648_v17  ;;  %v2499_v38 = vpack.i.b16 %v2229_v16, %v2229_v16  ;;  %v16325_v18 = vld [vmem:[#allocation32_spill] sm:$0xff] }
 0x1f4   : > { %6931 = vrot.lane.b32.xlu0 %v13952_v2, %s11355_s16  ;;  %v4886_v14 = vrot.slane %v14163_v35, 4  ;;  %v6691_v32 = vmul.bf16 %v16325_v18, %v13952_v2  ;;  %10938 = vmatmul.mubr.msk.bf16.vlgmr.msra.gmra.mrb[44].mxu1 %vm3055_vm0, %v13648_v17  ;;  %v10775_v33 = vcombine.low %v3988_v39, %v14108_v48  ;;  %v10776_v34 = vcombine.high %v3988_v39, %v14108_v48  ;;  %v14186_v56 = vpop.permute.xlu0 %6923  ;;  %v16330_v17 = vld [vmem:[#allocation31_spill] sm:$0xff] }
 0x1f5   : > { %9460 = vmatpush1.bf16.msra.mxu0 %v10734_v41  ;;  %v4723_v61 = vrot.slane %v16326_v45, 4  ;;  %v16329_v58 = vmul.bf16 %v16327_v21, %v16328_v59  ;;  %9503 = vmatpush1.bf16.msra.mxu1 %v10736_v31  ;;  %v10718_v63 = vcombine.low %v14126_v1, %v14139_v9  ;;  %v7803_v16 = vmul.bf16 %v16330_v17, %v13952_v2 }
 0x1f6   : > { %v2506_v57 = vpack.i.b16 %v2237_v10, %v2237_v10  ;;  %v4913_v48 = vsel %vm2700_vm10, %v4885_v43, %v4886_v14  ;;  %v6959_v28 = vrot.slane %v14186_v56, 4  ;;  %9461 = vmatprep.subr.bf16.mxu0 %v10776_v34  ;;  %v2238_v55 = vcombine.high %v14157_v52, %v14157_v52  ;;  %9491 = vmatprep.mubr.bf16.mxu0 %v16279_v4  ;;  %v5814_v13 = vpop.permute.xlu1 %5813  ;;  %v16331_v43 = vld [vmem:[#allocation34_spill] sm:$0xff] }
 0x1f7   : > { %5823 = vrot.lane.b32.xlu1 %v16329_v58, %s11349_s26  ;;  %v14202_v20 = vrot.slane %v14172_v51, %v16173_v30  ;;  %v5850_v2 = vrot.slane %v13807_v23, 4  ;;  %v4914_v1 = vsel %vm4901_vm11, %v14073_v3, %v4913_v48  ;;  %v16332_v46 = vmul.bf16 %v16327_v21, %v16331_v43  ;;  %9534 = vmatprep.mubr.bf16.mxu1 %v16279_v4  ;;  %v14225_v10 = vld [vmem:[%s16000_s7 + $0x48] sm:$0xaa] }
 0x1f8   : > { %v10719_v0 = vcombine.low %v14123_v44, %v7529_v22  ;;  %v14214_v7 = vrot.slane %v2499_v38, %v16186_v47  ;;  %v6985_v53 = vsel %vm2700_vm10, %v6958_v29, %v6959_v28  ;;  %v5849_v3 = vrot.slane %v5814_v13, 4  ;;  %v14232_v22 = vpop.permute.xlu0 %6737 }
 0x1f9   : > { %6745 = vrot.lane.b32.xlu0 %v16332_v46, %s11348_s24  ;;  %9462 = vmatpush1.bf16.msra.mxu0 %v10775_v33  ;;  %v10777_v9 = vcombine.low %v3990_v8, %v4914_v1  ;;  %v10778_v31 = vcombine.high %v3990_v8, %v4914_v1  ;;  %v14229_v44 = vsel %vm6975_vm15, %v16303_v62, %v6985_v53  ;;  %v6880_v53 = vld [vmem:[#allocation2 + $0x5c] sm:$0xff] }
 0x1fa   : > { %v14235_v19 = vrot.slane %v2506_v57, %v16186_v47  ;;  %v2513_v29 = vpack.i.b16 %v14157_v52, %v14157_v52  ;;  %v4255_v37 = vcombine.high %v14172_v51, %v14172_v51  ;;  %v5874_v41 = vsel %vm2700_vm10, %v5848_v6, %v5849_v3  ;;  %v6736_v18 = vpop.permute.xlu1 %6735  ;;  %v8072_v6 = vld [vmem:[#allocation3 + $0x2b8] sm:$0xff] }
 0x1fb   : > { %6743 = vrot.lane.b32.xlu1 %v6691_v32, %s11348_s24  ;;  %v5876_v62 = vsel %vm2700_vm10, %v5849_v3, %v5850_v2  ;;  %9504 = vmatprep.subr.bf16.mxu1 %v10778_v31  ;;  %v2520_v39 = vpack.i.b16 %v2238_v55, %v2238_v55  ;;  %v4270_v8 = vcombine.high %v14202_v20, %v14202_v20  ;;  %v6772_v51 = vrot.slane %v14232_v22, 4  ;;  %v8073_v32 = vld [vmem:[#allocation3 + $0x2c0] sm:$0xff] }
 0x1fc   : > { %v5875_v38 = vsel %vm4732_vm9, %v13557_v26, %v5874_v41  ;;  %v5877_v52 = vsel %vm4732_vm9, %v5814_v13, %v5876_v62  ;;  %9505 = vmatpush1.bf16.msra.mxu1 %v10777_v9  ;;  %v14256_v33 = vrot.slane %v14225_v10, %v16173_v30  ;;  %v6771_v34 = vrot.slane %v6736_v18, 4  ;;  %v14259_v26 = vpop.permute.xlu0 %7694  ;;  %v16333_v31 = vld [vmem:[#allocation11_spill] sm:$0xff]  ;;  %v16335_v41 = vld [vmem:[#allocation37_spill] sm:$0xff] }
 0x1fd   : > { %7702 = vrot.lane.b32.xlu0 %v10719_v0, %s11352_s21  ;;  %v10816_v21 = vcombine.low %v8072_v6, %v5875_v38  ;;  %v10817_v59 = vcombine.high %v8072_v6, %v5875_v38  ;;  %v10818_v58 = vcombine.low %v8073_v32, %v5877_v52  ;;  %v10819_v17 = vcombine.high %v8073_v32, %v5877_v52  ;;  %v16337_v52 = vld [vmem:[#allocation26_spill] sm:$0xff]  ;;  %v16339_v32 = vld [vmem:[#allocation16_spill] sm:$0xff] }
 0x1fe   : > { %v14262_v57 = vrot.slane %v2513_v29, %v16186_v47  ;;  %v4532_v48 = vpack.i.b16 %v14202_v20, %v14202_v20  ;;  %v14267_v55 = vrot.slane %v4255_v37, %v16173_v30  ;;  %v6796_v1 = vsel %vm2700_vm10, %v6770_v11, %v6771_v34  ;;  %v14281_v0 = vpop.permute.xlu1 %7692  ;;  %v11274_v37 = vld [vmem:[#allocation2 + $0x5c] sm:$0xff] }
 0x1ff   : > { %7700 = vrot.lane.b32.xlu1 %v10718_v63, %s11352_s21  ;;  %v6798_v63 = vsel %vm2700_vm10, %v6771_v34, %v6772_v51  ;;  %9463 = vmatprep.subr.bf16.mxu0 %v10817_v59  ;;  %v2525_v13 = vrot.slane %v2520_v39, %v16186_v47  ;;  %v4539_v43 = vpack.i.b16 %v4270_v8, %v4270_v8  ;;  %v16334_v29 = vrot.slane %v16333_v31, 4  ;;  %v16336_v8 = vld [vmem:[#allocation14_spill] sm:$0xff] }
 0x200   : > { %v6797_v46 = vsel %vm3809_vm7, %v16318_v49, %v6796_v1  ;;  %v14279_v20 = vsel %vm3809_vm7, %v6736_v18, %v6798_v63  ;;  %9506 = vmatprep.subr.bf16.mxu1 %v10819_v17  ;;  %v3333_v11 = vcombine.high %v14225_v10, %v14225_v10  ;;  %9464 = vmatpush1.bf16.msra.mxu0 %v10816_v21  ;;  %v7848_v62 = vpop.permute.xlu0 %7847  ;;  %v3801_v38 = vrot.slane %v16336_v8, 4  ;;  %v14313_v59 = vld [vmem:[%s16000_s7 + $0x48] sm:$0xaa] }
 0x201   : > { %7855 = vrot.lane.b32.xlu0 %v7803_v16, %s16111_s23  ;;  %9507 = vmatpush1.bf16.msra.mxu1 %v10818_v58  ;;  %v10857_v3 = vcombine.low %v6797_v46, %v14229_v44  ;;  %v10858_v9 = vcombine.high %v6797_v46, %v14229_v44  ;;  %v3348_v49 = vcombine.high %v14256_v33, %v14256_v33  ;;  %v16338_v18 = vrot.slane %v16337_v52, 4 }
 0x202   : > { %v14295_v16 = vsel %vm2700_vm10, %v16334_v29, %v2691_v60  ;;  %v7804_v10 = vmul.bf16 %v11274_v37, %v16335_v41  ;;  %v10610_v39 = vcombine.low %v14214_v7, %v14235_v19  ;;  %v4271_v44 = vcombine.high %v14267_v55, %v14267_v55  ;;  %v14315_v7 = vpop.permute.xlu1 %6925 }
 0x203   : > { %6933 = vrot.lane.b32.xlu1 %v6880_v53, %s11355_s16  ;;  %v4756_v6 = vsel %vm2700_vm10, %v16338_v18, %v4723_v61  ;;  %v16114_v34 = vrot.slane %v16339_v32, 4  ;;  %v7883_v21 = vrot.slane %v7848_v62, 4  ;;  %9465 = vmatprep.subr.bf16.mxu0 %v10858_v9  ;;  %v4537_v19 = vrot.slane %v4532_v48, %v16186_v47 }
 0x204   : > { %v4544_v58 = vrot.slane %v4539_v43, %v16186_v47  ;;  %v3610_v17 = vpack.i.b16 %v14256_v33, %v14256_v33  ;;  %v14323_v1 = vrot.slane %v3333_v11, %v16173_v30  ;;  %v6960_v46 = vrot.slane %v14315_v7, 4  ;;  %9466 = vmatpush1.bf16.msra.mxu0 %v10857_v3  ;;  %v14333_v43 = vpop.permute.xlu0 %7849 }
 0x205   : > { %7857 = vrot.lane.b32.xlu0 %v7804_v10, %s16111_s23  ;;  %v7908_v63 = vsel %vm2700_vm10, %v7882_v40, %v7883_v21  ;;  %v10611_v53 = vcombine.low %v14262_v57, %v2525_v13  ;;  %v3617_v9 = vpack.i.b16 %v3348_v49, %v3348_v49  ;;  %v4546_v33 = vpack.i.b16 %v14267_v55, %v14267_v55 }
 0x206   : > { %v7909_v48 = vsel %vm2698_vm8, %v13544_v24, %v7908_v63  ;;  %v4553_v11 = vpack.i.b16 %v4271_v44, %v4271_v44  ;;  %v5222_v40 = vcombine.high %v14313_v59, %v14313_v59  ;;  %v6987_v57 = vsel %vm2700_vm10, %v6959_v28, %v6960_v46  ;;  %v14345_v24 = vld [vmem:[#allocation2 + $0x60] sm:$0xff]  ;;  %v14349_v55 = vpop.permute.xlu1 %2664 }
 0x207   : > { %2672 = vrot.lane.b32.xlu1 %v10610_v39, %s16111_s23  ;;  %v7884_v13 = vrot.slane %v14333_v43, 4  ;;  %v10899_v3 = vcombine.high %v7909_v48, %v7909_v48  ;;  %v10898_v49 = vcombine.low %v7909_v48, %v7909_v48  ;;  %v6988_v31 = vsel %vm6975_vm15, %v14186_v56, %v6987_v57 }
 0x208   : > { %v10654_v29 = vcombine.low %v4537_v19, %v4544_v58  ;;  %v3615_v37 = vrot.slane %v3610_v17, %v16209_v50  ;;  %v3349_v28 = vcombine.high %v14323_v1, %v14323_v1  ;;  %v3622_v10 = vrot.slane %v3617_v9, %v16209_v50  ;;  %v14365_v52 = vpop.permute.xlu0 %3007 }
 0x209   : > { %3015 = vrot.lane.b32.xlu0 %v14345_v24, %s11356_s17  ;;  %v7910_v41 = vsel %vm2700_vm10, %v7883_v21, %v7884_v13  ;;  %10939 = vmatprep.subr.msk.bf16.mxu0 %vm2700_vm10, %v10899_v3  ;;  %v10859_v56 = vcombine.low %v14279_v20, %v6988_v31  ;;  %v10860_v39 = vcombine.high %v14279_v20, %v6988_v31  ;;  %v9152_v18 = vsel %vm2700_vm10, %v10898_v49, 0  ;;  %v5976_v49 = vld [vmem:[%s16000_s7 + $0x48] sm:$0x55] }
 0x20a   : > { %v7911_v44 = vsel %vm2698_vm8, %v7848_v62, %v7910_v41  ;;  %v4551_v19 = vrot.slane %v4546_v33, %v16186_v47  ;;  %v5236_v21 = vrot.slane %v5222_v40, %v16173_v30  ;;  %v3041_v58 = vrot.slane %v14365_v52, 4  ;;  %9468 = vmatpush1.bf16.msra.mxu0 %v9152_v18  ;;  %v14372_v9 = vpop.permute.xlu1 %2666  ;;  %v16340_v62 = vld [vmem:[#allocation33_spill] sm:$0xff] }
 0x20b   : > { %2674 = vrot.lane.b32.xlu1 %v10611_v53, %s16111_s23  ;;  %9508 = vmatprep.subr.bf16.mxu1 %v10860_v39  ;;  %v4558_v17 = vrot.slane %v4553_v11, %v16186_v47  ;;  %v10901_v63 = vcombine.high %v7911_v44, %v7911_v44  ;;  %v10900_v20 = vcombine.low %v7911_v44, %v7911_v44  ;;  %v16341_v44 = vld [vmem:[#allocation28_spill] sm:$0xff]  ;;  %s16353_s23 = smov 55  }
 0x20c   : > { %v2773_v53 = vmul.bf16 %v14345_v24, %v16340_v62  ;;  %9509 = vmatpush1.bf16.msra.mxu1 %v10859_v56  ;;  %v3624_v48 = vpack.i.b16 %v14323_v1, %v14323_v1  ;;  %v3631_v33 = vpack.i.b16 %v3349_v28, %v3349_v28  ;;  %v2726_v40 = vsel %vm2698_vm8, %v14295_v16, %v16324_v54  ;;  %v14394_v16 = vpop.permute.xlu0 %4697 }
 0x20d   : > { %4705 = vrot.lane.b32.xlu0 %v10654_v29, %s11349_s26  ;;  %v4757_v11 = vsel %vm4732_vm9, %v4756_v6, %v16326_v45  ;;  %v3069_v57 = vsel %vm2700_vm10, %v3040_v25, %v3041_v58  ;;  %v10632_v3 = vcombine.low %v3615_v37, %v3622_v10  ;;  %10941 = vmatprep.subr.msk.bf16.mxu1 %vm2700_vm10, %v10901_v63  ;;  %v14399_v6 = vld [vmem:[%s15996_s3] sm:$0xff]   ;;  %v14410_v29 = vld [vmem:[#allocation2 + $0x68] sm:$0xff]  ;;  %v9158_v28 = vsel %vm2700_vm10, %v10900_v20, 0 }
 0x20e   : > { %v3070_v1 = vsel %vm3055_vm0, %v14043_v36, %v3069_v57  ;;  %10940 = vmatmul.mubr.msk.bf16.vlgmr.msra.gmra.mrb[56].mxu0 %vm3055_vm0, %v14399_v6  ;;  %v5238_v25 = vcombine.high %v5236_v21, %v5236_v21  ;;  %v5229_v31 = vrot.slane %v14313_v59, %v16173_v30  ;;  %v3835_v36 = vsel %vm2700_vm10, %v3801_v38, %v16114_v34  ;;  %v2820_v10 = vpop.permute.xlu1 %2819 }
 0x20f   : > { %2827 = vrot.lane.b32.xlu1 %v2773_v53, %s11352_s21  ;;  %v10655_v37 = vcombine.low %v4551_v19, %v4558_v17  ;;  %v6142_v41 = vcombine.high %v5976_v49, %v5976_v49  ;;  %9577 = vmatprep.mubr.bf16.mxu0 %v16279_v4  ;;  %v3629_v59 = vrot.slane %v3624_v48, %v16209_v50  ;;  %v16342_v18 = vrot.slane %v16341_v44, 4 }
 0x210   : > { %9511 = vmatpush1.bf16.msra.mxu1 %v9158_v28  ;;  %v3636_v56 = vrot.slane %v3631_v33, %v16209_v50  ;;  %v6149_v39 = vrot.slane %v5976_v49, %v16173_v30  ;;  %v2853_v17 = vrot.slane %v2820_v10, 4  ;;  %v5513_v63 = vpack.i.b16 %v5236_v21, %v5236_v21  ;;  %v14427_v62 = vpop.permute.xlu0 %3009 }
 0x211   : > { %3017 = vrot.lane.b32.xlu0 %v14410_v29, %s11356_s17  ;;  %v3833_v19 = vsel %vm2700_vm10, %v16342_v18, %v3801_v38  ;;  %v3836_v20 = vsel %vm3809_vm7, %v3835_v36, %v16339_v32  ;;  %v2774_v53 = vmul.bf16 %v14410_v29, %v2726_v40  ;;  %v5520_v48 = vpack.i.b16 %v5238_v25, %v5238_v25 }
 0x212   : > { %v5237_v33 = vcombine.high %v5229_v31, %v5229_v31  ;;  %v2881_v57 = vsel %vm2700_vm10, %v2852_v15, %v2853_v17  ;;  %v16113_v49 = vrot.slane %v14427_v62, 4  ;;  %v4807_v38 = vmul.bf16 %v4757_v11, %v14345_v24  ;;  %v14440_v36 = vpop.permute.xlu1 %3775 }
 0x213   : > { %3783 = vrot.lane.b32.xlu1 %v10632_v3, %s11348_s24  ;;  %10942 = vmatmul.mubr.msk.bf16.vlgmr.msra.gmra.mrb[48].mxu1 %vm3055_vm0, %v14399_v6  ;;  %v6156_v21 = vrot.slane %v6142_v41, %v16173_v30  ;;  %v2882_v3 = vsel %vm2867_vm12, %v14088_v27, %v2881_v57  ;;  %v10633_v40 = vcombine.low %v3629_v59, %v3636_v56 }
 0x214   : > { %v6157_v25 = vcombine.high %v6149_v39, %v6149_v39  ;;  %9620 = vmatprep.mubr.bf16.mxu1 %v16279_v4  ;;  %v3071_v15 = vsel %vm2700_vm10, %v3041_v58, %v16113_v49  ;;  %v10738_v11 = vcombine.low %v2882_v3, %v3070_v1  ;;  %v10739_v28 = vcombine.high %v2882_v3, %v3070_v1  ;;  %v14451_v27 = vpop.permute.xlu0 %4699  ;;  %v16344_v3 = vld [vmem:[#allocation21_spill] sm:$0xff] }
 0x215   : > { %4707 = vrot.lane.b32.xlu0 %v10655_v37, %s11349_s26  ;;  %v5518_v44 = vrot.slane %v5513_v63, %v16209_v50  ;;  %v3072_v41 = vsel %vm3055_vm0, %v14365_v52, %v3071_v15  ;;  %v5525_v37 = vrot.slane %v5520_v48, %v16209_v50  ;;  %v5499_v59 = vpack.i.b16 %v5229_v31, %v5229_v31  ;;  %v16343_v63 = vld [vmem:[#allocation15_spill] sm:$0xff] }
 0x216   : > { %v5506_v56 = vpack.i.b16 %v5237_v33, %v5237_v33  ;;  %v3834_v18 = vsel %vm3809_vm7, %v3833_v19, %v16336_v8  ;;  %9545 = vmatprep.subr.bf16.mxu0 %v10739_v28  ;;  %v6158_v58 = vcombine.high %v6156_v21, %v6156_v21  ;;  %v14456_v57 = vpop.permute.xlu1 %2821  ;;  %v6419_v1 = vpack.i.b16 %v6149_v39, %v6149_v39  ;;  %v7088_v8 = vld [vmem:[%s16000_s7 + $0x48] sm:$0xaa] }
 0x217   : > { %2829 = vrot.lane.b32.xlu1 %v2774_v53, %s11352_s21  ;;  %9546 = vmatpush1.bf16.msra.mxu0 %v10738_v11  ;;  %v6426_v52 = vpack.i.b16 %v6157_v25, %v6157_v25  ;;  %v4724_v53 = vrot.slane %v16343_v63, 4  ;;  %v5690_v15 = vrot.slane %v16344_v3, 4  ;;  %v2854_v48 = vrot.slane %v14456_v57, 4 }
 0x218   : > { %v3884_v31 = vmul.bf16 %v3836_v20, %v14410_v29  ;;  %v14467_v19 = vpop.permute.xlu0 %4853  ;;  %v3883_v33 = vmul.bf16 %v3834_v18, %v14345_v24  ;;  %v10677_v39 = vcombine.low %v5518_v44, %v5525_v37  ;;  %v5511_v25 = vrot.slane %v5506_v56, %v16209_v50  ;;  %v16345_v56 = vld [vmem:[#allocation17_spill] sm:$0xff] }
 0x219   : > { %4861 = vrot.lane.b32.xlu0 %v4807_v38, %s11350_s27  ;;  %v5504_v38 = vrot.slane %v5499_v59, %v16209_v50  ;;  %v2883_v11 = vsel %vm2700_vm10, %v2853_v17, %v2854_v48  ;;  %v4887_v20 = vrot.slane %v14467_v19, 4  ;;  %v6433_v28 = vpack.i.b16 %v6156_v21, %v6156_v21 }
 0x21a   : > { %v6440_v49 = vpack.i.b16 %v6158_v58, %v6158_v58  ;;  %v2884_v34 = vsel %vm2867_vm12, %v2820_v10, %v2883_v11  ;;  %v6424_v24 = vrot.slane %v6419_v1, %v16186_v47  ;;  %v6431_v44 = vrot.slane %v6426_v52, %v16186_v47  ;;  %v16346_v52 = vld [vmem:[#allocation27_spill] sm:$0xff] }
 0x21b   : > { %3785 = vrot.lane.b32.xlu1 %v10633_v40, %s11348_s24  ;;  %v14477_v40 = vpop.permute.xlu1 %3777  ;;  %v7254_v37 = vcombine.high %v7088_v8, %v7088_v8  ;;  %v4758_v17 = vsel %vm2700_vm10, %v4723_v61, %v4724_v53  ;;  %v4915_v10 = vsel %vm2700_vm10, %v4886_v14, %v4887_v20  ;;  %v10740_v21 = vcombine.low %v2884_v34, %v3072_v41 }
 0x21c   : > { %v10741_v59 = vcombine.high %v2884_v34, %v3072_v41  ;;  %v5691_v18 = vrot.slane %v16345_v56, 4  ;;  %v4916_v58 = vsel %vm4901_vm11, %v14163_v35, %v4915_v10  ;;  %v14496_v1 = vpop.permute.xlu0 %3931  ;;  %v10676_v45 = vcombine.low %v5504_v38, %v5511_v25 }
 0x21d   : > { %3939 = vrot.lane.b32.xlu0 %v3884_v31, %s16266_s14  ;;  %v16347_v61 = vrot.slane %v16346_v52, 4  ;;  %v6438_v11 = vrot.slane %v6433_v28, %v16186_v47  ;;  %v6445_v14 = vrot.slane %v6440_v49, %v16186_v47  ;;  %v4759_v34 = vsel %vm4732_vm9, %v4758_v17, %v16343_v63  ;;  %v16348_v28 = vld [vmem:[#allocation18_spill] sm:$0xff] }
 0x21e   : > { %9588 = vmatprep.subr.bf16.mxu1 %v10741_v59  ;;  %v10698_v35 = vcombine.low %v6424_v24, %v6431_v44  ;;  %v16115_v38 = vrot.slane %v14496_v1, 4  ;;  %v5723_v49 = vsel %vm2700_vm10, %v5690_v15, %v5691_v18  ;;  %v6610_v59 = vrot.slane %v16348_v28, 4 }
 0x21f   : > { %3937 = vrot.lane.b32.xlu1 %v3883_v33, %s16266_s14  ;;  %v5721_v31 = vsel %vm2700_vm10, %v16347_v61, %v5690_v15  ;;  %v3930_v41 = vpop.permute.xlu1 %3929  ;;  %9589 = vmatpush1.bf16.msra.mxu1 %v10740_v21  ;;  %v7268_v33 = vrot.slane %v7254_v37, %v16173_v30  ;;  %v4808_v44 = vmul.bf16 %v4759_v34, %v14410_v29  ;;  %v6611_v15 = vrot.slane %v14145_v5, 4 }
 0x220   : > { %v3963_v25 = vrot.slane %v3930_v41, 4  ;;  %v5722_v10 = vsel %vm4901_vm11, %v5721_v31, %v16344_v3  ;;  %v14515_v17 = vpop.permute.xlu0 %5666  ;;  %v10699_v37 = vcombine.low %v6438_v11, %v6445_v14  ;;  %v11276_v31 = vld [vmem:[#allocation2 + $0x64] sm:$0xff]  ;;  %v5724_v14 = vsel %vm4901_vm11, %v5723_v49, %v16345_v56  ;;  %v10591_v49 = vld.sshfl [vmem:[%s16000_s7 + $0x50] sm:$0x1 pattern:$0x76325410] }
 0x221   : > { %5674 = vrot.lane.b32.xlu0 %v10677_v39, %s11350_s27  ;;  %v7261_v39 = vrot.slane %v7088_v8, %v16173_v30  ;;  %v7270_v30 = vcombine.high %v7268_v33, %v7268_v33  ;;  %v5771_v11 = vmul.bf16 %v11276_v31, %v5722_v10 }
 0x222   : > { %v3991_v24 = vsel %vm2700_vm10, %v3962_v12, %v3963_v25  ;;  %v3993_v3 = vsel %vm2700_vm10, %v3963_v25, %v16115_v38  ;;  %v7545_v25 = vpack.i.b16 %v7268_v33, %v7268_v33 }
 0x223   : > { %5672 = vrot.lane.b32.xlu1 %v10676_v45, %s11350_s27  ;;  %v3992_v21 = vsel %vm3977_vm13, %v14114_v42, %v3991_v24  ;;  %v3994_v45 = vsel %vm3977_vm13, %v3930_v41, %v3993_v3  ;;  %v14529_v52 = vpop.permute.xlu1 %5664  ;;  %v7269_v29 = vcombine.high %v7261_v39, %v7261_v39  ;;  %v16349_v42 = vld [vmem:[#allocation7_spill] sm:$0xff]  ;;  %v7552_v24 = vpack.i.b16 %v7270_v30, %v7270_v30  ;;  %v14557_v30 = vld [vmem:[#allocation2 + $0x64] sm:$0xff] }
 0x224   : > { %v10779_v12 = vcombine.low %v3992_v21, %v4916_v58  ;;  %v10780_v8 = vcombine.high %v3992_v21, %v4916_v58  ;;  %v14533_v61 = vpop.permute.xlu0 %6584  ;;  %v16350_v34 = vrot.slane %v16349_v42, 4  ;;  %v14570_v42 = vld [vmem:[#allocation2 + $0x6c] sm:$0xff] }
 0x225   : > { %6592 = vrot.lane.b32.xlu0 %v10698_v35, %s16266_s14  ;;  %v6644_v35 = vsel %vm2700_vm10, %v6610_v59, %v6611_v15  ;;  %v7538_v21 = vpack.i.b16 %v7269_v29, %v7269_v29  ;;  %v6612_v63 = vrot.slane %v14533_v61, 4 }
 0x226   : > { %v6642_v41 = vsel %vm2700_vm10, %v16350_v34, %v6610_v59  ;;  %9547 = vmatprep.subr.bf16.mxu0 %v10780_v8  ;;  %v11277_v59 = vld [vmem:[#allocation2 + $0x6c] sm:$0xff]  ;;  %v6645_v33 = vsel %vm3977_vm13, %v6644_v35, %v14145_v5 }
 0x227   : > { %4863 = vrot.lane.b32.xlu1 %v4808_v44, %s11350_s27  ;;  %v14543_v58 = vpop.permute.xlu1 %4855  ;;  %9548 = vmatpush1.bf16.msra.mxu0 %v10779_v12  ;;  %v7531_v44 = vpack.i.b16 %v7261_v39, %v7261_v39  ;;  %v5772_v8 = vmul.bf16 %v11277_v59, %v5724_v14  ;;  %v2527_v14 = vpack.i.b16 %v10591_v49, %v10591_v49 }
 0x228   : > { %v4888_v10 = vrot.slane %v14543_v58, 4  ;;  %v14551_v3 = vpop.permute.xlu0 %6586  ;;  %v6694_v59 = vmul.bf16 %v6645_v33, %v14570_v42 }
 0x229   : > { %6594 = vrot.lane.b32.xlu0 %v10699_v37, %s16266_s14  ;;  %v6643_v37 = vsel %vm3977_vm13, %v6642_v41, %v16348_v28  ;;  %v7550_v28 = vrot.slane %v7545_v25, %v16209_v50 }
 0x22a   : > { %v4917_v12 = vsel %vm2700_vm10, %v4887_v20, %v4888_v10  ;;  %v6693_v38 = vmul.bf16 %v11276_v31, %v6643_v37  ;;  %v2532_v31 = vrot.slane %v2527_v14, %v16186_v47 }
 0x22b   : > { %5825 = vrot.lane.b32.xlu1 %v5771_v11, %s11349_s26  ;;  %v4918_v39 = vsel %vm4901_vm11, %v14467_v19, %v4917_v12  ;;  %v5818_v29 = vpop.permute.xlu1 %5817  ;;  %v7557_v11 = vrot.slane %v7552_v24, %v16209_v50  ;;  %v7536_v19 = vrot.slane %v7531_v44, %v16209_v50  ;;  %v7543_v12 = vrot.slane %v7538_v21, %v16209_v50  ;;  %v8074_v21 = vld [vmem:[#allocation3 + $0x2c8] sm:$0xff] }
 0x22c   : > { %v5851_v34 = vrot.slane %v5818_v29, 4  ;;  %v10781_v41 = vcombine.low %v3994_v45, %v4918_v39  ;;  %v10782_v35 = vcombine.high %v3994_v45, %v4918_v39  ;;  %v14574_v20 = vpop.permute.xlu0 %6927  ;;  %v2692_v45 = vrot.slane %v14349_v55, 4 }
 0x22d   : > { %6935 = vrot.lane.b32.xlu0 %v14557_v30, %s11355_s16  ;;  %v6961_v24 = vrot.slane %v14574_v20, 4  ;;  %v10721_v44 = vcombine.low %v7550_v28, %v7557_v11  ;;  %v10720_v47 = vcombine.low %v7536_v19, %v7543_v12 }
 0x22e   : > { %v5878_v25 = vsel %vm2700_vm10, %v5850_v2, %v5851_v34  ;;  %9590 = vmatprep.subr.bf16.mxu1 %v10782_v35 }
 0x22f   : > { %5827 = vrot.lane.b32.xlu1 %v5772_v8, %s11349_s26  ;;  %v5879_v49 = vsel %vm4732_vm9, %v13807_v23, %v5878_v25  ;;  %v14585_v8 = vpop.permute.xlu1 %5819  ;;  %9591 = vmatpush1.bf16.msra.mxu1 %v10781_v41  ;;  %v6989_v2 = vsel %vm2700_vm10, %v6960_v46, %v6961_v24  ;;  %v7722_v23 = vrot.slane %v14281_v0, 4  ;;  %v2727_v46 = vsel %vm2700_vm10, %v2691_v60, %v2692_v45  ;;  %v16351_v25 = vld [vmem:[#allocation10_spill] sm:$0xff] }
 0x230   : > { %v5852_v37 = vrot.slane %v14585_v8, 4  ;;  %v10820_v33 = vcombine.low %v8074_v21, %v5879_v49  ;;  %v10821_v39 = vcombine.high %v8074_v21, %v5879_v49  ;;  %v6990_v35 = vsel %vm6975_vm15, %v14315_v7, %v6989_v2  ;;  %v14599_v28 = vpop.permute.xlu0 %6741 }
 0x231   : > { %6749 = vrot.lane.b32.xlu0 %v6694_v59, %s11348_s24  ;;  %v14611_v7 = vcombine.low %v2532_v31, %v2532_v31  ;;  %v6774_v59 = vrot.slane %v14599_v28, 4  ;;  %v16352_v49 = vrot.slane %v16351_v25, 4  ;;  %v7723_v21 = vrot.slane %v14259_v26, 4 }
 0x232   : > { %v5880_v11 = vsel %vm2700_vm10, %v5851_v34, %v5852_v37  ;;  %9549 = vmatprep.subr.bf16.mxu0 %v10821_v39  ;;  %v2693_v25 = vrot.slane %v14372_v9, 4 }
 0x233   : > { %6747 = vrot.lane.b32.xlu1 %v6693_v38, %s11348_s24  ;;  %v5881_v14 = vsel %vm4732_vm9, %v5818_v29, %v5880_v11  ;;  %v6740_v41 = vpop.permute.xlu1 %6739  ;;  %9550 = vmatpush1.bf16.msra.mxu0 %v10820_v33  ;;  %v8075_v38 = vld [vmem:[#allocation3 + $0x2d0] sm:$0xff]  ;;  %v7754_v54 = vsel %vm2700_vm10, %v16352_v49, %v7722_v23  ;;  %v2728_v29 = vsel %vm2698_vm8, %v2727_v46, %v14349_v55 }
 0x234   : > { %v6773_v19 = vrot.slane %v6740_v41, 4  ;;  %v10822_v34 = vcombine.low %v8075_v38, %v5881_v14  ;;  %v10823_v12 = vcombine.high %v8075_v38, %v5881_v14  ;;  %v14618_v60 = vpop.permute.xlu0 %7698  ;;  %v7756_v14 = vsel %vm2700_vm10, %v7722_v23, %v7723_v21 }
 0x235   : > { %7706 = vrot.lane.b32.xlu0 %v10721_v44, %s11352_s21 }
 0x236   : > { %v6800_v44 = vsel %vm2700_vm10, %v6772_v51, %v6773_v19  ;;  %v6802_v31 = vsel %vm2700_vm10, %v6773_v19, %v6774_v59  ;;  %9592 = vmatprep.subr.bf16.mxu1 %v10823_v12  ;;  %v7755_v51 = vsel %vm2867_vm12, %v7754_v54, %v14281_v0  ;;  %v3803_v0 = vrot.slane %v14440_v36, 4 }
 0x237   : > { %7704 = vrot.lane.b32.xlu1 %v10720_v47, %s11352_s21  ;;  %v6801_v2 = vsel %vm3809_vm7, %v14232_v22, %v6800_v44  ;;  %v6803_v33 = vsel %vm3809_vm7, %v6740_v41, %v6802_v31  ;;  %v14632_v39 = vpop.permute.xlu1 %7696  ;;  %9593 = vmatpush1.bf16.msra.mxu1 %v10822_v34  ;;  %v14638_v47 = vld [vmem:[#allocation2 + $0x70] sm:$0xff]  ;;  %v7805_v19 = vmul.bf16 %v7755_v51, %v14557_v30  ;;  %v3804_v51 = vrot.slane %v14477_v40, 4 }
 0x238   : > { %v10861_v11 = vcombine.low %v6801_v2, %v6990_v35  ;;  %v10862_v46 = vcombine.high %v6801_v2, %v6990_v35  ;;  %v2775_v22 = vmul.bf16 %v2728_v29, %v14638_v47  ;;  %v7852_v41 = vpop.permute.xlu0 %7851  ;;  %v7757_v12 = vsel %vm2867_vm12, %v7756_v14, %v14259_v26  ;;  %v10613_v31 = vld.sshfl [vmem:[%s16000_s7 + $0x50] sm:$0x2 pattern:$0x76325410] }
 0x239   : > { %2676 = vrot.lane.b32.xlu0 %v14611_v7, %s16353_s23  ;;  %v7885_v38 = vrot.slane %v7852_v41, 4 }
 0x23a   : > { %9551 = vmatprep.subr.bf16.mxu0 %v10862_v46 }
 0x23b   : > { %6937 = vrot.lane.b32.xlu1 %v14570_v42, %s11355_s16  ;;  %v14648_v34 = vpop.permute.xlu1 %6929  ;;  %9552 = vmatpush1.bf16.msra.mxu0 %v10861_v11  ;;  %v7912_v23 = vsel %vm2700_vm10, %v7884_v13, %v7885_v38 }
 0x23c   : > { %v6962_v35 = vrot.slane %v14648_v34, 4  ;;  %v7913_v30 = vsel %vm2698_vm8, %v14333_v43, %v7912_v23  ;;  %v14661_v49 = vpop.permute.xlu0 %7853  ;;  %v16354_v43 = vrot.slane %v16339_v32, 4 }
 0x23d   : > { %2831 = vrot.lane.b32.xlu0 %v2775_v22, %s11352_s21  ;;  %v7886_v54 = vrot.slane %v14661_v49, 4  ;;  %v10903_v29 = vcombine.high %v7913_v30, %v7913_v30  ;;  %v10902_v44 = vcombine.low %v7913_v30, %v7913_v30  ;;  %v14695_v30 = vld [vmem:[#allocation2 + $0x78] sm:$0xff] }
 0x23e   : > { %v6991_v13 = vsel %vm2700_vm10, %v6961_v24, %v6962_v35  ;;  %v3837_v2 = vsel %vm2700_vm10, %v16354_v43, %v3803_v0  ;;  %v7806_v24 = vmul.bf16 %v7757_v12, %v14570_v42  ;;  %v3638_v12 = vpack.i.b16 %v10613_v31, %v10613_v31 }
 0x23f   : > { %7859 = vrot.lane.b32.xlu1 %v7805_v19, %s16353_s23  ;;  %v6992_v11 = vsel %vm6975_vm15, %v14574_v20, %v6991_v13  ;;  %v14678_v46 = vpop.permute.xlu1 %2668  ;;  %v7914_v14 = vsel %vm2700_vm10, %v7885_v38, %v7886_v54  ;;  %10943 = vmatprep.subr.msk.bf16.mxu0 %vm2700_vm10, %v10903_v29  ;;  %v2729_v20 = vsel %vm2700_vm10, %v2692_v45, %v2693_v25  ;;  %v9164_v23 = vsel %vm2700_vm10, %v10902_v44, 0 }
 0x240   : > { %v10863_v32 = vcombine.low %v6803_v33, %v6992_v11  ;;  %v10864_v22 = vcombine.high %v6803_v33, %v6992_v11  ;;  %v7915_v19 = vsel %vm2698_vm8, %v7852_v41, %v7914_v14  ;;  %v3012_v42 = vpop.permute.xlu0 %3011  ;;  %v3838_v38 = vsel %vm3809_vm7, %v3837_v2, %v14440_v36  ;;  %9554 = vmatpush1.bf16.msra.mxu0 %v9164_v23 }
 0x241   : > { %4709 = vrot.lane.b32.xlu0 %v14611_v7, %s11349_s26  ;;  %v3043_v33 = vrot.slane %v3012_v42, 4  ;;  %v10905_v13 = vcombine.high %v7915_v19, %v7915_v19  ;;  %v10904_v55 = vcombine.low %v7915_v19, %v7915_v19  ;;  %v3839_v45 = vsel %vm2700_vm10, %v3803_v0, %v3804_v51 }
 0x242   : > { %9594 = vmatprep.subr.bf16.mxu1 %v10864_v22  ;;  %v2730_v29 = vsel %vm2698_vm8, %v2729_v20, %v14372_v9  ;;  %v16355_v36 = vrot.slane %v14427_v62, 4  ;;  %v4725_v31 = vrot.slane %v14394_v16, 4  ;;  %v3885_v43 = vmul.bf16 %v3838_v38, %v14638_v47 }
 0x243   : > { %7861 = vrot.lane.b32.xlu1 %v7806_v24, %s16353_s23  ;;  %v14702_v41 = vpop.permute.xlu1 %2670  ;;  %9595 = vmatpush1.bf16.msra.mxu1 %v10863_v32  ;;  %v3643_v11 = vrot.slane %v3638_v12, %v16209_v50  ;;  %v3840_v24 = vsel %vm3809_vm7, %v3839_v45, %v14477_v40  ;;  %v9170_v14 = vsel %vm2700_vm10, %v10904_v55, 0  ;;  %v2776_v32 = vmul.bf16 %v2730_v29, %v14695_v30 }
 0x244   : > { %v3073_v44 = vsel %vm2700_vm10, %v16355_v36, %v3043_v33  ;;  %10945 = vmatprep.subr.msk.bf16.mxu1 %vm2700_vm10, %v10905_v13  ;;  %v14718_v2 = vpop.permute.xlu0 %4701  ;;  %10944 = vmatmul.mubr.msk.bf16.vlgmr.msra.gmra.mrb[60].mxu0 %vm3055_vm0, %v14399_v6  ;;  %v4760_v50 = vsel %vm2700_vm10, %v4724_v53, %v4725_v31  ;;  %v4726_v20 = vrot.slane %v14451_v27, 4  ;;  %v3886_v19 = vmul.bf16 %v3840_v24, %v14695_v30 }
 0x245   : > { %3021 = vrot.lane.b32.xlu0 %v14695_v30, %s11356_s17  ;;  %v3074_v0 = vsel %vm3055_vm0, %v14427_v62, %v3073_v44  ;;  %9663 = vmatprep.mubr.bf16.mxu0 %v16279_v4  ;;  %v14737_v12 = vcombine.low %v3643_v11, %v3643_v11  ;;  %v4761_v45 = vsel %vm4732_vm9, %v4760_v50, %v14394_v16  ;;  %v14798_v50 = vld [vmem:[#allocation2 + $0x74] sm:$0xff] }
 0x246   : > { %v4762_v36 = vsel %vm2700_vm10, %v4725_v31, %v4726_v20  ;;  %v4809_v16 = vmul.bf16 %v4761_v45, %v14638_v47 }
 0x247   : > { %3019 = vrot.lane.b32.xlu1 %v14638_v47, %s11356_s17  ;;  %v2824_v62 = vpop.permute.xlu1 %2823  ;;  %9597 = vmatpush1.bf16.msra.mxu1 %v9170_v14 }
 0x248   : > { %v2855_v22 = vrot.slane %v2824_v62, 4  ;;  %v14735_v23 = vpop.permute.xlu0 %3013 }
 0x249   : > { %3941 = vrot.lane.b32.xlu0 %v3885_v43, %s16266_s14  ;;  %v3044_v13 = vrot.slane %v14735_v23, 4 }
 0x24a   : > { %v2885_v38 = vsel %vm2700_vm10, %v2854_v48, %v2855_v22  ;;  %10946 = vmatmul.mubr.msk.bf16.vlgmr.msra.gmra.mrb[52].mxu1 %vm3055_vm0, %v14399_v6 }
 0x24b   : > { %2833 = vrot.lane.b32.xlu1 %v2776_v32, %s11352_s21  ;;  %v2886_v53 = vsel %vm2867_vm12, %v14456_v57, %v2885_v38  ;;  %v14748_v55 = vpop.permute.xlu1 %3779  ;;  %9706 = vmatprep.mubr.bf16.mxu1 %v16279_v4  ;;  %v3075_v48 = vsel %vm2700_vm10, %v3043_v33, %v3044_v13  ;;  %v5692_v57 = vrot.slane %v14529_v52, 4  ;;  %v6646_v33 = vsel %vm2700_vm10, %v6611_v15, %v6612_v63 }
 0x24c   : > { %v10742_v29 = vcombine.low %v2886_v53, %v3074_v0  ;;  %v10743_v6 = vcombine.high %v2886_v53, %v3074_v0  ;;  %v3076_v44 = vsel %vm3055_vm0, %v3012_v42, %v3075_v48  ;;  %v14764_v43 = vpop.permute.xlu0 %4703  ;;  %v4763_v42 = vsel %vm4732_vm9, %v4762_v36, %v14451_v27 }
 0x24d   : > { %3943 = vrot.lane.b32.xlu0 %v3886_v19, %s16266_s14  ;;  %v5725_v47 = vsel %vm2700_vm10, %v5691_v18, %v5692_v57  ;;  %v6647_v15 = vsel %vm3977_vm13, %v6646_v33, %v14533_v61  ;;  %v4810_v14 = vmul.bf16 %v4763_v42, %v14695_v30  ;;  %v5693_v32 = vrot.slane %v14515_v17, 4 }
 0x24e   : > { %9631 = vmatprep.subr.bf16.mxu0 %v10743_v6  ;;  %v5726_v19 = vsel %vm4901_vm11, %v5725_v47, %v14529_v52  ;;  %v6695_v53 = vmul.bf16 %v6647_v15, %v14798_v50  ;;  %v16356_v33 = vrot.slane %v14496_v1, 4  ;;  %v2694_v61 = vrot.slane %v14678_v46, 4 }
 0x24f   : > { %3787 = vrot.lane.b32.xlu1 %v14737_v12, %s11348_s24  ;;  %v14772_v0 = vpop.permute.xlu1 %2825  ;;  %9632 = vmatpush1.bf16.msra.mxu0 %v10742_v29  ;;  %v5773_v52 = vmul.bf16 %v5726_v19, %v14798_v50  ;;  %v6613_v29 = vrot.slane %v14551_v3, 4 }
 0x250   : > { %v2856_v31 = vrot.slane %v14772_v0, 4 }
 0x251   : > { %5676 = vrot.lane.b32.xlu0 %v14737_v12, %s11350_s27 }
 0x252   : > { %v14783_v5 = vpop.permute.xlu0 %4857  ;;  %v2887_v11 = vsel %vm2700_vm10, %v2855_v22, %v2856_v31 }
 0x253   : > { %4865 = vrot.lane.b32.xlu1 %v4809_v16, %s11350_s27  ;;  %v4889_v24 = vrot.slane %v14783_v5, 4  ;;  %v2888_v56 = vsel %vm2867_vm12, %v2824_v62, %v2887_v11  ;;  %v14794_v18 = vpop.permute.xlu1 %3781  ;;  %v5727_v62 = vsel %vm2700_vm10, %v5692_v57, %v5693_v32  ;;  %v7725_v57 = vrot.slane %v14618_v60, 4  ;;  %v5961_v16 = vld [vmem:[#allocation2 + $0x7c] sm:$0xff] }
 0x254   : > { %v10744_v38 = vcombine.low %v2888_v56, %v3076_v44  ;;  %v10745_v30 = vcombine.high %v2888_v56, %v3076_v44 }
 0x255   : > { %6596 = vrot.lane.b32.xlu0 %v14611_v7, %s16266_s14  ;;  %v4919_v22 = vsel %vm2700_vm10, %v4888_v10, %v4889_v24  ;;  %v7724_v10 = vrot.slane %v14632_v39, 4 }
 0x256   : > { %v4920_v7 = vsel %vm4901_vm11, %v14543_v58, %v4919_v22  ;;  %v14812_v45 = vpop.permute.xlu0 %3935  ;;  %9674 = vmatprep.subr.bf16.mxu1 %v10745_v30  ;;  %v5728_v58 = vsel %vm4901_vm11, %v5727_v62, %v14515_v17  ;;  %v6648_v22 = vsel %vm2700_vm10, %v6612_v63, %v6613_v29 }
 0x257   : > { %4867 = vrot.lane.b32.xlu1 %v4810_v14, %s11350_s27  ;;  %9675 = vmatpush1.bf16.msra.mxu1 %v10744_v38  ;;  %v3966_v6 = vrot.slane %v14812_v45, 4  ;;  %v7760_v15 = vsel %vm2700_vm10, %v7724_v10, %v7725_v57  ;;  %v5774_v19 = vmul.bf16 %v5961_v16, %v5728_v58  ;;  %v2695_v58 = vrot.slane %v14702_v41, 4 }
 0x258   : > { %v3934_v48 = vpop.permute.xlu1 %3933 }
 0x259   : > { %6751 = vrot.lane.b32.xlu0 %v6695_v53, %s11348_s24  ;;  %v3965_v36 = vrot.slane %v3934_v48, 4  ;;  %v7758_v53 = vsel %vm2700_vm10, %v7723_v21, %v7724_v10  ;;  %v2731_v10 = vsel %vm2700_vm10, %v2693_v25, %v2694_v61  ;;  %v14882_v25 = vld [vmem:[#allocation2 + $0x80] sm:$0xff] }
 0x25a   : > { %v14823_v44 = vpop.permute.xlu0 %5670  ;;  %v7759_v26 = vsel %vm2867_vm12, %v7758_v53, %v14632_v39 }
 0x25b   : > { %5829 = vrot.lane.b32.xlu1 %v5773_v52, %s11349_s26  ;;  %v3995_v42 = vsel %vm2700_vm10, %v16356_v33, %v3965_v36  ;;  %v3997_v47 = vsel %vm2700_vm10, %v3965_v36, %v3966_v6  ;;  %v4727_v33 = vrot.slane %v14718_v2, 4  ;;  %v7807_v9 = vmul.bf16 %v7759_v26, %v14798_v50 }
 0x25c   : > { %v3996_v11 = vsel %vm3977_vm13, %v14496_v1, %v3995_v42  ;;  %v3998_v14 = vsel %vm3977_vm13, %v3934_v48, %v3997_v47  ;;  %v14837_v56 = vpop.permute.xlu1 %5668  ;;  %v7761_v1 = vsel %vm2867_vm12, %v7760_v15, %v14618_v60 }
 0x25d   : > { %7708 = vrot.lane.b32.xlu0 %v14737_v12, %s11352_s21  ;;  %v10783_v38 = vcombine.low %v3996_v11, %v4920_v7  ;;  %v10784_v30 = vcombine.high %v3996_v11, %v4920_v7  ;;  %v6649_v12 = vsel %vm3977_vm13, %v6648_v22, %v14551_v3  ;;  %v7808_v48 = vmul.bf16 %v7761_v1, %v5961_v16 }
 0x25e   : > { %v14847_v62 = vpop.permute.xlu0 %6588  ;;  %v6696_v36 = vmul.bf16 %v6649_v12, %v5961_v16  ;;  %v2732_v11 = vsel %vm2698_vm8, %v2731_v10, %v14678_v46  ;;  %v4728_v22 = vrot.slane %v14764_v43, 4  ;;  %v3805_v12 = vrot.slane %v14748_v55, 4 }
 0x25f   : > { %5831 = vrot.lane.b32.xlu1 %v5774_v19, %s11349_s26  ;;  %9633 = vmatprep.subr.bf16.mxu0 %v10784_v30  ;;  %v5694_v10 = vrot.slane %v14837_v56, 4 }
 0x260   : > { %v14857_v63 = vpop.permute.xlu1 %4859  ;;  %9634 = vmatpush1.bf16.msra.mxu0 %v10783_v38 }
 0x261   : > { %6941 = vrot.lane.b32.xlu0 %v5961_v16, %s11355_s16  ;;  %v4890_v7 = vrot.slane %v14857_v63, 4 }
 0x262   : > { %v14863_v52 = vpop.permute.xlu0 %6590 }
 0x263   : > { %6939 = vrot.lane.b32.xlu1 %v14798_v50, %s11355_s16  ;;  %v4921_v21 = vsel %vm2700_vm10, %v4889_v24, %v4890_v7  ;;  %v4764_v50 = vsel %vm2700_vm10, %v4726_v20, %v4727_v33 }
 0x264   : > { %v4922_v42 = vsel %vm4901_vm11, %v14783_v5, %v4921_v21  ;;  %v5822_v47 = vpop.permute.xlu1 %5821  ;;  %v3806_v21 = vrot.slane %v14794_v18, 4 }
 0x265   : > { %7865 = vrot.lane.b32.xlu0 %v7808_v48, %s16353_s23  ;;  %v5853_v16 = vrot.slane %v5822_v47, 4  ;;  %v10785_v39 = vcombine.low %v3998_v14, %v4922_v42  ;;  %v10786_v15 = vcombine.high %v3998_v14, %v4922_v42  ;;  %v2733_v14 = vsel %vm2700_vm10, %v2694_v61, %v2695_v58  ;;  %v14916_v48 = vld [vmem:[#allocation2 + $0x88] sm:$0xff] }
 0x266   : > { %v14879_v24 = vpop.permute.xlu0 %6931  ;;  %v2777_v61 = vmul.bf16 %v2732_v11, %v14882_v25 }
 0x267   : > { %6753 = vrot.lane.b32.xlu1 %v6696_v36, %s11348_s24  ;;  %v5882_v5 = vsel %vm2700_vm10, %v5852_v37, %v5853_v16  ;;  %v6963_v19 = vrot.slane %v14879_v24, 4  ;;  %9676 = vmatprep.subr.bf16.mxu1 %v10786_v15  ;;  %v8076_v37 = vld [vmem:[#allocation3 + $0x2d8] sm:$0xff]  ;;  %v4765_v36 = vsel %vm4732_vm9, %v4764_v50, %v14718_v2  ;;  %v8077_v2 = vld [vmem:[#allocation3 + $0x2e0] sm:$0xff] }
 0x268   : > { %v5883_v46 = vsel %vm4732_vm9, %v14585_v8, %v5882_v5  ;;  %9677 = vmatpush1.bf16.msra.mxu1 %v10785_v39  ;;  %v4811_v5 = vmul.bf16 %v4765_v36, %v14882_v25 }
 0x269   : > { %v14899_v38 = vpop.permute.xlu1 %5823  ;;  %3023 = vrot.lane.b32.xlu0 %v14882_v25, %s11356_s17  ;;  %v6993_v27 = vsel %vm2700_vm10, %v6962_v35, %v6963_v19  ;;  %v10824_v30 = vcombine.low %v8076_v37, %v5883_v46  ;;  %v10825_v1 = vcombine.high %v8076_v37, %v5883_v46  ;;  %v2734_v35 = vsel %vm2698_vm8, %v2733_v14, %v14702_v41 }
 0x26a   : > { %v5854_v20 = vrot.slane %v14899_v38, 4  ;;  %v6994_v8 = vsel %vm6975_vm15, %v14648_v34, %v6993_v27  ;;  %v4766_v34 = vsel %vm2700_vm10, %v4727_v33, %v4728_v22  ;;  %v3841_v33 = vsel %vm2700_vm10, %v3804_v51, %v3805_v12 }
 0x26b   : > { %7863 = vrot.lane.b32.xlu1 %v7807_v9, %s16353_s23  ;;  %v14913_v53 = vpop.permute.xlu0 %6745  ;;  %9635 = vmatprep.subr.bf16.mxu0 %v10825_v1  ;;  %v5695_v14 = vrot.slane %v14823_v44, 4  ;;  %v2778_v50 = vmul.bf16 %v2734_v35, %v14916_v48  ;;  %v4767_v46 = vsel %vm4732_vm9, %v4766_v34, %v14764_v43 }
 0x26c   : > { %v5884_v26 = vsel %vm2700_vm10, %v5853_v16, %v5854_v20  ;;  %9636 = vmatpush1.bf16.msra.mxu0 %v10824_v30  ;;  %v6776_v15 = vrot.slane %v14913_v53, 4 }
 0x26d   : > { %v5885_v42 = vsel %vm4732_vm9, %v5822_v47, %v5884_v26  ;;  %v6744_v39 = vpop.permute.xlu1 %6743  ;;  %3025 = vrot.lane.b32.xlu0 %v14916_v48, %s11356_s17  ;;  %v5731_v51 = vsel %vm2700_vm10, %v5694_v10, %v5695_v14  ;;  %v4812_v26 = vmul.bf16 %v4767_v46, %v14916_v48 }
 0x26e   : > { %v6775_v16 = vrot.slane %v6744_v39, 4  ;;  %v10826_v9 = vcombine.low %v8077_v2, %v5885_v42  ;;  %v10827_v11 = vcombine.high %v8077_v2, %v5885_v42  ;;  %v5732_v42 = vsel %vm4901_vm11, %v5731_v51, %v14823_v44 }
 0x26f   : > { %2835 = vrot.lane.b32.xlu1 %v2777_v61, %s11352_s21  ;;  %v14940_v47 = vpop.permute.xlu0 %7702  ;;  %v3843_v61 = vsel %vm2700_vm10, %v3805_v12, %v3806_v21  ;;  %v5729_v12 = vsel %vm2700_vm10, %v5693_v32, %v5694_v10 }
 0x270   : > { %v6804_v37 = vsel %vm2700_vm10, %v6774_v59, %v6775_v16  ;;  %v6806_v40 = vsel %vm2700_vm10, %v6775_v16, %v6776_v15  ;;  %9678 = vmatprep.subr.bf16.mxu1 %v10827_v11  ;;  %v3842_v59 = vsel %vm3809_vm7, %v3841_v33, %v14748_v55  ;;  %v3844_v55 = vsel %vm3809_vm7, %v3843_v61, %v14794_v18  ;;  %v14979_v16 = vld [vmem:[#allocation2 + $0x8c] sm:$0xff] }
 0x271   : > { %v6805_v27 = vsel %vm3809_vm7, %v14599_v28, %v6804_v37  ;;  %v6807_v30 = vsel %vm3809_vm7, %v6744_v39, %v6806_v40  ;;  %v14957_v1 = vpop.permute.xlu1 %7700  ;;  %4869 = vrot.lane.b32.xlu0 %v4811_v5, %s11350_s27  ;;  %9679 = vmatpush1.bf16.msra.mxu1 %v10826_v9  ;;  %v3887_v39 = vmul.bf16 %v3842_v59, %v14882_v25 }
 0x272   : > { %v10865_v35 = vcombine.low %v6805_v27, %v6994_v8  ;;  %v10866_v36 = vcombine.high %v6805_v27, %v6994_v8  ;;  %v6614_v8 = vrot.slane %v14847_v62, 4  ;;  %v5776_v17 = vmul.bf16 %v14979_v16, %v5732_v42 }
 0x273   : > { %2837 = vrot.lane.b32.xlu1 %v2778_v50, %s11352_s21  ;;  %v7856_v28 = vpop.permute.xlu0 %7855  ;;  %v3888_v50 = vmul.bf16 %v3844_v55, %v14916_v48  ;;  %v7726_v46 = vrot.slane %v14957_v1, 4  ;;  %v6615_v27 = vrot.slane %v14863_v52, 4 }
 0x274   : > { %v7887_v34 = vrot.slane %v7856_v28, 4  ;;  %9637 = vmatprep.subr.bf16.mxu0 %v10866_v36 }
 0x275   : > { %v14972_v2 = vpop.permute.xlu1 %6933  ;;  %4871 = vrot.lane.b32.xlu0 %v4812_v26, %s11350_s27  ;;  %9638 = vmatpush1.bf16.msra.mxu0 %v10865_v35  ;;  %v6652_v55 = vsel %vm2700_vm10, %v6614_v8, %v6615_v27 }
 0x276   : > { %v7916_v25 = vsel %vm2700_vm10, %v7886_v54, %v7887_v34  ;;  %v6964_v9 = vrot.slane %v14972_v2, 4 }
 0x277   : > { %v7917_v11 = vsel %vm2698_vm8, %v14661_v49, %v7916_v25  ;;  %3945 = vrot.lane.b32.xlu1 %v3887_v39, %s16266_s14  ;;  %v14988_v5 = vpop.permute.xlu0 %7857  ;;  %v5730_v49 = vsel %vm4901_vm11, %v5729_v12, %v14837_v56 }
 0x278   : > { %v6995_v32 = vsel %vm2700_vm10, %v6963_v19, %v6964_v9  ;;  %v7888_v10 = vrot.slane %v14988_v5, 4  ;;  %v10907_v54 = vcombine.high %v7917_v11, %v7917_v11  ;;  %v10906_v33 = vcombine.low %v7917_v11, %v7917_v11 }
 0x279   : > { %v6996_v37 = vsel %vm6975_vm15, %v14879_v24, %v6995_v32  ;;  %v15003_v40 = vpop.permute.xlu1 %2672  ;;  %5835 = vrot.lane.b32.xlu0 %v5776_v17, %s11349_s26  ;;  %v6650_v19 = vsel %vm2700_vm10, %v6613_v29, %v6614_v8  ;;  %v7727_v24 = vrot.slane %v14940_v47, 4  ;;  %v15018_v29 = vld [vmem:[#allocation2 + $0x84] sm:$0xff]  ;;  %v6653_v17 = vsel %vm3977_vm13, %v6652_v55, %v14863_v52 }
 0x27a   : > { %v7918_v48 = vsel %vm2700_vm10, %v7887_v34, %v7888_v10  ;;  %10947 = vmatprep.subr.msk.bf16.mxu0 %vm2700_vm10, %v10907_v54  ;;  %v10867_v56 = vcombine.low %v6807_v30, %v6996_v37  ;;  %v10868_v51 = vcombine.high %v6807_v30, %v6996_v37  ;;  %v9176_v3 = vsel %vm2700_vm10, %v10906_v33, 0 }
 0x27b   : > { %v7919_v59 = vsel %vm2698_vm8, %v7856_v28, %v7918_v48  ;;  %3947 = vrot.lane.b32.xlu1 %v3888_v50, %s16266_s14  ;;  %v3016_v61 = vpop.permute.xlu0 %3015  ;;  %9640 = vmatpush1.bf16.msra.mxu0 %v9176_v3  ;;  %v5775_v30 = vmul.bf16 %v5730_v49, %v15018_v29  ;;  %v7764_v34 = vsel %vm2700_vm10, %v7726_v46, %v7727_v24  ;;  %v2696_v33 = vrot.slane %v15003_v40, 4 }
 0x27c   : > { %v3045_v35 = vrot.slane %v3016_v61, 4  ;;  %9680 = vmatprep.subr.bf16.mxu1 %v10868_v51  ;;  %v10909_v36 = vcombine.high %v7919_v59, %v7919_v59  ;;  %v10908_v26 = vcombine.low %v7919_v59, %v7919_v59  ;;  %v6651_v28 = vsel %vm3977_vm13, %v6650_v19, %v14847_v62  ;;  %v15043_v62 = vld [vmem:[%s15996_s3] sm:$0xff]  }
 0x27d   : > { %v15024_v42 = vpop.permute.xlu1 %2674  ;;  %6943 = vrot.lane.b32.xlu0 %v15018_v29, %s11355_s16  ;;  %9681 = vmatpush1.bf16.msra.mxu1 %v10867_v56  ;;  %v7762_v32 = vsel %vm2700_vm10, %v7725_v57, %v7726_v46  ;;  %v6698_v60 = vmul.bf16 %v6653_v17, %v14979_v16 }
 0x27e   : > { %v3077_v39 = vsel %vm2700_vm10, %v3044_v13, %v3045_v35  ;;  %10949 = vmatprep.subr.msk.bf16.mxu1 %vm2700_vm10, %v10909_v36  ;;  %10948 = vmatmul.mubr.msk.bf16.vlgmr.msra.gmra.mrb[64].mxu0 %vm3055_vm0, %v15043_v62  ;;  %v7765_v13 = vsel %vm2867_vm12, %v7764_v34, %v14940_v47  ;;  %v9182_v11 = vsel %vm2700_vm10, %v10908_v26, 0  ;;  %v7763_v57 = vsel %vm2867_vm12, %v7762_v32, %v14957_v1  ;;  %v2044_v36 = vld [vmem:[#allocation2 + $0x90] sm:$0xff] }
 0x27f   : > { %v3078_v12 = vsel %vm3055_vm0, %v14735_v23, %v3077_v39  ;;  %5833 = vrot.lane.b32.xlu1 %v5775_v30, %s11349_s26  ;;  %v4706_v25 = vpop.permute.xlu0 %4705  ;;  %9749 = vmatprep.mubr.bf16.mxu0 %v16279_v4  ;;  %v6697_v23 = vmul.bf16 %v6651_v28, %v15018_v29  ;;  %v7810_v49 = vmul.bf16 %v7765_v13, %v14979_v16 }
 0x280   : > { %v4729_v46 = vrot.slane %v4706_v25, 4  ;;  %v2735_v1 = vsel %vm2700_vm10, %v2695_v58, %v2696_v33  ;;  %v7809_v26 = vmul.bf16 %v7763_v57, %v15018_v29 }
 0x281   : > { %v2828_v8 = vpop.permute.xlu1 %2827  ;;  %6945 = vrot.lane.b32.xlu0 %v14979_v16, %s11355_s16  ;;  %9683 = vmatpush1.bf16.msra.mxu1 %v9182_v11  ;;  %v2736_v41 = vsel %vm2698_vm8, %v2735_v1, %v15003_v40 }
 0x282   : > { %v2857_v54 = vrot.slane %v2828_v8, 4  ;;  %v2779_v55 = vmul.bf16 %v2736_v41, %v2044_v36 }
 0x283   : > { %6755 = vrot.lane.b32.xlu1 %v6697_v23, %s11348_s24  ;;  %v15061_v50 = vpop.permute.xlu0 %3017 }
 0x284   : > { %v2889_v37 = vsel %vm2700_vm10, %v2856_v31, %v2857_v54  ;;  %v3046_v19 = vrot.slane %v15061_v50, 4  ;;  %10950 = vmatmul.mubr.msk.bf16.vlgmr.msra.gmra.mrb[56].mxu1 %vm3055_vm0, %v15043_v62  ;;  %v2697_v31 = vrot.slane %v15024_v42, 4 }
 0x285   : > { %v2890_v48 = vsel %vm2867_vm12, %v14772_v0, %v2889_v37  ;;  %v3784_v56 = vpop.permute.xlu1 %3783  ;;  %7869 = vrot.lane.b32.xlu0 %v7810_v49, %s16353_s23  ;;  %9792 = vmatprep.mubr.bf16.mxu1 %v16279_v4 }
 0x286   : > { %v3079_v51 = vsel %vm2700_vm10, %v3045_v35, %v3046_v19  ;;  %v10746_v59 = vcombine.low %v2890_v48, %v3078_v12  ;;  %v10747_v16 = vcombine.high %v2890_v48, %v3078_v12  ;;  %v4768_v35 = vsel %vm2700_vm10, %v4728_v22, %v4729_v46  ;;  %v2045_v22 = vld [vmem:[#allocation2 + $0x98] sm:$0xff] }
 0x287   : > { %v3080_v3 = vsel %vm3055_vm0, %v3016_v61, %v3079_v51  ;;  %6757 = vrot.lane.b32.xlu1 %v6698_v60, %s11348_s24  ;;  %v15086_v0 = vpop.permute.xlu0 %4707  ;;  %v2737_v58 = vsel %vm2700_vm10, %v2696_v33, %v2697_v31  ;;  %v3807_v29 = vrot.slane %v3784_v56, 4  ;;  %v4769_v28 = vsel %vm4732_vm9, %v4768_v35, %v4706_v25 }
 0x288   : > { %9717 = vmatprep.subr.bf16.mxu0 %v10747_v16  ;;  %v4730_v30 = vrot.slane %v15086_v0, 4  ;;  %v2738_v12 = vsel %vm2698_vm8, %v2737_v58, %v15024_v42  ;;  %v4813_v33 = vmul.bf16 %v4769_v28, %v2044_v36 }
 0x289   : > { %v15093_v34 = vpop.permute.xlu1 %2829  ;;  %3027 = vrot.lane.b32.xlu0 %v2044_v36, %s11356_s17  ;;  %9718 = vmatpush1.bf16.msra.mxu0 %v10746_v59  ;;  %v3845_v49 = vsel %vm2700_vm10, %v3806_v21, %v3807_v29 }
 0x28a   : > { %v2858_v61 = vrot.slane %v15093_v34, 4  ;;  %v4770_v13 = vsel %vm2700_vm10, %v4729_v46, %v4730_v30  ;;  %v3846_v18 = vsel %vm3809_vm7, %v3845_v49, %v3784_v56 }
 0x28b   : > { %7867 = vrot.lane.b32.xlu1 %v7809_v26, %s16353_s23  ;;  %v15103_v43 = vpop.permute.xlu0 %4861  ;;  %v4771_v60 = vsel %vm4732_vm9, %v4770_v13, %v15086_v0  ;;  %v3889_v16 = vmul.bf16 %v3846_v18, %v2044_v36  ;;  %v15164_v13 = vld [vmem:[#allocation2 + $0x9c] sm:$0xff] }
 0x28c   : > { %v2891_v39 = vsel %vm2700_vm10, %v2857_v54, %v2858_v61  ;;  %v4891_v40 = vrot.slane %v15103_v43, 4  ;;  %v4814_v48 = vmul.bf16 %v4771_v60, %v2045_v22 }
 0x28d   : > { %v2892_v11 = vsel %vm2867_vm12, %v2828_v8, %v2891_v39  ;;  %v15116_v23 = vpop.permute.xlu1 %3785  ;;  %3029 = vrot.lane.b32.xlu0 %v2045_v22, %s11356_s17 }
 0x28e   : > { %v4923_v25 = vsel %vm2700_vm10, %v4890_v7, %v4891_v40  ;;  %v3808_v17 = vrot.slane %v15116_v23, 4  ;;  %v10748_v32 = vcombine.low %v2892_v11, %v3080_v3  ;;  %v10749_v54 = vcombine.high %v2892_v11, %v3080_v3 }
 0x28f   : > { %v4924_v8 = vsel %vm4901_vm11, %v14857_v63, %v4923_v25  ;;  %2839 = vrot.lane.b32.xlu1 %v2779_v55, %s11352_s21  ;;  %v15129_v37 = vpop.permute.xlu0 %3939  ;;  %v2780_v7 = vmul.bf16 %v2738_v12, %v2045_v22 }
 0x290   : > { %9760 = vmatprep.subr.bf16.mxu1 %v10749_v54  ;;  %v3847_v21 = vsel %vm2700_vm10, %v3807_v29, %v3808_v17  ;;  %v3968_v63 = vrot.slane %v15129_v37, 4  ;;  %v15177_v54 = vld [vmem:[#allocation2 + $0x94] sm:$0xff] }
 0x291   : > { %v3938_v57 = vpop.permute.xlu1 %3937  ;;  %4873 = vrot.lane.b32.xlu0 %v4813_v33, %s11350_s27  ;;  %9761 = vmatpush1.bf16.msra.mxu1 %v10748_v32  ;;  %v3848_v1 = vsel %vm3809_vm7, %v3847_v21, %v15116_v23  ;;  %v5046_v23 = vld [vmem:[#allocation2 + $0xa4] sm:$0xf] }
 0x292   : > { %v3967_v46 = vrot.slane %v3938_v57, 4  ;;  %v3890_v55 = vmul.bf16 %v3848_v1, %v2045_v22  ;;  %v8078_v1 = vld [vmem:[#allocation3 + $0x2e8] sm:$0xff] }
 0x293   : > { %2841 = vrot.lane.b32.xlu1 %v2780_v7, %s11352_s21  ;;  %v15140_v51 = vpop.permute.xlu0 %5674 }
 0x294   : > { %v3999_v59 = vsel %vm2700_vm10, %v3966_v6, %v3967_v46  ;;  %v4001_v56 = vsel %vm2700_vm10, %v3967_v46, %v3968_v63  ;;  %v5697_v41 = vrot.slane %v15140_v51, 4 }
 0x295   : > { %v4000_v3 = vsel %vm3977_vm13, %v14812_v45, %v3999_v59  ;;  %v4002_v26 = vsel %vm3977_vm13, %v3938_v57, %v4001_v56  ;;  %v5673_v35 = vpop.permute.xlu1 %5672  ;;  %4875 = vrot.lane.b32.xlu0 %v4814_v48, %s11350_s27 }
 0x296   : > { %v5696_v58 = vrot.slane %v5673_v35, 4  ;;  %v10787_v6 = vcombine.low %v4000_v3, %v4924_v8  ;;  %v10788_v29 = vcombine.high %v4000_v3, %v4924_v8 }
 0x297   : > { %3949 = vrot.lane.b32.xlu1 %v3889_v16, %s16266_s14  ;;  %v6593_v28 = vpop.permute.xlu0 %6592 }
 0x298   : > { %v5733_v36 = vsel %vm2700_vm10, %v5695_v14, %v5696_v58  ;;  %v5735_v45 = vsel %vm2700_vm10, %v5696_v58, %v5697_v41  ;;  %v6616_v39 = vrot.slane %v6593_v28, 4  ;;  %9719 = vmatprep.subr.bf16.mxu0 %v10788_v29 }
 0x299   : > { %v15162_v12 = vpop.permute.xlu1 %4863  ;;  %v5736_v11 = vsel %vm4901_vm11, %v5735_v45, %v15140_v51  ;;  %9720 = vmatpush1.bf16.msra.mxu0 %v10787_v6  ;;  %v5734_v25 = vsel %vm4901_vm11, %v5733_v36, %v5673_v35  ;;  %v8079_v36 = vld [vmem:[#allocation3 + $0x2f0] sm:$0xff] }
 0x29a   : > { %v6654_v44 = vsel %vm2700_vm10, %v6615_v27, %v6616_v39  ;;  %v4892_v14 = vrot.slane %v15162_v12, 4  ;;  %v5778_v32 = vmul.bf16 %v5736_v11, %v15164_v13  ;;  %v5777_v27 = vmul.bf16 %v5734_v25, %v15177_v54 }
 0x29b   : > { %3951 = vrot.lane.b32.xlu1 %v3890_v55, %s16266_s14  ;;  %v15175_v22 = vpop.permute.xlu0 %6594  ;;  %v6655_v49 = vsel %vm3977_vm13, %v6654_v44, %v6593_v28 }
 0x29c   : > { %v4925_v33 = vsel %vm2700_vm10, %v4891_v40, %v4892_v14  ;;  %5839 = vrot.lane.b32.xlu0 %v5778_v32, %s11349_s26  ;;  %v6617_v52 = vrot.slane %v15175_v22, 4  ;;  %v6699_v48 = vmul.bf16 %v6655_v49, %v15177_v54 }
 0x29d   : > { %v4926_v8 = vsel %vm4901_vm11, %v15103_v43, %v4925_v33  ;;  %v5826_v60 = vpop.permute.xlu1 %5825 }
 0x29e   : > { %v6656_v7 = vsel %vm2700_vm10, %v6616_v39, %v6617_v52  ;;  %v5855_v57 = vrot.slane %v5826_v60, 4  ;;  %v10789_v18 = vcombine.low %v4002_v26, %v4926_v8  ;;  %v10790_v21 = vcombine.high %v4002_v26, %v4926_v8 }
 0x29f   : > { %5837 = vrot.lane.b32.xlu1 %v5777_v27, %s11349_s26  ;;  %v15192_v40 = vpop.permute.xlu0 %6935  ;;  %v6657_v59 = vsel %vm3977_vm13, %v6656_v7, %v15175_v22 }
 0x2a0   : > { %v5886_v46 = vsel %vm2700_vm10, %v5854_v20, %v5855_v57  ;;  %6947 = vrot.lane.b32.xlu0 %v15177_v54, %s11355_s16  ;;  %v6965_v43 = vrot.slane %v15192_v40, 4  ;;  %9762 = vmatprep.subr.bf16.mxu1 %v10790_v21 }
 0x2a1   : > { %v5887_v56 = vsel %vm4732_vm9, %v14899_v38, %v5886_v46  ;;  %v15205_v16 = vpop.permute.xlu1 %5827  ;;  %9763 = vmatpush1.bf16.msra.mxu1 %v10789_v18 }
 0x2a2   : > { %v6997_v20 = vsel %vm2700_vm10, %v6964_v9, %v6965_v43  ;;  %v5856_v3 = vrot.slane %v15205_v16, 4  ;;  %v10828_v26 = vcombine.low %v8078_v1, %v5887_v56  ;;  %v10829_v35 = vcombine.high %v8078_v1, %v5887_v56  ;;  %v2046_v1 = vld [vmem:[#allocation2 + $0xa0] sm:$0xf] }
 0x2a3   : > { %v6998_v58 = vsel %vm6975_vm15, %v14972_v2, %v6997_v20  ;;  %6759 = vrot.lane.b32.xlu1 %v6699_v48, %s11348_s24  ;;  %v15214_v6 = vpop.permute.xlu0 %6749  ;;  %v6700_v9 = vmul.bf16 %v6657_v59, %v15164_v13 }
 0x2a4   : > { %v5888_v38 = vsel %vm2700_vm10, %v5855_v57, %v5856_v3  ;;  %6949 = vrot.lane.b32.xlu0 %v15164_v13, %s11355_s16  ;;  %9721 = vmatprep.subr.bf16.mxu0 %v10829_v35  ;;  %v6778_v2 = vrot.slane %v15214_v6, 4 }
 0x2a5   : > { %v5889_v29 = vsel %vm4732_vm9, %v5826_v60, %v5888_v38  ;;  %v6748_v28 = vpop.permute.xlu1 %6747  ;;  %9722 = vmatpush1.bf16.msra.mxu0 %v10828_v26 }
 0x2a6   : > { %v6777_v45 = vrot.slane %v6748_v28, 4  ;;  %v10830_v39 = vcombine.low %v8079_v36, %v5889_v29  ;;  %v10831_v55 = vcombine.high %v8079_v36, %v5889_v29 }
 0x2a7   : > { %6761 = vrot.lane.b32.xlu1 %v6700_v9, %s11348_s24  ;;  %v15225_v11 = vpop.permute.xlu0 %7706  ;;  %v2969_v9 = vld [vmem:[#allocation2 + $0xa0] sm:$0xf] }
 0x2a8   : > { %v6808_v25 = vsel %vm2700_vm10, %v6776_v15, %v6777_v45  ;;  %v6810_v44 = vsel %vm2700_vm10, %v6777_v45, %v6778_v2  ;;  %9764 = vmatprep.subr.bf16.mxu1 %v10831_v55  ;;  %v7729_v49 = vrot.slane %v15225_v11, 4  ;;  %v4079_v55 = vld [vmem:[#allocation2 + $0xa0] sm:$0xff] }
 0x2a9   : > { %v6809_v32 = vsel %vm3809_vm7, %v14913_v53, %v6808_v25  ;;  %v6811_v33 = vsel %vm3809_vm7, %v6748_v28, %v6810_v44  ;;  %v7705_v27 = vpop.permute.xlu1 %7704  ;;  %9765 = vmatpush1.bf16.msra.mxu1 %v10830_v39 }
 0x2aa   : > { %v7728_v8 = vrot.slane %v7705_v27, 4  ;;  %v10869_v60 = vcombine.low %v6809_v32, %v6998_v58  ;;  %v10870_v7 = vcombine.high %v6809_v32, %v6998_v58 }
 0x2ab   : > { %v2677_v57 = vpop.permute.xlu0 %2676 }
 0x2ac   : > { %v7766_v15 = vsel %vm2700_vm10, %v7727_v24, %v7728_v8  ;;  %v7768_v18 = vsel %vm2700_vm10, %v7728_v8, %v7729_v49  ;;  %9723 = vmatprep.subr.bf16.mxu0 %v10870_v7  ;;  %v2739_v47 = vsel %vm2698_vm8, %v2697_v31, %v2677_v57 }
 0x2ad   : > { %v7767_v53 = vsel %vm2867_vm12, %v7766_v15, %v7705_v27  ;;  %v15244_v21 = vpop.permute.xlu1 %6937  ;;  %v7769_v46 = vsel %vm2867_vm12, %v7768_v18, %v15225_v11  ;;  %9724 = vmatpush1.bf16.msra.mxu0 %v10869_v60  ;;  %v2781_v42 = vmul.bf16 %v2739_v47, %v2046_v1 }
 0x2ae   : > { %v7811_v48 = vmul.bf16 %v7767_v53, %v15177_v54  ;;  %v6966_v24 = vrot.slane %v15244_v21, 4  ;;  %v7812_v59 = vmul.bf16 %v7769_v46, %v15164_v13 }
 0x2af   : > { %v15254_v56 = vpop.permute.xlu0 %2831 }
 0x2b0   : > { %v6999_v20 = vsel %vm2700_vm10, %v6965_v43, %v6966_v24  ;;  %7873 = vrot.lane.b32.xlu0 %v7812_v59, %s16353_s23  ;;  %7871 = vrot.lane.b32.xlu1 %v7811_v48, %s16353_s23  ;;  %v2859_v54 = vrot.slane %v15254_v56, 4 }
 0x2b1   : > { %v7000_v31 = vsel %vm6975_vm15, %v15192_v40, %v6999_v20  ;;  %v7860_v26 = vpop.permute.xlu1 %7859 }
 0x2b2   : > { %v2893_v13 = vsel %vm2700_vm10, %v2858_v61, %v2859_v54  ;;  %v7889_v35 = vrot.slane %v7860_v26, 4  ;;  %v10871_v58 = vcombine.low %v6811_v33, %v7000_v31  ;;  %v10872_v38 = vcombine.high %v6811_v33, %v7000_v31 }
 0x2b3   : > { %v2894_v43 = vsel %vm2867_vm12, %v15093_v34, %v2893_v13  ;;  %v4710_v29 = vpop.permute.xlu0 %4709 }
 0x2b4   : > { %v7920_v28 = vsel %vm2700_vm10, %v7888_v10, %v7889_v35  ;;  %3031 = vrot.lane.b32.xlu0 %v2969_v9, %s11356_s17  ;;  %2843 = vrot.lane.b32.xlu1 %v2781_v42, %s11352_s21  ;;  %v4731_v40 = vrot.slane %v4710_v29, 4  ;;  %s10970_s21 = sshll.u32 %s11429_s13, 4 }
 0x2b5   : > { %v7921_v61 = vsel %vm2698_vm8, %v14988_v5, %v7920_v28  ;;  %v15276_v36 = vpop.permute.xlu1 %7861  ;;  %9766 = vmatprep.subr.bf16.mxu1 %v10872_v38 }
 0x2b6   : > { %v4772_v34 = vsel %vm2700_vm10, %v4730_v30, %v4731_v40  ;;  %v7890_v45 = vrot.slane %v15276_v36, 4  ;;  %9767 = vmatpush1.bf16.msra.mxu1 %v10871_v58  ;;  %v10911_v39 = vcombine.high %v7921_v61, %v7921_v61  ;;  %v10910_v10 = vcombine.low %v7921_v61, %v7921_v61  ;;  %v3157_v58 = vld [vmem:[#allocation2 + $0xa0] sm:$0xf]  ;;  %v15337_v61 = vpop.f32.mrb[36].mxu1 }
 0x2b7   : > { %v4773_v25 = vsel %vm4732_vm9, %v4772_v34, %v4710_v29  ;;  %v15283_v44 = vpop.permute.xlu0 %3021 }
 0x2b8   : > { %v4815_v32 = vmul.bf16 %v4773_v25, %v4079_v55  ;;  %v7922_v5 = vsel %vm2700_vm10, %v7889_v35, %v7890_v45  ;;  %10951 = vmatprep.subr.msk.bf16.mxu0 %vm2700_vm10, %v10911_v39  ;;  %v9188_v0 = vsel %vm2700_vm10, %v10910_v10, 0  ;;  %v3048_v27 = vrot.slane %v15283_v44, 4 }
 0x2b9   : > { %v7923_v30 = vsel %vm2698_vm8, %v7860_v26, %v7922_v5  ;;  %v3020_v33 = vpop.permute.xlu1 %3019  ;;  %9726 = vmatpush1.bf16.msra.mxu0 %v9188_v0 }
 0x2ba   : > { %v3047_v8 = vrot.slane %v3020_v33, 4  ;;  %4877 = vrot.lane.b32.xlu0 %v4815_v32, %s11350_s27  ;;  %v10913_v60 = vcombine.high %v7923_v30, %v7923_v30  ;;  %v10912_v7 = vcombine.low %v7923_v30, %v7923_v30  ;;  %s324_s27 = sand.u32 1, %s11334_s10  }
 0x2bb   : > { %v3942_v57 = vpop.permute.xlu0 %3941  ;;  %s10370_s28 = scalar_lea.sflag [#allocation5], %s324_s27 }
 0x2bc   : > { %v3081_v15 = vsel %vm2700_vm10, %v3046_v19, %v3047_v8  ;;  %v3083_v18 = vsel %vm2700_vm10, %v3047_v8, %v3048_v27  ;;  %v3969_v53 = vrot.slane %v3942_v57, 4  ;;  %10952 = vmatmul.mubr.msk.bf16.vlgmr.msra.gmra.mrb[68].mxu0 %vm3055_vm0, %v15043_v62  ;;  %10953 = vmatprep.subr.msk.bf16.mxu1 %vm2700_vm10, %v10913_v60  ;;  %v9194_v46 = vsel %vm2700_vm10, %v10912_v7, 0  ;;  %v5966_v8 = vld [vmem:[#allocation2 + $0xa4] sm:$0xff] }
 0x2bd   : > { %v3082_v48 = vsel %vm3055_vm0, %v15061_v50, %v3081_v15  ;;  %v3084_v47 = vsel %vm3055_vm0, %v3020_v33, %v3083_v18  ;;  %v15306_v59 = vpop.permute.xlu1 %2833  ;;  %9769 = vmatpush1.bf16.msra.mxu1 %v9194_v46  ;;  %9835 = vmatprep.mubr.bf16.mxu0 %v16279_v4 }
 0x2be   : > { %v4003_v19 = vsel %vm2700_vm10, %v3968_v63, %v3969_v53  ;;  %v2860_v1 = vrot.slane %v15306_v59, 4  ;;  %v10750_v20 = vcombine.low %v2894_v43, %v3082_v48  ;;  %v10751_v42 = vcombine.high %v2894_v43, %v3082_v48 }
 0x2bf   : > { %v4004_v31 = vsel %vm3977_vm13, %v15129_v37, %v4003_v19  ;;  %v15315_v26 = vpop.permute.xlu0 %3943  ;;  %v15375_v19 = vpop.f32.mrb[48].mxu0 }
 0x2c0   : > { %v2895_v50 = vsel %vm2700_vm10, %v2859_v54, %v2860_v1  ;;  %v3970_v13 = vrot.slane %v15315_v26, 4  ;;  %10954 = vmatmul.mubr.msk.bf16.vlgmr.msra.gmra.mrb[60].mxu1 %vm3055_vm0, %v15043_v62  ;;  %9803 = vmatprep.subr.bf16.mxu0 %v10751_v42 }
 0x2c1   : > { %v2896_v63 = vsel %vm2867_vm12, %v15254_v56, %v2895_v50  ;;  %v3788_v35 = vpop.permute.xlu1 %3787  ;;  %9804 = vmatpush1.bf16.msra.mxu0 %v10750_v20  ;;  %9878 = vmatprep.mubr.bf16.mxu1 %v16279_v4  ;;  %v15381_v50 = vpop.f32.mrb[49].mxu0 }
 0x2c2   : > { %v4005_v37 = vsel %vm2700_vm10, %v3969_v53, %v3970_v13  ;;  %v3849_v54 = vsel %vm3809_vm7, %v3808_v17, %v3788_v35  ;;  %v10752_v38 = vcombine.low %v2896_v63, %v3084_v47  ;;  %v10753_v43 = vcombine.high %v2896_v63, %v3084_v47  ;;  %v15339_v17 = vpop.f32.mrb[37].mxu1  ;;  %v8172_v47 = vld [vmem:[%s15997_s4] sm:$0xff]  ;;  %v15386_v35 = vpop.f32.mrb[50].mxu0 }
 0x2c3   : > { %v4006_v9 = vsel %vm3977_vm13, %v3942_v57, %v4005_v37  ;;  %v3891_v29 = vmul.bf16 %v3849_v54, %v3157_v58  ;;  %v5677_v28 = vpop.permute.xlu0 %5676  ;;  %v15341_v55 = vpop.f32.mrb[38].mxu1 }
 0x2c4   : > { %v5737_v56 = vsel %vm4901_vm11, %v5697_v41, %v5677_v28  ;;  %9846 = vmatprep.subr.bf16.mxu1 %v10753_v43  ;;  %v15364_v15 = vpop.f32.mrb[39].mxu1 }
 0x2c5   : > { %3953 = vrot.lane.b32.xlu1 %v3891_v29, %s16266_s14  ;;  %v4866_v40 = vpop.permute.xlu1 %4865  ;;  %9847 = vmatpush1.bf16.msra.mxu1 %v10752_v38  ;;  %v5779_v39 = vmul.bf16 %v5737_v56, %v5046_v23  ;;  %v15377_v20 = vpop.f32.mrb[40].mxu1  ;;  %s15953_s14 = scalar_lea.hbm %s16001_s8, %s10970_s21 }
 0x2c6   : > { %v4893_v34 = vrot.slane %v4866_v40, 4  ;;  %v15388_v37 = vpop.f32.mrb[41].mxu1  ;;  %v15394_v38 = vpop.f32.mrb[51].mxu0 }
 0x2c7   : > { %v6597_v10 = vpop.permute.xlu0 %6596  ;;  %v15400_v28 = vpop.f32.mrb[42].mxu1 }
 0x2c8   : > { %v4927_v51 = vsel %vm2700_vm10, %v4892_v14, %v4893_v34  ;;  %v6618_v41 = vrot.slane %v6597_v10, 4  ;;  %v15402_v56 = vpop.f32.mrb[52].mxu0  ;;  %v15407_v23 = vpop.f32.mrb[43].mxu1 }
 0x2c9   : > { %v4928_v25 = vsel %vm4901_vm11, %v15162_v12, %v4927_v51  ;;  %5841 = vrot.lane.b32.xlu1 %v5779_v39, %s11349_s26  ;;  %v15349_v32 = vpop.permute.xlu1 %4867  ;;  %v15414_v39 = vpop.f32.mrb[44].mxu1  ;;  %s11284_s26 = sshll.u32 %s11357_s29, 4  ;;  %s11285_s26 = int_to_ptr.vmem [resolvable:$false] %s11284_s26 }
 0x2ca   : > { %v6658_v5 = vsel %vm2700_vm10, %v6617_v52, %v6618_v41  ;;  %v4894_v0 = vrot.slane %v15349_v32, 4  ;;  %v10791_v30 = vcombine.low %v4004_v31, %v4928_v25  ;;  %v10792_v33 = vcombine.high %v4004_v31, %v4928_v25  ;;  %v8081_v41 = vld [vmem:[#allocation3 + $0x300] sm:$0xff]  ;;  %s11286_s0 = scalar_lea.vmem %s11285_s26, 32 }
 0x2cb   : > { %v6659_v60 = vsel %vm3977_vm13, %v6658_v5, %v6597_v10  ;;  %v15356_v14 = vpop.permute.xlu0 %6751 }
 0x2cc   : > { %v6701_v7 = vmul.bf16 %v6659_v60, %v5966_v8  ;;  %v4929_v12 = vsel %vm2700_vm10, %v4893_v34, %v4894_v0  ;;  %v6779_v57 = vrot.slane %v15356_v14, 4  ;;  %9805 = vmatprep.subr.bf16.mxu0 %v10792_v33  ;;  %v15421_v60 = vpop.f32.mrb[45].mxu1 }
 0x2cd   : > { %v4930_v22 = vsel %vm4901_vm11, %v4866_v40, %v4929_v12  ;;  %6951 = vrot.lane.b32.xlu1 %v5966_v8, %s11355_s16  ;;  %v5830_v52 = vpop.permute.xlu1 %5829  ;;  %9806 = vmatpush1.bf16.msra.mxu0 %v10791_v30 }
 0x2ce   : > { %v6812_v18 = vsel %vm2700_vm10, %v6778_v2, %v6779_v57  ;;  %v5857_v53 = vrot.slane %v5830_v52, 4  ;;  %6763 = vrot.lane.b32.xlu0 %v6701_v7, %s11348_s24  ;;  %v10793_v46 = vcombine.low %v4006_v9, %v4930_v22  ;;  %v10794_v48 = vcombine.high %v4006_v9, %v4930_v22  ;;  %v8173_v22 = vld [vmem:[%s15997_s4 + $0x8] sm:$0xff]  ;;  %s325_s24 = scalar_lea.vmem [#allocation4], %s324_s27 }
 0x2cf   : > { %v6813_v42 = vsel %vm3809_vm7, %v15214_v6, %v6812_v18  ;;  %v7709_v31 = vpop.permute.xlu0 %7708  ;;  %v8080_v6 = vld [vmem:[#allocation3 + $0x2f8] sm:$0xff] }
 0x2d0   : > { %v5890_v2 = vsel %vm2700_vm10, %v5856_v3, %v5857_v53  ;;  %v7730_v63 = vrot.slane %v7709_v31, 4  ;;  %9848 = vmatprep.subr.bf16.mxu1 %v10794_v48 }
 0x2d1   : > { %v5891_v58 = vsel %vm4732_vm9, %v15205_v16, %v5890_v2  ;;  %v15392_v54 = vpop.permute.xlu1 %5831  ;;  %9849 = vmatpush1.bf16.msra.mxu1 %v10793_v46  ;;  %8176 = vperm.xlu1 %11079, %v8172_v47  }
 0x2d2   : > { %v7770_v3 = vsel %vm2700_vm10, %v7729_v49, %v7730_v63  ;;  %v5858_v43 = vrot.slane %v15392_v54, 4  ;;  %v10832_v9 = vcombine.low %v8080_v6, %v5891_v58  ;;  %v10833_v29 = vcombine.high %v8080_v6, %v5891_v58  ;;  %v15412_v49 = vpop.f32.mrb[53].mxu0 }
 0x2d3   : > { %v7771_v16 = vsel %vm2867_vm12, %v7770_v3, %v7709_v31  ;;  %v15405_v40 = vpop.permute.xlu0 %6941  ;;  %v15417_v25 = vpop.f32.mrb[54].mxu0 }
 0x2d4   : > { %v7813_v34 = vmul.bf16 %v7771_v16, %v5966_v8  ;;  %v5892_v11 = vsel %vm2700_vm10, %v5857_v53, %v5858_v43  ;;  %9807 = vmatprep.subr.bf16.mxu0 %v10833_v29  ;;  %v6968_v5 = vrot.slane %v15405_v40, 4  ;;  %v15423_v7 = vpop.f32.mrb[55].mxu0 }
 0x2d5   : > { %v5893_v10 = vsel %vm4732_vm9, %v5830_v52, %v5892_v11  ;;  %v6940_v51 = vpop.permute.xlu1 %6939  ;;  %9808 = vmatpush1.bf16.msra.mxu0 %v10832_v9  ;;  %v15430_v52 = vpop.f32.mrb[46].mxu1 }
 0x2d6   : > { %v6967_v30 = vrot.slane %v6940_v51, 4  ;;  %7875 = vrot.lane.b32.xlu0 %v7813_v34, %s16353_s23  ;;  %v10834_v33 = vcombine.low %v8081_v41, %v5893_v10  ;;  %v10835_v8 = vcombine.high %v8081_v41, %v5893_v10  ;;  %v15438_v46 = vpop.f32.mrb[47].mxu1  ;;  %s10385_s23 = sshll.u32 %s325_s24, 4  ;;  %s10386_s23 = int_to_ptr.vmem [resolvable:$true] %s10385_s23 }
 0x2d7   : > { %v15425_v12 = vpop.permute.xlu0 %7865  ;;  %s11280_s22 = scalar_lea.vmem %s10386_s23, 16  ;;  %p11287_p0 = scmp.lt.s32.totalorder %s10386_s23, %s11285_s26 }
 0x2d8   : > { %v7001_v18 = vsel %vm2700_vm10, %v6966_v24, %v6967_v30  ;;  %v7003_v53 = vsel %vm2700_vm10, %v6967_v30, %v6968_v5  ;;  %9850 = vmatprep.subr.bf16.mxu1 %v10835_v8  ;;  %p11281_p11 = scmp.ne.s32.totalorder %s10386_s23, %s11280_s22  ;;  %p11288_p1 = scmp.lt.s32.totalorder %s11286_s0, %s11280_s22 }
 0x2d9   : > { %v7002_v48 = vsel %vm6975_vm15, %v15244_v21, %v7001_v18  ;;  %v7004_v47 = vsel %vm6975_vm15, %v6940_v51, %v7003_v53  ;;  %v15443_v31 = vpop.permute.xlu1 %6753  ;;  %9851 = vmatpush1.bf16.msra.mxu1 %v10834_v33  ;;  %v7892_v21 = vrot.slane %v15425_v12, 4 }
 0x2da   : > { %v6780_v2 = vrot.slane %v15443_v31, 4  ;;  %8181 = vperm.xlu0 %11078, %v8173_v22   ;;  %v10873_v63 = vcombine.low %v6813_v42, %v7002_v48  ;;  %v10874_v24 = vcombine.high %v6813_v42, %v7002_v48  ;;  %p11282_p12 = pnand %p11281_p11, %p11446_p5  ;;  %p11289_p2 = por %p11288_p1, %p11287_p0 }
 0x2db   : > { %v3024_v58 = vpop.permute.xlu0 %3023 }
 0x2dc   : > { %v6814_v6 = vsel %vm2700_vm10, %v6779_v57, %v6780_v2  ;;  %v3049_v3 = vrot.slane %v3024_v58, 4  ;;  %9809 = vmatprep.subr.bf16.mxu0 %v10874_v24  ;;  %p11283_p13 = pneg %p11282_p12 }
 0x2dd   : > { %v6815_v9 = vsel %vm3809_vm7, %v15356_v14, %v6814_v6  ;;  %v7864_v29 = vpop.permute.xlu1 %7863  ;;  %9810 = vmatpush1.bf16.msra.mxu0 %v10873_v63 }
 0x2de   : > { %v3085_v42 = vsel %vm2700_vm10, %v3048_v27, %v3049_v3  ;;  %v7891_v16 = vrot.slane %v7864_v29, 4  ;;  %v10875_v34 = vcombine.low %v6815_v9, %v7004_v47  ;;  %v10876_v11 = vcombine.high %v6815_v9, %v7004_v47  ;;  %p11290_p3 = pnand %p11289_p2, %p11283_p13 }
 0x2df   : > { %v3086_v10 = vsel %vm3055_vm0, %v15283_v44, %v3085_v42  ;;  %v15459_v57 = vpop.permute.xlu0 %3025 }
 0x2e0   : > { %v7924_v51 = vsel %vm2700_vm10, %v7890_v45, %v7891_v16  ;;  %v7926_v14 = vsel %vm2700_vm10, %v7891_v16, %v7892_v21  ;;  %v3050_v41 = vrot.slane %v15459_v57, 4  ;;  %9852 = vmatprep.subr.bf16.mxu1 %v10876_v11 }
 0x2e1   : > { %v7925_v27 = vsel %vm2698_vm8, %v15276_v36, %v7924_v51  ;;  %v7927_v30 = vsel %vm2698_vm8, %v7864_v29, %v7926_v14  ;;  %v2836_v33 = vpop.permute.xlu1 %2835  ;;  %9853 = vmatpush1.bf16.msra.mxu1 %v10875_v34  ;;  %v15474_v18 = vpop.f32.mrb[56].mxu0 }
 0x2e2   : > { %v3087_v44 = vsel %vm2700_vm10, %v3049_v3, %v3050_v41  ;;  %v2861_v8 = vrot.slane %v2836_v33, 4  ;;  %v10915_v45 = vcombine.high %v7925_v27, %v7925_v27  ;;  %v10917_v22 = vcombine.high %v7927_v30, %v7927_v30  ;;  %v15477_v24 = vpop.f32.mrb[57].mxu0 }
 0x2e3   : > { %v3088_v53 = vsel %vm3055_vm0, %v3024_v58, %v3087_v44  ;;  %v4870_v48 = vpop.permute.xlu0 %4869  ;;  %v10914_v47 = vcombine.low %v7925_v27, %v7925_v27  ;;  %v10916_v63 = vcombine.low %v7927_v30, %v7927_v30  ;;  %v15484_v3 = vpop.f32.mrb[58].mxu0 }
 0x2e4   : > { %v2897_v36 = vsel %vm2700_vm10, %v2860_v1, %v2861_v8  ;;  %v4895_v6 = vrot.slane %v4870_v48, 4  ;;  %10955 = vmatprep.subr.msk.bf16.mxu0 %vm2700_vm10, %v10915_v45  ;;  %10957 = vmatprep.subr.msk.bf16.mxu1 %vm2700_vm10, %v10917_v22  ;;  %v15492_v16 = vpop.f32.mrb[59].mxu0 }
 0x2e5   : > { %v2898_v9 = vsel %vm2867_vm12, %v15306_v59, %v2897_v36  ;;  %v15488_v58 = vpop.permute.xlu1 %2837  ;;  %v9200_v29 = vsel %vm2700_vm10, %v10914_v47, 0  ;;  %v9206_v42 = vsel %vm2700_vm10, %v10916_v63, 0 }
 0x2e6   : > { %v4931_v1 = vsel %vm2700_vm10, %v4894_v0, %v4895_v6  ;;  %v2862_v34 = vrot.slane %v15488_v58, 4  ;;  %9812 = vmatpush1.bf16.msra.mxu0 %v9200_v29  ;;  %9855 = vmatpush1.bf16.msra.mxu1 %v9206_v42  ;;  %v10754_v11 = vcombine.low %v2898_v9, %v3086_v10  ;;  %v10755_v51 = vcombine.high %v2898_v9, %v3086_v10  ;;  %v15502_v27 = vpop.f32.mrb[48].mxu1 }
 0x2e7   : > { %v4932_v59 = vsel %vm4901_vm11, %v15349_v32, %v4931_v1  ;;  %v15500_v14 = vpop.permute.xlu0 %4871  ;;  %v15508_v0 = vpop.f32.mrb[49].mxu1 }
 0x2e8   : > { %v2899_v30 = vsel %vm2700_vm10, %v2861_v8, %v2862_v34  ;;  %v4896_v44 = vrot.slane %v15500_v14, 4  ;;  %9889 = vmatprep.subr.bf16.mxu0 %v10755_v51  ;;  %v15515_v32 = vpop.f32.mrb[50].mxu1 }
 0x2e9   : > { %v2900_v45 = vsel %vm2867_vm12, %v2836_v33, %v2899_v30  ;;  %v3946_v22 = vpop.permute.xlu1 %3945  ;;  %10956 = vmatmul.mubr.msk.bf16.vlgmr.msra.gmra.mrb[72].mxu0 %vm3055_vm0, %v15043_v62  ;;  %10958 = vmatmul.mubr.msk.bf16.vlgmr.msra.gmra.mrb[64].mxu1 %vm3055_vm0, %v15043_v62  ;;  %v15521_v33 = vpop.f32.mrb[51].mxu1 }
 0x2ea   : > { %v4933_v10 = vsel %vm2700_vm10, %v4895_v6, %v4896_v44  ;;  %v3971_v8 = vrot.slane %v3946_v22, 4  ;;  %9890 = vmatpush1.bf16.msra.mxu0 %v10754_v11  ;;  %v10756_v47 = vcombine.low %v2900_v45, %v3088_v53  ;;  %v10757_v63 = vcombine.high %v2900_v45, %v3088_v53  ;;  %9921 = vmatprep.mubr.bf16.mxu0 %v16279_v4 }
 0x2eb   : > { %v4934_v36 = vsel %vm4901_vm11, %v4870_v48, %v4933_v10  ;;  %v15524_v9 = vpop.permute.xlu0 %5835  ;;  %9964 = vmatprep.mubr.bf16.mxu1 %v16279_v4 }
 0x2ec   : > { %v4007_v62 = vsel %vm2700_vm10, %v3970_v13, %v3971_v8  ;;  %9932 = vmatprep.subr.bf16.mxu1 %v10757_v63  ;;  %v16116_v13 = vrot.slane %v15524_v9, 4 }
 0x2ed   : > { %v4008_v6 = vsel %vm3977_vm13, %v15315_v26, %v4007_v62  ;;  %v15532_v29 = vpop.permute.xlu1 %3947  ;;  %9933 = vmatpush1.bf16.msra.mxu1 %v10756_v47 }
 0x2ee   : > { %v16117_v53 = vrot.slane %v15532_v29, 4  ;;  %v10795_v42 = vcombine.low %v4008_v6, %v4932_v59  ;;  %v10796_v1 = vcombine.high %v4008_v6, %v4932_v59 }
 0x2ef   : > { %v6944_v48 = vpop.permute.xlu0 %6943 }
 0x2f0   : > { %v4009_v11 = vsel %vm2700_vm10, %v3971_v8, %v16117_v53  ;;  %v6969_v51 = vrot.slane %v6944_v48, 4  ;;  %9891 = vmatprep.subr.bf16.mxu0 %v10796_v1 }
 0x2f1   : > { %v4010_v30 = vsel %vm3977_vm13, %v3946_v22, %v4009_v11  ;;  %v5834_v45 = vpop.permute.xlu1 %5833  ;;  %9892 = vmatpush1.bf16.msra.mxu0 %v10795_v42 }
 0x2f2   : > { %v7005_v26 = vsel %vm2700_vm10, %v6968_v5, %v6969_v51  ;;  %v5859_v10 = vrot.slane %v5834_v45, 4  ;;  %v10797_v47 = vcombine.low %v4010_v30, %v4934_v36  ;;  %v10798_v59 = vcombine.high %v4010_v30, %v4934_v36 }
 0x2f3   : > { %v7006_v63 = vsel %vm6975_vm15, %v15405_v40, %v7005_v26  ;;  %v15545_v62 = vpop.permute.xlu0 %6945  ;;  %v8082_v40 = vld [vmem:[#allocation3 + $0x308] sm:$0xff]  ;;  %v8083_v26 = vld [vmem:[#allocation3 + $0x310] sm:$0xff] }
 0x2f4   : > { %v5894_v8 = vsel %vm2700_vm10, %v5858_v43, %v5859_v10  ;;  %v5896_v22 = vsel %vm2700_vm10, %v5859_v10, %v16116_v13  ;;  %v6970_v6 = vrot.slane %v15545_v62, 4  ;;  %9934 = vmatprep.subr.bf16.mxu1 %v10798_v59 }
 0x2f5   : > { %v5895_v5 = vsel %vm4732_vm9, %v15392_v54, %v5894_v8  ;;  %v5897_v36 = vsel %vm4732_vm9, %v5834_v45, %v5896_v22  ;;  %v6756_v42 = vpop.permute.xlu1 %6755  ;;  %9935 = vmatpush1.bf16.msra.mxu1 %v10797_v47 }
 0x2f6   : > { %v7007_v1 = vsel %vm2700_vm10, %v6969_v51, %v6970_v6  ;;  %v6781_v43 = vrot.slane %v6756_v42, 4  ;;  %v10836_v11 = vcombine.low %v8082_v40, %v5895_v5  ;;  %v10837_v30 = vcombine.high %v8082_v40, %v5895_v5 }
 0x2f7   : > { %v7008_v10 = vsel %vm6975_vm15, %v6944_v48, %v7007_v1  ;;  %v15561_v13 = vpop.permute.xlu0 %7869  ;;  %v10838_v59 = vcombine.low %v8083_v26, %v5897_v36  ;;  %v10839_v53 = vcombine.high %v8083_v26, %v5897_v36 }
 0x2f8   : > { %v6816_v54 = vsel %vm2700_vm10, %v6780_v2, %v6781_v43  ;;  %9893 = vmatprep.subr.bf16.mxu0 %v10837_v30  ;;  %v7894_v2 = vrot.slane %v15561_v13, 4 }
 0x2f9   : > { %v6817_v45 = vsel %vm3809_vm7, %v15443_v31, %v6816_v54  ;;  %v15568_v47 = vpop.permute.xlu1 %6757  ;;  %9936 = vmatprep.subr.bf16.mxu1 %v10839_v53  ;;  %9894 = vmatpush1.bf16.msra.mxu0 %v10836_v11 }
 0x2fa   : > { %v6782_v51 = vrot.slane %v15568_v47, 4  ;;  %9937 = vmatpush1.bf16.msra.mxu1 %v10838_v59  ;;  %v10877_v48 = vcombine.low %v6817_v45, %v7006_v63  ;;  %v10878_v8 = vcombine.high %v6817_v45, %v7006_v63 }
 0x2fb   : > { %v3028_v22 = vpop.permute.xlu0 %3027 }
 0x2fc   : > { %v6818_v5 = vsel %vm2700_vm10, %v6781_v43, %v6782_v51  ;;  %v3051_v36 = vrot.slane %v3028_v22, 4  ;;  %9895 = vmatprep.subr.bf16.mxu0 %v10878_v8 }
 0x2fd   : > { %v6819_v31 = vsel %vm3809_vm7, %v6756_v42, %v6818_v5  ;;  %v7868_v40 = vpop.permute.xlu1 %7867  ;;  %9896 = vmatpush1.bf16.msra.mxu0 %v10877_v48 }
 0x2fe   : > { %v3089_v53 = vsel %vm2700_vm10, %v3050_v41, %v3051_v36  ;;  %v7893_v1 = vrot.slane %v7868_v40, 4  ;;  %v10879_v11 = vcombine.low %v6819_v31, %v7008_v10  ;;  %v10880_v63 = vcombine.high %v6819_v31, %v7008_v10 }
 0x2ff   : > { %v3090_v30 = vsel %vm3055_vm0, %v15459_v57, %v3089_v53  ;;  %v15581_v26 = vpop.permute.xlu0 %3029 }
 0x300   : > { %v7928_v43 = vsel %vm2700_vm10, %v7892_v21, %v7893_v1  ;;  %v7930_v42 = vsel %vm2700_vm10, %v7893_v1, %v7894_v2  ;;  %v3052_v59 = vrot.slane %v15581_v26, 4  ;;  %9938 = vmatprep.subr.bf16.mxu1 %v10880_v63 }
 0x301   : > { %v7929_v41 = vsel %vm2698_vm8, %v15425_v12, %v7928_v43  ;;  %v7931_v10 = vsel %vm2698_vm8, %v7868_v40, %v7930_v42  ;;  %v2840_v54 = vpop.permute.xlu1 %2839  ;;  %9939 = vmatpush1.bf16.msra.mxu1 %v10879_v11 }
 0x302   : > { %v3091_v57 = vsel %vm2700_vm10, %v3051_v36, %v3052_v59  ;;  %v2863_v45 = vrot.slane %v2840_v54, 4  ;;  %v10919_v21 = vcombine.high %v7929_v41, %v7929_v41  ;;  %v10921_v48 = vcombine.high %v7931_v10, %v7931_v10 }
 0x303   : > { %v3092_v8 = vsel %vm3055_vm0, %v3028_v22, %v3091_v57  ;;  %v4874_v5 = vpop.permute.xlu0 %4873  ;;  %v10918_v31 = vcombine.low %v7929_v41, %v7929_v41  ;;  %v10920_v53 = vcombine.low %v7931_v10, %v7931_v10 }
 0x304   : > { %v2901_v12 = vsel %vm2700_vm10, %v2862_v34, %v2863_v45  ;;  %v4897_v1 = vrot.slane %v4874_v5, 4  ;;  %10959 = vmatprep.subr.msk.bf16.mxu0 %vm2700_vm10, %v10919_v21  ;;  %10961 = vmatprep.subr.msk.bf16.mxu1 %vm2700_vm10, %v10921_v48  ;;  %v15624_v48 = vld [vmem:[%s15996_s3] sm:$0xff]  }
 0x305   : > { %v2902_v36 = vsel %vm2867_vm12, %v15488_v58, %v2901_v12  ;;  %v15604_v40 = vpop.permute.xlu1 %2841  ;;  %v9212_v11 = vsel %vm2700_vm10, %v10918_v31, 0  ;;  %v9218_v22 = vsel %vm2700_vm10, %v10920_v53, 0  ;;  %v16357_v53 = vrot.slane %v15532_v29, 4 }
 0x306   : > { %v4935_v63 = vsel %vm2700_vm10, %v4896_v44, %v4897_v1  ;;  %v2864_v34 = vrot.slane %v15604_v40, 4  ;;  %9898 = vmatpush1.bf16.msra.mxu0 %v9212_v11  ;;  %9941 = vmatpush1.bf16.msra.mxu1 %v9218_v22  ;;  %v10758_v43 = vcombine.low %v2902_v36, %v3090_v30  ;;  %v10759_v42 = vcombine.high %v2902_v36, %v3090_v30 }
 0x307   : > { %v4936_v41 = vsel %vm4901_vm11, %v15500_v14, %v4935_v63  ;;  %v15614_v58 = vpop.permute.xlu0 %4875 }
 0x308   : > { %v2903_v10 = vsel %vm2700_vm10, %v2863_v45, %v2864_v34  ;;  %v16122_v57 = vrot.slane %v15614_v58, 4  ;;  %9975 = vmatprep.subr.bf16.mxu0 %v10759_v42 }
 0x309   : > { %v2904_v44 = vsel %vm2867_vm12, %v2840_v54, %v2903_v10  ;;  %v3950_v21 = vpop.permute.xlu1 %3949  ;;  %10960 = vmatmul.mubr.msk.bf16.vlgmr.msra.gmra.mrb[76].mxu0 %vm3055_vm0, %v15624_v48  ;;  %10962 = vmatmul.mubr.msk.bf16.vlgmr.msra.gmra.mrb[68].mxu1 %vm3055_vm0, %v15624_v48 }
 0x30a   : > { %v4937_v14 = vsel %vm2700_vm10, %v4897_v1, %v16122_v57  ;;  %v3973_v30 = vrot.slane %v3950_v21, 4  ;;  %9976 = vmatpush1.bf16.msra.mxu0 %v10758_v43  ;;  %v10760_v45 = vcombine.low %v2904_v44, %v3092_v8  ;;  %v10761_v54 = vcombine.high %v2904_v44, %v3092_v8  ;;  %10007 = vmatprep.mubr.bf16.mxu0 %v16279_v4 }
 0x30b   : > { %v4938_v31 = vsel %vm4901_vm11, %v4874_v5, %v4937_v14  ;;  %10050 = vmatprep.mubr.bf16.mxu1 %v16279_v4 }
 0x30c   : > { %v4011_v12 = vsel %vm2700_vm10, %v16357_v53, %v3973_v30  ;;  %10018 = vmatprep.subr.bf16.mxu1 %v10761_v54  ;;  %v16358_v53 = vrot.slane %v15524_v9, 4 }
 0x30d   : > { %v4012_v36 = vsel %vm3977_vm13, %v15532_v29, %v4011_v12  ;;  %v15641_v11 = vpop.permute.xlu1 %3951  ;;  %10019 = vmatpush1.bf16.msra.mxu1 %v10760_v45 }
 0x30e   : > { %v16121_v1 = vrot.slane %v15641_v11, 4  ;;  %v15644_v8 = vpop.permute.xlu0 %5839  ;;  %v10799_v22 = vcombine.low %v4012_v36, %v4936_v41  ;;  %v10800_v63 = vcombine.high %v4012_v36, %v4936_v41 }
 0x30f   : > { %v16120_v29 = vrot.slane %v15644_v8, 4 }
 0x310   : > { %v4013_v5 = vsel %vm2700_vm10, %v3973_v30, %v16121_v1  ;;  %9977 = vmatprep.subr.bf16.mxu0 %v10800_v63 }
 0x311   : > { %v4014_v43 = vsel %vm3977_vm13, %v3950_v21, %v4013_v5  ;;  %v5838_v42 = vpop.permute.xlu1 %5837  ;;  %9978 = vmatpush1.bf16.msra.mxu0 %v10799_v22  ;;  %v8084_v22 = vld [vmem:[#allocation3 + $0x318] sm:$0xff] }
 0x312   : > { %v5861_v10 = vrot.slane %v5838_v42, 4  ;;  %v6948_v44 = vpop.permute.xlu0 %6947  ;;  %v10801_v14 = vcombine.low %v4014_v43, %v4938_v31  ;;  %v10802_v45 = vcombine.high %v4014_v43, %v4938_v31 }
 0x313   : > { %v6971_v54 = vrot.slane %v6948_v44, 4 }
 0x314   : > { %v5898_v41 = vsel %vm2700_vm10, %v16358_v53, %v5861_v10  ;;  %v5900_v30 = vsel %vm2700_vm10, %v5861_v10, %v16120_v29  ;;  %10020 = vmatprep.subr.bf16.mxu1 %v10802_v45  ;;  %v8085_v53 = vld [vmem:[#allocation3 + $0x320] sm:$0xff] }
 0x315   : > { %v5899_v21 = vsel %vm4732_vm9, %v15524_v9, %v5898_v41  ;;  %v5901_v12 = vsel %vm4732_vm9, %v5838_v42, %v5900_v30  ;;  %v7009_v36 = vsel %vm2700_vm10, %v6970_v6, %v6971_v54  ;;  %v6760_v31 = vpop.permute.xlu1 %6759  ;;  %10021 = vmatpush1.bf16.msra.mxu1 %v10801_v14 }
 0x316   : > { %v7010_v63 = vsel %vm6975_vm15, %v15545_v62, %v7009_v36  ;;  %v6783_v5 = vrot.slane %v6760_v31, 4  ;;  %v15665_v43 = vpop.permute.xlu0 %6949  ;;  %v10840_v10 = vcombine.low %v8084_v22, %v5899_v21  ;;  %v10841_v45 = vcombine.high %v8084_v22, %v5899_v21 }
 0x317   : > { %v16119_v9 = vrot.slane %v15665_v43, 4  ;;  %v10842_v41 = vcombine.low %v8085_v53, %v5901_v12  ;;  %v10843_v42 = vcombine.high %v8085_v53, %v5901_v12 }
 0x318   : > { %v6820_v6 = vsel %vm2700_vm10, %v6782_v51, %v6783_v5  ;;  %9979 = vmatprep.subr.bf16.mxu0 %v10841_v45  ;;  %v15680_v51 = vpop.f32.mrb[60].mxu0 }
 0x319   : > { %v6821_v14 = vsel %vm3809_vm7, %v15568_v47, %v6820_v6  ;;  %v7011_v62 = vsel %vm2700_vm10, %v6971_v54, %v16119_v9  ;;  %v15676_v30 = vpop.permute.xlu1 %6761  ;;  %10022 = vmatprep.subr.bf16.mxu1 %v10843_v42  ;;  %9980 = vmatpush1.bf16.msra.mxu0 %v10840_v10  ;;  %v15682_v45 = vpop.f32.mrb[61].mxu0 }
 0x31a   : > { %v7012_v21 = vsel %vm6975_vm15, %v6948_v44, %v7011_v62  ;;  %v16118_v12 = vrot.slane %v15676_v30, 4  ;;  %10023 = vmatpush1.bf16.msra.mxu1 %v10842_v41  ;;  %v10881_v36 = vcombine.low %v6821_v14, %v7010_v63  ;;  %v10882_v22 = vcombine.high %v6821_v14, %v7010_v63  ;;  %v15687_v54 = vpop.f32.mrb[62].mxu0 }
 0x31b   : > { %v15690_v44 = vpop.f32.mrb[63].mxu0 }
 0x31c   : > { %v6822_v47 = vsel %vm2700_vm10, %v6783_v5, %v16118_v12  ;;  %9981 = vmatprep.subr.bf16.mxu0 %v10882_v22 }
 0x31d   : > { %v6823_v10 = vsel %vm3809_vm7, %v6760_v31, %v6822_v47  ;;  %9982 = vmatpush1.bf16.msra.mxu0 %v10881_v36  ;;  %v15692_v42 = vpop.f32.mrb[52].mxu1 }
 0x31e   : > { %v10883_v53 = vcombine.low %v6823_v10, %v7012_v21  ;;  %v10884_v41 = vcombine.high %v6823_v10, %v7012_v21  ;;  %v15694_v63 = vpop.f32.mrb[53].mxu1 }
 0x31f   : > { %v15696_v6 = vpop.f32.mrb[54].mxu1 }
 0x320   : > { %10024 = vmatprep.subr.bf16.mxu1 %v10884_v41  ;;  %v15701_v31 = vpop.f32.mrb[55].mxu1 }
 0x321   : > { %10025 = vmatpush1.bf16.msra.mxu1 %v10883_v53 }
 0x322   : > { %v15698_v14 = vpop.permute.xlu0 %7873  ;;  %v7872_v5 = vpop.permute.xlu1 %7871 }
 0x323   : > { %v7896_v62 = vrot.slane %v15698_v14, 4  ;;  %v7895_v22 = vrot.slane %v7872_v5, 4 }
 0x325   : > { %v7932_v21 = vsel %vm2700_vm10, %v7894_v2, %v7895_v22  ;;  %v7934_v36 = vsel %vm2700_vm10, %v7895_v22, %v7896_v62 }
 0x326   : > { %v7933_v47 = vsel %vm2698_vm8, %v15561_v13, %v7932_v21  ;;  %v7935_v10 = vsel %vm2698_vm8, %v7872_v5, %v7934_v36  ;;  %v3032_v53 = vpop.permute.xlu0 %3031  ;;  %v2844_v41 = vpop.permute.xlu1 %2843 }
 0x327   : > { %v3053_v12 = vrot.slane %v3032_v53, 4  ;;  %3136 = vst.msk [vmem:[#allocation3 + $0x144] sm:$0xf] %vm2024_vm14, %v3032_v53  ;;  %v2865_v9 = vrot.slane %v2844_v41, 4  ;;  %2948 = vst.msk [vmem:[#allocation3 + $0xa0] sm:$0xf] %vm2024_vm14, %v2844_v41  ;;  %v10923_v29 = vcombine.high %v7933_v47, %v7933_v47  ;;  %v10925_v1 = vcombine.high %v7935_v10, %v7935_v10 }
 0x328   : > { %v10922_v2 = vcombine.low %v7933_v47, %v7933_v47  ;;  %v10924_v57 = vcombine.low %v7935_v10, %v7935_v10 }
 0x329   : > { %v3093_v22 = vsel %vm2700_vm10, %v3052_v59, %v3053_v12  ;;  %v2905_v13 = vsel %vm2700_vm10, %v2864_v34, %v2865_v9  ;;  %10963 = vmatprep.subr.msk.bf16.mxu0 %vm2700_vm10, %v10923_v29  ;;  %10965 = vmatprep.subr.msk.bf16.mxu1 %vm2700_vm10, %v10925_v1  ;;  %v16359_v34 = vmov 0.0  }
 0x32a   : > { %v3094_v5 = vsel %vm3055_vm0, %v15581_v26, %v3093_v22  ;;  %v2906_v21 = vsel %vm2867_vm12, %v15604_v40, %v2905_v13  ;;  %v9224_v36 = vsel %vm2700_vm10, %v10922_v2, 0  ;;  %v9230_v47 = vsel %vm2700_vm10, %v10924_v57, 0 }
 0x32b   : > { %9984 = vmatpush1.bf16.msra.mxu0 %v9224_v36  ;;  %10027 = vmatpush1.bf16.msra.mxu1 %v9230_v47  ;;  %v10762_v59 = vcombine.low %v2906_v21, %v3094_v5  ;;  %v10763_v12 = vcombine.high %v2906_v21, %v3094_v5  ;;  %v16360_v40 = vrot.slane %v15614_v58, 4  ;;  %v16361_v2 = vrot.slane %v15641_v11, 4 }
 0x32c   : > { %v4878_v10 = vpop.permute.xlu0 %4877  ;;  %11011 = vmatprep.subr.bf16.mxu1 %v16359_v34 }
 0x32d   : > { %v4899_v29 = vrot.slane %v4878_v10, 4  ;;  %10061 = vmatprep.subr.bf16.mxu0 %v10763_v12 }
 0x32e   : > { %10964 = vmatmul.mubr.msk.bf16.vlgmr.msra.gmra.mrb[80].mxu0 %vm3055_vm0, %v15624_v48  ;;  %10966 = vmatmul.mubr.msk.bf16.vlgmr.msra.gmra.mrb[72].mxu1 %vm3055_vm0, %v15624_v48  ;;  %v11263_v26 = vld [vmem:[#allocation3 + $0xa0] ss:$164 sps:$4 sm:$0xff]  }
 0x32f   : > { %v4939_v57 = vsel %vm2700_vm10, %v16360_v40, %v4899_v29  ;;  %v4941_v1 = vsel %vm4901_vm11, %v4878_v10, %v4899_v29  ;;  %10062 = vmatpush1.bf16.msra.mxu0 %v10762_v59  ;;  %11021 = vmatprep.mubr.msk.bf16.mxu1 %vm11354_vm3, %v16359_v34  ;;  %v8086_v29 = vld [vmem:[#allocation3 + $0x328] sm:$0xff]  ;;  %vm10332_vm3 = vcmask 40960  }
 0x330   : > { %v4940_v9 = vsel %vm4901_vm11, %v15614_v58, %v4939_v57  ;;  %4983 = vst.msk [vmem:[#allocation3 + $0x28c] sm:$0xf] %vm2024_vm14, %v4941_v1  ;;  %11012 = vmatpush3.bf16.msra.mxu1 %v11263_v26  ;;  %10093 = vmatprep.mubr.bf16.mxu0 %v16279_v4  ;;  %v16362_v4 = vrot.slane %v15644_v8, 4 }
 0x331   : > { %11013 = vmatprep.subr.bf16.mxu1 %v16359_v34 }
 0x337   : > { %v3954_v53 = vpop.permute.xlu1 %3953 }
 0x338   : > { %v3975_v41 = vrot.slane %v3954_v53, 4  ;;  %4058 = vst.msk [vmem:[#allocation3 + $0x1e8] sm:$0xf] %vm2024_vm14, %v3954_v53 }
 0x33a   : > { %v4015_v22 = vsel %vm2700_vm10, %v16361_v2, %v3975_v41  ;;  %v16364_v2 = vrot.slane %v15676_v30, 4 }
 0x33b   : > { %v4016_v13 = vsel %vm3977_vm13, %v15641_v11, %v4015_v22  ;;  %v5842_v5 = vpop.permute.xlu1 %5841 }
 0x33c   : > { %v5863_v58 = vrot.slane %v5842_v5, 4  ;;  %5945 = vst.msk [vmem:[#allocation3 + $0x3d4] sm:$0xf] %vm2024_vm14, %v5842_v5  ;;  %v10803_v21 = vcombine.low %v4016_v13, %v4940_v9  ;;  %v10804_v36 = vcombine.high %v4016_v13, %v4940_v9  ;;  %v16363_v9 = vrot.slane %v15665_v43, 4 }
 0x33e   : > { %v5902_v47 = vsel %vm2700_vm10, %v16362_v4, %v5863_v58  ;;  %10063 = vmatprep.subr.bf16.mxu0 %v10804_v36 }
 0x33f   : > { %v5903_v59 = vsel %vm4732_vm9, %v15644_v8, %v5902_v47  ;;  %v6952_v12 = vpop.permute.xlu1 %6951  ;;  %v11264_v10 = vld [vmem:[#allocation3 + $0x1e8] ss:$164 sps:$4 sm:$0xff]   ;;  %10064 = vmatpush1.bf16.msra.mxu0 %v10803_v21 }
 0x340   : > { %v6973_v26 = vrot.slane %v6952_v12, 4  ;;  %v6764_v11 = vpop.permute.xlu0 %6763  ;;  %v10844_v40 = vcombine.low %v8086_v29, %v5903_v59  ;;  %v10845_v57 = vcombine.high %v8086_v29, %v5903_v59  ;;  %11014 = vmatpush3.bf16.msra.mxu1 %v11264_v10 }
 0x341   : > { %v6785_v1 = vrot.slane %v6764_v11, 4  ;;  %11015 = vmatprep.subr.bf16.mxu1 %v16359_v34 }
 0x342   : > { %v7013_v53 = vsel %vm2700_vm10, %v16363_v9, %v6973_v26  ;;  %v7015_v41 = vsel %vm6975_vm15, %v6952_v12, %v6973_v26  ;;  %10065 = vmatprep.subr.bf16.mxu0 %v10845_v57 }
 0x343   : > { %v7014_v8 = vsel %vm6975_vm15, %v15665_v43, %v7013_v53  ;;  %7057 = vst.msk [vmem:[#allocation3 + $0x51c] sm:$0xf] %vm2024_vm14, %v7015_v41  ;;  %v6824_v22 = vsel %vm2700_vm10, %v16364_v2, %v6785_v1  ;;  %v6826_v13 = vsel %vm3809_vm7, %v6764_v11, %v6785_v1  ;;  %v11265_v5 = vld [vmem:[#allocation3 + $0x330] ss:$164 sps:$4 sm:$0xff]   ;;  %10066 = vmatpush1.bf16.msra.mxu0 %v10844_v40 }
 0x344   : > { %v6825_v58 = vsel %vm3809_vm7, %v15676_v30, %v6824_v22  ;;  %6868 = vst.msk [vmem:[#allocation3 + $0x478] sm:$0xf] %vm2024_vm14, %v6826_v13  ;;  %11016 = vmatpush3.bf16.msra.mxu1 %v11265_v5 }
 0x345   : > { %v10885_v21 = vcombine.low %v6825_v58, %v7014_v8  ;;  %v10886_v36 = vcombine.high %v6825_v58, %v7014_v8  ;;  %11017 = vmatprep.subr.bf16.mxu1 %v16359_v34 }
 0x347   : > { %10067 = vmatprep.subr.bf16.mxu0 %v10886_v36 }
 0x348   : > { %v7876_v43 = vpop.permute.xlu0 %7875  ;;  %10068 = vmatpush1.bf16.msra.mxu0 %v10885_v21 }
 0x349   : > { %v7897_v4 = vrot.slane %v7876_v43, 4 }
 0x34b   : > { %v7936_v47 = vsel %vm2700_vm10, %v7896_v62, %v7897_v4  ;;  %v7938_v59 = vsel %vm2698_vm8, %v7876_v43, %v7897_v4  ;;  %v11266_v12 = vld [vmem:[#allocation3 + $0x478] ss:$164 sps:$4 sm:$0xff]  }
 0x34c   : > { %v7937_v30 = vsel %vm2698_vm8, %v15698_v14, %v7936_v47  ;;  %7980 = vst.msk [vmem:[#allocation3 + $0x5c0] sm:$0xf] %vm2024_vm14, %v7938_v59  ;;  %11018 = vmatpush3.bf16.msra.mxu1 %v11266_v12 }
 0x34d   : > { %v10927_v10 = vcombine.high %v7937_v30, %v7937_v30  ;;  %v10926_v29 = vcombine.low %v7937_v30, %v7937_v30  ;;  %11019 = vmatprep.subr.bf16.mxu1 %v16359_v34 }
 0x34f   : > { %10967 = vmatprep.subr.msk.bf16.mxu0 %vm2700_vm10, %v10927_v10  ;;  %v9236_v26 = vsel %vm2700_vm10, %v10926_v29, 0 }
 0x350   : > { %10070 = vmatpush1.bf16.msra.mxu0 %v9236_v26  ;;  %v15809_v13 = vpop.permute.xlu1 %8176 }
 0x351   : > { %v15782_v11 = vpop.f32.mrb[64].mxu0  ;;  %v9281_v36 = vadd.f32 %v15339_v17, %v15809_v13  ;;  %v9367_v26 = vadd.f32 %v15388_v37, %v15809_v13  ;;  %v9410_v37 = vadd.f32 %v15412_v49, %v15809_v13  ;;  %v9453_v49 = vadd.f32 %v15421_v60, %v15809_v13 }
 0x352   : > { %v15784_v40 = vpop.f32.mrb[65].mxu0  ;;  %v9496_v60 = vadd.f32 %v15477_v24, %v15809_v13  ;;  %v9539_v24 = vadd.f32 %v15508_v0, %v15809_v13  ;;  %v9582_v0 = vadd.f32 %v15682_v45, %v15809_v13  ;;  %v9625_v45 = vadd.f32 %v15694_v63, %v15809_v13 }
 0x353   : > { %v11267_v62 = vld [vmem:[#allocation3 + $0x5c0] ss:$0 sps:$4 sm:$0xff]   ;;  %10968 = vmatmul.mubr.msk.bf16.vlgmr.msra.gmra.mrb[84].mxu0 %vm3055_vm0, %v15624_v48  ;;  %v15788_v14 = vpop.f32.mrb[66].mxu0  ;;  %v10146_v12 = vmax.f32 %v9281_v36, 0.0  ;;  %v9668_v63 = vadd.f32 %v15784_v40, %v15809_v13 }
 0x354   : > { %v9242_v57 = vsel %vm2700_vm10, %v11267_v62, 0  ;;  %v15791_v1 = vpop.f32.mrb[67].mxu0 }
 0x355   : > { %11020 = vmatpush3.bf16.msra.mxu1 %v9242_v57 }
 0x357   : > { %v15793_v34 = vpop.f32.mrb[56].mxu1 }
 0x358   : > { %v15795_v9 = vpop.f32.mrb[57].mxu1  ;;  %11022 = vmatmul.mubr.msk.bf16.vlgmr.msra.gmra.mrb[76].mxu1 %vm3055_vm0, %v15624_v48  ;;  %v9279_v48 = vadd.f32 %v15337_v61, %v15809_v13 }
 0x359   : > { %v15797_v53 = vpop.permute.xlu0 %8181  ;;  %v15801_v41 = vpop.f32.mrb[58].mxu1 }
 0x35a   : > { %v15803_v8 = vpop.f32.mrb[59].mxu1  ;;  %v9283_v2 = vadd.f32 %v15341_v55, %v15797_v53  ;;  %v9285_v22 = vadd.f32 %v15364_v15, %v15797_v53  ;;  %v9326_v5 = vadd.f32 %v15386_v35, %v15797_v53  ;;  %v9328_v43 = vadd.f32 %v15394_v38, %v15797_v53 }
 0x35b   : > { %v9322_v55 = vadd.f32 %v15375_v19, %v15809_v13  ;;  %v9369_v15 = vadd.f32 %v15400_v28, %v15797_v53  ;;  %v9324_v35 = vadd.f32 %v15381_v50, %v15809_v13  ;;  %v10145_v59 = vmax.f32 %v9279_v48, 0.0 }
 0x35c   : > { %v10186_v58 = vmax.f32 %v9283_v2, 0.0  ;;  %v10187_v21 = vmax.f32 %v9285_v22, 0.0  ;;  %v10188_v4 = vmax.f32 %v9326_v5, 0.0  ;;  %v9371_v61 = vadd.f32 %v15407_v23, %v15797_v53 }
 0x35d   : > { %v10189_v17 = vmax.f32 %v9328_v43, 0.0  ;;  %v9365_v38 = vadd.f32 %v15377_v20, %v15809_v13  ;;  %v10147_v10 = vmax.f32 %v9322_v55, 0.0  ;;  %v9412_v19 = vadd.f32 %v15417_v25, %v15797_v53 }
 0x35e   : > { %v10271_v47 = vadd.f32 %v10187_v21, %v10186_v58  ;;  %v10190_v28 = vmax.f32 %v9369_v15, 0.0  ;;  %v10148_v50 = vmax.f32 %v9324_v35, 0.0  ;;  %v10227_v62 = vadd.f32 %v10146_v12, %v10145_v59 }
 0x35f   : > { %v9414_v57 = vadd.f32 %v15423_v7, %v15797_v53  ;;  %v10191_v23 = vmax.f32 %v9371_v61, 0.0  ;;  %v9408_v22 = vadd.f32 %v15402_v56, %v15809_v13  ;;  %v10149_v20 = vmax.f32 %v9365_v38, 0.0 }
 0x360   : > { %v10272_v30 = vadd.f32 %v10271_v47, %v10188_v4  ;;  %v10228_v5 = vadd.f32 %v10227_v62, %v10147_v10  ;;  %v9455_v25 = vadd.f32 %v15430_v52, %v15797_v53  ;;  %v10192_v58 = vmax.f32 %v9412_v19, 0.0 }
 0x361   : > { %v10150_v48 = vmax.f32 %v9367_v26, 0.0  ;;  %v9457_v7 = vadd.f32 %v15438_v46, %v15797_v53  ;;  %v10193_v43 = vmax.f32 %v9414_v57, 0.0  ;;  %v9451_v56 = vadd.f32 %v15414_v39, %v15809_v13 }
 0x362   : > { %v10273_v29 = vadd.f32 %v10272_v30, %v10189_v17  ;;  %v10229_v36 = vadd.f32 %v10228_v5, %v10148_v50  ;;  %v10151_v15 = vmax.f32 %v9408_v22, 0.0  ;;  %v9498_v52 = vadd.f32 %v15484_v3, %v15797_v53 }
 0x363   : > { %v10194_v47 = vmax.f32 %v9455_v25, 0.0  ;;  %v10152_v59 = vmax.f32 %v9410_v37, 0.0  ;;  %v9500_v46 = vadd.f32 %v15492_v16, %v15797_v53  ;;  %v10195_v61 = vmax.f32 %v9457_v7, 0.0 }
 0x364   : > { %v10274_v2 = vadd.f32 %v10273_v29, %v10190_v28  ;;  %v10230_v4 = vadd.f32 %v10229_v36, %v10149_v20  ;;  %v9494_v39 = vadd.f32 %v15474_v18, %v15809_v13  ;;  %v10153_v30 = vmax.f32 %v9451_v56, 0.0 }
 0x365   : > { %v9541_v3 = vadd.f32 %v15515_v32, %v15797_v53  ;;  %v10196_v10 = vmax.f32 %v9498_v52, 0.0  ;;  %v10154_v28 = vmax.f32 %v9453_v49, 0.0  ;;  %v9543_v16 = vadd.f32 %v15521_v33, %v15797_v53 }
 0x366   : > { %v10275_v21 = vadd.f32 %v10274_v2, %v10191_v23  ;;  %v10231_v12 = vadd.f32 %v10230_v4, %v10150_v48  ;;  %v10197_v26 = vmax.f32 %v9500_v46, 0.0  ;;  %v9537_v18 = vadd.f32 %v15502_v27, %v15809_v13 }
 0x367   : > { %v10155_v62 = vmax.f32 %v9494_v39, 0.0  ;;  %v9584_v32 = vadd.f32 %v15687_v54, %v15797_v53  ;;  %v10198_v23 = vmax.f32 %v9541_v3, 0.0  ;;  %v10156_v22 = vmax.f32 %v9496_v60, 0.0 }
 0x368   : > { %v10276_v55 = vadd.f32 %v10275_v21, %v10192_v58  ;;  %v10232_v38 = vadd.f32 %v10231_v12, %v10151_v15  ;;  %v9586_v33 = vadd.f32 %v15690_v44, %v15797_v53  ;;  %v10199_v5 = vmax.f32 %v9543_v16, 0.0 }
 0x369   : > { %v9580_v27 = vadd.f32 %v15680_v51, %v15809_v13  ;;  %v10157_v58 = vmax.f32 %v9537_v18, 0.0  ;;  %v9627_v54 = vadd.f32 %v15696_v6, %v15797_v53  ;;  %v10200_v37 = vmax.f32 %v9584_v32, 0.0 }
 0x36a   : > { %v10277_v35 = vadd.f32 %v10276_v55, %v10193_v43  ;;  %v10233_v29 = vadd.f32 %v10232_v38, %v10152_v59  ;;  %v10158_v36 = vmax.f32 %v9539_v24, 0.0  ;;  %v9629_v44 = vadd.f32 %v15701_v31, %v15797_v53 }
 0x36b   : > { %v10201_v43 = vmax.f32 %v9586_v33, 0.0  ;;  %v9623_v51 = vadd.f32 %v15692_v42, %v15809_v13  ;;  %v10159_v56 = vmax.f32 %v9580_v27, 0.0  ;;  %v9670_v6 = vadd.f32 %v15788_v14, %v15797_v53 }
 0x36c   : > { %v10278_v17 = vadd.f32 %v10277_v35, %v10194_v47  ;;  %v10234_v57 = vadd.f32 %v10233_v29, %v10153_v30  ;;  %v10202_v4 = vmax.f32 %v9627_v54, 0.0  ;;  %v10160_v47 = vmax.f32 %v9582_v0, 0.0 }
 0x36d   : > { %v10203_v49 = vmax.f32 %v9629_v44, 0.0  ;;  %v9672_v31 = vadd.f32 %v15791_v1, %v15797_v53  ;;  %v9666_v42 = vadd.f32 %v15782_v11, %v15809_v13  ;;  %v10161_v12 = vmax.f32 %v9623_v51, 0.0 }
 0x36e   : > { %v10279_v19 = vadd.f32 %v10278_v17, %v10195_v61  ;;  %v10235_v20 = vadd.f32 %v10234_v57, %v10154_v28  ;;  %v10204_v61 = vmax.f32 %v9670_v6, 0.0  ;;  %v9713_v14 = vadd.f32 %v15801_v41, %v15797_v53 }
 0x36f   : > { %v10162_v39 = vmax.f32 %v9625_v45, 0.0  ;;  %v10205_v3 = vmax.f32 %v9672_v31, 0.0  ;;  %v9715_v1 = vadd.f32 %v15803_v8, %v15797_v53  ;;  %v9709_v11 = vadd.f32 %v15793_v34, %v15809_v13 }
 0x370   : > { %v10280_v50 = vadd.f32 %v10279_v19, %v10196_v10  ;;  %v10236_v21 = vadd.f32 %v10235_v20, %v10155_v62  ;;  %v10163_v10 = vmax.f32 %v9666_v42, 0.0  ;;  %v10206_v28 = vmax.f32 %v9713_v14, 0.0 }
 0x371   : > { %v9711_v41 = vadd.f32 %v15795_v9, %v15809_v13  ;;  %v10164_v29 = vmax.f32 %v9668_v63, 0.0 }
 0x372   : > { %v10281_v2 = vadd.f32 %v10280_v50, %v10197_v26  ;;  %v10237_v7 = vadd.f32 %v10236_v21, %v10156_v22  ;;  %v10207_v26 = vmax.f32 %v9715_v1, 0.0  ;;  %v10165_v50 = vmax.f32 %v9709_v11, 0.0 }
 0x373   : > { %v10166_v57 = vmax.f32 %v9711_v41, 0.0 }
 0x374   : > { %v10282_v25 = vadd.f32 %v10281_v2, %v10198_v23  ;;  %v10238_v15 = vadd.f32 %v10237_v7, %v10157_v58 }
 0x376   : > { %v10283_v48 = vadd.f32 %v10282_v25, %v10199_v5  ;;  %v10239_v35 = vadd.f32 %v10238_v15, %v10158_v36 }
 0x378   : > { %v10284_v55 = vadd.f32 %v10283_v48, %v10200_v37  ;;  %v10240_v46 = vadd.f32 %v10239_v35, %v10159_v56 }
 0x37a   : > { %v10285_v52 = vadd.f32 %v10284_v55, %v10201_v43  ;;  %v10241_v30 = vadd.f32 %v10240_v46, %v10160_v47 }
 0x37c   : > { %v10286_v59 = vadd.f32 %v10285_v52, %v10202_v4  ;;  %v10242_v19 = vadd.f32 %v10241_v30, %v10161_v12 }
 0x37e   : > { %v10287_v17 = vadd.f32 %v10286_v59, %v10203_v49  ;;  %v10243_v16 = vadd.f32 %v10242_v19, %v10162_v39 }
 0x380   : > { %v10288_v38 = vadd.f32 %v10287_v17, %v10204_v61  ;;  %v10244_v18 = vadd.f32 %v10243_v16, %v10163_v10 }
 0x382   : > { %v10289_v60 = vadd.f32 %v10288_v38, %v10205_v3  ;;  %v10245_v32 = vadd.f32 %v10244_v18, %v10164_v29 }
 0x384   : > { %v10290_v40 = vadd.f32 %v10289_v60, %v10206_v28  ;;  %v10246_v8 = vadd.f32 %v10245_v32, %v10165_v50 }
 0x386   : > { %v10291_v62 = vadd.f32 %v10290_v40, %v10207_v26  ;;  %v10247_v2 = vadd.f32 %v10246_v8, %v10166_v57 }
 0x38f   : > { %v9751_v23 = vpop.f32.mrb[68].mxu0 }
 0x390   : > { %v9752_v34 = vadd.f32 %v9751_v23, %v15809_v13  ;;  %v9753_v24 = vpop.f32.mrb[69].mxu0 }
 0x391   : > { %v9754_v22 = vadd.f32 %v9753_v24, %v15809_v13  ;;  %v9755_v20 = vpop.f32.mrb[70].mxu0 }
 0x392   : > { %v10167_v33 = vmax.f32 %v9752_v34, 0.0  ;;  %v9756_v9 = vadd.f32 %v9755_v20, %v15797_v53  ;;  %v9757_v5 = vpop.f32.mrb[71].mxu0 }
 0x393   : > { %v10168_v25 = vmax.f32 %v9754_v22, 0.0  ;;  %v9758_v27 = vadd.f32 %v9757_v5, %v15797_v53  ;;  %v9794_v58 = vpop.f32.mrb[60].mxu1 }
 0x394   : > { %v10248_v21 = vadd.f32 %v10247_v2, %v10167_v33  ;;  %v10208_v54 = vmax.f32 %v9756_v9, 0.0  ;;  %v9795_v37 = vadd.f32 %v9794_v58, %v15809_v13  ;;  %v9796_v48 = vpop.f32.mrb[61].mxu1 }
 0x395   : > { %v10209_v0 = vmax.f32 %v9758_v27, 0.0  ;;  %v9797_v36 = vadd.f32 %v9796_v48, %v15809_v13  ;;  %v9798_v7 = vpop.f32.mrb[62].mxu1 }
 0x396   : > { %v10249_v44 = vadd.f32 %v10248_v21, %v10168_v25  ;;  %v10292_v43 = vadd.f32 %v10291_v62, %v10208_v54  ;;  %v10169_v55 = vmax.f32 %v9795_v37, 0.0  ;;  %v9799_v51 = vadd.f32 %v9798_v7, %v15797_v53  ;;  %v9800_v56 = vpop.f32.mrb[63].mxu1 }
 0x397   : > { %v10170_v15 = vmax.f32 %v9797_v36, 0.0  ;;  %v9801_v6 = vadd.f32 %v9800_v56, %v15797_v53 }
 0x398   : > { %v10293_v4 = vadd.f32 %v10292_v43, %v10209_v0  ;;  %v10250_v52 = vadd.f32 %v10249_v44, %v10169_v55  ;;  %v10210_v45 = vmax.f32 %v9799_v51, 0.0 }
 0x399   : > { %v10211_v47 = vmax.f32 %v9801_v6, 0.0 }
 0x39a   : > { %v10251_v35 = vadd.f32 %v10250_v52, %v10170_v15  ;;  %v10294_v49 = vadd.f32 %v10293_v4, %v10210_v45 }
 0x39c   : > { %v10295_v59 = vadd.f32 %v10294_v49, %v10211_v47 }
 0x3bc   : > { %v9837_v31 = vpop.f32.mrb[72].mxu0  ;;  %v9880_v42 = vpop.f32.mrb[64].mxu1 }
 0x3bd   : > { %v9838_v12 = vadd.f32 %v9837_v31, %v15809_v13  ;;  %v9881_v46 = vadd.f32 %v9880_v42, %v15809_v13  ;;  %v9839_v61 = vpop.f32.mrb[73].mxu0  ;;  %v9882_v17 = vpop.f32.mrb[65].mxu1 }
 0x3be   : > { %v9840_v14 = vadd.f32 %v9839_v61, %v15809_v13  ;;  %v9841_v63 = vpop.f32.mrb[74].mxu0  ;;  %v9884_v39 = vpop.f32.mrb[66].mxu1  ;;  %v9883_v38 = vadd.f32 %v9882_v17, %v15809_v13 }
 0x3bf   : > { %v10171_v30 = vmax.f32 %v9838_v12, 0.0  ;;  %v9842_v3 = vadd.f32 %v9841_v63, %v15797_v53  ;;  %v9843_v1 = vpop.f32.mrb[75].mxu0  ;;  %v9886_v11 = vpop.f32.mrb[67].mxu1  ;;  %v10173_v28 = vmax.f32 %v9881_v46, 0.0  ;;  %v9885_v29 = vadd.f32 %v9884_v39, %v15797_v53 }
 0x3c0   : > { %v10172_v10 = vmax.f32 %v9840_v14, 0.0  ;;  %v9844_v19 = vadd.f32 %v9843_v1, %v15797_v53  ;;  %v10174_v26 = vmax.f32 %v9883_v38, 0.0  ;;  %v9887_v18 = vadd.f32 %v9886_v11, %v15797_v53 }
 0x3c1   : > { %v10252_v60 = vadd.f32 %v10251_v35, %v10171_v30  ;;  %v10212_v41 = vmax.f32 %v9842_v3, 0.0  ;;  %v10214_v57 = vmax.f32 %v9885_v29, 0.0 }
 0x3c2   : > { %v10213_v16 = vmax.f32 %v9844_v19, 0.0  ;;  %v10215_v23 = vmax.f32 %v9887_v18, 0.0 }
 0x3c3   : > { %v10253_v40 = vadd.f32 %v10252_v60, %v10172_v10  ;;  %v10296_v50 = vadd.f32 %v10295_v59, %v10212_v41 }
 0x3c5   : > { %v10254_v62 = vadd.f32 %v10253_v40, %v10173_v28  ;;  %v10297_v32 = vadd.f32 %v10296_v50, %v10213_v16 }
 0x3c7   : > { %v10255_v8 = vadd.f32 %v10254_v62, %v10174_v26  ;;  %v10298_v34 = vadd.f32 %v10297_v32, %v10214_v57 }
 0x3c9   : > { %v10299_v2 = vadd.f32 %v10298_v34, %v10215_v23 }
 0x3dc   : > { %v9923_v24 = vpop.f32.mrb[76].mxu0  ;;  %v9966_v22 = vpop.f32.mrb[68].mxu1 }
 0x3dd   : > { %v9924_v20 = vadd.f32 %v9923_v24, %v15809_v13  ;;  %v9967_v33 = vadd.f32 %v9966_v22, %v15809_v13  ;;  %v9925_v9 = vpop.f32.mrb[77].mxu0  ;;  %v9968_v5 = vpop.f32.mrb[69].mxu1 }
 0x3de   : > { %v9926_v25 = vadd.f32 %v9925_v9, %v15809_v13  ;;  %v9927_v27 = vpop.f32.mrb[78].mxu0  ;;  %v9970_v58 = vpop.f32.mrb[70].mxu1  ;;  %v9969_v54 = vadd.f32 %v9968_v5, %v15809_v13 }
 0x3df   : > { %v10175_v21 = vmax.f32 %v9924_v20, 0.0  ;;  %v9928_v37 = vadd.f32 %v9927_v27, %v15797_v53  ;;  %v9929_v48 = vpop.f32.mrb[79].mxu0  ;;  %v9972_v0 = vpop.f32.mrb[71].mxu1  ;;  %v10177_v43 = vmax.f32 %v9967_v33, 0.0  ;;  %v9971_v51 = vadd.f32 %v9970_v58, %v15797_v53 }
 0x3e0   : > { %v10176_v36 = vmax.f32 %v9926_v25, 0.0  ;;  %v9930_v7 = vadd.f32 %v9929_v48, %v15797_v53  ;;  %v10178_v6 = vmax.f32 %v9969_v54, 0.0  ;;  %v9973_v52 = vadd.f32 %v9972_v0, %v15797_v53 }
 0x3e1   : > { %v10256_v44 = vadd.f32 %v10255_v8, %v10175_v21  ;;  %v10216_v55 = vmax.f32 %v9928_v37, 0.0  ;;  %v10218_v47 = vmax.f32 %v9971_v51, 0.0 }
 0x3e2   : > { %v10217_v56 = vmax.f32 %v9930_v7, 0.0  ;;  %v10219_v59 = vmax.f32 %v9973_v52, 0.0 }
 0x3e3   : > { %v10257_v15 = vadd.f32 %v10256_v44, %v10176_v36  ;;  %v10300_v4 = vadd.f32 %v10299_v2, %v10216_v55 }
 0x3e5   : > { %v10258_v45 = vadd.f32 %v10257_v15, %v10177_v43  ;;  %v10301_v35 = vadd.f32 %v10300_v4, %v10217_v56 }
 0x3e7   : > { %v10259_v49 = vadd.f32 %v10258_v45, %v10178_v6  ;;  %v10302_v31 = vadd.f32 %v10301_v35, %v10218_v47 }
 0x3e9   : > { %v10303_v42 = vadd.f32 %v10302_v31, %v10219_v59 }
 0x401   : > { %v10009_v12 = vpop.f32.mrb[80].mxu0  ;;  %v10052_v46 = vpop.f32.mrb[72].mxu1 }
 0x402   : > { %v10010_v61 = vadd.f32 %v10009_v12, %v15809_v13  ;;  %v10011_v17 = vpop.f32.mrb[81].mxu0  ;;  %v10054_v14 = vpop.f32.mrb[73].mxu1  ;;  %v10053_v3 = vadd.f32 %v10052_v46, %v15809_v13  ;;  %v10317_v12 = vld [vmem:[%s15998_s5 + $0x8] sm:$0xff] }
 0x403   : > { %v10012_v63 = vadd.f32 %v10011_v17, %v15809_v13  ;;  %v10013_v39 = vpop.f32.mrb[82].mxu0  ;;  %v10056_v30 = vpop.f32.mrb[74].mxu1  ;;  %v10055_v41 = vadd.f32 %v10054_v14, %v15809_v13 }
 0x404   : > { %v10179_v38 = vmax.f32 %v10010_v61, 0.0  ;;  %v10014_v1 = vadd.f32 %v10013_v39, %v15797_v53  ;;  %v10015_v11 = vpop.f32.mrb[83].mxu0  ;;  %v10058_v10 = vpop.f32.mrb[75].mxu1  ;;  %v10057_v16 = vadd.f32 %v10056_v30, %v15797_v53  ;;  %v10181_v26 = vmax.f32 %v10053_v3, 0.0 }
 0x405   : > { %v10180_v19 = vmax.f32 %v10012_v63, 0.0  ;;  %v10016_v60 = vadd.f32 %v10015_v11, %v15797_v53  ;;  %v10059_v62 = vadd.f32 %v10058_v10, %v15797_v53  ;;  %v10182_v57 = vmax.f32 %v10055_v41, 0.0  ;;  %v10330_v10 = vld [vmem:[%s15999_s6] sm:$0x1] }
 0x406   : > { %v10260_v28 = vadd.f32 %v10259_v49, %v10179_v38  ;;  %v10220_v29 = vmax.f32 %v10014_v1, 0.0  ;;  %v10222_v8 = vmax.f32 %v10057_v16, 0.0 }
 0x407   : > { %v10221_v40 = vmax.f32 %v10016_v60, 0.0  ;;  %v10223_v2 = vmax.f32 %v10059_v62, 0.0 }
 0x408   : > { %v10261_v50 = vadd.f32 %v10260_v28, %v10180_v19  ;;  %v10304_v18 = vadd.f32 %v10303_v42, %v10220_v29 }
 0x40a   : > { %v10262_v32 = vadd.f32 %v10261_v50, %v10181_v26  ;;  %v10305_v23 = vadd.f32 %v10304_v18, %v10221_v40 }
 0x40c   : > { %v10263_v34 = vadd.f32 %v10262_v32, %v10182_v57  ;;  %v10306_v24 = vadd.f32 %v10305_v23, %v10222_v8  ;;  %v16365_v32 = vlaneseq }
 0x40e   : > { %v10307_v22 = vadd.f32 %v10306_v24, %v10223_v2  ;;  %v10346_v8 = vand.u32 127, %v16365_v32 }
 0x426   : > { %v10095_v20 = vpop.f32.mrb[84].mxu0 }
 0x427   : > { %v10096_v33 = vadd.f32 %v10095_v20, %v15809_v13  ;;  %v10097_v9 = vpop.f32.mrb[85].mxu0 }
 0x428   : > { %v10098_v5 = vadd.f32 %v10097_v9, %v15809_v13  ;;  %v10099_v25 = vpop.f32.mrb[86].mxu0 }
 0x429   : > { %v10183_v27 = vmax.f32 %v10096_v33, 0.0  ;;  %v10100_v58 = vadd.f32 %v10099_v25, %v15797_v53  ;;  %v10101_v21 = vpop.f32.mrb[87].mxu0 }
 0x42a   : > { %v10184_v54 = vmax.f32 %v10098_v5, 0.0  ;;  %v10102_v37 = vadd.f32 %v10101_v21, %v15797_v53 }
 0x42b   : > { %v10264_v48 = vadd.f32 %v10263_v34, %v10183_v27  ;;  %v10224_v0 = vmax.f32 %v10100_v58, 0.0  ;;  %v10138_v36 = vpop.f32.mrb[76].mxu1 }
 0x42c   : > { %v10225_v7 = vmax.f32 %v10102_v37, 0.0  ;;  %v10139_v44 = vadd.f32 %v10138_v36, %v15809_v13  ;;  %v11023_v43 = vpop.f32.mrb[77].mxu1  ;;  %v10316_v13 = vld [vmem:[%s15998_s5] sm:$0xff] }
 0x42d   : > { %v10265_v55 = vadd.f32 %v10264_v48, %v10184_v54  ;;  %v10308_v51 = vadd.f32 %v10307_v22, %v10224_v0  ;;  %v10141_v56 = vpop.f32.mrb[78].mxu1 }
 0x42e   : > { %v10185_v15 = vmax.f32 %v10139_v44, 0.0  ;;  %v10142_v6 = vadd.f32 %v10141_v56, %v15797_v53  ;;  %v11024_v52 = vpop.f32.mrb[79].mxu1 }
 0x42f   : > { %v10309_v4 = vadd.f32 %v10308_v51, %v10225_v7 }
 0x430   : > { %v10267_v45 = vsel %vm10266_vm1, %v10185_v15, 0.0  ;;  %v10226_v47 = vmax.f32 %v10142_v6, 0.0 }
 0x431   : > { %v10268_v35 = vadd.f32 %v10267_v45, %v10265_v55 }
 0x432   : > { %v10310_v49 = vsel %vm10266_vm1, %v10226_v47, 0.0 }
 0x433   : > { %10269 = vadd.xlane.f32.xlu1 %v10268_v35  ;;  %v10311_v59 = vadd.f32 %v10310_v49, %v10309_v4 }
 0x435   : > { %10312 = vadd.xlane.f32.xlu0 %v10311_v59 }
 0x4c0   : > { %v10270_v31 = vpop.xlane.xlu1 %10269 }
 0x4c1   : > { %v10314_v42 = vmul.f32 0.00019290124, %v10270_v31 }
 0x4c2   : > { %v10313_v53 = vpop.xlane.xlu0 %10312 }
 0x4c3   : > { %v10318_v46 = vmul.f32 %v10316_v13, %v10314_v42  ;;  %v10315_v61 = vmul.f32 0.00019290124, %v10313_v53 }
 0x4c5   : > { %v10319_v17 = vmul.f32 %v10317_v12, %v10315_v61  ;;  %v10321_v14 = vsel %vm10320_vm2, %v10318_v46, 0.0 }
 0x4c7   : > { %v10322_v63 = vsel %vm10320_vm2, %v10319_v17, 0.0 }
 0x4c8   : > { %v10323_v39 = vadd.f32 %v10322_v63, %v10321_v14 }
 0x4ca   : > { %v10324_v30 = vrot.slane %v10323_v39, 4 }
 0x4cc   : > { %v10325_v38 = vadd.f32 %v10324_v30, %v10323_v39 }
 0x4ce   : > { %v10326_v3 = vrot.slane %v10325_v38, 2 }
 0x4d0   : > { %v10327_v1 = vadd.f32 %v10326_v3, %v10325_v38 }
 0x4d2   : > { %v10328_v11 = vrot.slane %v10327_v1, 1 }
 0x4d4   : > { %v10329_v19 = vadd.f32 %v10328_v11, %v10327_v1 }
 0x4d6   : > { %v10331_v60 = vadd.f32 %v10330_v10, %v10329_v19 }
 0x4d8   : > { %v10333_v28 = vsel %vm10332_vm3, %v10331_v60, -inf }
 0x4d9   : > { %10334 = vmax.xlane.f32.xlu0 %v10333_v28 }
 0x566   : > { %v10335_v41 = vpop.xlane.xlu0 %10334 }
 0x567   : > { %v10336_v29 = vsub.f32 %v10331_v60, %v10335_v41 }
 0x569   : > { %v10337_v16 = vmul.f32 1.442695, %v10336_v29 }
 0x56b   : > { %11268 = vpow2.f32 %v10337_v16 }
 0x575   : > { %v11269_v40 = vpop.eup %11268 }
 0x576   : > { %v10339_v26 = vsel %vm10332_vm3, %v11269_v40, 0.0 }
 0x577   : > { %10340 = vadd.xlane.f32.xlu1 %v10339_v26 }
 0x604   : > { %v10341_v50 = vpop.xlane.xlu1 %10340 }
 0x605   : > { %11270 = vrcp.f32 %v10341_v50 }
 0x60f   : > { %v11271_v18 = vpop.eup %11270 }
 0x610   : > { %v10343_v62 = vmul.f32 %v11271_v18, %v11269_v40 }
 0x612   : > { %v10347_v57 = vsel %vm10332_vm3, %v10343_v62, -inf  ;;  %10344 = vst.msk [vmem:[%s325_s24] sm:$0x1] %vm10332_vm3, %v10343_v62 }
 0x613   : > { %10348 = vmax.xlane.f32.xlu0 %v10347_v57 }
 0x6a0   : > { %v10349_v23 = vpop.xlane.xlu0 %10348 }
 0x6a1   : > { %vm10350_vm4 = vcmp.ge.f32.partialorder %v10343_v62, %v10349_v23 }
 0x6a2   : > { %v10351_v34 = vsel %vm10350_vm4, %v10346_v8, 6 }
 0x6a3   : > { %v10352_v2 = vsel %vm10332_vm3, %v10351_v34, 2147483647 }
 0x6a4   : > { %v10354_v24 = vshra.s32 %v10352_v2, 16  ;;  %v10353_v20 = vand.u32 65535, %v10352_v2 }
 0x6a6   : > { %v10356_v22 = vcvt.s32.f32 %v10354_v24  ;;  %v10355_v9 = vcvt.s32.f32 %v10353_v20 }
 0x6a8   : > { %10357 = vmin.xlane.f32.xlu1 %v10356_v22 }
 0x735   : > { %v10358_v33 = vpop.xlane.xlu1 %10357 }
 0x736   : > { %vm10359_vm5 = vcmp.eq.f32.partialorder %v10356_v22, %v10358_v33 }
 0x737   : > { %v10360_v5 = vsel %vm10359_vm5, %v10355_v9, inf }
 0x738   : > { %10361 = vmin.xlane.f32.xlu0 %v10360_v5 }
 0x739   : > { %11293 = shalt.err (!%p11290_p3)
}
 0x73a   : > { %s11294_s13 = scalar_lea.hbm %s15953_s14, 16  ;;  %s11298_s21 = scalar_lea.hbm %s16001_s8, 32 }
 0x73b   : > { %p11295_p4 = scmp.ne.s32.totalorder %s15953_s14, %s11294_s13  ;;  %p11299_p9 = scmp.lt.u32.totalorder %s15953_s14, %s16001_s8 }
 0x73c   : > { %p11300_p10 = scmp.lt.u32.totalorder %s11298_s21, %s11294_s13  ;;  %p11302_p12 = scmp.lt.u32.totalorder %s11294_s13, %s15953_s14 }
 0x73d   : > { %p11296_p7 = pnand %p11295_p4, %p11446_p5 }
 0x73e   : > { %p11301_p11 = por %p11300_p10, %p11299_p9 }
 0x73f   : > { %p11297_p8 = pneg %p11296_p7 }
 0x740   : > { %p11303_p13 = por %p11302_p12, %p11301_p11 }
 0x742   : > { %p11304_p0 = pnand %p11303_p13, %p11297_p8 }
 0x744   : > { %11307 = shalt.err (!%p11304_p0)
}
 0x745   : > { %11026 = dma.vmem_to_hbm [thread:$0]  (%p11446_p5), %s10386_s23, 16, %s15953_s14, %s10370_s28   ;;  %v10364_v25 = vcvt.f32.s32 %v10358_v33  ;;  %vm10367_vm6 = vcmask 0  }
 0x746   : > { %s338_s29 = scalar_lea.vmem %s16002_s9, %s11467_s25 }
 0x747   : > { %v10365_v58 = vshll.u32 %v10364_v25, 16 }
 0x7c5   : > { %v10362_v27 = vpop.xlane.xlu0 %10361 }
 0x7c6   : > { %v10363_v21 = vcvt.f32.s32 %v10362_v27 }
 0x7c8   : > { %v10366_v54 = vadd.s32 %v10365_v58, %v10363_v21 }
 0x7ca   : > { %10368 = vst.msk [vmem:[%s338_s29] sm:$0x1] %vm10367_vm6, %v10366_v54 }
 0x7cb PF: > { %p11032_p1 = scmp.ge.s32.totalorder %s11342_s12, 2  ;;  %s10400_s19 = sand.u32 1, %s11330_s30  }
 0x7cc   : > { %s10401_s14 = scalar_lea.sflag [#allocation5], %s10400_s19 }
 0x7cd   : > { %p11029_p2 = pnand %p11032_p1, %p11450_p6 }
 0x7cf   : > { %11325 = dma.done.wait (!%p11029_p2), %s10401_s14, 16  }
 0x7d0   : > { %11327 = vsyncadd (!%p11029_p2), %s10401_s14, 4294967280  ;;  %p20_p5 = scmp.ge.s32.totalorder %s11433_s15, 4   ;;  %s16366_s30 = smov %s11334_s10 }
 0x7d1   : > { %s16367_s10 = smov %s11338_s11  ;;  %s16368_s11 = smov %s11444_s18 }
 0x7d2   : > { %s16369_s12 = smov %s11433_s15  ;;  %22 = sbr.rel (!%p20_p5) target bundleno = 5 (0x5), region = 99 }
 0x7d9   :  { %10411 = vsyncpa [#allocation5], 1 }
 0x7da   :  { %10413 = vsyncpa [#allocation5 + $0x1], 1 }

</bundles_post_ra>
